<compile_context>
chip_gen: v6e
topology: v6e:2x2x1
jax: 0.10.0
libtpu: 0.0.40
codegen_flags: <defaults>
</compile_context>

<pallas_src>
import functools
import math

import jax
import jax.numpy as jnp
from jax import lax
from jax.experimental import pallas as pl
from jax.experimental.pallas import tpu as pltpu

N_EMBD = 384
N_HEAD = 6
DROPOUT = 0.2  # unused at inference (identity)

# Scoped-VMEM budget: above the 16/32 MiB defaults, below v7x's 64 MiB/TC.
_VMEM_LIMIT_BYTES = 48 * 1024 * 1024


# --------------------------------------------------------------------------
# Fused kernel: block_rows batch rows per grid step
# --------------------------------------------------------------------------
def _fused_csa_kernel(x_ref, wa_ref, wp_ref, o_ref, *, n_head, scale):
    """x_ref: (bt, T, C); wa_ref: (C, 3C); wp_ref: (C, C); o_ref: (bt, T, C)."""
    bt, T, C = x_ref.shape
    D = C // n_head
    mm_dtype = wa_ref.dtype          # matmul-operand dtype (bf16 fast path)

    # (bt, T, C) -> (bt*T, C): sublane-merge only (T is a multiple of 8).
    xm = x_ref[...].reshape(bt * T, C)

    # c_attn: one MXU slab with M = bt*T rows, f32 accumulation.
    qkv = jnp.dot(xm, wa_ref[...], preferred_element_type=jnp.float32)

    # Additive causal bias, built once and shared by every (row, head).
    r = lax.broadcasted_iota(jnp.int32, (T, T), 0)
    c = lax.broadcasted_iota(jnp.int32, (T, T), 1)
    bias = jnp.where(r >= c, jnp.float32(0.0), jnp.float32(-jnp.inf))

    rows = []
    for b in range(bt):                        # static unroll over batch rows
        qkv_b = qkv[b * T:(b + 1) * T, :]      # (T, 3C), sublane-aligned slice
        heads = []
        for h in range(n_head):                # static unroll over heads
            q = (qkv_b[:, h * D:(h + 1) * D] * scale).astype(mm_dtype)
            k = qkv_b[:, C + h * D:C + (h + 1) * D].astype(mm_dtype)
            v = qkv_b[:, 2 * C + h * D:2 * C + (h + 1) * D].astype(mm_dtype)

            # q @ k^T without materializing a transpose of k; f32 scores.
            s = lax.dot_general(q, k, (((1,), (1,)), ((), ())),
                                preferred_element_type=jnp.float32)
            s = s + bias                       # causal mask (diag unmasked)

            m = jnp.max(s, axis=-1, keepdims=True)
            p = jnp.exp(s - m)
            denom = jnp.sum(p, axis=-1, keepdims=True)
            p = p * pl.reciprocal(denom, approx=True)   # EUP slot, ~free

            heads.append(jnp.dot(p.astype(mm_dtype), v,
                                 preferred_element_type=jnp.float32))
        rows.append(jnp.concatenate(heads, axis=-1))     # (T, C)
    y = jnp.concatenate(rows, axis=0)                    # (bt*T, C), f32

    # c_proj (resid_dropout is identity in eval mode).
    out = jnp.dot(y.astype(mm_dtype), wp_ref[...],
                  preferred_element_type=jnp.float32)
    o_ref[...] = out.reshape(bt, T, C).astype(o_ref.dtype)


def _pick_block_rows(B, T, target_m=256):
    """Largest divisor of B with M = block_rows*T <= ~target_m, while keeping
    >= 2 grid steps when B >= 2 (v7x has 2 TensorCores)."""
    cap = max(1, target_m // max(T, 1))
    if B >= 2:
        cap = min(cap, B // 2)
    cap = max(1, min(cap, B))
    for rows in range(cap, 0, -1):
        if B % rows == 0:
            return rows
    return 1


def _weight_spec(shape, single_buffer):
    index_map = lambda i: (0, 0)
    if single_buffer:
        # Constant index_map => block never changes; a second pipeline buffer
        # would never be used, so request single buffering to save VMEM.
        return pl.BlockSpec(shape, index_map, pipeline_mode=pl.Buffered(1))
    return pl.BlockSpec(shape, index_map)


def causal_self_attention(x, w_attn, w_proj, n_head=N_HEAD, *,
                          compute_dtype=jnp.bfloat16, block_rows=None):
    """x: (B, T, C); w_attn: (C, 3C); w_proj: (C, C) -> (B, T, C) in x.dtype."""
    B, T, C = x.shape
    assert C % n_head == 0
    assert w_attn.shape == (C, 3 * C) and w_proj.shape == (C, C)
    D = C // n_head
    scale = 1.0 / math.sqrt(D)
    out_dtype = x.dtype

    if block_rows is None:
        block_rows = _pick_block_rows(B, T)
    assert B % block_rows == 0
    grid_b = B // block_rows

    # bf16 operands: halves HBM weight traffic and enables the bf16 MXU path;
    # accumulation and softmax statistics stay f32 inside the kernel.
    xc = x.astype(compute_dtype)
    wa = w_attn.astype(compute_dtype)
    wp = w_proj.astype(compute_dtype)

    in_bytes = jnp.dtype(compute_dtype).itemsize
    out_bytes = jnp.dtype(out_dtype).itemsize
    flops = (2 * B * T * C * 3 * C              # c_attn
             + 4 * B * n_head * T * T * D       # qk^T + pv
             + 2 * B * T * C * C)               # c_proj
    cost = pl.CostEstimate(
        flops=flops,
        transcendentals=B * n_head * T * T,     # exp
        bytes_accessed=(in_bytes * (B * T * C + 4 * C * C)
                        + out_bytes * B * T * C),
    )

    kernel = functools.partial(_fused_csa_kernel, n_head=n_head, scale=scale)

    def build(single_buffer_weights):
        return pl.pallas_call(
            kernel,
            out_shape=jax.ShapeDtypeStruct((B, T, C), out_dtype),
            grid=(grid_b,),
            in_specs=[
                pl.BlockSpec((block_rows, T, C), lambda i: (i, 0, 0)),   # x slab
                _weight_spec((C, 3 * C), single_buffer_weights),         # w_attn
                _weight_spec((C, C), single_buffer_weights),             # w_proj
            ],
            out_specs=pl.BlockSpec((block_rows, T, C), lambda i: (i, 0, 0)),
            compiler_params=pltpu.CompilerParams(
                dimension_semantics=("parallel",),
                vmem_limit_bytes=_VMEM_LIMIT_BYTES,
            ),
            cost_estimate=cost,
        )

    try:
        return build(True)(xc, wa, wp)
    except Exception:
        # pipeline_mode=pl.Buffered(1) is a pure VMEM optimization; fall back
        # to default double-buffered weights if this JAX build rejects it.
        return build(False)(xc, wa, wp)


# --------------------------------------------------------------------------
# Pure-JAX reference (eval mode) for correctness check
# --------------------------------------------------------------------------
def reference(x, w_attn, w_proj, n_head):
    B, T, C = x.shape
    hd = C // n_head
    qkv = x @ w_attn
    q, k, v = jnp.split(qkv, 3, axis=2)
    q = q.reshape(B, T, n_head, hd).transpose(0, 2, 1, 3)
    k = k.reshape(B, T, n_head, hd).transpose(0, 2, 1, 3)
    v = v.reshape(B, T, n_head, hd).transpose(0, 2, 1, 3)
    s = jnp.einsum("bhqd,bhkd->bhqk", q, k) / math.sqrt(hd)
    mask = jnp.tril(jnp.ones((T, T), dtype=bool))
    s = jnp.where(mask, s, -jnp.inf)
    p = jax.nn.softmax(s, axis=-1)
    y = jnp.einsum("bhqk,bhkd->bhqd", p, v)
    y = y.transpose(0, 2, 1, 3).reshape(B, T, C)
    return y @ w_proj


if __name__ == "__main__":
    B, T, C, H = 4, 16, N_EMBD, N_HEAD   # exercises block_rows=2, grid=(2,)

    key = jax.random.PRNGKey(0)
    kx, ka, kp = jax.random.split(key, 3)
    x = jax.random.normal(kx, (B, T, C), dtype=jnp.float32)

    # PyTorch nn.Linear default init: U(-1/sqrt(fan_in), 1/sqrt(fan_in)).
    bound = 1.0 / math.sqrt(C)
    w_attn = jax.random.uniform(ka, (C, 3 * C), jnp.float32, -bound, bound)
    w_proj = jax.random.uniform(kp, (C, C), jnp.float32, -bound, bound)

    # 1) f32 path: tight check against the pure-JAX reference.
    out_f32 = jax.block_until_ready(
        causal_self_attention(x, w_attn, w_proj, H, compute_dtype=jnp.float32))
    ref_f32 = reference(x, w_attn, w_proj, H)
    assert out_f32.shape == (B, T, C)
    assert jnp.allclose(out_f32, ref_f32, atol=2e-3, rtol=2e-3), \
        "f32 mismatch vs reference"

    # 2) bf16 fast path (default): compare against an f32 reference computed
    #    from the same bf16-rounded operands.
    out_bf16 = jax.block_until_ready(
        causal_self_attention(x, w_attn, w_proj, H))
    xr = x.astype(jnp.bfloat16).astype(jnp.float32)
    war = w_attn.astype(jnp.bfloat16).astype(jnp.float32)
    wpr = w_proj.astype(jnp.bfloat16).astype(jnp.float32)
    ref_bf16 = reference(xr, war, wpr, H)
    assert out_bf16.shape == (B, T, C)
    assert jnp.allclose(out_bf16, ref_bf16, atol=3e-2, rtol=3e-2), \
        "bf16 mismatch vs reference"

    print("KERNEL_OK")
</pallas_src>

<mosaic_0001>
module attributes {stable_mosaic.version = 11 : i64} {
  func.func @_fused_csa_kernel(%arg0: i32, %arg1: memref<2x16x384xf32, #tpu.memory_space<vmem>>, %arg2: memref<384x1152xf32, #tpu.memory_space<vmem>>, %arg3: memref<384x384xf32, #tpu.memory_space<vmem>>, %arg4: memref<2x16x384xf32, #tpu.memory_space<vmem>>) attributes {dimension_semantics = [#tpu.dimension_semantics<parallel>], iteration_bounds = array<i64: 2>, scalar_prefetch = 0 : i64, scratch_operands = 0 : i64, tpu.core_type = #tpu.core_type<tc>, window_params = [{transform_indices = @transform_0, window_bounds = array<i64: 2, 16, 384>}, {pipeline_mode = #tpu.pipeline_mode<synchronous>, transform_indices = @transform_1, window_bounds = array<i64: 384, 1152>}, {pipeline_mode = #tpu.pipeline_mode<synchronous>, transform_indices = @transform_2, window_bounds = array<i64: 384, 384>}, {transform_indices = @transform_3, window_bounds = array<i64: 2, 16, 384>}]} {
    %c0 = arith.constant 0 : index
    %c0_0 = arith.constant 0 : index
    %c0_1 = arith.constant 0 : index
    %0 = vector.load %arg1[%c0, %c0_0, %c0_1] : memref<2x16x384xf32, #tpu.memory_space<vmem>>, vector<2x16x384xf32>
    %1 = vector.shape_cast %0 : vector<2x16x384xf32> to vector<32x384xf32>
    %c0_2 = arith.constant 0 : index
    %c0_3 = arith.constant 0 : index
    %2 = vector.load %arg2[%c0_2, %c0_3] : memref<384x1152xf32, #tpu.memory_space<vmem>>, vector<384x1152xf32>
    %cst = arith.constant dense<0.000000e+00> : vector<32x1152xf32>
    %3 = tpu.matmul %1, %2, %cst {dimension_numbers = #tpu.dot_dimension_numbers<[1], [0], [0], [1], [0, 0, 1, 1], [], []>} : vector<32x384xf32>, vector<384x1152xf32>, vector<32x1152xf32> -> vector<32x1152xf32>
    %4 = tpu.iota {dimensions = array<i32: 0>} : vector<16x16xi32>
    %5 = tpu.iota {dimensions = array<i32: 1>} : vector<16x16xi32>
    %6 = arith.cmpi sge, %4, %5 : vector<16x16xi32>
    %cst_4 = arith.constant 0.000000e+00 : f32
    %cst_5 = arith.constant 0xFF800000 : f32
    %7 = vector.broadcast %cst_4 : f32 to vector<16x16xf32>
    %8 = vector.broadcast %cst_5 : f32 to vector<16x16xf32>
    %9 = arith.select %6, %7, %8 : vector<16x16xi1>, vector<16x16xf32>
    %10 = vector.extract_strided_slice %3 {offsets = [0, 0], sizes = [16, 1152], strides = [1, 1]} : vector<32x1152xf32> to vector<16x1152xf32>
    %11 = vector.extract_strided_slice %10 {offsets = [0, 0], sizes = [16, 64], strides = [1, 1]} : vector<16x1152xf32> to vector<16x64xf32>
    %cst_6 = arith.constant 1.250000e-01 : f32
    %12 = vector.broadcast %cst_6 : f32 to vector<16x64xf32>
    %13 = arith.mulf %11, %12 : vector<16x64xf32>
    %14 = vector.extract_strided_slice %10 {offsets = [0, 384], sizes = [16, 64], strides = [1, 1]} : vector<16x1152xf32> to vector<16x64xf32>
    %15 = vector.extract_strided_slice %10 {offsets = [0, 768], sizes = [16, 64], strides = [1, 1]} : vector<16x1152xf32> to vector<16x64xf32>
    %cst_7 = arith.constant dense<0.000000e+00> : vector<16x16xf32>
    %16 = tpu.matmul %13, %14, %cst_7 {dimension_numbers = #tpu.dot_dimension_numbers<[1], [1], [0], [0], [0, 0, 1, 0], [], []>} : vector<16x64xf32>, vector<16x64xf32>, vector<16x16xf32> -> vector<16x16xf32>
    %17 = arith.addf %16, %9 : vector<16x16xf32>
    %cst_8 = arith.constant dense<0xFF800000> : vector<16xf32>
    %18 = vector.multi_reduction <maximumf>, %17, %cst_8 [1] : vector<16x16xf32> to vector<16xf32>
    %19 = vector.shape_cast %18 : vector<16xf32> to vector<16x1xf32>
    %20 = vector.broadcast %19 : vector<16x1xf32> to vector<16x16xf32>
    %21 = arith.subf %17, %20 : vector<16x16xf32>
    %22 = math.exp %21 : vector<16x16xf32>
    %cst_9 = arith.constant dense<0.000000e+00> : vector<16xf32>
    %23 = vector.multi_reduction <add>, %22, %cst_9 [1] : vector<16x16xf32> to vector<16xf32>
    %24 = vector.shape_cast %23 : vector<16xf32> to vector<16x1xf32>
    %25 = tpu.reciprocal %24 {approx = true} : vector<16x1xf32> -> vector<16x1xf32>
    %26 = vector.broadcast %25 : vector<16x1xf32> to vector<16x16xf32>
    %27 = arith.mulf %22, %26 : vector<16x16xf32>
    %cst_10 = arith.constant dense<0.000000e+00> : vector<16x64xf32>
    %28 = tpu.matmul %27, %15, %cst_10 {dimension_numbers = #tpu.dot_dimension_numbers<[1], [0], [0], [1], [0, 0, 1, 1], [], []>} : vector<16x16xf32>, vector<16x64xf32>, vector<16x64xf32> -> vector<16x64xf32>
    %29 = vector.extract_strided_slice %10 {offsets = [0, 64], sizes = [16, 64], strides = [1, 1]} : vector<16x1152xf32> to vector<16x64xf32>
    %cst_11 = arith.constant 1.250000e-01 : f32
    %30 = vector.broadcast %cst_11 : f32 to vector<16x64xf32>
    %31 = arith.mulf %29, %30 : vector<16x64xf32>
    %32 = vector.extract_strided_slice %10 {offsets = [0, 448], sizes = [16, 64], strides = [1, 1]} : vector<16x1152xf32> to vector<16x64xf32>
    %33 = vector.extract_strided_slice %10 {offsets = [0, 832], sizes = [16, 64], strides = [1, 1]} : vector<16x1152xf32> to vector<16x64xf32>
    %cst_12 = arith.constant dense<0.000000e+00> : vector<16x16xf32>
    %34 = tpu.matmul %31, %32, %cst_12 {dimension_numbers = #tpu.dot_dimension_numbers<[1], [1], [0], [0], [0, 0, 1, 0], [], []>} : vector<16x64xf32>, vector<16x64xf32>, vector<16x16xf32> -> vector<16x16xf32>
    %35 = arith.addf %34, %9 : vector<16x16xf32>
    %cst_13 = arith.constant dense<0xFF800000> : vector<16xf32>
    %36 = vector.multi_reduction <maximumf>, %35, %cst_13 [1] : vector<16x16xf32> to vector<16xf32>
    %37 = vector.shape_cast %36 : vector<16xf32> to vector<16x1xf32>
    %38 = vector.broadcast %37 : vector<16x1xf32> to vector<16x16xf32>
    %39 = arith.subf %35, %38 : vector<16x16xf32>
    %40 = math.exp %39 : vector<16x16xf32>
    %cst_14 = arith.constant dense<0.000000e+00> : vector<16xf32>
    %41 = vector.multi_reduction <add>, %40, %cst_14 [1] : vector<16x16xf32> to vector<16xf32>
    %42 = vector.shape_cast %41 : vector<16xf32> to vector<16x1xf32>
    %43 = tpu.reciprocal %42 {approx = true} : vector<16x1xf32> -> vector<16x1xf32>
    %44 = vector.broadcast %43 : vector<16x1xf32> to vector<16x16xf32>
    %45 = arith.mulf %40, %44 : vector<16x16xf32>
    %cst_15 = arith.constant dense<0.000000e+00> : vector<16x64xf32>
    %46 = tpu.matmul %45, %33, %cst_15 {dimension_numbers = #tpu.dot_dimension_numbers<[1], [0], [0], [1], [0, 0, 1, 1], [], []>} : vector<16x16xf32>, vector<16x64xf32>, vector<16x64xf32> -> vector<16x64xf32>
    %47 = vector.extract_strided_slice %10 {offsets = [0, 128], sizes = [16, 64], strides = [1, 1]} : vector<16x1152xf32> to vector<16x64xf32>
    %cst_16 = arith.constant 1.250000e-01 : f32
    %48 = vector.broadcast %cst_16 : f32 to vector<16x64xf32>
    %49 = arith.mulf %47, %48 : vector<16x64xf32>
    %50 = vector.extract_strided_slice %10 {offsets = [0, 512], sizes = [16, 64], strides = [1, 1]} : vector<16x1152xf32> to vector<16x64xf32>
    %51 = vector.extract_strided_slice %10 {offsets = [0, 896], sizes = [16, 64], strides = [1, 1]} : vector<16x1152xf32> to vector<16x64xf32>
    %cst_17 = arith.constant dense<0.000000e+00> : vector<16x16xf32>
    %52 = tpu.matmul %49, %50, %cst_17 {dimension_numbers = #tpu.dot_dimension_numbers<[1], [1], [0], [0], [0, 0, 1, 0], [], []>} : vector<16x64xf32>, vector<16x64xf32>, vector<16x16xf32> -> vector<16x16xf32>
    %53 = arith.addf %52, %9 : vector<16x16xf32>
    %cst_18 = arith.constant dense<0xFF800000> : vector<16xf32>
    %54 = vector.multi_reduction <maximumf>, %53, %cst_18 [1] : vector<16x16xf32> to vector<16xf32>
    %55 = vector.shape_cast %54 : vector<16xf32> to vector<16x1xf32>
    %56 = vector.broadcast %55 : vector<16x1xf32> to vector<16x16xf32>
    %57 = arith.subf %53, %56 : vector<16x16xf32>
    %58 = math.exp %57 : vector<16x16xf32>
    %cst_19 = arith.constant dense<0.000000e+00> : vector<16xf32>
    %59 = vector.multi_reduction <add>, %58, %cst_19 [1] : vector<16x16xf32> to vector<16xf32>
    %60 = vector.shape_cast %59 : vector<16xf32> to vector<16x1xf32>
    %61 = tpu.reciprocal %60 {approx = true} : vector<16x1xf32> -> vector<16x1xf32>
    %62 = vector.broadcast %61 : vector<16x1xf32> to vector<16x16xf32>
    %63 = arith.mulf %58, %62 : vector<16x16xf32>
    %cst_20 = arith.constant dense<0.000000e+00> : vector<16x64xf32>
    %64 = tpu.matmul %63, %51, %cst_20 {dimension_numbers = #tpu.dot_dimension_numbers<[1], [0], [0], [1], [0, 0, 1, 1], [], []>} : vector<16x16xf32>, vector<16x64xf32>, vector<16x64xf32> -> vector<16x64xf32>
    %65 = vector.extract_strided_slice %10 {offsets = [0, 192], sizes = [16, 64], strides = [1, 1]} : vector<16x1152xf32> to vector<16x64xf32>
    %cst_21 = arith.constant 1.250000e-01 : f32
    %66 = vector.broadcast %cst_21 : f32 to vector<16x64xf32>
    %67 = arith.mulf %65, %66 : vector<16x64xf32>
    %68 = vector.extract_strided_slice %10 {offsets = [0, 576], sizes = [16, 64], strides = [1, 1]} : vector<16x1152xf32> to vector<16x64xf32>
    %69 = vector.extract_strided_slice %10 {offsets = [0, 960], sizes = [16, 64], strides = [1, 1]} : vector<16x1152xf32> to vector<16x64xf32>
    %cst_22 = arith.constant dense<0.000000e+00> : vector<16x16xf32>
    %70 = tpu.matmul %67, %68, %cst_22 {dimension_numbers = #tpu.dot_dimension_numbers<[1], [1], [0], [0], [0, 0, 1, 0], [], []>} : vector<16x64xf32>, vector<16x64xf32>, vector<16x16xf32> -> vector<16x16xf32>
    %71 = arith.addf %70, %9 : vector<16x16xf32>
    %cst_23 = arith.constant dense<0xFF800000> : vector<16xf32>
    %72 = vector.multi_reduction <maximumf>, %71, %cst_23 [1] : vector<16x16xf32> to vector<16xf32>
    %73 = vector.shape_cast %72 : vector<16xf32> to vector<16x1xf32>
    %74 = vector.broadcast %73 : vector<16x1xf32> to vector<16x16xf32>
    %75 = arith.subf %71, %74 : vector<16x16xf32>
    %76 = math.exp %75 : vector<16x16xf32>
    %cst_24 = arith.constant dense<0.000000e+00> : vector<16xf32>
    %77 = vector.multi_reduction <add>, %76, %cst_24 [1] : vector<16x16xf32> to vector<16xf32>
    %78 = vector.shape_cast %77 : vector<16xf32> to vector<16x1xf32>
    %79 = tpu.reciprocal %78 {approx = true} : vector<16x1xf32> -> vector<16x1xf32>
    %80 = vector.broadcast %79 : vector<16x1xf32> to vector<16x16xf32>
    %81 = arith.mulf %76, %80 : vector<16x16xf32>
    %cst_25 = arith.constant dense<0.000000e+00> : vector<16x64xf32>
    %82 = tpu.matmul %81, %69, %cst_25 {dimension_numbers = #tpu.dot_dimension_numbers<[1], [0], [0], [1], [0, 0, 1, 1], [], []>} : vector<16x16xf32>, vector<16x64xf32>, vector<16x64xf32> -> vector<16x64xf32>
    %83 = vector.extract_strided_slice %10 {offsets = [0, 256], sizes = [16, 64], strides = [1, 1]} : vector<16x1152xf32> to vector<16x64xf32>
    %cst_26 = arith.constant 1.250000e-01 : f32
    %84 = vector.broadcast %cst_26 : f32 to vector<16x64xf32>
    %85 = arith.mulf %83, %84 : vector<16x64xf32>
    %86 = vector.extract_strided_slice %10 {offsets = [0, 640], sizes = [16, 64], strides = [1, 1]} : vector<16x1152xf32> to vector<16x64xf32>
    %87 = vector.extract_strided_slice %10 {offsets = [0, 1024], sizes = [16, 64], strides = [1, 1]} : vector<16x1152xf32> to vector<16x64xf32>
    %cst_27 = arith.constant dense<0.000000e+00> : vector<16x16xf32>
    %88 = tpu.matmul %85, %86, %cst_27 {dimension_numbers = #tpu.dot_dimension_numbers<[1], [1], [0], [0], [0, 0, 1, 0], [], []>} : vector<16x64xf32>, vector<16x64xf32>, vector<16x16xf32> -> vector<16x16xf32>
    %89 = arith.addf %88, %9 : vector<16x16xf32>
    %cst_28 = arith.constant dense<0xFF800000> : vector<16xf32>
    %90 = vector.multi_reduction <maximumf>, %89, %cst_28 [1] : vector<16x16xf32> to vector<16xf32>
    %91 = vector.shape_cast %90 : vector<16xf32> to vector<16x1xf32>
    %92 = vector.broadcast %91 : vector<16x1xf32> to vector<16x16xf32>
    %93 = arith.subf %89, %92 : vector<16x16xf32>
    %94 = math.exp %93 : vector<16x16xf32>
    %cst_29 = arith.constant dense<0.000000e+00> : vector<16xf32>
    %95 = vector.multi_reduction <add>, %94, %cst_29 [1] : vector<16x16xf32> to vector<16xf32>
    %96 = vector.shape_cast %95 : vector<16xf32> to vector<16x1xf32>
    %97 = tpu.reciprocal %96 {approx = true} : vector<16x1xf32> -> vector<16x1xf32>
    %98 = vector.broadcast %97 : vector<16x1xf32> to vector<16x16xf32>
    %99 = arith.mulf %94, %98 : vector<16x16xf32>
    %cst_30 = arith.constant dense<0.000000e+00> : vector<16x64xf32>
    %100 = tpu.matmul %99, %87, %cst_30 {dimension_numbers = #tpu.dot_dimension_numbers<[1], [0], [0], [1], [0, 0, 1, 1], [], []>} : vector<16x16xf32>, vector<16x64xf32>, vector<16x64xf32> -> vector<16x64xf32>
    %101 = vector.extract_strided_slice %10 {offsets = [0, 320], sizes = [16, 64], strides = [1, 1]} : vector<16x1152xf32> to vector<16x64xf32>
    %cst_31 = arith.constant 1.250000e-01 : f32
    %102 = vector.broadcast %cst_31 : f32 to vector<16x64xf32>
    %103 = arith.mulf %101, %102 : vector<16x64xf32>
    %104 = vector.extract_strided_slice %10 {offsets = [0, 704], sizes = [16, 64], strides = [1, 1]} : vector<16x1152xf32> to vector<16x64xf32>
    %105 = vector.extract_strided_slice %10 {offsets = [0, 1088], sizes = [16, 64], strides = [1, 1]} : vector<16x1152xf32> to vector<16x64xf32>
    %cst_32 = arith.constant dense<0.000000e+00> : vector<16x16xf32>
    %106 = tpu.matmul %103, %104, %cst_32 {dimension_numbers = #tpu.dot_dimension_numbers<[1], [1], [0], [0], [0, 0, 1, 0], [], []>} : vector<16x64xf32>, vector<16x64xf32>, vector<16x16xf32> -> vector<16x16xf32>
    %107 = arith.addf %106, %9 : vector<16x16xf32>
    %cst_33 = arith.constant dense<0xFF800000> : vector<16xf32>
    %108 = vector.multi_reduction <maximumf>, %107, %cst_33 [1] : vector<16x16xf32> to vector<16xf32>
    %109 = vector.shape_cast %108 : vector<16xf32> to vector<16x1xf32>
    %110 = vector.broadcast %109 : vector<16x1xf32> to vector<16x16xf32>
    %111 = arith.subf %107, %110 : vector<16x16xf32>
    %112 = math.exp %111 : vector<16x16xf32>
    %cst_34 = arith.constant dense<0.000000e+00> : vector<16xf32>
    %113 = vector.multi_reduction <add>, %112, %cst_34 [1] : vector<16x16xf32> to vector<16xf32>
    %114 = vector.shape_cast %113 : vector<16xf32> to vector<16x1xf32>
    %115 = tpu.reciprocal %114 {approx = true} : vector<16x1xf32> -> vector<16x1xf32>
    %116 = vector.broadcast %115 : vector<16x1xf32> to vector<16x16xf32>
    %117 = arith.mulf %112, %116 : vector<16x16xf32>
    %cst_35 = arith.constant dense<0.000000e+00> : vector<16x64xf32>
    %118 = tpu.matmul %117, %105, %cst_35 {dimension_numbers = #tpu.dot_dimension_numbers<[1], [0], [0], [1], [0, 0, 1, 1], [], []>} : vector<16x16xf32>, vector<16x64xf32>, vector<16x64xf32> -> vector<16x64xf32>
    %119 = tpu.concatenate %28, %46, %64, %82, %100, %118 in 1 : vector<16x64xf32>, vector<16x64xf32>, vector<16x64xf32>, vector<16x64xf32>, vector<16x64xf32>, vector<16x64xf32> -> vector<16x384xf32>
    %120 = vector.extract_strided_slice %3 {offsets = [16, 0], sizes = [16, 1152], strides = [1, 1]} : vector<32x1152xf32> to vector<16x1152xf32>
    %121 = vector.extract_strided_slice %120 {offsets = [0, 0], sizes = [16, 64], strides = [1, 1]} : vector<16x1152xf32> to vector<16x64xf32>
    %cst_36 = arith.constant 1.250000e-01 : f32
    %122 = vector.broadcast %cst_36 : f32 to vector<16x64xf32>
    %123 = arith.mulf %121, %122 : vector<16x64xf32>
    %124 = vector.extract_strided_slice %120 {offsets = [0, 384], sizes = [16, 64], strides = [1, 1]} : vector<16x1152xf32> to vector<16x64xf32>
    %125 = vector.extract_strided_slice %120 {offsets = [0, 768], sizes = [16, 64], strides = [1, 1]} : vector<16x1152xf32> to vector<16x64xf32>
    %cst_37 = arith.constant dense<0.000000e+00> : vector<16x16xf32>
    %126 = tpu.matmul %123, %124, %cst_37 {dimension_numbers = #tpu.dot_dimension_numbers<[1], [1], [0], [0], [0, 0, 1, 0], [], []>} : vector<16x64xf32>, vector<16x64xf32>, vector<16x16xf32> -> vector<16x16xf32>
    %127 = arith.addf %126, %9 : vector<16x16xf32>
    %cst_38 = arith.constant dense<0xFF800000> : vector<16xf32>
    %128 = vector.multi_reduction <maximumf>, %127, %cst_38 [1] : vector<16x16xf32> to vector<16xf32>
    %129 = vector.shape_cast %128 : vector<16xf32> to vector<16x1xf32>
    %130 = vector.broadcast %129 : vector<16x1xf32> to vector<16x16xf32>
    %131 = arith.subf %127, %130 : vector<16x16xf32>
    %132 = math.exp %131 : vector<16x16xf32>
    %cst_39 = arith.constant dense<0.000000e+00> : vector<16xf32>
    %133 = vector.multi_reduction <add>, %132, %cst_39 [1] : vector<16x16xf32> to vector<16xf32>
    %134 = vector.shape_cast %133 : vector<16xf32> to vector<16x1xf32>
    %135 = tpu.reciprocal %134 {approx = true} : vector<16x1xf32> -> vector<16x1xf32>
    %136 = vector.broadcast %135 : vector<16x1xf32> to vector<16x16xf32>
    %137 = arith.mulf %132, %136 : vector<16x16xf32>
    %cst_40 = arith.constant dense<0.000000e+00> : vector<16x64xf32>
    %138 = tpu.matmul %137, %125, %cst_40 {dimension_numbers = #tpu.dot_dimension_numbers<[1], [0], [0], [1], [0, 0, 1, 1], [], []>} : vector<16x16xf32>, vector<16x64xf32>, vector<16x64xf32> -> vector<16x64xf32>
    %139 = vector.extract_strided_slice %120 {offsets = [0, 64], sizes = [16, 64], strides = [1, 1]} : vector<16x1152xf32> to vector<16x64xf32>
    %cst_41 = arith.constant 1.250000e-01 : f32
    %140 = vector.broadcast %cst_41 : f32 to vector<16x64xf32>
    %141 = arith.mulf %139, %140 : vector<16x64xf32>
    %142 = vector.extract_strided_slice %120 {offsets = [0, 448], sizes = [16, 64], strides = [1, 1]} : vector<16x1152xf32> to vector<16x64xf32>
    %143 = vector.extract_strided_slice %120 {offsets = [0, 832], sizes = [16, 64], strides = [1, 1]} : vector<16x1152xf32> to vector<16x64xf32>
    %cst_42 = arith.constant dense<0.000000e+00> : vector<16x16xf32>
    %144 = tpu.matmul %141, %142, %cst_42 {dimension_numbers = #tpu.dot_dimension_numbers<[1], [1], [0], [0], [0, 0, 1, 0], [], []>} : vector<16x64xf32>, vector<16x64xf32>, vector<16x16xf32> -> vector<16x16xf32>
    %145 = arith.addf %144, %9 : vector<16x16xf32>
    %cst_43 = arith.constant dense<0xFF800000> : vector<16xf32>
    %146 = vector.multi_reduction <maximumf>, %145, %cst_43 [1] : vector<16x16xf32> to vector<16xf32>
    %147 = vector.shape_cast %146 : vector<16xf32> to vector<16x1xf32>
    %148 = vector.broadcast %147 : vector<16x1xf32> to vector<16x16xf32>
    %149 = arith.subf %145, %148 : vector<16x16xf32>
    %150 = math.exp %149 : vector<16x16xf32>
    %cst_44 = arith.constant dense<0.000000e+00> : vector<16xf32>
    %151 = vector.multi_reduction <add>, %150, %cst_44 [1] : vector<16x16xf32> to vector<16xf32>
    %152 = vector.shape_cast %151 : vector<16xf32> to vector<16x1xf32>
    %153 = tpu.reciprocal %152 {approx = true} : vector<16x1xf32> -> vector<16x1xf32>
    %154 = vector.broadcast %153 : vector<16x1xf32> to vector<16x16xf32>
    %155 = arith.mulf %150, %154 : vector<16x16xf32>
    %cst_45 = arith.constant dense<0.000000e+00> : vector<16x64xf32>
    %156 = tpu.matmul %155, %143, %cst_45 {dimension_numbers = #tpu.dot_dimension_numbers<[1], [0], [0], [1], [0, 0, 1, 1], [], []>} : vector<16x16xf32>, vector<16x64xf32>, vector<16x64xf32> -> vector<16x64xf32>
    %157 = vector.extract_strided_slice %120 {offsets = [0, 128], sizes = [16, 64], strides = [1, 1]} : vector<16x1152xf32> to vector<16x64xf32>
    %cst_46 = arith.constant 1.250000e-01 : f32
    %158 = vector.broadcast %cst_46 : f32 to vector<16x64xf32>
    %159 = arith.mulf %157, %158 : vector<16x64xf32>
    %160 = vector.extract_strided_slice %120 {offsets = [0, 512], sizes = [16, 64], strides = [1, 1]} : vector<16x1152xf32> to vector<16x64xf32>
    %161 = vector.extract_strided_slice %120 {offsets = [0, 896], sizes = [16, 64], strides = [1, 1]} : vector<16x1152xf32> to vector<16x64xf32>
    %cst_47 = arith.constant dense<0.000000e+00> : vector<16x16xf32>
    %162 = tpu.matmul %159, %160, %cst_47 {dimension_numbers = #tpu.dot_dimension_numbers<[1], [1], [0], [0], [0, 0, 1, 0], [], []>} : vector<16x64xf32>, vector<16x64xf32>, vector<16x16xf32> -> vector<16x16xf32>
    %163 = arith.addf %162, %9 : vector<16x16xf32>
    %cst_48 = arith.constant dense<0xFF800000> : vector<16xf32>
    %164 = vector.multi_reduction <maximumf>, %163, %cst_48 [1] : vector<16x16xf32> to vector<16xf32>
    %165 = vector.shape_cast %164 : vector<16xf32> to vector<16x1xf32>
    %166 = vector.broadcast %165 : vector<16x1xf32> to vector<16x16xf32>
    %167 = arith.subf %163, %166 : vector<16x16xf32>
    %168 = math.exp %167 : vector<16x16xf32>
    %cst_49 = arith.constant dense<0.000000e+00> : vector<16xf32>
    %169 = vector.multi_reduction <add>, %168, %cst_49 [1] : vector<16x16xf32> to vector<16xf32>
    %170 = vector.shape_cast %169 : vector<16xf32> to vector<16x1xf32>
    %171 = tpu.reciprocal %170 {approx = true} : vector<16x1xf32> -> vector<16x1xf32>
    %172 = vector.broadcast %171 : vector<16x1xf32> to vector<16x16xf32>
    %173 = arith.mulf %168, %172 : vector<16x16xf32>
    %cst_50 = arith.constant dense<0.000000e+00> : vector<16x64xf32>
    %174 = tpu.matmul %173, %161, %cst_50 {dimension_numbers = #tpu.dot_dimension_numbers<[1], [0], [0], [1], [0, 0, 1, 1], [], []>} : vector<16x16xf32>, vector<16x64xf32>, vector<16x64xf32> -> vector<16x64xf32>
    %175 = vector.extract_strided_slice %120 {offsets = [0, 192], sizes = [16, 64], strides = [1, 1]} : vector<16x1152xf32> to vector<16x64xf32>
    %cst_51 = arith.constant 1.250000e-01 : f32
    %176 = vector.broadcast %cst_51 : f32 to vector<16x64xf32>
    %177 = arith.mulf %175, %176 : vector<16x64xf32>
    %178 = vector.extract_strided_slice %120 {offsets = [0, 576], sizes = [16, 64], strides = [1, 1]} : vector<16x1152xf32> to vector<16x64xf32>
    %179 = vector.extract_strided_slice %120 {offsets = [0, 960], sizes = [16, 64], strides = [1, 1]} : vector<16x1152xf32> to vector<16x64xf32>
    %cst_52 = arith.constant dense<0.000000e+00> : vector<16x16xf32>
    %180 = tpu.matmul %177, %178, %cst_52 {dimension_numbers = #tpu.dot_dimension_numbers<[1], [1], [0], [0], [0, 0, 1, 0], [], []>} : vector<16x64xf32>, vector<16x64xf32>, vector<16x16xf32> -> vector<16x16xf32>
    %181 = arith.addf %180, %9 : vector<16x16xf32>
    %cst_53 = arith.constant dense<0xFF800000> : vector<16xf32>
    %182 = vector.multi_reduction <maximumf>, %181, %cst_53 [1] : vector<16x16xf32> to vector<16xf32>
    %183 = vector.shape_cast %182 : vector<16xf32> to vector<16x1xf32>
    %184 = vector.broadcast %183 : vector<16x1xf32> to vector<16x16xf32>
    %185 = arith.subf %181, %184 : vector<16x16xf32>
    %186 = math.exp %185 : vector<16x16xf32>
    %cst_54 = arith.constant dense<0.000000e+00> : vector<16xf32>
    %187 = vector.multi_reduction <add>, %186, %cst_54 [1] : vector<16x16xf32> to vector<16xf32>
    %188 = vector.shape_cast %187 : vector<16xf32> to vector<16x1xf32>
    %189 = tpu.reciprocal %188 {approx = true} : vector<16x1xf32> -> vector<16x1xf32>
    %190 = vector.broadcast %189 : vector<16x1xf32> to vector<16x16xf32>
    %191 = arith.mulf %186, %190 : vector<16x16xf32>
    %cst_55 = arith.constant dense<0.000000e+00> : vector<16x64xf32>
    %192 = tpu.matmul %191, %179, %cst_55 {dimension_numbers = #tpu.dot_dimension_numbers<[1], [0], [0], [1], [0, 0, 1, 1], [], []>} : vector<16x16xf32>, vector<16x64xf32>, vector<16x64xf32> -> vector<16x64xf32>
    %193 = vector.extract_strided_slice %120 {offsets = [0, 256], sizes = [16, 64], strides = [1, 1]} : vector<16x1152xf32> to vector<16x64xf32>
    %cst_56 = arith.constant 1.250000e-01 : f32
    %194 = vector.broadcast %cst_56 : f32 to vector<16x64xf32>
    %195 = arith.mulf %193, %194 : vector<16x64xf32>
    %196 = vector.extract_strided_slice %120 {offsets = [0, 640], sizes = [16, 64], strides = [1, 1]} : vector<16x1152xf32> to vector<16x64xf32>
    %197 = vector.extract_strided_slice %120 {offsets = [0, 1024], sizes = [16, 64], strides = [1, 1]} : vector<16x1152xf32> to vector<16x64xf32>
    %cst_57 = arith.constant dense<0.000000e+00> : vector<16x16xf32>
    %198 = tpu.matmul %195, %196, %cst_57 {dimension_numbers = #tpu.dot_dimension_numbers<[1], [1], [0], [0], [0, 0, 1, 0], [], []>} : vector<16x64xf32>, vector<16x64xf32>, vector<16x16xf32> -> vector<16x16xf32>
    %199 = arith.addf %198, %9 : vector<16x16xf32>
    %cst_58 = arith.constant dense<0xFF800000> : vector<16xf32>
    %200 = vector.multi_reduction <maximumf>, %199, %cst_58 [1] : vector<16x16xf32> to vector<16xf32>
    %201 = vector.shape_cast %200 : vector<16xf32> to vector<16x1xf32>
    %202 = vector.broadcast %201 : vector<16x1xf32> to vector<16x16xf32>
    %203 = arith.subf %199, %202 : vector<16x16xf32>
    %204 = math.exp %203 : vector<16x16xf32>
    %cst_59 = arith.constant dense<0.000000e+00> : vector<16xf32>
    %205 = vector.multi_reduction <add>, %204, %cst_59 [1] : vector<16x16xf32> to vector<16xf32>
    %206 = vector.shape_cast %205 : vector<16xf32> to vector<16x1xf32>
    %207 = tpu.reciprocal %206 {approx = true} : vector<16x1xf32> -> vector<16x1xf32>
    %208 = vector.broadcast %207 : vector<16x1xf32> to vector<16x16xf32>
    %209 = arith.mulf %204, %208 : vector<16x16xf32>
    %cst_60 = arith.constant dense<0.000000e+00> : vector<16x64xf32>
    %210 = tpu.matmul %209, %197, %cst_60 {dimension_numbers = #tpu.dot_dimension_numbers<[1], [0], [0], [1], [0, 0, 1, 1], [], []>} : vector<16x16xf32>, vector<16x64xf32>, vector<16x64xf32> -> vector<16x64xf32>
    %211 = vector.extract_strided_slice %120 {offsets = [0, 320], sizes = [16, 64], strides = [1, 1]} : vector<16x1152xf32> to vector<16x64xf32>
    %cst_61 = arith.constant 1.250000e-01 : f32
    %212 = vector.broadcast %cst_61 : f32 to vector<16x64xf32>
    %213 = arith.mulf %211, %212 : vector<16x64xf32>
    %214 = vector.extract_strided_slice %120 {offsets = [0, 704], sizes = [16, 64], strides = [1, 1]} : vector<16x1152xf32> to vector<16x64xf32>
    %215 = vector.extract_strided_slice %120 {offsets = [0, 1088], sizes = [16, 64], strides = [1, 1]} : vector<16x1152xf32> to vector<16x64xf32>
    %cst_62 = arith.constant dense<0.000000e+00> : vector<16x16xf32>
    %216 = tpu.matmul %213, %214, %cst_62 {dimension_numbers = #tpu.dot_dimension_numbers<[1], [1], [0], [0], [0, 0, 1, 0], [], []>} : vector<16x64xf32>, vector<16x64xf32>, vector<16x16xf32> -> vector<16x16xf32>
    %217 = arith.addf %216, %9 : vector<16x16xf32>
    %cst_63 = arith.constant dense<0xFF800000> : vector<16xf32>
    %218 = vector.multi_reduction <maximumf>, %217, %cst_63 [1] : vector<16x16xf32> to vector<16xf32>
    %219 = vector.shape_cast %218 : vector<16xf32> to vector<16x1xf32>
    %220 = vector.broadcast %219 : vector<16x1xf32> to vector<16x16xf32>
    %221 = arith.subf %217, %220 : vector<16x16xf32>
    %222 = math.exp %221 : vector<16x16xf32>
    %cst_64 = arith.constant dense<0.000000e+00> : vector<16xf32>
    %223 = vector.multi_reduction <add>, %222, %cst_64 [1] : vector<16x16xf32> to vector<16xf32>
    %224 = vector.shape_cast %223 : vector<16xf32> to vector<16x1xf32>
    %225 = tpu.reciprocal %224 {approx = true} : vector<16x1xf32> -> vector<16x1xf32>
    %226 = vector.broadcast %225 : vector<16x1xf32> to vector<16x16xf32>
    %227 = arith.mulf %222, %226 : vector<16x16xf32>
    %cst_65 = arith.constant dense<0.000000e+00> : vector<16x64xf32>
    %228 = tpu.matmul %227, %215, %cst_65 {dimension_numbers = #tpu.dot_dimension_numbers<[1], [0], [0], [1], [0, 0, 1, 1], [], []>} : vector<16x16xf32>, vector<16x64xf32>, vector<16x64xf32> -> vector<16x64xf32>
    %229 = tpu.concatenate %138, %156, %174, %192, %210, %228 in 1 : vector<16x64xf32>, vector<16x64xf32>, vector<16x64xf32>, vector<16x64xf32>, vector<16x64xf32>, vector<16x64xf32> -> vector<16x384xf32>
    %230 = tpu.concatenate %119, %229 in 0 : vector<16x384xf32>, vector<16x384xf32> -> vector<32x384xf32>
    %c0_66 = arith.constant 0 : index
    %c0_67 = arith.constant 0 : index
    %231 = vector.load %arg3[%c0_66, %c0_67] : memref<384x384xf32, #tpu.memory_space<vmem>>, vector<384x384xf32>
    %cst_68 = arith.constant dense<0.000000e+00> : vector<32x384xf32>
    %232 = tpu.matmul %230, %231, %cst_68 {dimension_numbers = #tpu.dot_dimension_numbers<[1], [0], [0], [1], [0, 0, 1, 1], [], []>} : vector<32x384xf32>, vector<384x384xf32>, vector<32x384xf32> -> vector<32x384xf32>
    %233 = vector.shape_cast %232 : vector<32x384xf32> to vector<2x16x384xf32>
    %c0_69 = arith.constant 0 : index
    %c0_70 = arith.constant 0 : index
    %c0_71 = arith.constant 0 : index
    %234 = vector.load %arg4[%c0_69, %c0_70, %c0_71] : memref<2x16x384xf32, #tpu.memory_space<vmem>>, vector<2x16x384xf32>
    tpu.vector_store %arg4[%c0_69, %c0_70, %c0_71], %233 {strides = array<i32>} : memref<2x16x384xf32, #tpu.memory_space<vmem>>, vector<2x16x384xf32>,
    return
  }
  func.func @transform_0(%arg0: i32) -> (i32, i32, i32) {
    %c0_i32 = arith.constant 0 : i32
    %c0_i32_0 = arith.constant 0 : i32
    %c0_i32_1 = arith.constant 0 : i32
    return %arg0, %c0_i32, %c0_i32_0 : i32, i32, i32
  }
  func.func @transform_1(%arg0: i32) -> (i32, i32) {
    %c0_i32 = arith.constant 0 : i32
    %c0_i32_0 = arith.constant 0 : i32
    %c0_i32_1 = arith.constant 0 : i32
    return %c0_i32, %c0_i32_0 : i32, i32
  }
  func.func @transform_2(%arg0: i32) -> (i32, i32) {
    %c0_i32 = arith.constant 0 : i32
    %c0_i32_0 = arith.constant 0 : i32
    %c0_i32_1 = arith.constant 0 : i32
    return %c0_i32, %c0_i32_0 : i32, i32
  }
  func.func @transform_3(%arg0: i32) -> (i32, i32, i32) {
    %c0_i32 = arith.constant 0 : i32
    %c0_i32_0 = arith.constant 0 : i32
    %c0_i32_1 = arith.constant 0 : i32
    return %arg0, %c0_i32, %c0_i32_0 : i32, i32, i32
  }
}

module attributes {stable_mosaic.version = 11 : i64} {
  func.func @_fused_csa_kernel(%arg0: i32, %arg1: memref<2x16x384xf32, #tpu.memory_space<vmem>>, %arg2: memref<384x1152xf32, #tpu.memory_space<vmem>>, %arg3: memref<384x384xf32, #tpu.memory_space<vmem>>, %arg4: memref<2x16x384xf32, #tpu.memory_space<vmem>>) attributes {dimension_semantics = [#tpu.dimension_semantics<parallel>], iteration_bounds = array<i64: 2>, scalar_prefetch = 0 : i64, scratch_operands = 0 : i64, tpu.core_type = #tpu.core_type<tc>, window_params = [{transform_indices = @transform_0, window_bounds = array<i64: 2, 16, 384>}, {pipeline_mode = #tpu.pipeline_mode<synchronous>, transform_indices = @transform_1, window_bounds = array<i64: 384, 1152>}, {pipeline_mode = #tpu.pipeline_mode<synchronous>, transform_indices = @transform_2, window_bounds = array<i64: 384, 384>}, {transform_indices = @transform_3, window_bounds = array<i64: 2, 16, 384>}]} {
    %c0 = arith.constant 0 : index
    %c0_0 = arith.constant 0 : index
    %c0_1 = arith.constant 0 : index
    %0 = vector.load %arg1[%c0, %c0_0, %c0_1] : memref<2x16x384xf32, #tpu.memory_space<vmem>>, vector<2x16x384xf32>
    %1 = vector.shape_cast %0 : vector<2x16x384xf32> to vector<32x384xf32>
    %c0_2 = arith.constant 0 : index
    %c0_3 = arith.constant 0 : index
    %2 = vector.load %arg2[%c0_2, %c0_3] : memref<384x1152xf32, #tpu.memory_space<vmem>>, vector<384x1152xf32>
    %cst = arith.constant dense<0.000000e+00> : vector<32x1152xf32>
    %3 = tpu.matmul %1, %2, %cst {dimension_numbers = #tpu.dot_dimension_numbers<[1], [0], [0], [1], [0, 0, 1, 1], [], []>} : vector<32x384xf32>, vector<384x1152xf32>, vector<32x1152xf32> -> vector<32x1152xf32>
    %4 = tpu.iota {dimensions = array<i32: 0>} : vector<16x16xi32>
    %5 = tpu.iota {dimensions = array<i32: 1>} : vector<16x16xi32>
    %6 = arith.cmpi sge, %4, %5 : vector<16x16xi32>
    %cst_4 = arith.constant 0.000000e+00 : f32
    %cst_5 = arith.constant 0xFF800000 : f32
    %7 = vector.broadcast %cst_4 : f32 to vector<16x16xf32>
    %8 = vector.broadcast %cst_5 : f32 to vector<16x16xf32>
    %9 = arith.select %6, %7, %8 : vector<16x16xi1>, vector<16x16xf32>
    %10 = vector.extract_strided_slice %3 {offsets = [0, 0], sizes = [16, 1152], strides = [1, 1]} : vector<32x1152xf32> to vector<16x1152xf32>
    %11 = vector.extract_strided_slice %10 {offsets = [0, 0], sizes = [16, 64], strides = [1, 1]} : vector<16x1152xf32> to vector<16x64xf32>
    %cst_6 = arith.constant 1.250000e-01 : f32
    %12 = vector.broadcast %cst_6 : f32 to vector<16x64xf32>
    %13 = arith.mulf %11, %12 : vector<16x64xf32>
    %14 = vector.extract_strided_slice %10 {offsets = [0, 384], sizes = [16, 64], strides = [1, 1]} : vector<16x1152xf32> to vector<16x64xf32>
    %15 = vector.extract_strided_slice %10 {offsets = [0, 768], sizes = [16, 64], strides = [1, 1]} : vector<16x1152xf32> to vector<16x64xf32>
    %cst_7 = arith.constant dense<0.000000e+00> : vector<16x16xf32>
    %16 = tpu.matmul %13, %14, %cst_7 {dimension_numbers = #tpu.dot_dimension_numbers<[1], [1], [0], [0], [0, 0, 1, 0], [], []>} : vector<16x64xf32>, vector<16x64xf32>, vector<16x16xf32> -> vector<16x16xf32>
    %17 = arith.addf %16, %9 : vector<16x16xf32>
    %cst_8 = arith.constant dense<0xFF800000> : vector<16xf32>
    %18 = vector.multi_reduction <maximumf>, %17, %cst_8 [1] : vector<16x16xf32> to vector<16xf32>
    %19 = vector.shape_cast %18 : vector<16xf32> to vector<16x1xf32>
    %20 = vector.broadcast %19 : vector<16x1xf32> to vector<16x16xf32>
    %21 = arith.subf %17, %20 : vector<16x16xf32>
    %22 = math.exp %21 : vector<16x16xf32>
    %cst_9 = arith.constant dense<0.000000e+00> : vector<16xf32>
    %23 = vector.multi_reduction <add>, %22, %cst_9 [1] : vector<16x16xf32> to vector<16xf32>
    %24 = vector.shape_cast %23 : vector<16xf32> to vector<16x1xf32>
    %25 = tpu.reciprocal %24 {approx = true} : vector<16x1xf32> -> vector<16x1xf32>
    %26 = vector.broadcast %25 : vector<16x1xf32> to vector<16x16xf32>
    %27 = arith.mulf %22, %26 : vector<16x16xf32>
    %cst_10 = arith.constant dense<0.000000e+00> : vector<16x64xf32>
    %28 = tpu.matmul %27, %15, %cst_10 {dimension_numbers = #tpu.dot_dimension_numbers<[1], [0], [0], [1], [0, 0, 1, 1], [], []>} : vector<16x16xf32>, vector<16x64xf32>, vector<16x64xf32> -> vector<16x64xf32>
    %29 = vector.extract_strided_slice %10 {offsets = [0, 64], sizes = [16, 64], strides = [1, 1]} : vector<16x1152xf32> to vector<16x64xf32>
    %cst_11 = arith.constant 1.250000e-01 : f32
    %30 = vector.broadcast %cst_11 : f32 to vector<16x64xf32>
    %31 = arith.mulf %29, %30 : vector<16x64xf32>
    %32 = vector.extract_strided_slice %10 {offsets = [0, 448], sizes = [16, 64], strides = [1, 1]} : vector<16x1152xf32> to vector<16x64xf32>
    %33 = vector.extract_strided_slice %10 {offsets = [0, 832], sizes = [16, 64], strides = [1, 1]} : vector<16x1152xf32> to vector<16x64xf32>
    %cst_12 = arith.constant dense<0.000000e+00> : vector<16x16xf32>
    %34 = tpu.matmul %31, %32, %cst_12 {dimension_numbers = #tpu.dot_dimension_numbers<[1], [1], [0], [0], [0, 0, 1, 0], [], []>} : vector<16x64xf32>, vector<16x64xf32>, vector<16x16xf32> -> vector<16x16xf32>
    %35 = arith.addf %34, %9 : vector<16x16xf32>
    %cst_13 = arith.constant dense<0xFF800000> : vector<16xf32>
    %36 = vector.multi_reduction <maximumf>, %35, %cst_13 [1] : vector<16x16xf32> to vector<16xf32>
    %37 = vector.shape_cast %36 : vector<16xf32> to vector<16x1xf32>
    %38 = vector.broadcast %37 : vector<16x1xf32> to vector<16x16xf32>
    %39 = arith.subf %35, %38 : vector<16x16xf32>
    %40 = math.exp %39 : vector<16x16xf32>
    %cst_14 = arith.constant dense<0.000000e+00> : vector<16xf32>
    %41 = vector.multi_reduction <add>, %40, %cst_14 [1] : vector<16x16xf32> to vector<16xf32>
    %42 = vector.shape_cast %41 : vector<16xf32> to vector<16x1xf32>
    %43 = tpu.reciprocal %42 {approx = true} : vector<16x1xf32> -> vector<16x1xf32>
    %44 = vector.broadcast %43 : vector<16x1xf32> to vector<16x16xf32>
    %45 = arith.mulf %40, %44 : vector<16x16xf32>
    %cst_15 = arith.constant dense<0.000000e+00> : vector<16x64xf32>
    %46 = tpu.matmul %45, %33, %cst_15 {dimension_numbers = #tpu.dot_dimension_numbers<[1], [0], [0], [1], [0, 0, 1, 1], [], []>} : vector<16x16xf32>, vector<16x64xf32>, vector<16x64xf32> -> vector<16x64xf32>
    %47 = vector.extract_strided_slice %10 {offsets = [0, 128], sizes = [16, 64], strides = [1, 1]} : vector<16x1152xf32> to vector<16x64xf32>
    %cst_16 = arith.constant 1.250000e-01 : f32
    %48 = vector.broadcast %cst_16 : f32 to vector<16x64xf32>
    %49 = arith.mulf %47, %48 : vector<16x64xf32>
    %50 = vector.extract_strided_slice %10 {offsets = [0, 512], sizes = [16, 64], strides = [1, 1]} : vector<16x1152xf32> to vector<16x64xf32>
    %51 = vector.extract_strided_slice %10 {offsets = [0, 896], sizes = [16, 64], strides = [1, 1]} : vector<16x1152xf32> to vector<16x64xf32>
    %cst_17 = arith.constant dense<0.000000e+00> : vector<16x16xf32>
    %52 = tpu.matmul %49, %50, %cst_17 {dimension_numbers = #tpu.dot_dimension_numbers<[1], [1], [0], [0], [0, 0, 1, 0], [], []>} : vector<16x64xf32>, vector<16x64xf32>, vector<16x16xf32> -> vector<16x16xf32>
    %53 = arith.addf %52, %9 : vector<16x16xf32>
    %cst_18 = arith.constant dense<0xFF800000> : vector<16xf32>
    %54 = vector.multi_reduction <maximumf>, %53, %cst_18 [1] : vector<16x16xf32> to vector<16xf32>
    %55 = vector.shape_cast %54 : vector<16xf32> to vector<16x1xf32>
    %56 = vector.broadcast %55 : vector<16x1xf32> to vector<16x16xf32>
    %57 = arith.subf %53, %56 : vector<16x16xf32>
    %58 = math.exp %57 : vector<16x16xf32>
    %cst_19 = arith.constant dense<0.000000e+00> : vector<16xf32>
    %59 = vector.multi_reduction <add>, %58, %cst_19 [1] : vector<16x16xf32> to vector<16xf32>
    %60 = vector.shape_cast %59 : vector<16xf32> to vector<16x1xf32>
    %61 = tpu.reciprocal %60 {approx = true} : vector<16x1xf32> -> vector<16x1xf32>
    %62 = vector.broadcast %61 : vector<16x1xf32> to vector<16x16xf32>
    %63 = arith.mulf %58, %62 : vector<16x16xf32>
    %cst_20 = arith.constant dense<0.000000e+00> : vector<16x64xf32>
    %64 = tpu.matmul %63, %51, %cst_20 {dimension_numbers = #tpu.dot_dimension_numbers<[1], [0], [0], [1], [0, 0, 1, 1], [], []>} : vector<16x16xf32>, vector<16x64xf32>, vector<16x64xf32> -> vector<16x64xf32>
    %65 = vector.extract_strided_slice %10 {offsets = [0, 192], sizes = [16, 64], strides = [1, 1]} : vector<16x1152xf32> to vector<16x64xf32>
    %cst_21 = arith.constant 1.250000e-01 : f32
    %66 = vector.broadcast %cst_21 : f32 to vector<16x64xf32>
    %67 = arith.mulf %65, %66 : vector<16x64xf32>
    %68 = vector.extract_strided_slice %10 {offsets = [0, 576], sizes = [16, 64], strides = [1, 1]} : vector<16x1152xf32> to vector<16x64xf32>
    %69 = vector.extract_strided_slice %10 {offsets = [0, 960], sizes = [16, 64], strides = [1, 1]} : vector<16x1152xf32> to vector<16x64xf32>
    %cst_22 = arith.constant dense<0.000000e+00> : vector<16x16xf32>
    %70 = tpu.matmul %67, %68, %cst_22 {dimension_numbers = #tpu.dot_dimension_numbers<[1], [1], [0], [0], [0, 0, 1, 0], [], []>} : vector<16x64xf32>, vector<16x64xf32>, vector<16x16xf32> -> vector<16x16xf32>
    %71 = arith.addf %70, %9 : vector<16x16xf32>
    %cst_23 = arith.constant dense<0xFF800000> : vector<16xf32>
    %72 = vector.multi_reduction <maximumf>, %71, %cst_23 [1] : vector<16x16xf32> to vector<16xf32>
    %73 = vector.shape_cast %72 : vector<16xf32> to vector<16x1xf32>
    %74 = vector.broadcast %73 : vector<16x1xf32> to vector<16x16xf32>
    %75 = arith.subf %71, %74 : vector<16x16xf32>
    %76 = math.exp %75 : vector<16x16xf32>
    %cst_24 = arith.constant dense<0.000000e+00> : vector<16xf32>
    %77 = vector.multi_reduction <add>, %76, %cst_24 [1] : vector<16x16xf32> to vector<16xf32>
    %78 = vector.shape_cast %77 : vector<16xf32> to vector<16x1xf32>
    %79 = tpu.reciprocal %78 {approx = true} : vector<16x1xf32> -> vector<16x1xf32>
    %80 = vector.broadcast %79 : vector<16x1xf32> to vector<16x16xf32>
    %81 = arith.mulf %76, %80 : vector<16x16xf32>
    %cst_25 = arith.constant dense<0.000000e+00> : vector<16x64xf32>
    %82 = tpu.matmul %81, %69, %cst_25 {dimension_numbers = #tpu.dot_dimension_numbers<[1], [0], [0], [1], [0, 0, 1, 1], [], []>} : vector<16x16xf32>, vector<16x64xf32>, vector<16x64xf32> -> vector<16x64xf32>
    %83 = vector.extract_strided_slice %10 {offsets = [0, 256], sizes = [16, 64], strides = [1, 1]} : vector<16x1152xf32> to vector<16x64xf32>
    %cst_26 = arith.constant 1.250000e-01 : f32
    %84 = vector.broadcast %cst_26 : f32 to vector<16x64xf32>
    %85 = arith.mulf %83, %84 : vector<16x64xf32>
    %86 = vector.extract_strided_slice %10 {offsets = [0, 640], sizes = [16, 64], strides = [1, 1]} : vector<16x1152xf32> to vector<16x64xf32>
    %87 = vector.extract_strided_slice %10 {offsets = [0, 1024], sizes = [16, 64], strides = [1, 1]} : vector<16x1152xf32> to vector<16x64xf32>
    %cst_27 = arith.constant dense<0.000000e+00> : vector<16x16xf32>
    %88 = tpu.matmul %85, %86, %cst_27 {dimension_numbers = #tpu.dot_dimension_numbers<[1], [1], [0], [0], [0, 0, 1, 0], [], []>} : vector<16x64xf32>, vector<16x64xf32>, vector<16x16xf32> -> vector<16x16xf32>
    %89 = arith.addf %88, %9 : vector<16x16xf32>
    %cst_28 = arith.constant dense<0xFF800000> : vector<16xf32>
    %90 = vector.multi_reduction <maximumf>, %89, %cst_28 [1] : vector<16x16xf32> to vector<16xf32>
    %91 = vector.shape_cast %90 : vector<16xf32> to vector<16x1xf32>
    %92 = vector.broadcast %91 : vector<16x1xf32> to vector<16x16xf32>
    %93 = arith.subf %89, %92 : vector<16x16xf32>
    %94 = math.exp %93 : vector<16x16xf32>
    %cst_29 = arith.constant dense<0.000000e+00> : vector<16xf32>
    %95 = vector.multi_reduction <add>, %94, %cst_29 [1] : vector<16x16xf32> to vector<16xf32>
    %96 = vector.shape_cast %95 : vector<16xf32> to vector<16x1xf32>
    %97 = tpu.reciprocal %96 {approx = true} : vector<16x1xf32> -> vector<16x1xf32>
    %98 = vector.broadcast %97 : vector<16x1xf32> to vector<16x16xf32>
    %99 = arith.mulf %94, %98 : vector<16x16xf32>
    %cst_30 = arith.constant dense<0.000000e+00> : vector<16x64xf32>
    %100 = tpu.matmul %99, %87, %cst_30 {dimension_numbers = #tpu.dot_dimension_numbers<[1], [0], [0], [1], [0, 0, 1, 1], [], []>} : vector<16x16xf32>, vector<16x64xf32>, vector<16x64xf32> -> vector<16x64xf32>
    %101 = vector.extract_strided_slice %10 {offsets = [0, 320], sizes = [16, 64], strides = [1, 1]} : vector<16x1152xf32> to vector<16x64xf32>
    %cst_31 = arith.constant 1.250000e-01 : f32
    %102 = vector.broadcast %cst_31 : f32 to vector<16x64xf32>
    %103 = arith.mulf %101, %102 : vector<16x64xf32>
    %104 = vector.extract_strided_slice %10 {offsets = [0, 704], sizes = [16, 64], strides = [1, 1]} : vector<16x1152xf32> to vector<16x64xf32>
    %105 = vector.extract_strided_slice %10 {offsets = [0, 1088], sizes = [16, 64], strides = [1, 1]} : vector<16x1152xf32> to vector<16x64xf32>
    %cst_32 = arith.constant dense<0.000000e+00> : vector<16x16xf32>
    %106 = tpu.matmul %103, %104, %cst_32 {dimension_numbers = #tpu.dot_dimension_numbers<[1], [1], [0], [0], [0, 0, 1, 0], [], []>} : vector<16x64xf32>, vector<16x64xf32>, vector<16x16xf32> -> vector<16x16xf32>
    %107 = arith.addf %106, %9 : vector<16x16xf32>
    %cst_33 = arith.constant dense<0xFF800000> : vector<16xf32>
    %108 = vector.multi_reduction <maximumf>, %107, %cst_33 [1] : vector<16x16xf32> to vector<16xf32>
    %109 = vector.shape_cast %108 : vector<16xf32> to vector<16x1xf32>
    %110 = vector.broadcast %109 : vector<16x1xf32> to vector<16x16xf32>
    %111 = arith.subf %107, %110 : vector<16x16xf32>
    %112 = math.exp %111 : vector<16x16xf32>
    %cst_34 = arith.constant dense<0.000000e+00> : vector<16xf32>
    %113 = vector.multi_reduction <add>, %112, %cst_34 [1] : vector<16x16xf32> to vector<16xf32>
    %114 = vector.shape_cast %113 : vector<16xf32> to vector<16x1xf32>
    %115 = tpu.reciprocal %114 {approx = true} : vector<16x1xf32> -> vector<16x1xf32>
    %116 = vector.broadcast %115 : vector<16x1xf32> to vector<16x16xf32>
    %117 = arith.mulf %112, %116 : vector<16x16xf32>
    %cst_35 = arith.constant dense<0.000000e+00> : vector<16x64xf32>
    %118 = tpu.matmul %117, %105, %cst_35 {dimension_numbers = #tpu.dot_dimension_numbers<[1], [0], [0], [1], [0, 0, 1, 1], [], []>} : vector<16x16xf32>, vector<16x64xf32>, vector<16x64xf32> -> vector<16x64xf32>
    %119 = tpu.concatenate %28, %46, %64, %82, %100, %118 in 1 : vector<16x64xf32>, vector<16x64xf32>, vector<16x64xf32>, vector<16x64xf32>, vector<16x64xf32>, vector<16x64xf32> -> vector<16x384xf32>
    %120 = vector.extract_strided_slice %3 {offsets = [16, 0], sizes = [16, 1152], strides = [1, 1]} : vector<32x1152xf32> to vector<16x1152xf32>
    %121 = vector.extract_strided_slice %120 {offsets = [0, 0], sizes = [16, 64], strides = [1, 1]} : vector<16x1152xf32> to vector<16x64xf32>
    %cst_36 = arith.constant 1.250000e-01 : f32
    %122 = vector.broadcast %cst_36 : f32 to vector<16x64xf32>
    %123 = arith.mulf %121, %122 : vector<16x64xf32>
    %124 = vector.extract_strided_slice %120 {offsets = [0, 384], sizes = [16, 64], strides = [1, 1]} : vector<16x1152xf32> to vector<16x64xf32>
    %125 = vector.extract_strided_slice %120 {offsets = [0, 768], sizes = [16, 64], strides = [1, 1]} : vector<16x1152xf32> to vector<16x64xf32>
    %cst_37 = arith.constant dense<0.000000e+00> : vector<16x16xf32>
    %126 = tpu.matmul %123, %124, %cst_37 {dimension_numbers = #tpu.dot_dimension_numbers<[1], [1], [0], [0], [0, 0, 1, 0], [], []>} : vector<16x64xf32>, vector<16x64xf32>, vector<16x16xf32> -> vector<16x16xf32>
    %127 = arith.addf %126, %9 : vector<16x16xf32>
    %cst_38 = arith.constant dense<0xFF800000> : vector<16xf32>
    %128 = vector.multi_reduction <maximumf>, %127, %cst_38 [1] : vector<16x16xf32> to vector<16xf32>
    %129 = vector.shape_cast %128 : vector<16xf32> to vector<16x1xf32>
    %130 = vector.broadcast %129 : vector<16x1xf32> to vector<16x16xf32>
    %131 = arith.subf %127, %130 : vector<16x16xf32>
    %132 = math.exp %131 : vector<16x16xf32>
    %cst_39 = arith.constant dense<0.000000e+00> : vector<16xf32>
    %133 = vector.multi_reduction <add>, %132, %cst_39 [1] : vector<16x16xf32> to vector<16xf32>
    %134 = vector.shape_cast %133 : vector<16xf32> to vector<16x1xf32>
    %135 = tpu.reciprocal %134 {approx = true} : vector<16x1xf32> -> vector<16x1xf32>
    %136 = vector.broadcast %135 : vector<16x1xf32> to vector<16x16xf32>
    %137 = arith.mulf %132, %136 : vector<16x16xf32>
    %cst_40 = arith.constant dense<0.000000e+00> : vector<16x64xf32>
    %138 = tpu.matmul %137, %125, %cst_40 {dimension_numbers = #tpu.dot_dimension_numbers<[1], [0], [0], [1], [0, 0, 1, 1], [], []>} : vector<16x16xf32>, vector<16x64xf32>, vector<16x64xf32> -> vector<16x64xf32>
    %139 = vector.extract_strided_slice %120 {offsets = [0, 64], sizes = [16, 64], strides = [1, 1]} : vector<16x1152xf32> to vector<16x64xf32>
    %cst_41 = arith.constant 1.250000e-01 : f32
    %140 = vector.broadcast %cst_41 : f32 to vector<16x64xf32>
    %141 = arith.mulf %139, %140 : vector<16x64xf32>
    %142 = vector.extract_strided_slice %120 {offsets = [0, 448], sizes = [16, 64], strides = [1, 1]} : vector<16x1152xf32> to vector<16x64xf32>
    %143 = vector.extract_strided_slice %120 {offsets = [0, 832], sizes = [16, 64], strides = [1, 1]} : vector<16x1152xf32> to vector<16x64xf32>
    %cst_42 = arith.constant dense<0.000000e+00> : vector<16x16xf32>
    %144 = tpu.matmul %141, %142, %cst_42 {dimension_numbers = #tpu.dot_dimension_numbers<[1], [1], [0], [0], [0, 0, 1, 0], [], []>} : vector<16x64xf32>, vector<16x64xf32>, vector<16x16xf32> -> vector<16x16xf32>
    %145 = arith.addf %144, %9 : vector<16x16xf32>
    %cst_43 = arith.constant dense<0xFF800000> : vector<16xf32>
    %146 = vector.multi_reduction <maximumf>, %145, %cst_43 [1] : vector<16x16xf32> to vector<16xf32>
    %147 = vector.shape_cast %146 : vector<16xf32> to vector<16x1xf32>
    %148 = vector.broadcast %147 : vector<16x1xf32> to vector<16x16xf32>
    %149 = arith.subf %145, %148 : vector<16x16xf32>
    %150 = math.exp %149 : vector<16x16xf32>
    %cst_44 = arith.constant dense<0.000000e+00> : vector<16xf32>
    %151 = vector.multi_reduction <add>, %150, %cst_44 [1] : vector<16x16xf32> to vector<16xf32>
    %152 = vector.shape_cast %151 : vector<16xf32> to vector<16x1xf32>
    %153 = tpu.reciprocal %152 {approx = true} : vector<16x1xf32> -> vector<16x1xf32>
    %154 = vector.broadcast %153 : vector<16x1xf32> to vector<16x16xf32>
    %155 = arith.mulf %150, %154 : vector<16x16xf32>
    %cst_45 = arith.constant dense<0.000000e+00> : vector<16x64xf32>
    %156 = tpu.matmul %155, %143, %cst_45 {dimension_numbers = #tpu.dot_dimension_numbers<[1], [0], [0], [1], [0, 0, 1, 1], [], []>} : vector<16x16xf32>, vector<16x64xf32>, vector<16x64xf32> -> vector<16x64xf32>
    %157 = vector.extract_strided_slice %120 {offsets = [0, 128], sizes = [16, 64], strides = [1, 1]} : vector<16x1152xf32> to vector<16x64xf32>
    %cst_46 = arith.constant 1.250000e-01 : f32
    %158 = vector.broadcast %cst_46 : f32 to vector<16x64xf32>
    %159 = arith.mulf %157, %158 : vector<16x64xf32>
    %160 = vector.extract_strided_slice %120 {offsets = [0, 512], sizes = [16, 64], strides = [1, 1]} : vector<16x1152xf32> to vector<16x64xf32>
    %161 = vector.extract_strided_slice %120 {offsets = [0, 896], sizes = [16, 64], strides = [1, 1]} : vector<16x1152xf32> to vector<16x64xf32>
    %cst_47 = arith.constant dense<0.000000e+00> : vector<16x16xf32>
    %162 = tpu.matmul %159, %160, %cst_47 {dimension_numbers = #tpu.dot_dimension_numbers<[1], [1], [0], [0], [0, 0, 1, 0], [], []>} : vector<16x64xf32>, vector<16x64xf32>, vector<16x16xf32> -> vector<16x16xf32>
    %163 = arith.addf %162, %9 : vector<16x16xf32>
    %cst_48 = arith.constant dense<0xFF800000> : vector<16xf32>
    %164 = vector.multi_reduction <maximumf>, %163, %cst_48 [1] : vector<16x16xf32> to vector<16xf32>
    %165 = vector.shape_cast %164 : vector<16xf32> to vector<16x1xf32>
    %166 = vector.broadcast %165 : vector<16x1xf32> to vector<16x16xf32>
    %167 = arith.subf %163, %166 : vector<16x16xf32>
    %168 = math.exp %167 : vector<16x16xf32>
    %cst_49 = arith.constant dense<0.000000e+00> : vector<16xf32>
    %169 = vector.multi_reduction <add>, %168, %cst_49 [1] : vector<16x16xf32> to vector<16xf32>
    %170 = vector.shape_cast %169 : vector<16xf32> to vector<16x1xf32>
    %171 = tpu.reciprocal %170 {approx = true} : vector<16x1xf32> -> vector<16x1xf32>
    %172 = vector.broadcast %171 : vector<16x1xf32> to vector<16x16xf32>
    %173 = arith.mulf %168, %172 : vector<16x16xf32>
    %cst_50 = arith.constant dense<0.000000e+00> : vector<16x64xf32>
    %174 = tpu.matmul %173, %161, %cst_50 {dimension_numbers = #tpu.dot_dimension_numbers<[1], [0], [0], [1], [0, 0, 1, 1], [], []>} : vector<16x16xf32>, vector<16x64xf32>, vector<16x64xf32> -> vector<16x64xf32>
    %175 = vector.extract_strided_slice %120 {offsets = [0, 192], sizes = [16, 64], strides = [1, 1]} : vector<16x1152xf32> to vector<16x64xf32>
    %cst_51 = arith.constant 1.250000e-01 : f32
    %176 = vector.broadcast %cst_51 : f32 to vector<16x64xf32>
    %177 = arith.mulf %175, %176 : vector<16x64xf32>
    %178 = vector.extract_strided_slice %120 {offsets = [0, 576], sizes = [16, 64], strides = [1, 1]} : vector<16x1152xf32> to vector<16x64xf32>
    %179 = vector.extract_strided_slice %120 {offsets = [0, 960], sizes = [16, 64], strides = [1, 1]} : vector<16x1152xf32> to vector<16x64xf32>
    %cst_52 = arith.constant dense<0.000000e+00> : vector<16x16xf32>
    %180 = tpu.matmul %177, %178, %cst_52 {dimension_numbers = #tpu.dot_dimension_numbers<[1], [1], [0], [0], [0, 0, 1, 0], [], []>} : vector<16x64xf32>, vector<16x64xf32>, vector<16x16xf32> -> vector<16x16xf32>
    %181 = arith.addf %180, %9 : vector<16x16xf32>
    %cst_53 = arith.constant dense<0xFF800000> : vector<16xf32>
    %182 = vector.multi_reduction <maximumf>, %181, %cst_53 [1] : vector<16x16xf32> to vector<16xf32>
    %183 = vector.shape_cast %182 : vector<16xf32> to vector<16x1xf32>
    %184 = vector.broadcast %183 : vector<16x1xf32> to vector<16x16xf32>
    %185 = arith.subf %181, %184 : vector<16x16xf32>
    %186 = math.exp %185 : vector<16x16xf32>
    %cst_54 = arith.constant dense<0.000000e+00> : vector<16xf32>
    %187 = vector.multi_reduction <add>, %186, %cst_54 [1] : vector<16x16xf32> to vector<16xf32>
    %188 = vector.shape_cast %187 : vector<16xf32> to vector<16x1xf32>
    %189 = tpu.reciprocal %188 {approx = true} : vector<16x1xf32> -> vector<16x1xf32>
    %190 = vector.broadcast %189 : vector<16x1xf32> to vector<16x16xf32>
    %191 = arith.mulf %186, %190 : vector<16x16xf32>
    %cst_55 = arith.constant dense<0.000000e+00> : vector<16x64xf32>
    %192 = tpu.matmul %191, %179, %cst_55 {dimension_numbers = #tpu.dot_dimension_numbers<[1], [0], [0], [1], [0, 0, 1, 1], [], []>} : vector<16x16xf32>, vector<16x64xf32>, vector<16x64xf32> -> vector<16x64xf32>
    %193 = vector.extract_strided_slice %120 {offsets = [0, 256], sizes = [16, 64], strides = [1, 1]} : vector<16x1152xf32> to vector<16x64xf32>
    %cst_56 = arith.constant 1.250000e-01 : f32
    %194 = vector.broadcast %cst_56 : f32 to vector<16x64xf32>
    %195 = arith.mulf %193, %194 : vector<16x64xf32>
    %196 = vector.extract_strided_slice %120 {offsets = [0, 640], sizes = [16, 64], strides = [1, 1]} : vector<16x1152xf32> to vector<16x64xf32>
    %197 = vector.extract_strided_slice %120 {offsets = [0, 1024], sizes = [16, 64], strides = [1, 1]} : vector<16x1152xf32> to vector<16x64xf32>
    %cst_57 = arith.constant dense<0.000000e+00> : vector<16x16xf32>
    %198 = tpu.matmul %195, %196, %cst_57 {dimension_numbers = #tpu.dot_dimension_numbers<[1], [1], [0], [0], [0, 0, 1, 0], [], []>} : vector<16x64xf32>, vector<16x64xf32>, vector<16x16xf32> -> vector<16x16xf32>
    %199 = arith.addf %198, %9 : vector<16x16xf32>
    %cst_58 = arith.constant dense<0xFF800000> : vector<16xf32>
    %200 = vector.multi_reduction <maximumf>, %199, %cst_58 [1] : vector<16x16xf32> to vector<16xf32>
    %201 = vector.shape_cast %200 : vector<16xf32> to vector<16x1xf32>
    %202 = vector.broadcast %201 : vector<16x1xf32> to vector<16x16xf32>
    %203 = arith.subf %199, %202 : vector<16x16xf32>
    %204 = math.exp %203 : vector<16x16xf32>
    %cst_59 = arith.constant dense<0.000000e+00> : vector<16xf32>
    %205 = vector.multi_reduction <add>, %204, %cst_59 [1] : vector<16x16xf32> to vector<16xf32>
    %206 = vector.shape_cast %205 : vector<16xf32> to vector<16x1xf32>
    %207 = tpu.reciprocal %206 {approx = true} : vector<16x1xf32> -> vector<16x1xf32>
    %208 = vector.broadcast %207 : vector<16x1xf32> to vector<16x16xf32>
    %209 = arith.mulf %204, %208 : vector<16x16xf32>
    %cst_60 = arith.constant dense<0.000000e+00> : vector<16x64xf32>
    %210 = tpu.matmul %209, %197, %cst_60 {dimension_numbers = #tpu.dot_dimension_numbers<[1], [0], [0], [1], [0, 0, 1, 1], [], []>} : vector<16x16xf32>, vector<16x64xf32>, vector<16x64xf32> -> vector<16x64xf32>
    %211 = vector.extract_strided_slice %120 {offsets = [0, 320], sizes = [16, 64], strides = [1, 1]} : vector<16x1152xf32> to vector<16x64xf32>
    %cst_61 = arith.constant 1.250000e-01 : f32
    %212 = vector.broadcast %cst_61 : f32 to vector<16x64xf32>
    %213 = arith.mulf %211, %212 : vector<16x64xf32>
    %214 = vector.extract_strided_slice %120 {offsets = [0, 704], sizes = [16, 64], strides = [1, 1]} : vector<16x1152xf32> to vector<16x64xf32>
    %215 = vector.extract_strided_slice %120 {offsets = [0, 1088], sizes = [16, 64], strides = [1, 1]} : vector<16x1152xf32> to vector<16x64xf32>
    %cst_62 = arith.constant dense<0.000000e+00> : vector<16x16xf32>
    %216 = tpu.matmul %213, %214, %cst_62 {dimension_numbers = #tpu.dot_dimension_numbers<[1], [1], [0], [0], [0, 0, 1, 0], [], []>} : vector<16x64xf32>, vector<16x64xf32>, vector<16x16xf32> -> vector<16x16xf32>
    %217 = arith.addf %216, %9 : vector<16x16xf32>
    %cst_63 = arith.constant dense<0xFF800000> : vector<16xf32>
    %218 = vector.multi_reduction <maximumf>, %217, %cst_63 [1] : vector<16x16xf32> to vector<16xf32>
    %219 = vector.shape_cast %218 : vector<16xf32> to vector<16x1xf32>
    %220 = vector.broadcast %219 : vector<16x1xf32> to vector<16x16xf32>
    %221 = arith.subf %217, %220 : vector<16x16xf32>
    %222 = math.exp %221 : vector<16x16xf32>
    %cst_64 = arith.constant dense<0.000000e+00> : vector<16xf32>
    %223 = vector.multi_reduction <add>, %222, %cst_64 [1] : vector<16x16xf32> to vector<16xf32>
    %224 = vector.shape_cast %223 : vector<16xf32> to vector<16x1xf32>
    %225 = tpu.reciprocal %224 {approx = true} : vector<16x1xf32> -> vector<16x1xf32>
    %226 = vector.broadcast %225 : vector<16x1xf32> to vector<16x16xf32>
    %227 = arith.mulf %222, %226 : vector<16x16xf32>
    %cst_65 = arith.constant dense<0.000000e+00> : vector<16x64xf32>
    %228 = tpu.matmul %227, %215, %cst_65 {dimension_numbers = #tpu.dot_dimension_numbers<[1], [0], [0], [1], [0, 0, 1, 1], [], []>} : vector<16x16xf32>, vector<16x64xf32>, vector<16x64xf32> -> vector<16x64xf32>
    %229 = tpu.concatenate %138, %156, %174, %192, %210, %228 in 1 : vector<16x64xf32>, vector<16x64xf32>, vector<16x64xf32>, vector<16x64xf32>, vector<16x64xf32>, vector<16x64xf32> -> vector<16x384xf32>
    %230 = tpu.concatenate %119, %229 in 0 : vector<16x384xf32>, vector<16x384xf32> -> vector<32x384xf32>
    %c0_66 = arith.constant 0 : index
    %c0_67 = arith.constant 0 : index
    %231 = vector.load %arg3[%c0_66, %c0_67] : memref<384x384xf32, #tpu.memory_space<vmem>>, vector<384x384xf32>
    %cst_68 = arith.constant dense<0.000000e+00> : vector<32x384xf32>
    %232 = tpu.matmul %230, %231, %cst_68 {dimension_numbers = #tpu.dot_dimension_numbers<[1], [0], [0], [1], [0, 0, 1, 1], [], []>} : vector<32x384xf32>, vector<384x384xf32>, vector<32x384xf32> -> vector<32x384xf32>
    %233 = vector.shape_cast %232 : vector<32x384xf32> to vector<2x16x384xf32>
    %c0_69 = arith.constant 0 : index
    %c0_70 = arith.constant 0 : index
    %c0_71 = arith.constant 0 : index
    %234 = vector.load %arg4[%c0_69, %c0_70, %c0_71] : memref<2x16x384xf32, #tpu.memory_space<vmem>>, vector<2x16x384xf32>
    tpu.vector_store %arg4[%c0_69, %c0_70, %c0_71], %233 {strides = array<i32>} : memref<2x16x384xf32, #tpu.memory_space<vmem>>, vector<2x16x384xf32>,
    return
  }
  func.func @transform_0(%arg0: i32) -> (i32, i32, i32) {
    %c0_i32 = arith.constant 0 : i32
    %c0_i32_0 = arith.constant 0 : i32
    %c0_i32_1 = arith.constant 0 : i32
    return %arg0, %c0_i32, %c0_i32_0 : i32, i32, i32
  }
  func.func @transform_1(%arg0: i32) -> (i32, i32) {
    %c0_i32 = arith.constant 0 : i32
    %c0_i32_0 = arith.constant 0 : i32
    %c0_i32_1 = arith.constant 0 : i32
    return %c0_i32, %c0_i32_0 : i32, i32
  }
  func.func @transform_2(%arg0: i32) -> (i32, i32) {
    %c0_i32 = arith.constant 0 : i32
    %c0_i32_0 = arith.constant 0 : i32
    %c0_i32_1 = arith.constant 0 : i32
    return %c0_i32, %c0_i32_0 : i32, i32
  }
  func.func @transform_3(%arg0: i32) -> (i32, i32, i32) {
    %c0_i32 = arith.constant 0 : i32
    %c0_i32_0 = arith.constant 0 : i32
    %c0_i32_1 = arith.constant 0 : i32
    return %arg0, %c0_i32, %c0_i32_0 : i32, i32, i32
  }
}

</mosaic_0001>

<bundles_post_ra>
// kernel: tpu_custom_call.1
= control target key start
LH: loop header
LB: loop body
LE: loop exit
PB: predicated region body
PF: predicated region fallthrough
CT: control target
= control target key end

     0   :  { %8 = vsyncpa [#allocation3], 0  ;;  %s6342_s0 = inlined_call_operand.hbm [shape: f32[4,16,384], index: 0, kind: input, shape index: {}]   ;;  %s6343_s1 = inlined_call_operand.hbm [shape: f32[384,1152], index: 1, kind: input, shape index: {}]   ;;  %s6344_s2 = inlined_call_operand.hbm [shape: f32[384,384], index: 2, kind: input, shape index: {}]   ;;  %s6345_s3 = inlined_call_operand.hbm [shape: f32[4,16,384], index: 3, kind: output, shape index: {}]  }
   0x1   :  { %10 = vsyncpa [#allocation3 + $0x1], 0 }
   0x2   :  { %11 = vsyncpa [#allocation6], 0 }
   0x3   :  { %12 = vsyncpa [#allocation4], 0 }
   0x4   :  { %14 = vsyncpa [#allocation4 + $0x1], 0  ;;  %s5540_s12 = smov 0   ;;  %s5542_s13 = smov 0  }
   0x5   :  { %s5544_s14 = smov 0   ;;  %s5546_s15 = smov 0  }
   0x6 LB: > { %s5561_s16 = sadd.s32 4294967295, %s5505_s15   ;;  %s4593_s17 = sadd.s32 4294967294, %s5505_s15   ;;  %s5505_s15 = sphi %s5546_s15, %s6367_s15   ;;  %s5501_s14 = sphi %s5544_s14, %s6366_s14   ;;  %s5497_s13 = sphi %s5542_s13, %s6365_s13   ;;  %s5493_s12 = sphi %s5540_s12, %s6364_s12  }
   0x7   : > { %p40_p0 = scmp.ne.s32.totalorder %s5497_s13, %s5493_s12  ;;  %p6346_p1 = scmp.eq.s32.totalorder %s5561_s16, 0 }
   0x8   : > { %p112_p3 = scmp.eq.s32.totalorder %s4593_s17, 1  ;;  %p4594_p5 = scmp.ge.s32.totalorder %s5505_s15, 1 }
   0x9   : > { %p5570_p4 = por %p6346_p1, %p40_p0  ;;  %p119_p7 = scmp.lt.s32.totalorder %s5505_s15, 3 }
   0xa   : > { %p5575_p6 = por %p112_p3, %p40_p0  ;;  %s5507_s21 = smov [#allocation5]  }
   0xb   : > { %s6350_s18 = scalar_select %p5570_p4, 1, 0 }
   0xc   : > { %s6351_s19 = scalar_select %p5575_p6, 1, 0 }
   0xd   : > { %p5580_p8 = pnand %p4594_p5, %p119_p7  ;;  %s131_s22 = sshll.u32 %s5507_s21, 4  ;;  %s132_s22 = int_to_ptr.vmem [resolvable:$true] %s131_s22 }
   0xe   : > { %s5508_s24 = smov [#allocation7]   ;;  %s5368_s26 = scalar_lea.vmem %s132_s22, 55296 }
   0xf   : > { %s6352_s20 = scalar_select %p5580_p8, 1, 0 }
  0x10   : > { %p5165_p9 = pneg %p5580_p8  ;;  %s144_s25 = sshll.u32 %s5508_s24, 4  ;;  %s145_s25 = int_to_ptr.vmem [resolvable:$true] %s144_s25 }
  0x11   : > { %p5369_p13 = scmp.ne.s32.totalorder %s132_s22, %s5368_s26  ;;  %p5376_p5 = scmp.lt.s32.totalorder %s132_s22, %s132_s22 }
  0x12   : > { %p5589_p11 = pnand %p5165_p9, %p6346_p1  ;;  %p5377_p7 = scmp.lt.s32.totalorder %s5368_s26, %s5368_s26 }
  0x14   : > { %p5359_p12 = pneg %p5589_p11  ;;  %p5378_p10 = por %p5377_p7, %p5376_p5 }
  0x16   : > { %p5371_p0 = pnand %p5369_p13, %p5359_p12 }
  0x18   : > { %p5372_p3 = pneg %p5371_p0 }
  0x1a   : > { %p5379_p9 = pnand %p5378_p10, %p5372_p3 }
  0x1c   : > { %5382 = shalt.err (!%p5379_p9)
}
  0x1d   : > { %s5509_s27 = smov 1152   ;;  %s5510_s28 = smov 72  }
  0x1e   : > { %5168 = dma.hbm_to_vmem [thread:$0]  (!%p5589_p11), %s6343_s1, 55296, %s132_s22, [#allocation6], %s5509_s27, %s5509_s27, %s5510_s28  }
  0x1f   : > { %s5394_s4 = scalar_lea.vmem %s145_s25, 18432  ;;  %p5402_p2 = scmp.lt.s32.totalorder %s145_s25, %s145_s25 }
  0x20   : > { %p5395_p1 = scmp.ne.s32.totalorder %s145_s25, %s5394_s4  ;;  %p5403_p6 = scmp.lt.s32.totalorder %s5394_s4, %s5394_s4 }
  0x22   : > { %p5397_p13 = pnand %p5395_p1, %p5359_p12  ;;  %p5404_p5 = por %p5403_p6, %p5402_p2 }
  0x24   : > { %p5398_p0 = pneg %p5397_p13 }
  0x26   : > { %p5405_p10 = pnand %p5404_p5, %p5398_p0 }
  0x28   : > { %5408 = shalt.err (!%p5405_p10)
}
  0x29   : > { %s5511_s5 = smov 384   ;;  %s5512_s6 = smov 24  }
  0x2a   : > { %5171 = dma.hbm_to_vmem [thread:$0]  (!%p5589_p11), %s6344_s2, 18432, %s145_s25, [#allocation6], %s5511_s5, %s5511_s5, %s5512_s6  }
  0x2b   : > { %s5615_s9 = sadd.s32 1, %s5505_s15   ;;  %s27_s11 = sadd.s32 1, %s5501_s14 }
  0x2c   : > { %s24_s10 = ssub.s32 %s5505_s15, %s5615_s9  ;;  %p34_p2 = scmp.ne.s32.totalorder %s5501_s14, %s5497_s13 }
  0x2d   : > { %p25_p1 = scmp.eq.s32.totalorder %s24_s10, 0  ;;  %p35_p6 = scmp.eq.s32.totalorder %s5505_s15, 0 }
  0x2e   : > { %p6354_p3 = scmp.eq.s32.totalorder %s5561_s16, 1  ;;  %p5182_p9 = scmp.lt.s32.totalorder %s5505_s15, 2 }
  0x2f   : > { %s5624_s17 = scalar_select %p25_p1, %s5501_s14, %s27_s11  }
  0x30   : > { %p36_p12 = por %p35_p6, %p34_p2  ;;  %p5628_p7 = por %p6354_p3, %p34_p2 }
  0x31   : > { %s158_s22 = sand.u32 1, %s5501_s14   ;;  %s5150_s24 = smul.u32 1536, %s5505_s15 }
  0x32   : > { %s6355_s21 = scalar_select %p5628_p7, 1, 0 }
  0x33   : > { %s5149_s23 = smul.u32 96, %s158_s22  ;;  %p5635_p11 = pnand %p5182_p9, %p36_p12 }
  0x34   : > { %s5642_s28 = scalar_lea.hbm %s6342_s0, %s5150_s24  ;;  %s5646_s4 = scalar_lea.sflag [#allocation3], %s158_s22 }
  0x35   : > { %s162_s29 = scalar_lea.vmem [#allocation2], %s5149_s23  ;;  %s5409_s7 = scalar_lea.hbm %s5642_s28, 1536 }
  0x36   : > { %s170_s30 = sshll.u32 %s162_s29, 4  ;;  %p5410_p13 = scmp.ne.s32.totalorder %s5642_s28, %s5409_s7  ;;  %s5644_s30 = int_to_ptr.vmem [resolvable:$true] %s170_s30 }
  0x37   : > { %p5411_p0 = pneg %p5635_p11  ;;  %s5414_s11 = scalar_lea.hbm %s6342_s0, 3072 }
  0x38   : > { %p5415_p1 = scmp.lt.s32.totalorder %s5642_s28, %s6342_s0  ;;  %p5416_p2 = scmp.lt.s32.totalorder %s5414_s11, %s5409_s7 }
  0x39   : > { %p5412_p5 = pnand %p5411_p0, %p5410_p13 }
  0x3a   : > { %p5417_p6 = por %p5416_p2, %p5415_p1 }
  0x3b   : > { %p5413_p10 = pneg %p5412_p5 }
  0x3d   : > { %p5418_p12 = pnand %p5417_p6, %p5413_p10 }
  0x3f   : > { %5421 = shalt.err (!%p5418_p12)
}
  0x40   : > { %s5422_s22 = scalar_lea.vmem %s5644_s30, 1536  ;;  %s5513_s23 = smov [#allocation2]  }
  0x41   : > { %p5423_p3 = scmp.ne.s32.totalorder %s5644_s30, %s5422_s22  ;;  %s5427_s27 = sshll.u32 %s5513_s23, 4  ;;  %s5428_s27 = int_to_ptr.vmem [resolvable:$false] %s5427_s27 }
  0x42   : > { %s5429_s29 = scalar_lea.vmem %s5428_s27, 3072  ;;  %p5430_p5 = scmp.lt.s32.totalorder %s5644_s30, %s5428_s27 }
  0x43   : > { %p5425_p9 = pnand %p5423_p3, %p5411_p0  ;;  %p5431_p7 = scmp.lt.s32.totalorder %s5429_s29, %s5422_s22 }
  0x45   : > { %p5426_p13 = pneg %p5425_p9  ;;  %p5432_p4 = por %p5431_p7, %p5430_p5 }
  0x47   : > { %p5433_p8 = pnand %p5432_p4, %p5426_p13 }
  0x49   : > { %5436 = shalt.err (!%p5433_p8)
}
  0x4a   : > { %5175 = dma.hbm_to_vmem [thread:$0]  (!%p5635_p11), %s5642_s28, 1536, %s5644_s30, %s5646_s4, %s5511_s5, %s5511_s5, %s5512_s6  }
  0x4b   : > { %p6357_p0 = scmp.ne.s32.totalorder %s6352_s20, 0 }
  0x4c   : > { %s5673_s7 = sand.u32 (!%p6357_p0), 1, %s5497_s13   ;;  %p6358_p4 = scmp.ne.s32.totalorder (!%p6357_p0), %s6350_s18, 0 }
  0x4d   : > { %182 = sbr.rel (%p6357_p0) target bundleno = 6164 (0x1814), region = 32  ;;  %s185_s10 = scalar_lea.sflag (!%p6357_p0), [#allocation3], %s5673_s7 }
  0x4e   : > { %s5151_s8 = smul.u32 (!%p6357_p0), 96, %s5673_s7 }
  0x50   : > { %s5679_s25 = scalar_lea.vmem (!%p6357_p0), [#allocation2], %s5151_s8 }
  0x52   : > { %5480 = dma.done.wait (%p6358_p4), %s185_s10, 1536  }
  0x53   : > { %5482 = vsyncadd (%p6358_p4), %s185_s10, 4294965760  ;;  %p6359_p8 = scmp.eq.s32.totalorder %s5561_s16, 0 }
  0x55   : > { %5484 = dma.done.wait (%p6359_p8), [#allocation6], 73728   ;;  %p6360_p7 = pmov %p6359_p8 }
  0x56   : > { %v5514_v0 = vmov 0.0   ;;  %v369_v1 = vld [vmem:[#allocation5 + $0x440] sm:$0xff]  ;;  %v368_v3 = vld [vmem:[#allocation5 + $0x438] sm:$0xff]  ;;  %v359_v7 = vld [vmem:[#allocation5 + $0x3f0] sm:$0xff]  ;;  %vm1558_vm0 = vcmask 523264   ;;  %s5515_s18 = smov 64  }
  0x57   : > { %5486 = vsyncadd (%p6360_p7), [#allocation6], 4294893568  ;;  %818 = vmatprep.mubr.f32.mxu1 %v5514_v0  ;;  %v657_v2 = vld [vmem:[#allocation5 + $0xd40] sm:$0xff]  ;;  %665 = vmatprep.subr.mxu0 %v369_v1  ;;  %v656_v4 = vld [vmem:[#allocation5 + $0xd38] sm:$0xff]  ;;  %vm1646_vm3 = vcmask 130048   ;;  %s6257_s20 = scalar_lea.vmem [#allocation8], %s5151_s8 }
  0x58   : > { %754 = vmatprep.subr.mxu1 %v657_v2  ;;  %v360_v5 = vld [vmem:[#allocation5 + $0x3f8] sm:$0xff]  ;;  %666 = vmatpush1.msra.mxu0 %v368_v3  ;;  %v647_v8 = vld [vmem:[#allocation5 + $0xcf0] sm:$0xff]  ;;  %v350_v11 = vld [vmem:[#allocation5 + $0x3a8] sm:$0xff]  ;;  %s5152_s5 = smul.u32 1536, %s5561_s16  ;;  %s4501_s6 = sshll.u32 %s6257_s20, 4  ;;  %s6297_s6 = int_to_ptr.vmem [resolvable:$true] %s4501_s6 }
  0x59   : > { %v648_v6 = vld [vmem:[#allocation5 + $0xcf8] sm:$0xff]  ;;  %755 = vmatpush1.msra.mxu1 %v656_v4  ;;  %v351_v9 = vld [vmem:[#allocation5 + $0x3b0] sm:$0xff]  ;;  %667 = vmatprep.subr.mxu0 %v360_v5  ;;  %v638_v12 = vld [vmem:[#allocation5 + $0xca8] sm:$0xff]  ;;  %s4487_s16 = scalar_lea.sflag [#allocation4], %s5673_s7  ;;  %s5437_s11 = scalar_lea.vmem %s6297_s6, 1536 }
  0x5a   : > { %756 = vmatprep.subr.mxu1 %v648_v6  ;;  %v639_v10 = vld [vmem:[#allocation5 + $0xcb0] sm:$0xff]  ;;  %668 = vmatpush1.msra.mxu0 %v359_v7  ;;  %v342_v13 = vld [vmem:[#allocation5 + $0x368] sm:$0xff]  ;;  %v341_v15 = vld [vmem:[#allocation5 + $0x360] sm:$0xff]  ;;  %s6295_s4 = scalar_lea.hbm %s6345_s3, %s5152_s5  ;;  %p5438_p11 = scmp.ne.s32.totalorder %s6297_s6, %s5437_s11 }
  0x5b   : > { %757 = vmatpush1.msra.mxu1 %v647_v8  ;;  %v630_v14 = vld [vmem:[#allocation5 + $0xc68] sm:$0xff]  ;;  %669 = vmatprep.subr.mxu0 %v351_v9  ;;  %v629_v16 = vld [vmem:[#allocation5 + $0xc60] sm:$0xff]  ;;  %v332_v19 = vld [vmem:[#allocation5 + $0x318] sm:$0xff]  ;;  %p6361_p10 = scmp.ne.s32.totalorder %s6355_s21, 0  ;;  %s5517_s24 = smov [#allocation8]  }
  0x5c   : > { %758 = vmatprep.subr.mxu1 %v639_v10  ;;  %670 = vmatpush1.msra.mxu0 %v350_v11  ;;  %v333_v17 = vld [vmem:[#allocation5 + $0x320] sm:$0xff]  ;;  %v620_v20 = vld [vmem:[#allocation5 + $0xc18] sm:$0xff]  ;;  %v323_v23 = vld [vmem:[#allocation5 + $0x2d0] sm:$0xff]  ;;  %s5441_s26 = sshll.u32 %s5517_s24, 4  ;;  %s5442_s26 = int_to_ptr.vmem [resolvable:$false] %s5441_s26 }
  0x5d   : > { %759 = vmatpush1.msra.mxu1 %v638_v12  ;;  %v621_v18 = vld [vmem:[#allocation5 + $0xc20] sm:$0xff]  ;;  %671 = vmatprep.subr.mxu0 %v342_v13  ;;  %v324_v21 = vld [vmem:[#allocation5 + $0x2d8] sm:$0xff]  ;;  %v611_v24 = vld [vmem:[#allocation5 + $0xbd0] sm:$0xff]  ;;  %p5439_p1 = pnand %p5438_p11, %p6361_p10  ;;  %s5443_s22 = scalar_lea.vmem %s5442_s26, 3072 }
  0x5e   : > { %760 = vmatprep.subr.mxu1 %v630_v14  ;;  %672 = vmatpush1.msra.mxu0 %v341_v15  ;;  %v612_v22 = vld [vmem:[#allocation5 + $0xbd8] sm:$0xff]  ;;  %v315_v25 = vld [vmem:[#allocation5 + $0x290] sm:$0xff]  ;;  %v314_v27 = vld [vmem:[#allocation5 + $0x288] sm:$0xff]  ;;  %p5444_p6 = scmp.lt.s32.totalorder %s6297_s6, %s5442_s26  ;;  %p5445_p12 = scmp.lt.s32.totalorder %s5443_s22, %s5437_s11 }
  0x5f   : > { %761 = vmatpush1.msra.mxu1 %v629_v16  ;;  %673 = vmatprep.subr.mxu0 %v333_v17  ;;  %v603_v26 = vld [vmem:[#allocation5 + $0xb90] sm:$0xff]  ;;  %v602_v28 = vld [vmem:[#allocation5 + $0xb88] sm:$0xff]  ;;  %v305_v31 = vld [vmem:[#allocation5 + $0x240] sm:$0xff]  ;;  %p5440_p2 = pneg %p5439_p1 }
  0x60   : > { %762 = vmatprep.subr.mxu1 %v621_v18  ;;  %674 = vmatpush1.msra.mxu0 %v332_v19  ;;  %v306_v29 = vld [vmem:[#allocation5 + $0x248] sm:$0xff]  ;;  %v593_v32 = vld [vmem:[#allocation5 + $0xb40] sm:$0xff]  ;;  %v296_v35 = vld [vmem:[#allocation5 + $0x1f8] sm:$0xff]  ;;  %p5446_p3 = por %p5445_p12, %p5444_p6 }
  0x61   : > { %763 = vmatpush1.msra.mxu1 %v620_v20  ;;  %675 = vmatprep.subr.mxu0 %v324_v21  ;;  %v594_v30 = vld [vmem:[#allocation5 + $0xb48] sm:$0xff]  ;;  %v297_v33 = vld [vmem:[#allocation5 + $0x200] sm:$0xff]  ;;  %v584_v36 = vld [vmem:[#allocation5 + $0xaf8] sm:$0xff] }
  0x62   : > { %764 = vmatprep.subr.mxu1 %v612_v22  ;;  %676 = vmatpush1.msra.mxu0 %v323_v23  ;;  %v585_v34 = vld [vmem:[#allocation5 + $0xb00] sm:$0xff]  ;;  %v288_v37 = vld [vmem:[#allocation5 + $0x1b8] sm:$0xff]  ;;  %v287_v39 = vld [vmem:[#allocation5 + $0x1b0] sm:$0xff]  ;;  %p5447_p9 = pnand %p5446_p3, %p5440_p2 }
  0x63   : > { %765 = vmatpush1.msra.mxu1 %v611_v24  ;;  %677 = vmatprep.subr.mxu0 %v315_v25  ;;  %v576_v38 = vld [vmem:[#allocation5 + $0xab8] sm:$0xff]  ;;  %v575_v40 = vld [vmem:[#allocation5 + $0xab0] sm:$0xff]  ;;  %v278_v43 = vld [vmem:[#allocation5 + $0x168] sm:$0xff] }
  0x64   : > { %766 = vmatprep.subr.mxu1 %v603_v26  ;;  %678 = vmatpush1.msra.mxu0 %v314_v27  ;;  %v279_v41 = vld [vmem:[#allocation5 + $0x170] sm:$0xff]  ;;  %v566_v44 = vld [vmem:[#allocation5 + $0xa68] sm:$0xff]  ;;  %v269_v47 = vld [vmem:[#allocation5 + $0x120] sm:$0xff] }
  0x65   : > { %767 = vmatpush1.msra.mxu1 %v602_v28  ;;  %679 = vmatprep.subr.mxu0 %v306_v29  ;;  %v567_v42 = vld [vmem:[#allocation5 + $0xa70] sm:$0xff]  ;;  %v270_v45 = vld [vmem:[#allocation5 + $0x128] sm:$0xff]  ;;  %v557_v48 = vld [vmem:[#allocation5 + $0xa20] sm:$0xff] }
  0x66   : > { %768 = vmatprep.subr.mxu1 %v594_v30  ;;  %680 = vmatpush1.msra.mxu0 %v305_v31  ;;  %v558_v46 = vld [vmem:[#allocation5 + $0xa28] sm:$0xff]  ;;  %v261_v49 = vld [vmem:[#allocation5 + $0xe0] sm:$0xff]  ;;  %v260_v51 = vld [vmem:[#allocation5 + $0xd8] sm:$0xff] }
  0x67   : > { %769 = vmatpush1.msra.mxu1 %v593_v32  ;;  %681 = vmatprep.subr.mxu0 %v297_v33  ;;  %v549_v50 = vld [vmem:[#allocation5 + $0x9e0] sm:$0xff]  ;;  %v548_v52 = vld [vmem:[#allocation5 + $0x9d8] sm:$0xff]  ;;  %v251_v55 = vld [vmem:[#allocation5 + $0x90] sm:$0xff] }
  0x68   : > { %770 = vmatprep.subr.mxu1 %v585_v34  ;;  %682 = vmatpush1.msra.mxu0 %v296_v35  ;;  %v252_v53 = vld [vmem:[#allocation5 + $0x98] sm:$0xff]  ;;  %v539_v56 = vld [vmem:[#allocation5 + $0x990] sm:$0xff]  ;;  %v242_v59 = vld [vmem:[#allocation5 + $0x48] sm:$0xff] }
  0x69   : > { %771 = vmatpush1.msra.mxu1 %v584_v36  ;;  %683 = vmatprep.subr.mxu0 %v288_v37  ;;  %v540_v54 = vld [vmem:[#allocation5 + $0x998] sm:$0xff]  ;;  %v243_v57 = vld [vmem:[#allocation5 + $0x50] sm:$0xff]  ;;  %v530_v60 = vld [vmem:[#allocation5 + $0x948] sm:$0xff] }
  0x6a   : > { %772 = vmatprep.subr.mxu1 %v576_v38  ;;  %684 = vmatpush1.msra.mxu0 %v287_v39  ;;  %v531_v58 = vld [vmem:[#allocation5 + $0x950] sm:$0xff]  ;;  %v234_v61 = vld [vmem:[#allocation5 + $0x8] sm:$0xff]  ;;  %v233_v63 = vld [vmem:[#allocation5] sm:$0xff] }
  0x6b   : > { %773 = vmatpush1.msra.mxu1 %v575_v40  ;;  %685 = vmatprep.subr.mxu0 %v279_v41  ;;  %v522_v62 = vld [vmem:[#allocation5 + $0x908] sm:$0xff]  ;;  %v521_v1 = vld [vmem:[#allocation5 + $0x900] sm:$0xff]  ;;  %v5691_v3 = vld [vmem:[%s5679_s25 + $0x10] sm:$0xff] }
  0x6c   : > { %774 = vmatprep.subr.mxu1 %v567_v42  ;;  %686 = vmatpush1.msra.mxu0 %v278_v43  ;;  %v513_v2 = vld [vmem:[#allocation5 + $0x8c0] sm:$0xff]  ;;  %v371_v4 = vld [vmem:[#allocation5 + $0x450] sm:$0xff]  ;;  %v512_v5 = vld [vmem:[#allocation5 + $0x8b8] sm:$0xff] }
  0x6d   : > { %775 = vmatpush1.msra.mxu1 %v566_v44  ;;  %687 = vmatprep.subr.mxu0 %v270_v45  ;;  %v370_v6 = vld [vmem:[#allocation5 + $0x448] sm:$0xff]  ;;  %v504_v7 = vld [vmem:[#allocation5 + $0x878] sm:$0xff]  ;;  %v503_v9 = vld [vmem:[#allocation5 + $0x870] sm:$0xff] }
  0x6e   : > { %776 = vmatprep.subr.mxu1 %v558_v46  ;;  %688 = vmatpush1.msra.mxu0 %v269_v47  ;;  %v362_v8 = vld [vmem:[#allocation5 + $0x408] sm:$0xff]  ;;  %v361_v10 = vld [vmem:[#allocation5 + $0x400] sm:$0xff]  ;;  %v495_v11 = vld [vmem:[#allocation5 + $0x830] sm:$0xff] }
  0x6f   : > { %777 = vmatpush1.msra.mxu1 %v557_v48  ;;  %689 = vmatprep.subr.mxu0 %v261_v49  ;;  %v353_v12 = vld [vmem:[#allocation5 + $0x3c0] sm:$0xff]  ;;  %v494_v13 = vld [vmem:[#allocation5 + $0x828] sm:$0xff]  ;;  %v352_v14 = vld [vmem:[#allocation5 + $0x3b8] sm:$0xff] }
  0x70   : > { %778 = vmatprep.subr.mxu1 %v549_v50  ;;  %690 = vmatpush1.msra.mxu0 %v260_v51  ;;  %v486_v15 = vld [vmem:[#allocation5 + $0x7e8] sm:$0xff]  ;;  %v344_v16 = vld [vmem:[#allocation5 + $0x378] sm:$0xff]  ;;  %v485_v17 = vld [vmem:[#allocation5 + $0x7e0] sm:$0xff] }
  0x71   : > { %779 = vmatpush1.msra.mxu1 %v548_v52  ;;  %691 = vmatprep.subr.mxu0 %v252_v53  ;;  %v343_v18 = vld [vmem:[#allocation5 + $0x370] sm:$0xff]  ;;  %v477_v19 = vld [vmem:[#allocation5 + $0x7a0] sm:$0xff]  ;;  %v476_v21 = vld [vmem:[#allocation5 + $0x798] sm:$0xff] }
  0x72   : > { %780 = vmatprep.subr.mxu1 %v540_v54  ;;  %692 = vmatpush1.msra.mxu0 %v251_v55  ;;  %v335_v20 = vld [vmem:[#allocation5 + $0x330] sm:$0xff]  ;;  %v334_v22 = vld [vmem:[#allocation5 + $0x328] sm:$0xff]  ;;  %v468_v23 = vld [vmem:[#allocation5 + $0x758] sm:$0xff] }
  0x73   : > { %781 = vmatpush1.msra.mxu1 %v539_v56  ;;  %693 = vmatprep.subr.mxu0 %v243_v57  ;;  %v326_v24 = vld [vmem:[#allocation5 + $0x2e8] sm:$0xff]  ;;  %v467_v25 = vld [vmem:[#allocation5 + $0x750] sm:$0xff]  ;;  %v325_v26 = vld [vmem:[#allocation5 + $0x2e0] sm:$0xff] }
  0x74   : > { %782 = vmatprep.subr.mxu1 %v531_v58  ;;  %694 = vmatpush1.msra.mxu0 %v242_v59  ;;  %v459_v27 = vld [vmem:[#allocation5 + $0x710] sm:$0xff]  ;;  %v317_v28 = vld [vmem:[#allocation5 + $0x2a0] sm:$0xff]  ;;  %v458_v29 = vld [vmem:[#allocation5 + $0x708] sm:$0xff] }
  0x75   : > { %783 = vmatpush1.msra.mxu1 %v530_v60  ;;  %695 = vmatprep.subr.mxu0 %v234_v61  ;;  %v316_v30 = vld [vmem:[#allocation5 + $0x298] sm:$0xff]  ;;  %v450_v31 = vld [vmem:[#allocation5 + $0x6c8] sm:$0xff]  ;;  %v449_v33 = vld [vmem:[#allocation5 + $0x6c0] sm:$0xff] }
  0x76   : > { %784 = vmatprep.subr.mxu1 %v522_v62  ;;  %696 = vmatpush1.msra.mxu0 %v233_v63  ;;  %v308_v32 = vld [vmem:[#allocation5 + $0x258] sm:$0xff]  ;;  %v307_v34 = vld [vmem:[#allocation5 + $0x250] sm:$0xff]  ;;  %v441_v35 = vld [vmem:[#allocation5 + $0x680] sm:$0xff] }
  0x77   : > { %785 = vmatpush1.msra.mxu1 %v521_v1  ;;  %697 = vmatprep.subr.mxu0 %v513_v2  ;;  %v299_v36 = vld [vmem:[#allocation5 + $0x210] sm:$0xff]  ;;  %v440_v37 = vld [vmem:[#allocation5 + $0x678] sm:$0xff]  ;;  %v298_v38 = vld [vmem:[#allocation5 + $0x208] sm:$0xff] }
  0x78   : > { %819 = vmatmul.mubr.f32.vlgmr.msra.gmra.mxu1 %v5691_v3  ;;  %843 = vmatprep.subr.mxu1 %v371_v4  ;;  %v432_v39 = vld [vmem:[#allocation5 + $0x638] sm:$0xff]  ;;  %v290_v40 = vld [vmem:[#allocation5 + $0x1c8] sm:$0xff]  ;;  %v431_v41 = vld [vmem:[#allocation5 + $0x630] sm:$0xff] }
  0x79   : > { %698 = vmatpush2.msra.mxu0 %v512_v5  ;;  %844 = vmatpush1.msra.mxu1 %v370_v6  ;;  %v289_v42 = vld [vmem:[#allocation5 + $0x1c0] sm:$0xff]  ;;  %v423_v43 = vld [vmem:[#allocation5 + $0x5f0] sm:$0xff]  ;;  %v422_v45 = vld [vmem:[#allocation5 + $0x5e8] sm:$0xff] }
  0x7a   : > { %699 = vmatprep.subr.mxu0 %v504_v7  ;;  %845 = vmatprep.subr.mxu1 %v362_v8  ;;  %v281_v44 = vld [vmem:[#allocation5 + $0x180] sm:$0xff]  ;;  %v280_v46 = vld [vmem:[#allocation5 + $0x178] sm:$0xff]  ;;  %v414_v47 = vld [vmem:[#allocation5 + $0x5a8] sm:$0xff] }
  0x7b   : > { %700 = vmatpush2.msra.mxu0 %v503_v9  ;;  %846 = vmatpush1.msra.mxu1 %v361_v10  ;;  %v272_v48 = vld [vmem:[#allocation5 + $0x138] sm:$0xff]  ;;  %v413_v49 = vld [vmem:[#allocation5 + $0x5a0] sm:$0xff]  ;;  %v271_v50 = vld [vmem:[#allocation5 + $0x130] sm:$0xff] }
  0x7c   : > { %701 = vmatprep.subr.mxu0 %v495_v11  ;;  %847 = vmatprep.subr.mxu1 %v353_v12  ;;  %v405_v51 = vld [vmem:[#allocation5 + $0x560] sm:$0xff]  ;;  %v263_v52 = vld [vmem:[#allocation5 + $0xf0] sm:$0xff]  ;;  %v404_v53 = vld [vmem:[#allocation5 + $0x558] sm:$0xff] }
  0x7d   : > { %702 = vmatpush2.msra.mxu0 %v494_v13  ;;  %848 = vmatpush1.msra.mxu1 %v352_v14  ;;  %v262_v54 = vld [vmem:[#allocation5 + $0xe8] sm:$0xff]  ;;  %v396_v55 = vld [vmem:[#allocation5 + $0x518] sm:$0xff]  ;;  %v395_v57 = vld [vmem:[#allocation5 + $0x510] sm:$0xff] }
  0x7e   : > { %703 = vmatprep.subr.mxu0 %v486_v15  ;;  %849 = vmatprep.subr.mxu1 %v344_v16  ;;  %v254_v56 = vld [vmem:[#allocation5 + $0xa8] sm:$0xff]  ;;  %v253_v58 = vld [vmem:[#allocation5 + $0xa0] sm:$0xff]  ;;  %v387_v59 = vld [vmem:[#allocation5 + $0x4d0] sm:$0xff] }
  0x7f   : > { %704 = vmatpush2.msra.mxu0 %v485_v17  ;;  %850 = vmatpush1.msra.mxu1 %v343_v18  ;;  %v245_v60 = vld [vmem:[#allocation5 + $0x60] sm:$0xff]  ;;  %v386_v61 = vld [vmem:[#allocation5 + $0x4c8] sm:$0xff]  ;;  %v244_v62 = vld [vmem:[#allocation5 + $0x58] sm:$0xff] }
  0x80   : > { %705 = vmatprep.subr.mxu0 %v477_v19  ;;  %851 = vmatprep.subr.mxu1 %v335_v20  ;;  %v378_v63 = vld [vmem:[#allocation5 + $0x488] sm:$0xff]  ;;  %v236_v1 = vld [vmem:[#allocation5 + $0x18] sm:$0xff]  ;;  %v377_v2 = vld [vmem:[#allocation5 + $0x480] sm:$0xff] }
  0x81   : > { %706 = vmatpush2.msra.mxu0 %v476_v21  ;;  %852 = vmatpush1.msra.mxu1 %v334_v22  ;;  %v5695_v4 = vld [vmem:[%s5679_s25 + $0x8] sm:$0xff]  ;;  %v235_v5 = vld [vmem:[#allocation5 + $0x10] sm:$0xff]  ;;  %v5698_v6 = vld [vmem:[%s5679_s25] sm:$0xff] }
  0x82   : > { %707 = vmatprep.subr.mxu0 %v468_v23  ;;  %853 = vmatprep.subr.mxu1 %v326_v24  ;;  %v515_v7 = vld [vmem:[#allocation5 + $0x8d0] sm:$0xff]  ;;  %v514_v9 = vld [vmem:[#allocation5 + $0x8c8] sm:$0xff]  ;;  %v505_v13 = vld [vmem:[#allocation5 + $0x880] sm:$0xff] }
  0x83   : > { %708 = vmatpush2.msra.mxu0 %v467_v25  ;;  %854 = vmatpush1.msra.mxu1 %v325_v26  ;;  %v659_v8 = vld [vmem:[#allocation5 + $0xd50] sm:$0xff]  ;;  %v658_v10 = vld [vmem:[#allocation5 + $0xd48] sm:$0xff]  ;;  %v649_v14 = vld [vmem:[#allocation5 + $0xd00] sm:$0xff] }
  0x84   : > { %709 = vmatprep.subr.mxu0 %v459_v27  ;;  %855 = vmatprep.subr.mxu1 %v317_v28  ;;  %v506_v11 = vld [vmem:[#allocation5 + $0x888] sm:$0xff]  ;;  %v497_v15 = vld [vmem:[#allocation5 + $0x840] sm:$0xff]  ;;  %v496_v17 = vld [vmem:[#allocation5 + $0x838] sm:$0xff] }
  0x85   : > { %710 = vmatpush2.msra.mxu0 %v458_v29  ;;  %856 = vmatpush1.msra.mxu1 %v316_v30  ;;  %v650_v12 = vld [vmem:[#allocation5 + $0xd08] sm:$0xff]  ;;  %v641_v16 = vld [vmem:[#allocation5 + $0xcc0] sm:$0xff]  ;;  %v640_v18 = vld [vmem:[#allocation5 + $0xcb8] sm:$0xff] }
  0x86   : > { %711 = vmatprep.subr.mxu0 %v450_v31  ;;  %857 = vmatprep.subr.mxu1 %v308_v32  ;;  %v488_v19 = vld [vmem:[#allocation5 + $0x7f8] sm:$0xff]  ;;  %v487_v21 = vld [vmem:[#allocation5 + $0x7f0] sm:$0xff]  ;;  %v478_v25 = vld [vmem:[#allocation5 + $0x7a8] sm:$0xff] }
  0x87   : > { %712 = vmatpush2.msra.mxu0 %v449_v33  ;;  %858 = vmatpush1.msra.mxu1 %v307_v34  ;;  %v632_v20 = vld [vmem:[#allocation5 + $0xc78] sm:$0xff]  ;;  %v631_v22 = vld [vmem:[#allocation5 + $0xc70] sm:$0xff]  ;;  %v622_v26 = vld [vmem:[#allocation5 + $0xc28] sm:$0xff] }
  0x88   : > { %713 = vmatprep.subr.mxu0 %v441_v35  ;;  %859 = vmatprep.subr.mxu1 %v299_v36  ;;  %v479_v23 = vld [vmem:[#allocation5 + $0x7b0] sm:$0xff]  ;;  %v470_v27 = vld [vmem:[#allocation5 + $0x768] sm:$0xff]  ;;  %v469_v29 = vld [vmem:[#allocation5 + $0x760] sm:$0xff] }
  0x89   : > { %714 = vmatpush2.msra.mxu0 %v440_v37  ;;  %860 = vmatpush1.msra.mxu1 %v298_v38  ;;  %v623_v24 = vld [vmem:[#allocation5 + $0xc30] sm:$0xff]  ;;  %v614_v28 = vld [vmem:[#allocation5 + $0xbe8] sm:$0xff]  ;;  %v613_v30 = vld [vmem:[#allocation5 + $0xbe0] sm:$0xff] }
  0x8a   : > { %715 = vmatprep.subr.mxu0 %v432_v39  ;;  %861 = vmatprep.subr.mxu1 %v290_v40  ;;  %v461_v31 = vld [vmem:[#allocation5 + $0x720] sm:$0xff]  ;;  %v460_v33 = vld [vmem:[#allocation5 + $0x718] sm:$0xff]  ;;  %v451_v37 = vld [vmem:[#allocation5 + $0x6d0] sm:$0xff] }
  0x8b   : > { %716 = vmatpush2.msra.mxu0 %v431_v41  ;;  %862 = vmatpush1.msra.mxu1 %v289_v42  ;;  %v605_v32 = vld [vmem:[#allocation5 + $0xba0] sm:$0xff]  ;;  %v604_v34 = vld [vmem:[#allocation5 + $0xb98] sm:$0xff]  ;;  %v595_v38 = vld [vmem:[#allocation5 + $0xb50] sm:$0xff] }
  0x8c   : > { %717 = vmatprep.subr.mxu0 %v423_v43  ;;  %863 = vmatprep.subr.mxu1 %v281_v44  ;;  %v452_v35 = vld [vmem:[#allocation5 + $0x6d8] sm:$0xff]  ;;  %v443_v39 = vld [vmem:[#allocation5 + $0x690] sm:$0xff]  ;;  %v5703_v41 = vld [vmem:[%s5679_s25 + $0x20] sm:$0xff] }
  0x8d   : > { %718 = vmatpush2.msra.mxu0 %v422_v45  ;;  %864 = vmatpush1.msra.mxu1 %v280_v46  ;;  %v596_v36 = vld [vmem:[#allocation5 + $0xb58] sm:$0xff]  ;;  %v587_v40 = vld [vmem:[#allocation5 + $0xb10] sm:$0xff]  ;;  %v442_v42 = vld [vmem:[#allocation5 + $0x688] sm:$0xff] }
  0x8e   : > { %719 = vmatprep.subr.mxu0 %v414_v47  ;;  %865 = vmatprep.subr.mxu1 %v272_v48  ;;  %v586_v43 = vld [vmem:[#allocation5 + $0xb08] sm:$0xff]  ;;  %v5710_v45 = vld [vmem:[%s5679_s25 + $0x18] sm:$0xff]  ;;  %v433_v48 = vld [vmem:[#allocation5 + $0x640] sm:$0xff] }
  0x8f   : > { %720 = vmatpush2.msra.mxu0 %v413_v49  ;;  %866 = vmatpush1.msra.mxu1 %v271_v50  ;;  %v5706_v44 = vld [vmem:[%s5679_s25 + $0x28] sm:$0xff]  ;;  %v577_v49 = vld [vmem:[#allocation5 + $0xac0] sm:$0xff] }
  0x90   : > { %721 = vmatprep.subr.mxu0 %v405_v51  ;;  %867 = vmatprep.subr.mxu1 %v263_v52  ;;  %v434_v46 = vld [vmem:[#allocation5 + $0x648] sm:$0xff]  ;;  %v425_v50 = vld [vmem:[#allocation5 + $0x600] sm:$0xff]  ;;  %v5716_v52 = vld [vmem:[%s5679_s25 + $0x38] sm:$0xff] }
  0x91   : > { %722 = vmatpush2.msra.mxu0 %v404_v53  ;;  %868 = vmatpush1.msra.mxu1 %v262_v54  ;;  %v578_v47 = vld [vmem:[#allocation5 + $0xac8] sm:$0xff]  ;;  %v569_v51 = vld [vmem:[#allocation5 + $0xa80] sm:$0xff]  ;;  %v424_v53 = vld [vmem:[#allocation5 + $0x5f8] sm:$0xff] }
  0x92   : > { %723 = vmatprep.subr.mxu0 %v396_v55  ;;  %869 = vmatprep.subr.mxu1 %v254_v56  ;;  %v568_v54 = vld [vmem:[#allocation5 + $0xa78] sm:$0xff]  ;;  %v5719_v55 = vld [vmem:[%s5679_s25 + $0x40] sm:$0xff]  ;;  %v5723_v56 = vld [vmem:[%s5679_s25 + $0x30] sm:$0xff] }
  0x93   : > { %724 = vmatpush2.msra.mxu0 %v395_v57  ;;  %870 = vmatpush1.msra.mxu1 %v253_v58  ;;  %v416_v57 = vld [vmem:[#allocation5 + $0x5b8] sm:$0xff] }
  0x94   : > { %725 = vmatprep.subr.mxu0 %v387_v59  ;;  %871 = vmatprep.subr.mxu1 %v245_v60  ;;  %v560_v58 = vld [vmem:[#allocation5 + $0xa38] sm:$0xff]  ;;  %v415_v59 = vld [vmem:[#allocation5 + $0x5b0] sm:$0xff] }
  0x95   : > { %726 = vmatpush2.msra.mxu0 %v386_v61  ;;  %872 = vmatpush1.msra.mxu1 %v244_v62  ;;  %v559_v60 = vld [vmem:[#allocation5 + $0xa30] sm:$0xff] }
  0x96   : > { %727 = vmatprep.subr.mxu0 %v378_v63  ;;  %873 = vmatprep.subr.mxu1 %v236_v1  ;;  %v407_v61 = vld [vmem:[#allocation5 + $0x570] sm:$0xff]  ;;  %v406_v1 = vld [vmem:[#allocation5 + $0x568] sm:$0xff] }
  0x97   : > { %728 = vmatpush2.msra.mxu0 %v377_v2  ;;  %729 = vmatprep.mubr.f32.mxu0 %v5695_v4  ;;  %v551_v62 = vld [vmem:[#allocation5 + $0x9f0] sm:$0xff]  ;;  %v550_v2 = vld [vmem:[#allocation5 + $0x9e8] sm:$0xff] }
  0x98   : > { %874 = vmatpush1.msra.mxu1 %v235_v5  ;;  %730 = vmatmul.mubr.f32.vlgmr.msra.gmra.mxu0 %v5698_v6  ;;  %v5729_v63 = vld [vmem:[%s5679_s25 + $0x50] sm:$0xff]  ;;  %v5732_v5 = vld [vmem:[%s5679_s25 + $0x58] sm:$0xff] }
  0x99   : > { %875 = vmatprep.subr.mxu1 %v515_v7  ;;  %932 = vmatprep.subr.mxu0 %v659_v8  ;;  %v5736_v7 = vld [vmem:[%s5679_s25 + $0x48] sm:$0xff] }
  0x9a   : > { %876 = vmatpush2.msra.mxu1 %v514_v9  ;;  %933 = vmatpush1.msra.mxu0 %v658_v10  ;;  %v398_v8 = vld [vmem:[#allocation5 + $0x528] sm:$0xff]  ;;  %v397_v10 = vld [vmem:[#allocation5 + $0x520] sm:$0xff] }
  0x9b   : > { %877 = vmatprep.subr.mxu1 %v506_v11  ;;  %934 = vmatprep.subr.mxu0 %v650_v12  ;;  %v542_v9 = vld [vmem:[#allocation5 + $0x9a8] sm:$0xff]  ;;  %v541_v11 = vld [vmem:[#allocation5 + $0x9a0] sm:$0xff] }
  0x9c   : > { %878 = vmatpush2.msra.mxu1 %v505_v13  ;;  %935 = vmatpush1.msra.mxu0 %v649_v14  ;;  %v389_v12 = vld [vmem:[#allocation5 + $0x4e0] sm:$0xff]  ;;  %v388_v14 = vld [vmem:[#allocation5 + $0x4d8] sm:$0xff] }
  0x9d   : > { %879 = vmatprep.subr.mxu1 %v497_v15  ;;  %936 = vmatprep.subr.mxu0 %v641_v16  ;;  %v533_v13 = vld [vmem:[#allocation5 + $0x960] sm:$0xff]  ;;  %v532_v15 = vld [vmem:[#allocation5 + $0x958] sm:$0xff] }
  0x9e   : > { %880 = vmatpush2.msra.mxu1 %v496_v17  ;;  %937 = vmatpush1.msra.mxu0 %v640_v18  ;;  %v380_v16 = vld [vmem:[#allocation5 + $0x498] sm:$0xff]  ;;  %v379_v18 = vld [vmem:[#allocation5 + $0x490] sm:$0xff] }
  0x9f   : > { %881 = vmatprep.subr.mxu1 %v488_v19  ;;  %938 = vmatprep.subr.mxu0 %v632_v20  ;;  %v524_v17 = vld [vmem:[#allocation5 + $0x918] sm:$0xff]  ;;  %v523_v19 = vld [vmem:[#allocation5 + $0x910] sm:$0xff]  ;;  %v373_v20 = vld [vmem:[#allocation5 + $0x460] sm:$0xff] }
  0xa0   : > { %882 = vmatpush2.msra.mxu1 %v487_v21  ;;  %939 = vmatpush1.msra.mxu0 %v631_v22  ;;  %v372_v21 = vld [vmem:[#allocation5 + $0x458] sm:$0xff] }
  0xa1   : > { %883 = vmatprep.subr.mxu1 %v479_v23  ;;  %940 = vmatprep.subr.mxu0 %v623_v24  ;;  %v364_v22 = vld [vmem:[#allocation5 + $0x418] sm:$0xff]  ;;  %v363_v23 = vld [vmem:[#allocation5 + $0x410] sm:$0xff] }
  0xa2   : > { %884 = vmatpush2.msra.mxu1 %v478_v25  ;;  %941 = vmatpush1.msra.mxu0 %v622_v26  ;;  %v355_v24 = vld [vmem:[#allocation5 + $0x3d0] sm:$0xff]  ;;  %v354_v25 = vld [vmem:[#allocation5 + $0x3c8] sm:$0xff]  ;;  %v661_v26 = vld [vmem:[#allocation5 + $0xd60] sm:$0xff] }
  0xa3   : > { %885 = vmatprep.subr.mxu1 %v470_v27  ;;  %942 = vmatprep.subr.mxu0 %v614_v28  ;;  %v346_v27 = vld [vmem:[#allocation5 + $0x388] sm:$0xff]  ;;  %v660_v28 = vld [vmem:[#allocation5 + $0xd58] sm:$0xff] }
  0xa4   : > { %886 = vmatpush2.msra.mxu1 %v469_v29  ;;  %943 = vmatpush1.msra.mxu0 %v613_v30  ;;  %v345_v29 = vld [vmem:[#allocation5 + $0x380] sm:$0xff]  ;;  %v652_v30 = vld [vmem:[#allocation5 + $0xd18] sm:$0xff] }
  0xa5   : > { %887 = vmatprep.subr.mxu1 %v461_v31  ;;  %944 = vmatprep.subr.mxu0 %v605_v32  ;;  %v337_v31 = vld [vmem:[#allocation5 + $0x340] sm:$0xff]  ;;  %v651_v32 = vld [vmem:[#allocation5 + $0xd10] sm:$0xff] }
  0xa6   : > { %888 = vmatpush2.msra.mxu1 %v460_v33  ;;  %945 = vmatpush1.msra.mxu0 %v604_v34  ;;  %v336_v33 = vld [vmem:[#allocation5 + $0x338] sm:$0xff]  ;;  %v643_v34 = vld [vmem:[#allocation5 + $0xcd0] sm:$0xff] }
  0xa7   : > { %889 = vmatprep.subr.mxu1 %v452_v35  ;;  %946 = vmatprep.subr.mxu0 %v596_v36  ;;  %v328_v35 = vld [vmem:[#allocation5 + $0x2f8] sm:$0xff]  ;;  %v642_v36 = vld [vmem:[#allocation5 + $0xcc8] sm:$0xff] }
  0xa8   : > { %890 = vmatpush2.msra.mxu1 %v451_v37  ;;  %947 = vmatpush1.msra.mxu0 %v595_v38  ;;  %v327_v37 = vld [vmem:[#allocation5 + $0x2f0] sm:$0xff]  ;;  %v634_v38 = vld [vmem:[#allocation5 + $0xc88] sm:$0xff] }
  0xa9   : > { %891 = vmatprep.subr.mxu1 %v443_v39  ;;  %948 = vmatprep.subr.mxu0 %v587_v40  ;;  %v319_v39 = vld [vmem:[#allocation5 + $0x2b0] sm:$0xff]  ;;  %v633_v40 = vld [vmem:[#allocation5 + $0xc80] sm:$0xff] }
  0xaa   : > { %735 = vmatprep.mubr.f32.mxu0 %v5703_v41  ;;  %824 = vmatprep.mubr.f32.mxu1 %v5514_v0 }
  0xab   : > { %892 = vmatpush2.msra.mxu1 %v442_v42  ;;  %949 = vmatpush1.msra.mxu0 %v586_v43  ;;  %v318_v42 = vld [vmem:[#allocation5 + $0x2a8] sm:$0xff]  ;;  %v625_v43 = vld [vmem:[#allocation5 + $0xc40] sm:$0xff] }
  0xac   : > { %825 = vmatmul.mubr.f32.gmra.mxu1 %v5706_v44  ;;  %736 = vmatmul.mubr.f32.gmra.mxu0 %v5710_v45 }
  0xad   : > { %893 = vmatprep.subr.mxu1 %v434_v46  ;;  %950 = vmatprep.subr.mxu0 %v578_v47  ;;  %v310_v46 = vld [vmem:[#allocation5 + $0x268] sm:$0xff]  ;;  %v624_v47 = vld [vmem:[#allocation5 + $0xc38] sm:$0xff] }
  0xae   : > { %894 = vmatpush2.msra.mxu1 %v433_v48  ;;  %951 = vmatpush1.msra.mxu0 %v577_v49  ;;  %v309_v48 = vld [vmem:[#allocation5 + $0x260] sm:$0xff]  ;;  %v616_v49 = vld [vmem:[#allocation5 + $0xbf8] sm:$0xff] }
  0xaf   : > { %895 = vmatprep.subr.mxu1 %v425_v50  ;;  %952 = vmatprep.subr.mxu0 %v569_v51  ;;  %v301_v50 = vld [vmem:[#allocation5 + $0x220] sm:$0xff]  ;;  %v615_v51 = vld [vmem:[#allocation5 + $0xbf0] sm:$0xff] }
  0xb0   : > { %741 = vmatprep.mubr.f32.mxu0 %v5716_v52  ;;  %830 = vmatprep.mubr.f32.mxu1 %v5514_v0 }
  0xb1   : > { %896 = vmatpush2.msra.mxu1 %v424_v53  ;;  %953 = vmatpush1.msra.mxu0 %v568_v54  ;;  %v300_v53 = vld [vmem:[#allocation5 + $0x218] sm:$0xff]  ;;  %v607_v54 = vld [vmem:[#allocation5 + $0xbb0] sm:$0xff] }
  0xb2   : > { %831 = vmatmul.mubr.f32.gmra.mxu1 %v5719_v55  ;;  %742 = vmatmul.mubr.f32.gmra.mxu0 %v5723_v56 }
  0xb3   : > { %897 = vmatprep.subr.mxu1 %v416_v57  ;;  %954 = vmatprep.subr.mxu0 %v560_v58  ;;  %v292_v57 = vld [vmem:[#allocation5 + $0x1d8] sm:$0xff]  ;;  %v606_v58 = vld [vmem:[#allocation5 + $0xba8] sm:$0xff] }
  0xb4   : > { %898 = vmatpush2.msra.mxu1 %v415_v59  ;;  %955 = vmatpush1.msra.mxu0 %v559_v60  ;;  %v291_v59 = vld [vmem:[#allocation5 + $0x1d0] sm:$0xff]  ;;  %v598_v60 = vld [vmem:[#allocation5 + $0xb68] sm:$0xff] }
  0xb5   : > { %899 = vmatprep.subr.mxu1 %v407_v61  ;;  %956 = vmatprep.subr.mxu0 %v551_v62  ;;  %v283_v61 = vld [vmem:[#allocation5 + $0x190] sm:$0xff]  ;;  %v597_v62 = vld [vmem:[#allocation5 + $0xb60] sm:$0xff] }
  0xb6   : > { %747 = vmatprep.mubr.f32.mxu0 %v5729_v63  ;;  %836 = vmatprep.mubr.f32.mxu1 %v5514_v0 }
  0xb7   : > { %900 = vmatpush2.msra.mxu1 %v406_v1  ;;  %957 = vmatpush1.msra.mxu0 %v550_v2  ;;  %v282_v1 = vld [vmem:[#allocation5 + $0x188] sm:$0xff]  ;;  %v589_v2 = vld [vmem:[#allocation5 + $0xb20] sm:$0xff] }
  0xb8   : > { %837 = vmatmul.mubr.f32.gmra.mxu1 %v5732_v5  ;;  %748 = vmatmul.mubr.f32.gmra.mxu0 %v5736_v7 }
  0xb9   : > { %901 = vmatprep.subr.mxu1 %v398_v8  ;;  %958 = vmatprep.subr.mxu0 %v542_v9  ;;  %v274_v8 = vld [vmem:[#allocation5 + $0x148] sm:$0xff]  ;;  %v588_v9 = vld [vmem:[#allocation5 + $0xb18] sm:$0xff] }
  0xba   : > { %902 = vmatpush2.msra.mxu1 %v397_v10  ;;  %959 = vmatpush1.msra.mxu0 %v541_v11  ;;  %v273_v10 = vld [vmem:[#allocation5 + $0x140] sm:$0xff]  ;;  %v580_v11 = vld [vmem:[#allocation5 + $0xad8] sm:$0xff] }
  0xbb   : > { %903 = vmatprep.subr.mxu1 %v389_v12  ;;  %960 = vmatprep.subr.mxu0 %v533_v13  ;;  %v265_v12 = vld [vmem:[#allocation5 + $0x100] sm:$0xff]  ;;  %v579_v13 = vld [vmem:[#allocation5 + $0xad0] sm:$0xff] }
  0xbc   : > { %904 = vmatpush2.msra.mxu1 %v388_v14  ;;  %961 = vmatpush1.msra.mxu0 %v532_v15  ;;  %v264_v14 = vld [vmem:[#allocation5 + $0xf8] sm:$0xff]  ;;  %v571_v15 = vld [vmem:[#allocation5 + $0xa90] sm:$0xff] }
  0xbd   : > { %905 = vmatprep.subr.mxu1 %v380_v16  ;;  %962 = vmatprep.subr.mxu0 %v524_v17  ;;  %v256_v16 = vld [vmem:[#allocation5 + $0xb8] sm:$0xff]  ;;  %v570_v17 = vld [vmem:[#allocation5 + $0xa88] sm:$0xff] }
  0xbe   : > { %906 = vmatpush2.msra.mxu1 %v379_v18  ;;  %907 = vmatprep.mubr.f32.mxu1 %v5695_v4  ;;  %v255_v18 = vld [vmem:[#allocation5 + $0xb0] sm:$0xff] }
  0xbf   : > { %963 = vmatpush1.msra.mxu0 %v523_v19  ;;  %996 = vmatprep.mubr.f32.mxu0 %v5514_v0  ;;  %v562_v19 = vld [vmem:[#allocation5 + $0xa48] sm:$0xff] }
  0xc0   : > { %908 = vmatmul.mubr.f32.vlgmr.msra.gmra.mxu1 %v5698_v6  ;;  %997 = vmatmul.mubr.f32.vlgmr.msra.gmra.mxu0 %v5691_v3 }
  0xc1   : > { %1021 = vmatprep.subr.mxu0 %v373_v20  ;;  %913 = vmatprep.mubr.f32.mxu1 %v5703_v41  ;;  %v247_v20 = vld [vmem:[#allocation5 + $0x70] sm:$0xff] }
  0xc2   : > { %1022 = vmatpush1.msra.mxu0 %v372_v21  ;;  %1002 = vmatprep.mubr.f32.mxu0 %v5514_v0  ;;  %v246_v21 = vld [vmem:[#allocation5 + $0x68] sm:$0xff] }
  0xc3   : > { %1023 = vmatprep.subr.mxu0 %v364_v22  ;;  %1110 = vmatprep.subr.mxu1 %v661_v26  ;;  %v238_v22 = vld [vmem:[#allocation5 + $0x28] sm:$0xff]  ;;  %v516_v26 = vld [vmem:[#allocation5 + $0x8d8] sm:$0xff] }
  0xc4   : > { %1024 = vmatpush1.msra.mxu0 %v363_v23  ;;  %914 = vmatmul.mubr.f32.gmra.mxu1 %v5710_v45  ;;  %v561_v23 = vld [vmem:[#allocation5 + $0xa40] sm:$0xff] }
  0xc5   : > { %1003 = vmatmul.mubr.f32.gmra.mxu0 %v5706_v44  ;;  %1025 = vmatprep.subr.mxu0 %v355_v24  ;;  %v237_v24 = vld [vmem:[#allocation5 + $0x20] sm:$0xff] }
  0xc6   : > { %1026 = vmatpush1.msra.mxu0 %v354_v25  ;;  %1111 = vmatpush1.msra.mxu1 %v660_v28  ;;  %v517_v25 = vld [vmem:[#allocation5 + $0x8e0] sm:$0xff]  ;;  %v508_v28 = vld [vmem:[#allocation5 + $0x898] sm:$0xff] }
  0xc7   : > { %1027 = vmatprep.subr.mxu0 %v346_v27  ;;  %1112 = vmatprep.subr.mxu1 %v652_v30  ;;  %v553_v27 = vld [vmem:[#allocation5 + $0xa00] sm:$0xff]  ;;  %v507_v30 = vld [vmem:[#allocation5 + $0x890] sm:$0xff] }
  0xc8   : > { %1028 = vmatpush1.msra.mxu0 %v345_v29  ;;  %1113 = vmatpush1.msra.mxu1 %v651_v32  ;;  %v552_v29 = vld [vmem:[#allocation5 + $0x9f8] sm:$0xff]  ;;  %v499_v32 = vld [vmem:[#allocation5 + $0x850] sm:$0xff] }
  0xc9   : > { %1029 = vmatprep.subr.mxu0 %v337_v31  ;;  %1114 = vmatprep.subr.mxu1 %v643_v34  ;;  %v544_v31 = vld [vmem:[#allocation5 + $0x9b8] sm:$0xff]  ;;  %v490_v34 = vld [vmem:[#allocation5 + $0x808] sm:$0xff] }
  0xca   : > { %1030 = vmatpush1.msra.mxu0 %v336_v33  ;;  %1115 = vmatpush1.msra.mxu1 %v642_v36  ;;  %v498_v33 = vld [vmem:[#allocation5 + $0x848] sm:$0xff]  ;;  %v489_v36 = vld [vmem:[#allocation5 + $0x800] sm:$0xff] }
  0xcb   : > { %1031 = vmatprep.subr.mxu0 %v328_v35  ;;  %1116 = vmatprep.subr.mxu1 %v634_v38  ;;  %v543_v35 = vld [vmem:[#allocation5 + $0x9b0] sm:$0xff]  ;;  %v480_v38 = vld [vmem:[#allocation5 + $0x7b8] sm:$0xff] }
  0xcc   : > { %1032 = vmatpush1.msra.mxu0 %v327_v37  ;;  %1117 = vmatpush1.msra.mxu1 %v633_v40  ;;  %v481_v37 = vld [vmem:[#allocation5 + $0x7c0] sm:$0xff]  ;;  %v472_v40 = vld [vmem:[#allocation5 + $0x778] sm:$0xff] }
  0xcd   : > { %1033 = vmatprep.subr.mxu0 %v319_v39  ;;  %1118 = vmatprep.subr.mxu1 %v625_v43  ;;  %v535_v39 = vld [vmem:[#allocation5 + $0x970] sm:$0xff] }
  0xce   : > { %1034 = vmatpush1.msra.mxu0 %v318_v42  ;;  %1119 = vmatpush1.msra.mxu1 %v624_v47  ;;  %v534_v42 = vld [vmem:[#allocation5 + $0x968] sm:$0xff]  ;;  %v471_v43 = vld [vmem:[#allocation5 + $0x770] sm:$0xff] }
  0xcf   : > { %1035 = vmatprep.subr.mxu0 %v310_v46  ;;  %1120 = vmatprep.subr.mxu1 %v616_v49  ;;  %v526_v46 = vld [vmem:[#allocation5 + $0x928] sm:$0xff]  ;;  %v463_v47 = vld [vmem:[#allocation5 + $0x730] sm:$0xff]  ;;  %v525_v49 = vld [vmem:[#allocation5 + $0x920] sm:$0xff] }
  0xd0   : > { %1036 = vmatpush1.msra.mxu0 %v309_v48  ;;  %1121 = vmatpush1.msra.mxu1 %v615_v51  ;;  %v462_v48 = vld [vmem:[#allocation5 + $0x728] sm:$0xff]  ;;  %v453_v51 = vld [vmem:[#allocation5 + $0x6e0] sm:$0xff] }
  0xd1   : > { %1037 = vmatprep.subr.mxu0 %v301_v50  ;;  %1122 = vmatprep.subr.mxu1 %v607_v54  ;;  %v454_v50 = vld [vmem:[#allocation5 + $0x6e8] sm:$0xff]  ;;  %v375_v54 = vld [vmem:[#allocation5 + $0x470] sm:$0xff] }
  0xd2   : > { %1038 = vmatpush1.msra.mxu0 %v300_v53  ;;  %1123 = vmatpush1.msra.mxu1 %v606_v58  ;;  %v445_v53 = vld [vmem:[#allocation5 + $0x6a0] sm:$0xff]  ;;  %v374_v58 = vld [vmem:[#allocation5 + $0x468] sm:$0xff] }
  0xd3   : > { %1039 = vmatprep.subr.mxu0 %v292_v57  ;;  %1124 = vmatprep.subr.mxu1 %v598_v60  ;;  %v444_v57 = vld [vmem:[#allocation5 + $0x698] sm:$0xff]  ;;  %v366_v60 = vld [vmem:[#allocation5 + $0x428] sm:$0xff] }
  0xd4   : > { %1040 = vmatpush1.msra.mxu0 %v291_v59  ;;  %1125 = vmatpush1.msra.mxu1 %v597_v62  ;;  %v436_v59 = vld [vmem:[#allocation5 + $0x658] sm:$0xff]  ;;  %v427_v62 = vld [vmem:[#allocation5 + $0x610] sm:$0xff] }
  0xd5   : > { %1041 = vmatprep.subr.mxu0 %v283_v61  ;;  %1126 = vmatprep.subr.mxu1 %v589_v2  ;;  %v435_v61 = vld [vmem:[#allocation5 + $0x650] sm:$0xff]  ;;  %v418_v2 = vld [vmem:[#allocation5 + $0x5c8] sm:$0xff] }
  0xd6   : > { %1042 = vmatpush1.msra.mxu0 %v282_v1  ;;  %1127 = vmatpush1.msra.mxu1 %v588_v9  ;;  %v426_v1 = vld [vmem:[#allocation5 + $0x608] sm:$0xff]  ;;  %v417_v9 = vld [vmem:[#allocation5 + $0x5c0] sm:$0xff] }
  0xd7   : > { %1043 = vmatprep.subr.mxu0 %v274_v8  ;;  %1128 = vmatprep.subr.mxu1 %v580_v11  ;;  %v357_v8 = vld [vmem:[#allocation5 + $0x3e0] sm:$0xff]  ;;  %v348_v11 = vld [vmem:[#allocation5 + $0x398] sm:$0xff] }
  0xd8   : > { %1044 = vmatpush1.msra.mxu0 %v273_v10  ;;  %1129 = vmatpush1.msra.mxu1 %v579_v13  ;;  %v409_v10 = vld [vmem:[#allocation5 + $0x580] sm:$0xff]  ;;  %v347_v13 = vld [vmem:[#allocation5 + $0x390] sm:$0xff] }
  0xd9   : > { %1045 = vmatprep.subr.mxu0 %v265_v12  ;;  %1130 = vmatprep.subr.mxu1 %v571_v15  ;;  %v408_v12 = vld [vmem:[#allocation5 + $0x578] sm:$0xff]  ;;  %v339_v15 = vld [vmem:[#allocation5 + $0x350] sm:$0xff] }
  0xda   : > { %1046 = vmatpush1.msra.mxu0 %v264_v14  ;;  %1131 = vmatpush1.msra.mxu1 %v570_v17  ;;  %v400_v14 = vld [vmem:[#allocation5 + $0x538] sm:$0xff]  ;;  %v338_v17 = vld [vmem:[#allocation5 + $0x348] sm:$0xff] }
  0xdb   : > { %1047 = vmatprep.subr.mxu0 %v256_v16  ;;  %1132 = vmatprep.subr.mxu1 %v562_v19  ;;  %v399_v16 = vld [vmem:[#allocation5 + $0x530] sm:$0xff]  ;;  %v330_v19 = vld [vmem:[#allocation5 + $0x308] sm:$0xff] }
  0xdc   : > { %1048 = vmatpush1.msra.mxu0 %v255_v18  ;;  %919 = vmatprep.mubr.f32.mxu1 %v5716_v52  ;;  %v391_v18 = vld [vmem:[#allocation5 + $0x4f0] sm:$0xff] }
  0xdd   : > { %1049 = vmatprep.subr.mxu0 %v247_v20  ;;  %1008 = vmatprep.mubr.f32.mxu0 %v5514_v0  ;;  %v390_v20 = vld [vmem:[#allocation5 + $0x4e8] sm:$0xff] }
  0xde   : > { %1050 = vmatpush1.msra.mxu0 %v246_v21  ;;  %1133 = vmatpush1.msra.mxu1 %v561_v23  ;;  %v382_v21 = vld [vmem:[#allocation5 + $0x4a8] sm:$0xff]  ;;  %v381_v23 = vld [vmem:[#allocation5 + $0x4a0] sm:$0xff] }
  0xdf   : > { %1051 = vmatprep.subr.mxu0 %v238_v22  ;;  %920 = vmatmul.mubr.f32.gmra.mxu1 %v5723_v56  ;;  %v321_v22 = vld [vmem:[#allocation5 + $0x2c0] sm:$0xff] }
  0xe0   : > { %1052 = vmatpush1.msra.mxu0 %v237_v24  ;;  %1134 = vmatprep.subr.mxu1 %v553_v27  ;;  %v320_v24 = vld [vmem:[#allocation5 + $0x2b8] sm:$0xff]  ;;  %v303_v27 = vld [vmem:[#allocation5 + $0x230] sm:$0xff] }
  0xe1   : > { %1053 = vmatprep.subr.mxu0 %v517_v25  ;;  %1009 = vmatmul.mubr.f32.gmra.mxu0 %v5719_v55  ;;  %v312_v25 = vld [vmem:[#allocation5 + $0x278] sm:$0xff] }
  0xe2   : > { %1054 = vmatpush2.msra.mxu0 %v516_v26  ;;  %1135 = vmatpush1.msra.mxu1 %v552_v29  ;;  %v311_v26 = vld [vmem:[#allocation5 + $0x270] sm:$0xff]  ;;  %v302_v29 = vld [vmem:[#allocation5 + $0x228] sm:$0xff] }
  0xe3   : > { %1055 = vmatprep.subr.mxu0 %v508_v28  ;;  %1136 = vmatprep.subr.mxu1 %v544_v31  ;;  %v663_v28 = vld [vmem:[#allocation5 + $0xd70] sm:$0xff]  ;;  %v294_v31 = vld [vmem:[#allocation5 + $0x1e8] sm:$0xff] }
  0xe4   : > { %1056 = vmatpush2.msra.mxu0 %v507_v30  ;;  %925 = vmatprep.mubr.f32.mxu1 %v5729_v63  ;;  %v662_v30 = vld [vmem:[#allocation5 + $0xd68] sm:$0xff] }
  0xe5   : > { %1057 = vmatprep.subr.mxu0 %v499_v32  ;;  %1014 = vmatprep.mubr.f32.mxu0 %v5514_v0  ;;  %v293_v32 = vld [vmem:[#allocation5 + $0x1e0] sm:$0xff] }
  0xe6   : > { %1058 = vmatpush2.msra.mxu0 %v498_v33  ;;  %1137 = vmatpush1.msra.mxu1 %v543_v35  ;;  %v654_v33 = vld [vmem:[#allocation5 + $0xd28] sm:$0xff]  ;;  %v653_v35 = vld [vmem:[#allocation5 + $0xd20] sm:$0xff] }
  0xe7   : > { %1059 = vmatprep.subr.mxu0 %v490_v34  ;;  %926 = vmatmul.mubr.f32.gmra.mxu1 %v5736_v7  ;;  %v285_v34 = vld [vmem:[#allocation5 + $0x1a0] sm:$0xff] }
  0xe8   : > { %1060 = vmatpush2.msra.mxu0 %v489_v36  ;;  %1138 = vmatprep.subr.mxu1 %v535_v39  ;;  %v284_v36 = vld [vmem:[#allocation5 + $0x198] sm:$0xff] }
  0xe9   : > { %1061 = vmatprep.subr.mxu0 %v481_v37  ;;  %1015 = vmatmul.mubr.f32.gmra.mxu0 %v5732_v5  ;;  %v276_v37 = vld [vmem:[#allocation5 + $0x158] sm:$0xff] }
  0xea   : > { %1062 = vmatpush2.msra.mxu0 %v480_v38  ;;  %1139 = vmatpush1.msra.mxu1 %v534_v42  ;;  %v644_v38 = vld [vmem:[#allocation5 + $0xcd8] sm:$0xff]  ;;  %v635_v42 = vld [vmem:[#allocation5 + $0xc90] sm:$0xff] }
  0xeb   : > { %1063 = vmatprep.subr.mxu0 %v472_v40  ;;  %1140 = vmatprep.subr.mxu1 %v526_v46  ;;  %v636_v39 = vld [vmem:[#allocation5 + $0xc98] sm:$0xff]  ;;  %v267_v40 = vld [vmem:[#allocation5 + $0x110] sm:$0xff] }
  0xec   : > { %1064 = vmatpush2.msra.mxu0 %v471_v43  ;;  %1085 = vmatprep.mubr.f32.mxu0 %v5695_v4  ;;  %v365_v4 = vld [vmem:[#allocation5 + $0x420] sm:$0xff]  ;;  %v266_v43 = vld [vmem:[#allocation5 + $0x108] sm:$0xff]  ;;  %v627_v46 = vld [vmem:[#allocation5 + $0xc50] sm:$0xff] }
  0xed   : > { %1065 = vmatprep.subr.mxu0 %v463_v47  ;;  %1141 = vmatpush1.msra.mxu1 %v525_v49  ;;  %v626_v47 = vld [vmem:[#allocation5 + $0xc48] sm:$0xff] }
  0xee   : > { %1066 = vmatpush2.msra.mxu0 %v462_v48  ;;  %1174 = vmatprep.mubr.f32.mxu1 %v5514_v0  ;;  %v257_v48 = vld [vmem:[#allocation5 + $0xc0] sm:$0xff]  ;;  %v618_v49 = vld [vmem:[#allocation5 + $0xc08] sm:$0xff] }
  0xef   : > { %1067 = vmatprep.subr.mxu0 %v454_v50  ;;  %1175 = vmatmul.mubr.f32.vlgmr.msra.gmra.mxu1 %v5691_v3  ;;  %v356_v3 = vld [vmem:[#allocation5 + $0x3d8] sm:$0xff]  ;;  %v249_v50 = vld [vmem:[#allocation5 + $0x80] sm:$0xff] }
  0xf0   : > { %1068 = vmatpush2.msra.mxu0 %v453_v51  ;;  %1199 = vmatprep.subr.mxu1 %v375_v54  ;;  %v617_v51 = vld [vmem:[#allocation5 + $0xc00] sm:$0xff] }
  0xf1   : > { %1069 = vmatprep.subr.mxu0 %v445_v53  ;;  %1200 = vmatpush1.msra.mxu1 %v374_v58  ;;  %v248_v53 = vld [vmem:[#allocation5 + $0x78] sm:$0xff]  ;;  %v609_v54 = vld [vmem:[#allocation5 + $0xbc0] sm:$0xff] }
  0xf2   : > { %1070 = vmatpush2.msra.mxu0 %v444_v57  ;;  %1201 = vmatprep.subr.mxu1 %v366_v60  ;;  %v240_v57 = vld [vmem:[#allocation5 + $0x38] sm:$0xff] }
  0xf3   : > { %1071 = vmatprep.subr.mxu0 %v436_v59  ;;  %1180 = vmatprep.mubr.f32.mxu1 %v5514_v0  ;;  %v608_v58 = vld [vmem:[#allocation5 + $0xbb8] sm:$0xff]  ;;  %v239_v59 = vld [vmem:[#allocation5 + $0x30] sm:$0xff] }
  0xf4   : > { %1072 = vmatpush2.msra.mxu0 %v435_v61  ;;  %1202 = vmatpush1.msra.mxu1 %v365_v4  ;;  %v600_v60 = vld [vmem:[#allocation5 + $0xb78] sm:$0xff]  ;;  %v519_v61 = vld [vmem:[#allocation5 + $0x8f0] sm:$0xff]  ;;  %v518_v4 = vld [vmem:[#allocation5 + $0x8e8] sm:$0xff] }
  0xf5   : > { %1073 = vmatprep.subr.mxu0 %v427_v62  ;;  %1181 = vmatmul.mubr.f32.gmra.mxu1 %v5706_v44  ;;  %v329_v44 = vld [vmem:[#allocation5 + $0x300] sm:$0xff]  ;;  %v599_v62 = vld [vmem:[#allocation5 + $0xb70] sm:$0xff] }
  0xf6   : > { %1074 = vmatpush2.msra.mxu0 %v426_v1  ;;  %1203 = vmatprep.subr.mxu1 %v357_v8  ;;  %v591_v1 = vld [vmem:[#allocation5 + $0xb30] sm:$0xff]  ;;  %v590_v8 = vld [vmem:[#allocation5 + $0xb28] sm:$0xff] }
  0xf7   : > { %1075 = vmatprep.subr.mxu0 %v418_v2  ;;  %1204 = vmatpush1.msra.mxu1 %v356_v3  ;;  %v510_v2 = vld [vmem:[#allocation5 + $0x8a8] sm:$0xff] }
  0xf8   : > { %1076 = vmatpush2.msra.mxu0 %v417_v9  ;;  %1205 = vmatprep.subr.mxu1 %v348_v11  ;;  %v509_v9 = vld [vmem:[#allocation5 + $0x8a0] sm:$0xff]  ;;  %v582_v3 = vld [vmem:[#allocation5 + $0xae8] sm:$0xff] }
  0xf9   : > { %1077 = vmatprep.subr.mxu0 %v409_v10  ;;  %1206 = vmatpush1.msra.mxu1 %v347_v13  ;;  %v501_v10 = vld [vmem:[#allocation5 + $0x860] sm:$0xff] }
  0xfa   : > { %1078 = vmatpush2.msra.mxu0 %v408_v12  ;;  %1207 = vmatprep.subr.mxu1 %v339_v15  ;;  %v581_v11 = vld [vmem:[#allocation5 + $0xae0] sm:$0xff]  ;;  %v500_v12 = vld [vmem:[#allocation5 + $0x858] sm:$0xff] }
  0xfb   : > { %1079 = vmatprep.subr.mxu0 %v400_v14  ;;  %1208 = vmatpush1.msra.mxu1 %v338_v17  ;;  %v573_v13 = vld [vmem:[#allocation5 + $0xaa0] sm:$0xff]  ;;  %v492_v14 = vld [vmem:[#allocation5 + $0x818] sm:$0xff] }
  0xfc   : > { %1080 = vmatpush2.msra.mxu0 %v399_v16  ;;  %1209 = vmatprep.subr.mxu1 %v330_v19  ;;  %v572_v15 = vld [vmem:[#allocation5 + $0xa98] sm:$0xff]  ;;  %v491_v16 = vld [vmem:[#allocation5 + $0x810] sm:$0xff] }
  0xfd   : > { %1081 = vmatprep.subr.mxu0 %v391_v18  ;;  %1210 = vmatpush1.msra.mxu1 %v329_v44  ;;  %v564_v17 = vld [vmem:[#allocation5 + $0xa58] sm:$0xff]  ;;  %v483_v18 = vld [vmem:[#allocation5 + $0x7d0] sm:$0xff]  ;;  %v474_v44 = vld [vmem:[#allocation5 + $0x788] sm:$0xff] }
  0xfe   : > { %1082 = vmatpush2.msra.mxu0 %v390_v20  ;;  %1211 = vmatprep.subr.mxu1 %v321_v22  ;;  %v563_v19 = vld [vmem:[#allocation5 + $0xa50] sm:$0xff]  ;;  %v482_v20 = vld [vmem:[#allocation5 + $0x7c8] sm:$0xff]  ;;  %v473_v22 = vld [vmem:[#allocation5 + $0x780] sm:$0xff] }
  0xff   : > { %1083 = vmatprep.subr.mxu0 %v382_v21  ;;  %1212 = vmatpush1.msra.mxu1 %v320_v24  ;;  %v555_v21 = vld [vmem:[#allocation5 + $0xa10] sm:$0xff]  ;;  %v554_v24 = vld [vmem:[#allocation5 + $0xa08] sm:$0xff] }
 0x100   : > { %1084 = vmatpush2.msra.mxu0 %v381_v23  ;;  %1213 = vmatprep.subr.mxu1 %v312_v25  ;;  %v465_v23 = vld [vmem:[#allocation5 + $0x740] sm:$0xff]  ;;  %v464_v25 = vld [vmem:[#allocation5 + $0x738] sm:$0xff] }
 0x101   : > { %1086 = vmatmul.mubr.f32.vlgmr.msra.gmra.mxu0 %v5698_v6  ;;  %1214 = vmatpush1.msra.mxu1 %v311_v26  ;;  %v645_v6 = vld [vmem:[#allocation5 + $0xce0] sm:$0xff]  ;;  %v546_v26 = vld [vmem:[#allocation5 + $0x9c8] sm:$0xff] }
 0x102   : > { %1091 = vmatprep.mubr.f32.mxu0 %v5703_v41  ;;  %1215 = vmatprep.subr.mxu1 %v303_v27  ;;  %v275_v41 = vld [vmem:[#allocation5 + $0x150] sm:$0xff]  ;;  %v456_v27 = vld [vmem:[#allocation5 + $0x6f8] sm:$0xff] }
 0x103   : > { %1288 = vmatprep.subr.mxu0 %v663_v28  ;;  %1216 = vmatpush1.msra.mxu1 %v302_v29  ;;  %v545_v28 = vld [vmem:[#allocation5 + $0x9c0] sm:$0xff]  ;;  %v455_v29 = vld [vmem:[#allocation5 + $0x6f0] sm:$0xff] }
 0x104   : > { %1289 = vmatpush1.msra.mxu0 %v662_v30  ;;  %1217 = vmatprep.subr.mxu1 %v294_v31  ;;  %v447_v30 = vld [vmem:[#allocation5 + $0x6b0] sm:$0xff]  ;;  %v537_v31 = vld [vmem:[#allocation5 + $0x980] sm:$0xff] }
 0x105   : > { %1092 = vmatmul.mubr.f32.gmra.mxu0 %v5710_v45  ;;  %1218 = vmatpush1.msra.mxu1 %v293_v32  ;;  %v258_v45 = vld [vmem:[#allocation5 + $0xc8] sm:$0xff] }
 0x106   : > { %1290 = vmatprep.subr.mxu0 %v654_v33  ;;  %1219 = vmatprep.subr.mxu1 %v285_v34  ;;  %v446_v32 = vld [vmem:[#allocation5 + $0x6a8] sm:$0xff]  ;;  %v536_v33 = vld [vmem:[#allocation5 + $0x978] sm:$0xff]  ;;  %v437_v34 = vld [vmem:[#allocation5 + $0x660] sm:$0xff] }
 0x107   : > { %1291 = vmatpush1.msra.mxu0 %v653_v35  ;;  %1220 = vmatpush1.msra.mxu1 %v284_v36  ;;  %v528_v35 = vld [vmem:[#allocation5 + $0x938] sm:$0xff] }
 0x108   : > { %1292 = vmatprep.subr.mxu0 %v645_v6  ;;  %1221 = vmatprep.subr.mxu1 %v276_v37  ;;  %v428_v36 = vld [vmem:[#allocation5 + $0x618] sm:$0xff]  ;;  %v527_v6 = vld [vmem:[#allocation5 + $0x930] sm:$0xff] }
 0x109   : > { %1293 = vmatpush1.msra.mxu0 %v644_v38  ;;  %1222 = vmatpush1.msra.mxu1 %v275_v41  ;;  %v420_v37 = vld [vmem:[#allocation5 + $0x5d8] sm:$0xff]  ;;  %v419_v38 = vld [vmem:[#allocation5 + $0x5d0] sm:$0xff] }
 0x10a   : > { %1294 = vmatprep.subr.mxu0 %v636_v39  ;;  %1223 = vmatprep.subr.mxu1 %v267_v40  ;;  %v520_v41 = vld [vmem:[#allocation5 + $0x8f8] sm:$0xff]  ;;  %v402_v39 = vld [vmem:[#allocation5 + $0x548] sm:$0xff] }
 0x10b   : > { %1295 = vmatpush1.msra.mxu0 %v635_v42  ;;  %1224 = vmatpush1.msra.mxu1 %v266_v43  ;;  %v376_v40 = vld [vmem:[#allocation5 + $0x478] sm:$0xff]  ;;  %v401_v42 = vld [vmem:[#allocation5 + $0x540] sm:$0xff]  ;;  %v5773_v43 = vld [vmem:[%s5679_s25 + $0x10] sm:$0xff] }
 0x10c   : > { %1296 = vmatprep.subr.mxu0 %v627_v46  ;;  %1225 = vmatprep.subr.mxu1 %v258_v45  ;;  %v393_v46 = vld [vmem:[#allocation5 + $0x500] sm:$0xff]  ;;  %v511_v45 = vld [vmem:[#allocation5 + $0x8b0] sm:$0xff] }
 0x10d   : > { %1297 = vmatpush1.msra.mxu0 %v626_v47  ;;  %1226 = vmatpush1.msra.mxu1 %v257_v48  ;;  %v367_v47 = vld [vmem:[#allocation5 + $0x430] sm:$0xff]  ;;  %v502_v48 = vld [vmem:[#allocation5 + $0x868] sm:$0xff] }
 0x10e   : > { %1298 = vmatprep.subr.mxu0 %v618_v49  ;;  %1227 = vmatprep.subr.mxu1 %v249_v50  ;;  %v384_v49 = vld [vmem:[#allocation5 + $0x4b8] sm:$0xff]  ;;  %v358_v50 = vld [vmem:[#allocation5 + $0x3e8] sm:$0xff] }
 0x10f   : > { %1299 = vmatpush1.msra.mxu0 %v617_v51  ;;  %1228 = vmatpush1.msra.mxu1 %v248_v53  ;;  %v383_v51 = vld [vmem:[#allocation5 + $0x4b0] sm:$0xff]  ;;  %v493_v53 = vld [vmem:[#allocation5 + $0x820] sm:$0xff] }
 0x110   : > { %1300 = vmatprep.subr.mxu0 %v609_v54  ;;  %1229 = vmatprep.subr.mxu1 %v240_v57  ;;  %v664_v54 = vld [vmem:[#allocation5 + $0xd78] sm:$0xff]  ;;  %v349_v57 = vld [vmem:[#allocation5 + $0x3a0] sm:$0xff] }
 0x111   : > { %1301 = vmatpush1.msra.mxu0 %v608_v58  ;;  %1230 = vmatpush1.msra.mxu1 %v239_v59  ;;  %v5779_v58 = vld [vmem:[%s5679_s25 + $0x8] sm:$0xff]  ;;  %v484_v59 = vld [vmem:[#allocation5 + $0x7d8] sm:$0xff] }
 0x112   : > { %1302 = vmatprep.subr.mxu0 %v600_v60  ;;  %1231 = vmatprep.subr.mxu1 %v519_v61  ;;  %v655_v60 = vld [vmem:[#allocation5 + $0xd30] sm:$0xff]  ;;  %v5783_v61 = vld [vmem:[%s5679_s25] sm:$0xff] }
 0x113   : > { %1303 = vmatpush1.msra.mxu0 %v599_v62  ;;  %1232 = vmatpush2.msra.mxu1 %v518_v4  ;;  %v475_v62 = vld [vmem:[#allocation5 + $0x790] sm:$0xff]  ;;  %v646_v4 = vld [vmem:[#allocation5 + $0xce8] sm:$0xff] }
 0x114   : > { %1304 = vmatprep.subr.mxu0 %v591_v1  ;;  %1233 = vmatprep.subr.mxu1 %v510_v2  ;;  %v331_v1 = vld [vmem:[#allocation5 + $0x310] sm:$0xff]  ;;  %v466_v2 = vld [vmem:[#allocation5 + $0x748] sm:$0xff] }
 0x115   : > { %1305 = vmatpush1.msra.mxu0 %v590_v8  ;;  %1234 = vmatpush2.msra.mxu1 %v509_v9  ;;  %v637_v8 = vld [vmem:[#allocation5 + $0xca0] sm:$0xff]  ;;  %v322_v9 = vld [vmem:[#allocation5 + $0x2c8] sm:$0xff] }
 0x116   : > { %1306 = vmatprep.subr.mxu0 %v582_v3  ;;  %1235 = vmatprep.subr.mxu1 %v501_v10  ;;  %v457_v3 = vld [vmem:[#allocation5 + $0x700] sm:$0xff]  ;;  %v628_v10 = vld [vmem:[#allocation5 + $0xc58] sm:$0xff] }
 0x117   : > { %1307 = vmatpush1.msra.mxu0 %v581_v11  ;;  %1236 = vmatpush2.msra.mxu1 %v500_v12  ;;  %v313_v11 = vld [vmem:[#allocation5 + $0x280] sm:$0xff]  ;;  %v448_v12 = vld [vmem:[#allocation5 + $0x6b8] sm:$0xff] }
 0x118   : > { %1308 = vmatprep.subr.mxu0 %v573_v13  ;;  %1237 = vmatprep.subr.mxu1 %v492_v14  ;;  %v619_v13 = vld [vmem:[#allocation5 + $0xc10] sm:$0xff]  ;;  %v304_v14 = vld [vmem:[#allocation5 + $0x238] sm:$0xff] }
 0x119   : > { %1309 = vmatpush1.msra.mxu0 %v572_v15  ;;  %1238 = vmatpush2.msra.mxu1 %v491_v16  ;;  %v439_v15 = vld [vmem:[#allocation5 + $0x670] sm:$0xff]  ;;  %v610_v16 = vld [vmem:[#allocation5 + $0xbc8] sm:$0xff] }
 0x11a   : > { %1310 = vmatprep.subr.mxu0 %v564_v17  ;;  %1239 = vmatprep.subr.mxu1 %v483_v18  ;;  %v295_v17 = vld [vmem:[#allocation5 + $0x1f0] sm:$0xff]  ;;  %v430_v18 = vld [vmem:[#allocation5 + $0x628] sm:$0xff] }
 0x11b   : > { %1311 = vmatpush1.msra.mxu0 %v563_v19  ;;  %1240 = vmatpush2.msra.mxu1 %v482_v20  ;;  %v601_v19 = vld [vmem:[#allocation5 + $0xb80] sm:$0xff]  ;;  %v286_v20 = vld [vmem:[#allocation5 + $0x1a8] sm:$0xff] }
 0x11c   : > { %1097 = vmatprep.mubr.f32.mxu0 %v5716_v52  ;;  %1241 = vmatprep.subr.mxu1 %v474_v44  ;;  %v438_v52 = vld [vmem:[#allocation5 + $0x668] sm:$0xff]  ;;  %v421_v44 = vld [vmem:[#allocation5 + $0x5e0] sm:$0xff] }
 0x11d   : > { %1312 = vmatprep.subr.mxu0 %v555_v21  ;;  %1242 = vmatpush2.msra.mxu1 %v473_v22  ;;  %v5788_v21 = vld [vmem:[%s5679_s25 + $0x28] sm:$0xff]  ;;  %v592_v22 = vld [vmem:[#allocation5 + $0xb38] sm:$0xff] }
 0x11e   : > { %1098 = vmatmul.mubr.f32.gmra.mxu0 %v5723_v56  ;;  %1243 = vmatprep.subr.mxu1 %v465_v23  ;;  %v429_v56 = vld [vmem:[#allocation5 + $0x620] sm:$0xff] }
 0x11f   : > { %1313 = vmatpush1.msra.mxu0 %v554_v24  ;;  %1244 = vmatpush2.msra.mxu1 %v464_v25  ;;  %v277_v23 = vld [vmem:[#allocation5 + $0x160] sm:$0xff]  ;;  %v412_v24 = vld [vmem:[#allocation5 + $0x598] sm:$0xff]  ;;  %v583_v25 = vld [vmem:[#allocation5 + $0xaf0] sm:$0xff] }
 0x120   : > { %1314 = vmatprep.subr.mxu0 %v546_v26  ;;  %1245 = vmatprep.subr.mxu1 %v456_v27  ;;  %v268_v26 = vld [vmem:[#allocation5 + $0x118] sm:$0xff]  ;;  %v5349_v27 = vld [vmem:[%s5679_s25 + $0x40] sm:$0xff] }
 0x121   : > { %1315 = vmatpush1.msra.mxu0 %v545_v28  ;;  %1246 = vmatpush2.msra.mxu1 %v455_v29  ;;  %v403_v28 = vld [vmem:[#allocation5 + $0x550] sm:$0xff]  ;;  %v5350_v29 = vld [vmem:[%s5679_s25 + $0x20] sm:$0xff] }
 0x122   : > { %1103 = vmatprep.mubr.f32.mxu0 %v5729_v63  ;;  %1247 = vmatprep.subr.mxu1 %v447_v30  ;;  %v411_v63 = vld [vmem:[#allocation5 + $0x590] sm:$0xff]  ;;  %v574_v30 = vld [vmem:[#allocation5 + $0xaa8] sm:$0xff] }
 0x123   : > { %1316 = vmatprep.subr.mxu0 %v537_v31  ;;  %1248 = vmatpush2.msra.mxu1 %v446_v32  ;;  %v259_v31 = vld [vmem:[#allocation5 + $0xd0] sm:$0xff]  ;;  %v5351_v32 = vld [vmem:[%s5679_s25 + $0x18] sm:$0xff] }
 0x124   : > { %1104 = vmatmul.mubr.f32.gmra.mxu0 %v5736_v7  ;;  %1249 = vmatprep.subr.mxu1 %v438_v52  ;;  %v410_v7 = vld [vmem:[#allocation5 + $0x588] sm:$0xff] }
 0x125   : > { %1317 = vmatpush1.msra.mxu0 %v536_v33  ;;  %1250 = vmatpush2.msra.mxu1 %v437_v34  ;;  %v394_v52 = vld [vmem:[#allocation5 + $0x508] sm:$0xff]  ;;  %v565_v33 = vld [vmem:[#allocation5 + $0xa60] sm:$0xff] }
 0x126   : > { %1186 = vmatprep.mubr.f32.mxu1 %v5514_v0  ;;  %1251 = vmatprep.subr.mxu1 %v429_v56  ;;  %v250_v34 = vld [vmem:[#allocation5 + $0x88] sm:$0xff]  ;;  %v5352_v56 = vld [vmem:[%s5679_s25 + $0x58] sm:$0xff] }
 0x127   : > { %1318 = vmatprep.subr.mxu0 %v528_v35  ;;  %1252 = vmatpush2.msra.mxu1 %v428_v36  ;;  %v385_v35 = vld [vmem:[#allocation5 + $0x4c0] sm:$0xff]  ;;  %v5353_v36 = vld [vmem:[%s5679_s25 + $0x38] sm:$0xff] }
 0x128   : > { %1319 = vmatpush1.msra.mxu0 %v527_v6  ;;  %1253 = vmatprep.subr.mxu1 %v420_v37  ;;  %v556_v6 = vld [vmem:[#allocation5 + $0xa18] sm:$0xff]  ;;  %v241_v37 = vld [vmem:[#allocation5 + $0x40] sm:$0xff] }
 0x129   : > { %1187 = vmatmul.mubr.f32.gmra.mxu1 %v5719_v55  ;;  %1352 = vmatprep.mubr.f32.mxu0 %v5514_v0  ;;  %v392_v55 = vld [vmem:[#allocation5 + $0x4f8] sm:$0xff] }
 0x12a   : > { %1254 = vmatpush2.msra.mxu1 %v419_v38  ;;  %4681 = vmatprep.subr.mxu0 %v520_v41  ;;  %v5354_v38 = vld [vmem:[%s5679_s25 + $0x30] sm:$0xff]  ;;  %v538_v41 = vld [vmem:[#allocation5 + $0x988] sm:$0xff] }
 0x12b   : > { %1255 = vmatprep.subr.mxu1 %v411_v63  ;;  %1353 = vmatmul.mubr.f32.vlgmr.msra.gmra.mxu0 %v5773_v43  ;;  %v547_v63 = vld [vmem:[#allocation5 + $0x9d0] sm:$0xff] }
 0x12c   : > { %1256 = vmatpush2.msra.mxu1 %v410_v7  ;;  %4682 = vmatpush3.msra.mxu0 %v376_v40  ;;  %v5355_v7 = vld [vmem:[%s5679_s25 + $0x50] sm:$0xff]  ;;  %v5356_v40 = vld [vmem:[%s5679_s25 + $0x48] sm:$0xff] }
 0x12d   : > { %1257 = vmatprep.subr.mxu1 %v402_v39  ;;  %1192 = vmatprep.mubr.f32.mxu1 %v5514_v0  ;;  %v529_v39 = vld [vmem:[#allocation5 + $0x940] sm:$0xff] }
 0x12e   : > { %1258 = vmatpush2.msra.mxu1 %v401_v42  ;;  %4683 = vmatprep.subr.mxu0 %v511_v45 }
 0x12f   : > { %1259 = vmatprep.subr.mxu1 %v393_v46  ;;  %1193 = vmatmul.mubr.f32.gmra.mxu1 %v5732_v5  ;;  %v340_v5 = vld [vmem:[#allocation5 + $0x358] sm:$0xff] }
 0x130   : > { %4684 = vmatpush3.msra.mxu0 %v367_v47  ;;  %1260 = vmatpush2.msra.mxu1 %v392_v55 }
 0x131   : > { %4685 = vmatprep.subr.mxu0 %v502_v48  ;;  %1261 = vmatprep.subr.mxu1 %v384_v49 }
 0x132   : > { %4686 = vmatpush3.msra.mxu0 %v358_v50  ;;  %1262 = vmatpush2.msra.mxu1 %v383_v51 }
 0x133   : > { %1263 = vmatprep.mubr.f32.mxu1 %v5779_v58  ;;  %4687 = vmatprep.subr.mxu0 %v493_v53 }
 0x134   : > { %4905 = vmatprep.subr.mxu1 %v664_v54  ;;  %1264 = vmatmul.mubr.f32.vlgmr.msra.gmra.mxu1 %v5783_v61 }
 0x135   : > { %4688 = vmatpush3.msra.mxu0 %v349_v57  ;;  %4906 = vmatpush3.msra.mxu1 %v664_v54 }
 0x136   : > { %4689 = vmatprep.subr.mxu0 %v484_v59  ;;  %4907 = vmatprep.subr.mxu1 %v655_v60 }
 0x137   : > { %4690 = vmatpush3.msra.mxu0 %v340_v5  ;;  %4908 = vmatpush3.msra.mxu1 %v655_v60 }
 0x138   : > { %4691 = vmatprep.subr.mxu0 %v475_v62  ;;  %4909 = vmatprep.subr.mxu1 %v646_v4  ;;  %v820_v42 = vpop.f32.mrf.mxu1 }
 0x139   : > { %4692 = vmatpush3.msra.mxu0 %v331_v1  ;;  %4910 = vmatpush3.msra.mxu1 %v646_v4 }
 0x13a   : > { %4693 = vmatprep.subr.mxu0 %v466_v2  ;;  %4911 = vmatprep.subr.mxu1 %v637_v8  ;;  %v822_v47 = vpop.f32.mrf.mxu1 }
 0x13b   : > { %4694 = vmatpush3.msra.mxu0 %v322_v9  ;;  %4912 = vmatpush3.msra.mxu1 %v637_v8 }
 0x13c   : > { %4695 = vmatprep.subr.mxu0 %v457_v3  ;;  %4913 = vmatprep.subr.mxu1 %v628_v10 }
 0x13d   : > { %4696 = vmatpush3.msra.mxu0 %v313_v11  ;;  %4914 = vmatpush3.msra.mxu1 %v628_v10 }
 0x13e   : > { %4697 = vmatprep.subr.mxu0 %v448_v12  ;;  %4915 = vmatprep.subr.mxu1 %v619_v13 }
 0x13f   : > { %4698 = vmatpush3.msra.mxu0 %v304_v14  ;;  %4916 = vmatpush3.msra.mxu1 %v619_v13 }
 0x140   : > { %4699 = vmatprep.subr.mxu0 %v439_v15  ;;  %4917 = vmatprep.subr.mxu1 %v610_v16 }
 0x141   : > { %1358 = vmatprep.mubr.f32.mxu0 %v5514_v0  ;;  %4700 = vmatpush3.msra.mxu0 %v295_v17 }
 0x142   : > { %4918 = vmatpush3.msra.mxu1 %v610_v16  ;;  %1359 = vmatmul.mubr.f32.gmra.mxu0 %v5788_v21 }
 0x143   : > { %4701 = vmatprep.subr.mxu0 %v430_v18  ;;  %4919 = vmatprep.subr.mxu1 %v601_v19 }
 0x144   : > { %4702 = vmatpush3.msra.mxu0 %v286_v20  ;;  %4920 = vmatpush3.msra.mxu1 %v601_v19 }
 0x145   : > { %4703 = vmatprep.subr.mxu0 %v421_v44  ;;  %4921 = vmatprep.subr.mxu1 %v592_v22 }
 0x146   : > { %1364 = vmatprep.mubr.f32.mxu0 %v5514_v0  ;;  %4704 = vmatpush3.msra.mxu0 %v277_v23 }
 0x147   : > { %4922 = vmatpush3.msra.mxu1 %v592_v22  ;;  %1365 = vmatmul.mubr.f32.gmra.mxu0 %v5349_v27 }
 0x148   : > { %4705 = vmatprep.subr.mxu0 %v412_v24  ;;  %4923 = vmatprep.subr.mxu1 %v583_v25 }
 0x149   : > { %1269 = vmatprep.mubr.f32.mxu1 %v5350_v29  ;;  %4706 = vmatpush3.msra.mxu0 %v268_v26 }
 0x14a   : > { %4924 = vmatpush3.msra.mxu1 %v583_v25  ;;  %4707 = vmatprep.subr.mxu0 %v403_v28 }
 0x14b   : > { %1270 = vmatmul.mubr.f32.gmra.mxu1 %v5351_v32  ;;  %4925 = vmatprep.subr.mxu1 %v574_v30 }
 0x14c   : > { %1370 = vmatprep.mubr.f32.mxu0 %v5514_v0  ;;  %4708 = vmatpush3.msra.mxu0 %v259_v31 }
 0x14d   : > { %4926 = vmatpush3.msra.mxu1 %v574_v30  ;;  %1371 = vmatmul.mubr.f32.gmra.mxu0 %v5352_v56 }
 0x14e   : > { %4709 = vmatprep.subr.mxu0 %v394_v52  ;;  %4927 = vmatprep.subr.mxu1 %v565_v33 }
 0x14f   : > { %1275 = vmatprep.mubr.f32.mxu1 %v5353_v36  ;;  %4710 = vmatpush3.msra.mxu0 %v250_v34 }
 0x150   : > { %4928 = vmatpush3.msra.mxu1 %v565_v33  ;;  %4711 = vmatprep.subr.mxu0 %v385_v35 }
 0x151   : > { %1276 = vmatmul.mubr.f32.gmra.mxu1 %v5354_v38  ;;  %4929 = vmatprep.subr.mxu1 %v556_v6 }
 0x152   : > { %4712 = vmatpush3.msra.mxu0 %v241_v37  ;;  %1441 = vmatprep.mubr.f32.mxu0 %v5779_v58 }
 0x153   : > { %4930 = vmatpush3.msra.mxu1 %v556_v6  ;;  %1442 = vmatmul.mubr.f32.vlgmr.msra.gmra.mxu0 %v5783_v61 }
 0x154   : > { %4931 = vmatprep.subr.mxu1 %v547_v63  ;;  %1281 = vmatprep.mubr.f32.mxu1 %v5355_v7 }
 0x155   : > { %4932 = vmatpush3.msra.mxu1 %v547_v63  ;;  %1446 = vmatprep.mubr.f32.mxu0 %v5350_v29 }
 0x156   : > { %1282 = vmatmul.mubr.f32.gmra.mxu1 %v5356_v40  ;;  %4933 = vmatprep.subr.mxu1 %v538_v41 }
 0x157   : > { %4934 = vmatpush3.msra.mxu1 %v538_v41  ;;  %1447 = vmatmul.mubr.f32.gmra.mxu0 %v5351_v32 }
 0x158   : > { %4935 = vmatprep.subr.mxu1 %v529_v39  ;;  %4937 = vmatprep.mubr.f32.mxu1 %v5773_v43  ;;  %v731_v46 = vpop.f32.mrf.mxu0 }
 0x159   : > { %4936 = vmatpush3.msra.mxu1 %v529_v39  ;;  %v821_v45 = vadd.f32 %v820_v42, %v731_v46  ;;  %1451 = vmatprep.mubr.f32.mxu0 %v5353_v36 }
 0x15a   : > { %4938 = vmatmul.mubr.f32.vlgmr.msra.gmra.mxu1 %v5788_v21  ;;  %v733_v55 = vpop.f32.mrf.mxu0 }
 0x15b   : > { %4940 = vmatprep.mubr.f32.mxu1 %v5349_v27  ;;  %v1556_v48 = vmul.f32 0.125, %v821_v45  ;;  %v823_v49 = vadd.f32 %v822_v47, %v733_v55  ;;  %1452 = vmatmul.mubr.f32.gmra.mxu0 %v5354_v38 }
 0x15c   : > { %1456 = vmatprep.mubr.f32.mxu0 %v5355_v7 }
 0x15d   : > { %v5805_v50 = vmul.f32 0.125, %v823_v49 }
 0x15e   : > { %4941 = vmatmul.mubr.f32.gmra.mxu1 %v5352_v56 }
 0x15f   : > { %4947 = vmatprep.mubr.msk.f32.mxu1 %vm1558_vm0, %v1556_v48  ;;  %1457 = vmatmul.mubr.f32.gmra.mxu0 %v5356_v40 }
 0x160   : > { %4975 = vmatprep.mubr.msk.f32.mxu0 %vm1558_vm0, %v5805_v50 }
 0x16c   : > { %v826_v43 = vpop.f32.mrf.mxu1  ;;  %v737_v51 = vpop.f32.mrf.mxu0 }
 0x16d   : > { %v827_v21 = vadd.f32 %v826_v43, %v737_v51 }
 0x16e   : > { %v828_v53 = vpop.f32.mrf.mxu1  ;;  %v739_v54 = vpop.f32.mrf.mxu0 }
 0x16f   : > { %v829_v57 = vadd.f32 %v828_v53, %v739_v54  ;;  %v5828_v22 = vmul.f32 0.125, %v827_v21 }
 0x171   : > { %v5854_v40 = vmul.f32 0.125, %v829_v57 }
 0x172   : > { %v832_v58 = vpop.f32.mrf.mxu1  ;;  %v743_v59 = vpop.f32.mrf.mxu0 }
 0x173   : > { %v5810_v60 = vadd.f32 %v832_v58, %v743_v59 }
 0x174   : > { %v834_v5 = vpop.f32.mrf.mxu1  ;;  %v745_v61 = vpop.f32.mrf.mxu0 }
 0x175   : > { %v5812_v62 = vadd.f32 %v834_v5, %v745_v61 }
 0x178   : > { %v838_v4 = vpop.f32.mrf.mxu1  ;;  %v749_v1 = vpop.f32.mrf.mxu0 }
 0x179   : > { %v5814_v2 = vadd.f32 %v838_v4, %v749_v1 }
 0x17a   : > { %v840_v8 = vpop.f32.mrf.mxu1  ;;  %v751_v9 = vpop.f32.mrf.mxu0 }
 0x17b   : > { %v5816_v3 = vadd.f32 %v840_v8, %v751_v9 }
 0x180   : > { %v909_v10 = vpop.f32.mrf.mxu1  ;;  %v998_v11 = vpop.f32.mrf.mxu0 }
 0x181   : > { %v999_v12 = vadd.f32 %v998_v11, %v909_v10 }
 0x182   : > { %v911_v13 = vpop.f32.mrf.mxu1  ;;  %v1000_v14 = vpop.f32.mrf.mxu0 }
 0x183   : > { %v1001_v15 = vadd.f32 %v1000_v14, %v911_v13  ;;  %v5860_v46 = vmul.f32 0.125, %v999_v12 }
 0x184   : > { %v915_v16 = vpop.f32.mrf.mxu1 }
 0x185   : > { %v1004_v17 = vpop.f32.mrf.mxu0  ;;  %1754 = vrot.lane.b32.xlu1 %v1001_v15, %s5515_s18 }
 0x186   : > { %v1005_v18 = vadd.f32 %v1004_v17, %v915_v16  ;;  %v917_v19 = vpop.f32.mrf.mxu1 }
 0x187   : > { %v1006_v20 = vpop.f32.mrf.mxu0 }
 0x188   : > { %v5819_v44 = vadd.f32 %v1006_v20, %v917_v19  ;;  %v5872_v45 = vmul.f32 0.125, %v1005_v18 }
 0x189   : > { %1750 = vrot.lane.b32.xlu1 %v1556_v48, %s5515_s18 }
 0x18a   : > { %4943 = vmatprep.subr.msk.mxu1 %vm1558_vm0, %v5819_v44 }
 0x18b   : > { %4944 = vmatpush3.xpose.msk.msra.mxu1 %vm1558_vm0, %v5819_v44 }
 0x18c   : > { %4945 = vmatprep.subr.msk.mxu1 %vm1558_vm0, %v1001_v15 }
 0x18f   : > { %4946 = vmatpush3.xpose.msk.msra.mxu1 %vm1558_vm0, %v1001_v15 }
 0x192   : > { %4948 = vmatmul.mubr.msk.f32.vlgmr.msra.gmra.mxu1 %vm1558_vm0, %v5828_v22 }
 0x19f   : > { %v921_v23 = vpop.f32.mrf.mxu1 }
 0x1a1   : > { %v1010_v24 = vpop.f32.mrf.mxu0  ;;  %v923_v26 = vpop.f32.mrf.mxu1 }
 0x1a2   : > { %v5832_v25 = vadd.f32 %v1010_v24, %v921_v23 }
 0x1a3   : > { %v1012_v27 = vpop.f32.mrf.mxu0 }
 0x1a4   : > { %v5834_v28 = vadd.f32 %v1012_v27, %v923_v26 }
 0x1a7   : > { %v927_v29 = vpop.f32.mrf.mxu1 }
 0x1a9   : > { %v1016_v30 = vpop.f32.mrf.mxu0  ;;  %v929_v32 = vpop.f32.mrf.mxu1 }
 0x1aa   : > { %v5836_v31 = vadd.f32 %v1016_v30, %v927_v29 }
 0x1ab   : > { %v1018_v52 = vpop.f32.mrf.mxu0 }
 0x1ac   : > { %v5838_v33 = vadd.f32 %v1018_v52, %v929_v32 }
 0x1af   : > { %v1176_v34 = vpop.f32.mrf.mxu1 }
 0x1b1   : > { %v1178_v56 = vpop.f32.mrf.mxu1 }
 0x1b5   : > { %v1182_v6 = vpop.f32.mrf.mxu1 }
 0x1b7   : > { %v1184_v7 = vpop.f32.mrf.mxu1 }
 0x1c1   : > { %v1087_v35 = vpop.f32.mrf.mxu0 }
 0x1c2   : > { %v5840_v38 = vadd.f32 %v1176_v34, %v1087_v35 }
 0x1c3   : > { %v1089_v36 = vpop.f32.mrf.mxu0 }
 0x1c4   : > { %v5856_v42 = vadd.f32 %v1178_v56, %v1089_v36 }
 0x1c5   : > { %v1093_v37 = vpop.f32.mrf.mxu0 }
 0x1c6   : > { %v5842_v63 = vadd.f32 %v1182_v6, %v1093_v37 }
 0x1c7   : > { %v1095_v41 = vpop.f32.mrf.mxu0 }
 0x1c8   : > { %4971 = vmatprep.subr.msk.mxu0 %vm1558_vm0, %v5842_v63  ;;  %v5850_v39 = vadd.f32 %v1184_v7, %v1095_v41 }
 0x1c9   : > { %4972 = vmatpush3.xpose.msk.msra.mxu0 %vm1558_vm0, %v5842_v63 }
 0x1ca   : > { %4973 = vmatprep.subr.msk.mxu0 %vm1558_vm0, %v5840_v38 }
 0x1cd   : > { %4974 = vmatpush3.xpose.msk.msra.mxu0 %vm1558_vm0, %v5840_v38 }
 0x1ce   : > { %4999 = vmatprep.subr.msk.mxu0 %vm1558_vm0, %v5850_v39 }
 0x1d0   : > { %4976 = vmatmul.mubr.msk.f32.vlgmr.msra.gmra.mxu0 %vm1558_vm0, %v5854_v40 }
 0x1d1   : > { %5000 = vmatpush3.xpose.msk.msra.mxu0 %vm1558_vm0, %v5850_v39  ;;  %5003 = vmatprep.mubr.msk.f32.mxu0 %vm1558_vm0, %v5860_v46 }
 0x1d2   : > { %5001 = vmatprep.subr.msk.mxu0 %vm1558_vm0, %v5856_v42 }
 0x1d5   : > { %5002 = vmatpush3.xpose.msk.msra.mxu0 %vm1558_vm0, %v5856_v42 }
 0x1d8   : > { %5004 = vmatmul.mubr.msk.f32.vlgmr.msra.gmra.mxu0 %vm1558_vm0, %v5872_v45 }
 0x1de   : > { %v1099_v47 = vpop.f32.mrf.mxu0 }
 0x1e0   : > { %v1101_v55 = vpop.f32.mrf.mxu0 }
 0x1e4   : > { %v1105_v51 = vpop.f32.mrf.mxu0 }
 0x1e6   : > { %v1107_v54 = vpop.f32.mrf.mxu0 }
 0x1e9   : > { %v1188_v48 = vpop.f32.mrf.mxu1 }
 0x1ea   : > { %v5876_v49 = vadd.f32 %v1188_v48, %v1099_v47 }
 0x1eb   : > { %v1190_v43 = vpop.f32.mrf.mxu1  ;;  %v1354_v61 = vpop.f32.mrf.mxu0 }
 0x1ec   : > { %v5878_v53 = vadd.f32 %v1190_v43, %v1101_v55 }
 0x1ed   : > { %v1356_v8 = vpop.f32.mrf.mxu0 }
 0x1ef   : > { %v1194_v57 = vpop.f32.mrf.mxu1 }
 0x1f0   : > { %v5880_v58 = vadd.f32 %v1194_v57, %v1105_v51 }
 0x1f1   : > { %v1196_v59 = vpop.f32.mrf.mxu1 }
 0x1f2   : > { %v5882_v5 = vadd.f32 %v1196_v59, %v1107_v54 }
 0x1f4   : > { %v1265_v4 = vpop.f32.mrf.mxu1 }
 0x1f5   : > { %v5886_v15 = vadd.f32 %v1354_v61, %v1265_v4 }
 0x1f6   : > { %v1267_v1 = vpop.f32.mrf.mxu1 }
 0x1f7   : > { %v5884_v9 = vadd.f32 %v1356_v8, %v1267_v1  ;;  %v1547_v8 = vlaneseq }
 0x202   : > { %v1360_v10 = vpop.f32.mrf.mxu0 }
 0x204   : > { %v1362_v11 = vpop.f32.mrf.mxu0 }
 0x207   : > { %v1366_v12 = vpop.f32.mrf.mxu0 }
 0x209   : > { %v1368_v13 = vpop.f32.mrf.mxu0 }
 0x20b   : > { %v1271_v14 = vpop.f32.mrf.mxu1 }
 0x20c   : > { %v5888_v16 = vadd.f32 %v1360_v10, %v1271_v14  ;;  %v1548_v10 = vshrl.u32 %v1547_v8, 7  ;;  %v5516_v14 = vmov -inf  }
 0x20d   : > { %v1273_v17 = vpop.f32.mrf.mxu1  ;;  %v1372_v18 = vpop.f32.mrf.mxu0 }
 0x20e   : > { %4950 = vmatprep.subr.mxu1 %v5888_v16  ;;  %v5891_v19 = vadd.f32 %v1362_v11, %v1273_v17  ;;  %v1549_v11 = vadd.s32 8, %v1548_v10 }
 0x20f   : > { %4951 = vmatpush3.msra.mxu1 %v5888_v16  ;;  %v1374_v20 = vpop.f32.mrf.mxu0 }
 0x210   : > { %4952 = vmatprep.subr.mxu1 %v5886_v15 }
 0x211   : > { %4953 = vmatpush3.msra.mxu1 %v5886_v15  ;;  %v1277_v21 = vpop.f32.mrf.mxu1 }
 0x212   : > { %v5896_v23 = vadd.f32 %v1366_v12, %v1277_v21  ;;  %v1551_v12 = vand.u32 127, %v1547_v8 }
 0x213   : > { %v1279_v24 = vpop.f32.mrf.mxu1  ;;  %v4713_v26 = vpop.f32.mrf.mxu0 }
 0x214   : > { %v5898_v27 = vadd.f32 %v1368_v13, %v1279_v24  ;;  %vm1552_vm1 = vcmp.ge.s32.totalorder %v1548_v10, %v1551_v12  ;;  %vm1553_vm2 = vcmp.ge.s32.totalorder %v1549_v11, %v1551_v12 }
 0x215   : > { %v4714_v29 = vpop.f32.mrf.mxu0  ;;  %v5912_v17 = vsel %vm1552_vm1, 0.0, %v5516_v14 }
 0x216   : > { %v1283_v30 = vpop.f32.mrf.mxu1  ;;  %v4715_v32 = vadd.f32 %v4714_v29, %v4713_v26 }
 0x217   : > { %v5900_v52 = vadd.f32 %v1372_v18, %v1283_v30  ;;  %v4716_v34 = vpop.f32.mrf.mxu0  ;;  %v5914_v18 = vsel %vm1553_vm2, 0.0, %v5516_v14 }
 0x218   : > { %v1285_v56 = vpop.f32.mrf.mxu1 }
 0x219   : > { %v5902_v35 = vadd.f32 %v1374_v20, %v1285_v56  ;;  %v4717_v36 = vpop.f32.mrf.mxu0 }
 0x21a   : > { %v4939_v6 = vpop.f32.mrf.mxu1  ;;  %v4718_v37 = vadd.f32 %v4717_v36, %v4716_v34 }
 0x21b   : > { %v4719_v41 = vpop.f32.mrf.mxu0 }
 0x21c   : > { %v1528_v7 = vpop.f32.mrf.mxu1  ;;  %v5904_v47 = vadd.f32 %v4939_v6, %v4718_v37 }
 0x21d   : > { %v5906_v55 = vadd.f32 %v4715_v32, %v1528_v7  ;;  %v4720_v48 = vpop.f32.mrf.mxu0 }
 0x21e   : > { %v4942_v43 = vpop.f32.mrf.mxu1  ;;  %v4721_v51 = vadd.f32 %v4720_v48, %v4719_v41 }
 0x21f   : > { %v4722_v54 = vpop.f32.mrf.mxu0 }
 0x220   : > { %v1538_v57 = vpop.f32.mrf.mxu1 }
 0x221   : > { %v5908_v59 = vadd.f32 %v4721_v51, %v1538_v57  ;;  %v4723_v61 = vpop.f32.mrf.mxu0 }
 0x222   : > { %v4724_v4 = vadd.f32 %v4723_v61, %v4722_v54 }
 0x224   : > { %v5910_v1 = vadd.f32 %v4942_v43, %v4724_v4 }
 0x252   : > { %v4949_v13 = vpop.f32.mrf.mxu1 }
 0x253   : > { %v1643_v24 = vadd.f32 %v4949_v13, %v5914_v18 }
 0x254   : > { %v1637_v20 = vpop.f32.mrf.mxu1 }
 0x255   : > { %v1638_v21 = vadd.f32 %v1637_v20, %v5912_v17  ;;  %v1650_v29 = vsel %vm1646_vm3, %v1643_v24, -inf }
 0x257   : > { %v1647_v26 = vsel %vm1646_vm3, %v1638_v21, -inf }
 0x258   : > { %1648 = vmax.xlane.f32.xlu0 %v1647_v26 }
 0x25c   : > { %1651 = vmax.xlane.f32.xlu0 %v1650_v29 }
 0x272   : > { %1756 = vrot.lane.b32.xlu0 %v5819_v44, %s5515_s18  ;;  %v1755_v44 = vpop.permute.xlu1 %1754 }
 0x276   : > { %v1751_v51 = vpop.permute.xlu1 %1750 }
 0x290   : > { %v4977_v12 = vpop.f32.mrf.mxu0 }
 0x2e1   : > { %v1649_v30 = vpop.xlane.xlu0 %1648 }
 0x2e2   : > { %v1653_v32 = vsub.f32 %v1638_v21, %v1649_v30  ;;  %v2032_v21 = vpop.f32.mrf.mxu0 }
 0x2e3   : > { %v2033_v30 = vadd.f32 %v2032_v21, %v5912_v17 }
 0x2e4   : > { %v1655_v36 = vmul.f32 1.442695, %v1653_v32 }
 0x2e5   : > { %v1652_v34 = vpop.xlane.xlu0 %1651 }
 0x2e6   : > { %v1654_v56 = vsub.f32 %v1643_v24, %v1652_v34  ;;  %v2038_v34 = vadd.f32 %v4977_v12, %v5914_v18 }
 0x2e8   : > { %v1657_v6 = vmul.f32 1.442695, %v1654_v56  ;;  %v2041_v56 = vsel %vm1646_vm3, %v2033_v30, -inf }
 0x2e9   : > { %v1757_v37 = vpop.permute.xlu0 %1756 }
 0x2ea   : > { %5249 = vpow2.f32 %v1657_v6  ;;  %4957 = vmatprep.subr.msk.mxu1 %vm1558_vm0, %v1757_v37 }
 0x2eb   : > { %5251 = vpow2.f32 %v1655_v36  ;;  %v2044_v36 = vsel %vm1646_vm3, %v2038_v34, -inf }
 0x2f7   : > { %v5250_v41 = vpop.eup %5249 }
 0x2f8   : > { %v1662_v7 = vsel %vm1646_vm3, %v5250_v41, 0.0  ;;  %v5252_v48 = vpop.eup %5251 }
 0x2f9   : > { %1663 = vadd.xlane.f32.xlu1 %v1662_v7  ;;  %v1659_v43 = vsel %vm1646_vm3, %v5252_v48, 0.0 }
 0x2fd   : > { %1660 = vadd.xlane.f32.xlu1 %v1659_v43 }
 0x30e   : > { %1752 = vrot.lane.b32.xlu1 %v5828_v22, %s5515_s18 }
 0x382   : > { %v1664_v54 = vpop.xlane.xlu1 %1663 }
 0x383   : > { %5253 = vrcp.f32 %v1664_v54 }
 0x386   : > { %v1661_v57 = vpop.xlane.xlu1 %1660 }
 0x387   : > { %5255 = vrcp.f32 %v1661_v57 }
 0x38a   : > { %v1753_v22 = vpop.permute.xlu1 %1752 }
 0x390   : > { %v5254_v61 = vpop.eup %5253 }
 0x391   : > { %v1668_v10 = vmul.f32 %v5254_v61, %v5250_v41 }
 0x394   : > { %v5256_v4 = vpop.eup %5255 }
 0x395   : > { %v1667_v8 = vmul.f32 %v5256_v4, %v5252_v48 }
 0x397   : > { %4954 = vmatprep.mubr.msk.f32.mxu1 %vm1646_vm3, %v1667_v8 }
 0x398   : > { %4955 = vmatmul.mubr.msk.f32.vlgmr.msra.gmra.mxu1 %vm1646_vm3, %v1668_v10 }
 0x399   : > { %4958 = vmatpush3.xpose.msk.msra.mxu1 %vm1558_vm0, %v1757_v37  ;;  %4961 = vmatprep.mubr.msk.f32.mxu1 %vm1558_vm0, %v1751_v51 }
 0x39a   : > { %4959 = vmatprep.subr.msk.mxu1 %vm1558_vm0, %v1755_v44 }
 0x39d   : > { %4960 = vmatpush3.xpose.msk.msra.mxu1 %vm1558_vm0, %v1755_v44 }
 0x3a0   : > { %4962 = vmatmul.mubr.msk.f32.vlgmr.msra.gmra.mxu1 %vm1558_vm0, %v1753_v22 }
 0x458   : > { %v5934_v11 = vpop.f32.mrf.mxu1 }
 0x45a   : > { %v5936_v13 = vpop.f32.mrf.mxu1 }
 0x460   : > { %v4963_v14 = vpop.f32.mrf.mxu1 }
 0x461   : > { %v1838_v20 = vadd.f32 %v4963_v14, %v5914_v18 }
 0x462   : > { %v1832_v24 = vpop.f32.mrf.mxu1 }
 0x463   : > { %v1833_v26 = vadd.f32 %v1832_v24, %v5912_v17  ;;  %v1844_v29 = vsel %vm1646_vm3, %v1838_v20, -inf }
 0x464   : > { %1845 = vmax.xlane.f32.xlu1 %v1844_v29 }
 0x465   : > { %v1841_v32 = vsel %vm1646_vm3, %v1833_v26, -inf }
 0x466   : > { %1842 = vmax.xlane.f32.xlu0 %v1841_v32 }
 0x46a   : > { %2042 = vmax.xlane.f32.xlu0 %v2041_v56 }
 0x46e   : > { %2045 = vmax.xlane.f32.xlu0 %v2044_v36 }
 0x4ed   : > { %v1846_v41 = vpop.xlane.xlu1 %1845 }
 0x4ee   : > { %v1848_v43 = vsub.f32 %v1838_v20, %v1846_v41 }
 0x4ef   : > { %v1843_v6 = vpop.xlane.xlu0 %1842 }
 0x4f0   : > { %v1847_v37 = vsub.f32 %v1833_v26, %v1843_v6  ;;  %v1851_v61 = vmul.f32 1.442695, %v1848_v43 }
 0x4f2   : > { %v1849_v44 = vmul.f32 1.442695, %v1847_v37 }
 0x4f3   : > { %v2043_v7 = vpop.xlane.xlu0 %2042 }
 0x4f4   : > { %v2047_v48 = vsub.f32 %v2033_v30, %v2043_v7 }
 0x4f6   : > { %v2049_v51 = vmul.f32 1.442695, %v2047_v48 }
 0x4f7   : > { %v2046_v54 = vpop.xlane.xlu0 %2045 }
 0x4f8   : > { %5257 = vpow2.f32 %v2049_v51  ;;  %v2048_v57 = vsub.f32 %v2038_v34, %v2046_v54  ;;  %v5005_v54 = vpop.f32.mrf.mxu0 }
 0x4f9   : > { %5259 = vpow2.f32 %v1849_v44 }
 0x4fa   : > { %v2051_v4 = vmul.f32 1.442695, %v2048_v57 }
 0x4fc   : > { %5261 = vpow2.f32 %v2051_v4 }
 0x4fd   : > { %5263 = vpow2.f32 %v1851_v61 }
 0x505   : > { %v5258_v8 = vpop.eup %5257 }
 0x506   : > { %v2053_v10 = vsel %vm1646_vm3, %v5258_v8, 0.0  ;;  %v5260_v22 = vpop.eup %5259 }
 0x507   : > { %2054 = vadd.xlane.f32.xlu0 %v2053_v10  ;;  %v1853_v14 = vsel %vm1646_vm3, %v5260_v22, 0.0 }
 0x509   : > { %v5262_v12 = vpop.eup %5261 }
 0x50a   : > { %v2056_v20 = vsel %vm1646_vm3, %v5262_v12, 0.0  ;;  %v5264_v21 = vpop.eup %5263 }
 0x50b   : > { %1854 = vadd.xlane.f32.xlu0 %v1853_v14  ;;  %2057 = vadd.xlane.f32.xlu1 %v2056_v20  ;;  %v1856_v24 = vsel %vm1646_vm3, %v5264_v21, 0.0 }
 0x50f   : > { %1857 = vadd.xlane.f32.xlu1 %v1856_v24 }
 0x520   : > { %1865 = vrot.lane.b32.xlu1 %v5886_v15, %s5515_s18 }
 0x521   : > { %1867 = vrot.lane.b32.xlu0 %v5888_v16, %s5515_s18 }
 0x524   : > { %2150 = vrot.lane.b32.xlu1 %v5842_v63, %s5515_s18 }
 0x525   : > { %2144 = vrot.lane.b32.xlu0 %v5805_v50, %s5515_s18 }
 0x528   : > { %2148 = vrot.lane.b32.xlu1 %v5840_v38, %s5515_s18 }
 0x52c   : > { %2146 = vrot.lane.b32.xlu1 %v5854_v40, %s5515_s18 }
 0x590   : > { %v2055_v26 = vpop.xlane.xlu0 %2054 }
 0x594   : > { %v2058_v29 = vpop.xlane.xlu1 %2057  ;;  %v1855_v30 = vpop.xlane.xlu0 %1854 }
 0x595   : > { %5265 = vrcp.f32 %v1855_v30 }
 0x596   : > { %5267 = vrcp.f32 %v2055_v26 }
 0x598   : > { %v1858_v15 = vpop.xlane.xlu1 %1857  ;;  %v1868_v32 = vpop.permute.xlu0 %1867 }
 0x599   : > { %5269 = vrcp.f32 %v1858_v15  ;;  %4964 = vmatprep.subr.mxu1 %v1868_v32 }
 0x59a   : > { %4965 = vmatpush3.msra.mxu1 %v1868_v32  ;;  %5271 = vrcp.f32 %v2058_v29 }
 0x59c   : > { %v1866_v63 = vpop.permute.xlu1 %1865  ;;  %v2145_v41 = vpop.permute.xlu0 %2144 }
 0x59d   : > { %4966 = vmatprep.subr.mxu1 %v1866_v63 }
 0x59e   : > { %4967 = vmatpush3.msra.mxu1 %v1866_v63 }
 0x59f   : > { %4978 = vmatprep.subr.mxu1 %v5891_v19 }
 0x5a0   : > { %v2151_v36 = vpop.permute.xlu1 %2150 }
 0x5a2   : > { %v5266_v50 = vpop.eup %5265 }
 0x5a3   : > { %v1861_v38 = vmul.f32 %v5266_v50, %v5260_v22  ;;  %v5268_v16 = vpop.eup %5267 }
 0x5a4   : > { %v2061_v6 = vmul.f32 %v5268_v16, %v5258_v8  ;;  %v2149_v7 = vpop.permute.xlu1 %2148  ;;  %v2426_v8 = vpop.f32.mrf.mxu0 }
 0x5a5   : > { %4968 = vmatprep.mubr.msk.f32.mxu1 %vm1646_vm3, %v1861_v38  ;;  %v2427_v14 = vadd.f32 %v2426_v8, %v5912_v17 }
 0x5a6   : > { %v5270_v40 = vpop.eup %5269 }
 0x5a7   : > { %v1862_v34 = vmul.f32 %v5270_v40, %v5264_v21  ;;  %v5272_v56 = vpop.eup %5271  ;;  %v2432_v21 = vadd.f32 %v5005_v54, %v5914_v18  ;;  %v2435_v24 = vsel %vm1646_vm3, %v2427_v14, -inf }
 0x5a8   : > { %v2062_v37 = vmul.f32 %v5272_v56, %v5262_v12  ;;  %v2147_v48 = vpop.permute.xlu1 %2146 }
 0x5a9   : > { %4969 = vmatmul.mubr.msk.f32.vlgmr.msra.gmra.mxu1 %vm1646_vm3, %v1862_v34  ;;  %v2438_v26 = vsel %vm1646_vm3, %v2432_v21, -inf }
 0x5aa   : > { %4979 = vmatpush3.msra.mxu1 %v5891_v19  ;;  %4982 = vmatprep.mubr.msk.f32.mxu1 %vm1646_vm3, %v2061_v6 }
 0x5ab   : > { %4980 = vmatprep.subr.mxu1 %v5884_v9 }
 0x5ac   : > { %4981 = vmatpush3.msra.mxu1 %v5884_v9 }
 0x5ad   : > { %4985 = vmatprep.subr.msk.mxu1 %vm1558_vm0, %v2151_v36  ;;  %4983 = vmatmul.mubr.msk.f32.vlgmr.msra.gmra.mxu1 %vm1646_vm3, %v2062_v37 }
 0x5ae   : > { %4986 = vmatpush3.xpose.msk.msra.mxu1 %vm1558_vm0, %v2151_v36  ;;  %4989 = vmatprep.mubr.msk.f32.mxu1 %vm1558_vm0, %v2145_v41 }
 0x5af   : > { %4987 = vmatprep.subr.msk.mxu1 %vm1558_vm0, %v2149_v7 }
 0x5b2   : > { %4988 = vmatpush3.xpose.msk.msra.mxu1 %vm1558_vm0, %v2149_v7 }
 0x5b5   : > { %4990 = vmatmul.mubr.msk.f32.vlgmr.msra.gmra.mxu1 %vm1558_vm0, %v2147_v48 }
 0x669   : > { %v5976_v43 = vpop.f32.mrf.mxu1 }
 0x66b   : > { %v5978_v44 = vpop.f32.mrf.mxu1 }
 0x66d   : > { %v5980_v51 = vpop.f32.mrf.mxu1 }
 0x66f   : > { %v5982_v57 = vpop.f32.mrf.mxu1 }
 0x675   : > { %v4991_v61 = vpop.f32.mrf.mxu1 }
 0x676   : > { %v2232_v4 = vadd.f32 %v4991_v61, %v5914_v18 }
 0x677   : > { %v2226_v10 = vpop.f32.mrf.mxu1 }
 0x678   : > { %v2227_v22 = vadd.f32 %v2226_v10, %v5912_v17  ;;  %v2238_v12 = vsel %vm1646_vm3, %v2232_v4, -inf }
 0x679   : > { %2239 = vmax.xlane.f32.xlu1 %v2238_v12 }
 0x67a   : > { %v2235_v20 = vsel %vm1646_vm3, %v2227_v22, -inf }
 0x67b   : > { %2236 = vmax.xlane.f32.xlu0 %v2235_v20 }
 0x67f   : > { %2436 = vmax.xlane.f32.xlu0 %v2435_v24 }
 0x683   : > { %2439 = vmax.xlane.f32.xlu0 %v2438_v26 }
 0x702   : > { %v2240_v15 = vpop.xlane.xlu1 %2239 }
 0x703   : > { %v2242_v50 = vsub.f32 %v2232_v4, %v2240_v15 }
 0x704   : > { %v2237_v29 = vpop.xlane.xlu0 %2236 }
 0x705   : > { %v2241_v30 = vsub.f32 %v2227_v22, %v2237_v29  ;;  %v2245_v56 = vmul.f32 1.442695, %v2242_v50 }
 0x707   : > { %v2243_v38 = vmul.f32 1.442695, %v2241_v30 }
 0x708   : > { %v2437_v32 = vpop.xlane.xlu0 %2436 }
 0x709   : > { %v2441_v63 = vsub.f32 %v2427_v14, %v2437_v32 }
 0x70b   : > { %v2443_v16 = vmul.f32 1.442695, %v2441_v63 }
 0x70c   : > { %v2440_v40 = vpop.xlane.xlu0 %2439 }
 0x70d   : > { %5273 = vpow2.f32 %v2443_v16  ;;  %v2442_v34 = vsub.f32 %v2432_v21, %v2440_v40 }
 0x70e   : > { %5275 = vpow2.f32 %v2243_v38 }
 0x70f   : > { %v2445_v36 = vmul.f32 1.442695, %v2442_v34 }
 0x711   : > { %5277 = vpow2.f32 %v2445_v36 }
 0x712   : > { %5279 = vpow2.f32 %v2245_v56 }
 0x71a   : > { %v5274_v6 = vpop.eup %5273 }
 0x71b   : > { %v2447_v37 = vsel %vm1646_vm3, %v5274_v6, 0.0  ;;  %v5276_v41 = vpop.eup %5275 }
 0x71c   : > { %2448 = vadd.xlane.f32.xlu0 %v2447_v37  ;;  %v2247_v48 = vsel %vm1646_vm3, %v5276_v41, 0.0 }
 0x71e   : > { %v5278_v7 = vpop.eup %5277 }
 0x71f   : > { %v2450_v54 = vsel %vm1646_vm3, %v5278_v7, 0.0  ;;  %v5280_v61 = vpop.eup %5279 }
 0x720   : > { %2248 = vadd.xlane.f32.xlu0 %v2247_v48  ;;  %2451 = vadd.xlane.f32.xlu1 %v2450_v54  ;;  %v2250_v4 = vsel %vm1646_vm3, %v5280_v61, 0.0 }
 0x724   : > { %2251 = vadd.xlane.f32.xlu1 %v2250_v4 }
 0x735   : > { %2259 = vrot.lane.b32.xlu1 %v5884_v9, %s5515_s18 }
 0x736   : > { %2261 = vrot.lane.b32.xlu0 %v5891_v19, %s5515_s18 }
 0x739   : > { %2544 = vrot.lane.b32.xlu1 %v5850_v39, %s5515_s18 }
 0x73a   : > { %2538 = vrot.lane.b32.xlu0 %v5860_v46, %s5515_s18 }
 0x73d   : > { %2542 = vrot.lane.b32.xlu1 %v5856_v42, %s5515_s18 }
 0x741   : > { %2540 = vrot.lane.b32.xlu1 %v5872_v45, %s5515_s18 }
 0x7a5   : > { %v2449_v8 = vpop.xlane.xlu0 %2448 }
 0x7a9   : > { %v2452_v10 = vpop.xlane.xlu1 %2451  ;;  %v2249_v22 = vpop.xlane.xlu0 %2248 }
 0x7aa   : > { %5281 = vrcp.f32 %v2249_v22 }
 0x7ab   : > { %5283 = vrcp.f32 %v2449_v8 }
 0x7ad   : > { %v2252_v9 = vpop.xlane.xlu1 %2251  ;;  %v2262_v12 = vpop.permute.xlu0 %2261 }
 0x7ae   : > { %5285 = vrcp.f32 %v2252_v9  ;;  %4992 = vmatprep.subr.mxu1 %v2262_v12 }
 0x7af   : > { %4993 = vmatpush3.msra.mxu1 %v2262_v12  ;;  %5287 = vrcp.f32 %v2452_v10 }
 0x7b1   : > { %v2260_v39 = vpop.permute.xlu1 %2259  ;;  %v2539_v29 = vpop.permute.xlu0 %2538 }
 0x7b2   : > { %4994 = vmatprep.subr.mxu1 %v2260_v39 }
 0x7b3   : > { %4995 = vmatpush3.msra.mxu1 %v2260_v39 }
 0x7b4   : > { %5006 = vmatprep.subr.mxu1 %v5904_v47 }
 0x7b5   : > { %v2545_v21 = vpop.permute.xlu1 %2544 }
 0x7b7   : > { %v5282_v42 = vpop.eup %5281 }
 0x7b8   : > { %v2255_v46 = vmul.f32 %v5282_v42, %v5276_v41  ;;  %v5284_v19 = vpop.eup %5283 }
 0x7b9   : > { %v2455_v24 = vmul.f32 %v5284_v19, %v5274_v6  ;;  %v2543_v30 = vpop.permute.xlu1 %2542 }
 0x7ba   : > { %4996 = vmatprep.mubr.msk.f32.mxu1 %vm1646_vm3, %v2255_v46 }
 0x7bb   : > { %v5286_v45 = vpop.eup %5285 }
 0x7bc   : > { %v2256_v14 = vmul.f32 %v5286_v45, %v5280_v61  ;;  %v5288_v20 = vpop.eup %5287 }
 0x7bd   : > { %v2456_v26 = vmul.f32 %v5288_v20, %v5278_v7  ;;  %v2541_v15 = vpop.permute.xlu1 %2540 }
 0x7be   : > { %4997 = vmatmul.mubr.msk.f32.vlgmr.msra.gmra.mxu1 %vm1646_vm3, %v2256_v14  ;;  %v2770_v14 = vmul.f32 0.125, %v5810_v60 }
 0x7bf   : > { %5007 = vmatpush3.msra.mxu1 %v5904_v47  ;;  %5010 = vmatprep.mubr.msk.f32.mxu1 %vm1646_vm3, %v2455_v24 }
 0x7c0   : > { %5008 = vmatprep.subr.mxu1 %v5906_v55 }
 0x7c1   : > { %5009 = vmatpush3.msra.mxu1 %v5906_v55 }
 0x7c2   : > { %5013 = vmatprep.subr.msk.mxu1 %vm1558_vm0, %v2545_v21  ;;  %5011 = vmatmul.mubr.msk.f32.vlgmr.msra.gmra.mxu1 %vm1646_vm3, %v2456_v26 }
 0x7c3   : > { %5014 = vmatpush3.xpose.msk.msra.mxu1 %vm1558_vm0, %v2545_v21  ;;  %5017 = vmatprep.mubr.msk.f32.mxu1 %vm1558_vm0, %v2539_v29 }
 0x7c4   : > { %5015 = vmatprep.subr.msk.mxu1 %vm1558_vm0, %v2543_v30 }
 0x7c7   : > { %5016 = vmatpush3.xpose.msk.msra.mxu1 %vm1558_vm0, %v2543_v30 }
 0x7c8   : > { %5034 = vmatprep.subr.mxu1 %v5900_v52 }
 0x7ca   : > { %5018 = vmatmul.mubr.msk.f32.vlgmr.msra.gmra.mxu1 %vm1558_vm0, %v2541_v15 }
 0x7cb   : > { %5035 = vmatpush3.msra.mxu1 %v5900_v52 }
 0x7cc   : > { %5036 = vmatprep.subr.mxu1 %v5896_v23 }
 0x7cd   : > { %5037 = vmatpush3.msra.mxu1 %v5896_v23 }
 0x87e   : > { %v6026_v32 = vpop.f32.mrf.mxu1 }
 0x880   : > { %v6028_v63 = vpop.f32.mrf.mxu1 }
 0x882   : > { %v6030_v50 = vpop.f32.mrf.mxu1 }
 0x884   : > { %v6032_v38 = vpop.f32.mrf.mxu1 }
 0x88a   : > { %v5019_v16 = vpop.f32.mrf.mxu1 }
 0x88b   : > { %v2626_v40 = vadd.f32 %v5019_v16, %v5914_v18 }
 0x88c   : > { %v2620_v34 = vpop.f32.mrf.mxu1 }
 0x88d   : > { %v2621_v56 = vadd.f32 %v2620_v34, %v5912_v17  ;;  %v2632_v36 = vsel %vm1646_vm3, %v2626_v40, -inf }
 0x88e   : > { %2633 = vmax.xlane.f32.xlu1 %v2632_v36 }
 0x88f   : > { %v2629_v6 = vsel %vm1646_vm3, %v2621_v56, -inf }
 0x890   : > { %2630 = vmax.xlane.f32.xlu0 %v2629_v6 }
 0x89f   : > { %2653 = vrot.lane.b32.xlu1 %v5906_v55, %s5515_s18 }
 0x917   : > { %v2634_v37 = vpop.xlane.xlu1 %2633 }
 0x918   : > { %v2636_v41 = vsub.f32 %v2626_v40, %v2634_v37 }
 0x919   : > { %v2631_v7 = vpop.xlane.xlu0 %2630 }
 0x91a   : > { %v2639_v48 = vmul.f32 1.442695, %v2636_v41  ;;  %v2635_v54 = vsub.f32 %v2621_v56, %v2631_v7 }
 0x91b   : > { %v2654_v39 = vpop.permute.xlu1 %2653 }
 0x91c   : > { %5289 = vpow2.f32 %v2639_v48  ;;  %v2637_v61 = vmul.f32 1.442695, %v2635_v54 }
 0x91e   : > { %5291 = vpow2.f32 %v2637_v61 }
 0x929   : > { %v5290_v4 = vpop.eup %5289 }
 0x92a   : > { %v2644_v8 = vsel %vm1646_vm3, %v5290_v4, 0.0 }
 0x92b   : > { %v5292_v10 = vpop.eup %5291  ;;  %2645 = vadd.xlane.f32.xlu0 %v2644_v8 }
 0x92c   : > { %v2641_v22 = vsel %vm1646_vm3, %v5292_v10, 0.0 }
 0x92f   : > { %2642 = vadd.xlane.f32.xlu0 %v2641_v22 }
 0x945   : > { %2655 = vrot.lane.b32.xlu0 %v5904_v47, %s5515_s18  ;;  %v2771_v47 = vmul.f32 0.125, %v5814_v2 }
 0x9b4   : > { %v2646_v55 = vpop.xlane.xlu0 %2645 }
 0x9b5   : > { %5293 = vrcp.f32 %v2646_v55 }
 0x9b8   : > { %v2643_v9 = vpop.xlane.xlu0 %2642 }
 0x9b9   : > { %5295 = vrcp.f32 %v2643_v9 }
 0x9bc   : > { %v2656_v12 = vpop.permute.xlu0 %2655 }
 0x9bd   : > { %5020 = vmatprep.subr.mxu0 %v2656_v12 }
 0x9be   : > { %5021 = vmatpush3.msra.mxu0 %v2656_v12 }
 0x9bf   : > { %5022 = vmatprep.subr.mxu0 %v2654_v39 }
 0x9c0   : > { %5023 = vmatpush3.msra.mxu0 %v2654_v39 }
 0x9c1   : > { %5027 = vmatprep.subr.msk.mxu0 %vm1558_vm0, %v5838_v33 }
 0x9c2   : > { %v5294_v42 = vpop.eup %5293 }
 0x9c3   : > { %v2650_v45 = vmul.f32 %v5294_v42, %v5290_v4 }
 0x9c6   : > { %v5296_v46 = vpop.eup %5295 }
 0x9c7   : > { %v2649_v19 = vmul.f32 %v5296_v46, %v5292_v10 }
 0x9c9   : > { %5024 = vmatprep.mubr.msk.f32.mxu0 %vm1646_vm3, %v2649_v19 }
 0x9ca   : > { %5025 = vmatmul.mubr.msk.f32.vlgmr.msra.gmra.mxu0 %vm1646_vm3, %v2650_v45 }
 0x9cb   : > { %5028 = vmatpush3.xpose.msk.msra.mxu0 %vm1558_vm0, %v5838_v33  ;;  %5031 = vmatprep.mubr.msk.f32.mxu0 %vm1558_vm0, %v2770_v14 }
 0x9cc   : > { %5029 = vmatprep.subr.msk.mxu0 %vm1558_vm0, %v5834_v28 }
 0x9cf   : > { %5030 = vmatpush3.xpose.msk.msra.mxu0 %vm1558_vm0, %v5834_v28 }
 0x9d2   : > { %5032 = vmatmul.mubr.msk.f32.vlgmr.msra.gmra.mxu0 %vm1558_vm0, %v2771_v47 }
 0xa8a   : > { %v6058_v60 = vpop.f32.mrf.mxu0 }
 0xa8c   : > { %v6060_v20 = vpop.f32.mrf.mxu0 }
 0xa92   : > { %v5033_v21 = vpop.f32.mrf.mxu0 }
 0xa93   : > { %v2856_v24 = vadd.f32 %v5033_v21, %v5914_v18 }
 0xa94   : > { %v2850_v26 = vpop.f32.mrf.mxu0 }
 0xa95   : > { %v2851_v29 = vadd.f32 %v2850_v26, %v5912_v17  ;;  %v2862_v30 = vsel %vm1646_vm3, %v2856_v24, -inf }
 0xa96   : > { %2863 = vmax.xlane.f32.xlu0 %v2862_v30 }
 0xa97   : > { %v2859_v15 = vsel %vm1646_vm3, %v2851_v29, -inf }
 0xa98   : > { %2860 = vmax.xlane.f32.xlu1 %v2859_v15 }
 0xb1f   : > { %v2864_v16 = vpop.xlane.xlu0 %2863 }
 0xb20   : > { %v2866_v2 = vsub.f32 %v2856_v24, %v2864_v16 }
 0xb21   : > { %v2861_v40 = vpop.xlane.xlu1 %2860 }
 0xb22   : > { %v2869_v34 = vmul.f32 1.442695, %v2866_v2  ;;  %v2865_v56 = vsub.f32 %v2851_v29, %v2861_v40 }
 0xb24   : > { %5297 = vpow2.f32 %v2869_v34  ;;  %v2867_v36 = vmul.f32 1.442695, %v2865_v56 }
 0xb26   : > { %5299 = vpow2.f32 %v2867_v36 }
 0xb31   : > { %v5298_v6 = vpop.eup %5297 }
 0xb32   : > { %v2874_v37 = vsel %vm1646_vm3, %v5298_v6, 0.0 }
 0xb33   : > { %v5300_v41 = vpop.eup %5299  ;;  %2875 = vadd.xlane.f32.xlu1 %v2874_v37 }
 0xb34   : > { %v2871_v7 = vsel %vm1646_vm3, %v5300_v41, 0.0 }
 0xb35   : > { %2872 = vadd.xlane.f32.xlu0 %v2871_v7 }
 0xb44   : > { %2966 = vrot.lane.b32.xlu1 %v5834_v28, %s5515_s18 }
 0xb48   : > { %2962 = vrot.lane.b32.xlu1 %v2770_v14, %s5515_s18 }
 0xb4b   : > { %2968 = vrot.lane.b32.xlu0 %v5838_v33, %s5515_s18 }
 0xb4c   : > { %2964 = vrot.lane.b32.xlu1 %v2771_v47, %s5515_s18 }
 0xbbc   : > { %v2876_v48 = vpop.xlane.xlu1 %2875 }
 0xbbd   : > { %5301 = vrcp.f32 %v2876_v48  ;;  %v3164_v48 = vmul.f32 0.125, %v5812_v62 }
 0xbbe   : > { %v2873_v54 = vpop.xlane.xlu0 %2872 }
 0xbbf   : > { %5303 = vrcp.f32 %v2873_v54 }
 0xbc0   : > { %v2967_v4 = vpop.permute.xlu1 %2966 }
 0xbc2   : > { %v2969_v61 = vpop.permute.xlu0 %2968 }
 0xbc3   : > { %5041 = vmatprep.subr.msk.mxu1 %vm1558_vm0, %v2969_v61 }
 0xbc4   : > { %v2963_v28 = vpop.permute.xlu1 %2962 }
 0xbc8   : > { %v2965_v33 = vpop.permute.xlu1 %2964 }
 0xbca   : > { %v5302_v8 = vpop.eup %5301 }
 0xbcb   : > { %v2880_v55 = vmul.f32 %v5302_v8, %v5298_v6 }
 0xbcc   : > { %v5304_v10 = vpop.eup %5303 }
 0xbcd   : > { %v2879_v22 = vmul.f32 %v5304_v10, %v5300_v41 }
 0xbcf   : > { %5038 = vmatprep.mubr.msk.f32.mxu1 %vm1646_vm3, %v2879_v22 }
 0xbd0   : > { %5039 = vmatmul.mubr.msk.f32.vlgmr.msra.gmra.mxu1 %vm1646_vm3, %v2880_v55 }
 0xbd1   : > { %5042 = vmatpush3.xpose.msk.msra.mxu1 %vm1558_vm0, %v2969_v61  ;;  %5045 = vmatprep.mubr.msk.f32.mxu1 %vm1558_vm0, %v2963_v28 }
 0xbd2   : > { %5043 = vmatprep.subr.msk.mxu1 %vm1558_vm0, %v2967_v4 }
 0xbd5   : > { %5044 = vmatpush3.xpose.msk.msra.mxu1 %vm1558_vm0, %v2967_v4 }
 0xbd6   : > { %5062 = vmatprep.subr.mxu1 %v5902_v35 }
 0xbd8   : > { %5046 = vmatmul.mubr.msk.f32.vlgmr.msra.gmra.mxu1 %vm1558_vm0, %v2965_v33 }
 0xbd9   : > { %5063 = vmatpush3.msra.mxu1 %v5902_v35 }
 0xbda   : > { %5064 = vmatprep.subr.mxu1 %v5898_v27 }
 0xbdb   : > { %5065 = vmatpush3.msra.mxu1 %v5898_v27 }
 0xc90   : > { %v6086_v9 = vpop.f32.mrf.mxu1 }
 0xc92   : > { %v6088_v12 = vpop.f32.mrf.mxu1 }
 0xc98   : > { %v5047_v39 = vpop.f32.mrf.mxu1 }
 0xc99   : > { %v3050_v42 = vadd.f32 %v5047_v39, %v5914_v18 }
 0xc9a   : > { %v3044_v46 = vpop.f32.mrf.mxu1 }
 0xc9b   : > { %v3045_v19 = vadd.f32 %v3044_v46, %v5912_v17  ;;  %v3056_v45 = vsel %vm1646_vm3, %v3050_v42, -inf }
 0xc9c   : > { %3057 = vmax.xlane.f32.xlu1 %v3056_v45 }
 0xc9d   : > { %v3053_v14 = vsel %vm1646_vm3, %v3045_v19, -inf }
 0xc9e   : > { %3054 = vmax.xlane.f32.xlu0 %v3053_v14 }
 0xcad   : > { %3077 = vrot.lane.b32.xlu1 %v5896_v23, %s5515_s18 }
 0xd25   : > { %v3058_v47 = vpop.xlane.xlu1 %3057 }
 0xd26   : > { %v3060_v21 = vsub.f32 %v3050_v42, %v3058_v47 }
 0xd27   : > { %v3055_v24 = vpop.xlane.xlu0 %3054 }
 0xd28   : > { %v3063_v26 = vmul.f32 1.442695, %v3060_v21  ;;  %v3059_v29 = vsub.f32 %v3045_v19, %v3055_v24 }
 0xd29   : > { %v3078_v36 = vpop.permute.xlu1 %3077 }
 0xd2a   : > { %5305 = vpow2.f32 %v3063_v26  ;;  %v3061_v30 = vmul.f32 1.442695, %v3059_v29 }
 0xd2c   : > { %5307 = vpow2.f32 %v3061_v30 }
 0xd37   : > { %v5306_v15 = vpop.eup %5305 }
 0xd38   : > { %v3068_v16 = vsel %vm1646_vm3, %v5306_v15, 0.0 }
 0xd39   : > { %v5308_v2 = vpop.eup %5307  ;;  %3069 = vadd.xlane.f32.xlu0 %v3068_v16 }
 0xd3a   : > { %v3065_v40 = vsel %vm1646_vm3, %v5308_v2, 0.0 }
 0xd3d   : > { %3066 = vadd.xlane.f32.xlu0 %v3065_v40 }
 0xd53   : > { %3079 = vrot.lane.b32.xlu0 %v5900_v52, %s5515_s18  ;;  %v3165_v52 = vmul.f32 0.125, %v5816_v3 }
 0xdc2   : > { %v3070_v23 = vpop.xlane.xlu0 %3069 }
 0xdc3   : > { %5309 = vrcp.f32 %v3070_v23 }
 0xdc6   : > { %v3067_v34 = vpop.xlane.xlu0 %3066 }
 0xdc7   : > { %5311 = vrcp.f32 %v3067_v34 }
 0xdca   : > { %v3080_v56 = vpop.permute.xlu0 %3079 }
 0xdcb   : > { %5048 = vmatprep.subr.mxu0 %v3080_v56 }
 0xdcc   : > { %5049 = vmatpush3.msra.mxu0 %v3080_v56 }
 0xdcd   : > { %5050 = vmatprep.subr.mxu0 %v3078_v36 }
 0xdce   : > { %5051 = vmatpush3.msra.mxu0 %v3078_v36 }
 0xdcf   : > { %5055 = vmatprep.subr.msk.mxu0 %vm1558_vm0, %v5880_v58 }
 0xdd0   : > { %v5310_v6 = vpop.eup %5309 }
 0xdd1   : > { %v3074_v7 = vmul.f32 %v5310_v6, %v5306_v15 }
 0xdd4   : > { %v5312_v37 = vpop.eup %5311 }
 0xdd5   : > { %v3073_v41 = vmul.f32 %v5312_v37, %v5308_v2 }
 0xdd7   : > { %5052 = vmatprep.mubr.msk.f32.mxu0 %vm1646_vm3, %v3073_v41 }
 0xdd8   : > { %5053 = vmatmul.mubr.msk.f32.vlgmr.msra.gmra.mxu0 %vm1646_vm3, %v3074_v7 }
 0xdd9   : > { %5056 = vmatpush3.xpose.msk.msra.mxu0 %vm1558_vm0, %v5880_v58  ;;  %5059 = vmatprep.mubr.msk.f32.mxu0 %vm1558_vm0, %v3164_v48 }
 0xdda   : > { %5057 = vmatprep.subr.msk.mxu0 %vm1558_vm0, %v5876_v49 }
 0xddd   : > { %5058 = vmatpush3.xpose.msk.msra.mxu0 %vm1558_vm0, %v5876_v49 }
 0xde0   : > { %5060 = vmatmul.mubr.msk.f32.vlgmr.msra.gmra.mxu0 %vm1558_vm0, %v3165_v52 }
 0xe98   : > { %v6114_v62 = vpop.f32.mrf.mxu0 }
 0xe9a   : > { %v6116_v54 = vpop.f32.mrf.mxu0 }
 0xea0   : > { %v5061_v61 = vpop.f32.mrf.mxu0 }
 0xea1   : > { %v3250_v4 = vadd.f32 %v5061_v61, %v5914_v18 }
 0xea2   : > { %v3244_v8 = vpop.f32.mrf.mxu0 }
 0xea3   : > { %v3245_v10 = vadd.f32 %v3244_v8, %v5912_v17  ;;  %v3256_v22 = vsel %vm1646_vm3, %v3250_v4, -inf }
 0xea4   : > { %3257 = vmax.xlane.f32.xlu0 %v3256_v22 }
 0xea5   : > { %v3253_v55 = vsel %vm1646_vm3, %v3245_v10, -inf }
 0xea6   : > { %3254 = vmax.xlane.f32.xlu1 %v3253_v55 }
 0xf2d   : > { %v3258_v28 = vpop.xlane.xlu0 %3257 }
 0xf2e   : > { %v3260_v3 = vsub.f32 %v3250_v4, %v3258_v28 }
 0xf2f   : > { %v3255_v33 = vpop.xlane.xlu1 %3254 }
 0xf30   : > { %v3263_v39 = vmul.f32 1.442695, %v3260_v3  ;;  %v3259_v42 = vsub.f32 %v3245_v10, %v3255_v33 }
 0xf32   : > { %5313 = vpow2.f32 %v3263_v39  ;;  %v3261_v46 = vmul.f32 1.442695, %v3259_v42 }
 0xf34   : > { %5315 = vpow2.f32 %v3261_v46 }
 0xf3f   : > { %v5314_v19 = vpop.eup %5313 }
 0xf40   : > { %v3268_v45 = vsel %vm1646_vm3, %v5314_v19, 0.0 }
 0xf41   : > { %v5316_v14 = vpop.eup %5315  ;;  %3269 = vadd.xlane.f32.xlu1 %v3268_v45 }
 0xf42   : > { %v3265_v47 = vsel %vm1646_vm3, %v5316_v14, 0.0 }
 0xf43   : > { %3266 = vadd.xlane.f32.xlu0 %v3265_v47 }
 0xf52   : > { %3360 = vrot.lane.b32.xlu1 %v5876_v49, %s5515_s18 }
 0xf56   : > { %3356 = vrot.lane.b32.xlu1 %v3164_v48, %s5515_s18 }
 0xf59   : > { %3362 = vrot.lane.b32.xlu0 %v5880_v58, %s5515_s18 }
 0xf5a   : > { %3358 = vrot.lane.b32.xlu1 %v3165_v52, %s5515_s18 }
 0xfca   : > { %v3270_v21 = vpop.xlane.xlu1 %3269 }
 0xfcb   : > { %5317 = vrcp.f32 %v3270_v21 }
 0xfcc   : > { %v3267_v24 = vpop.xlane.xlu0 %3266 }
 0xfcd   : > { %5319 = vrcp.f32 %v3267_v24 }
 0xfce   : > { %v3361_v29 = vpop.permute.xlu1 %3360 }
 0xfd0   : > { %v3363_v26 = vpop.permute.xlu0 %3362 }
 0xfd1   : > { %5069 = vmatprep.subr.msk.mxu1 %vm1558_vm0, %v3363_v26 }
 0xfd2   : > { %v3357_v49 = vpop.permute.xlu1 %3356 }
 0xfd6   : > { %v3359_v58 = vpop.permute.xlu1 %3358 }
 0xfd8   : > { %v5318_v30 = vpop.eup %5317 }
 0xfd9   : > { %v3274_v2 = vmul.f32 %v5318_v30, %v5314_v19 }
 0xfda   : > { %v5320_v15 = vpop.eup %5319 }
 0xfdb   : > { %v3273_v16 = vmul.f32 %v5320_v15, %v5316_v14  ;;  %v3558_v14 = vmul.f32 0.125, %v5832_v25 }
 0xfdd   : > { %5066 = vmatprep.mubr.msk.f32.mxu1 %vm1646_vm3, %v3273_v16 }
 0xfde   : > { %5067 = vmatmul.mubr.msk.f32.vlgmr.msra.gmra.mxu1 %vm1646_vm3, %v3274_v2 }
 0xfdf   : > { %5070 = vmatpush3.xpose.msk.msra.mxu1 %vm1558_vm0, %v3363_v26  ;;  %5073 = vmatprep.mubr.msk.f32.mxu1 %vm1558_vm0, %v3357_v49 }
 0xfe0   : > { %5071 = vmatprep.subr.msk.mxu1 %vm1558_vm0, %v3361_v29 }
 0xfe3   : > { %5072 = vmatpush3.xpose.msk.msra.mxu1 %vm1558_vm0, %v3361_v29 }
 0xfe4   : > { %5090 = vmatprep.subr.mxu1 %v5910_v1 }
 0xfe6   : > { %5074 = vmatmul.mubr.msk.f32.vlgmr.msra.gmra.mxu1 %vm1558_vm0, %v3359_v58 }
 0xfe7   : > { %5091 = vmatpush3.msra.mxu1 %v5910_v1 }
 0xfe8   : > { %5092 = vmatprep.subr.mxu1 %v5908_v59 }
 0xfe9   : > { %5093 = vmatpush3.msra.mxu1 %v5908_v59 }
0x109e   : > { %v6142_v40 = vpop.f32.mrf.mxu1 }
0x10a0   : > { %v6144_v23 = vpop.f32.mrf.mxu1 }
0x10a6   : > { %v5075_v34 = vpop.f32.mrf.mxu1 }
0x10a7   : > { %v3444_v56 = vadd.f32 %v5075_v34, %v5914_v18 }
0x10a8   : > { %v3438_v36 = vpop.f32.mrf.mxu1 }
0x10a9   : > { %v3439_v6 = vadd.f32 %v3438_v36, %v5912_v17  ;;  %v3450_v37 = vsel %vm1646_vm3, %v3444_v56, -inf }
0x10aa   : > { %3451 = vmax.xlane.f32.xlu1 %v3450_v37 }
0x10ab   : > { %v3447_v41 = vsel %vm1646_vm3, %v3439_v6, -inf }
0x10ac   : > { %3448 = vmax.xlane.f32.xlu0 %v3447_v41 }
0x10bb   : > { %3471 = vrot.lane.b32.xlu1 %v5898_v27, %s5515_s18 }
0x1133   : > { %v3452_v7 = vpop.xlane.xlu1 %3451 }
0x1134   : > { %v3454_v48 = vsub.f32 %v3444_v56, %v3452_v7 }
0x1135   : > { %v3449_v52 = vpop.xlane.xlu0 %3448 }
0x1136   : > { %v3457_v61 = vmul.f32 1.442695, %v3454_v48  ;;  %v3453_v4 = vsub.f32 %v3439_v6, %v3449_v52 }
0x1137   : > { %v3472_v39 = vpop.permute.xlu1 %3471 }
0x1138   : > { %5321 = vpow2.f32 %v3457_v61  ;;  %v3455_v8 = vmul.f32 1.442695, %v3453_v4 }
0x113a   : > { %5323 = vpow2.f32 %v3455_v8 }
0x1145   : > { %v5322_v10 = vpop.eup %5321 }
0x1146   : > { %v3462_v22 = vsel %vm1646_vm3, %v5322_v10, 0.0 }
0x1147   : > { %v5324_v55 = vpop.eup %5323  ;;  %3463 = vadd.xlane.f32.xlu0 %v3462_v22  ;;  %v4124_v22 = vld [vmem:[#allocation7 + $0x470] sm:$0xff] }
0x1148   : > { %v3459_v28 = vsel %vm1646_vm3, %v5324_v55, 0.0 }
0x114b   : > { %3460 = vadd.xlane.f32.xlu0 %v3459_v28  ;;  %v4121_v28 = vld [vmem:[#allocation7 + $0x458] sm:$0xff] }
0x1161   : > { %3473 = vrot.lane.b32.xlu0 %v5902_v35, %s5515_s18  ;;  %v3559_v35 = vmul.f32 0.125, %v5836_v31 }
0x11d0   : > { %v3464_v27 = vpop.xlane.xlu0 %3463 }
0x11d1   : > { %5325 = vrcp.f32 %v3464_v27  ;;  %v4120_v27 = vld [vmem:[#allocation7 + $0x450] sm:$0xff] }
0x11d4   : > { %v3461_v3 = vpop.xlane.xlu0 %3460 }
0x11d5   : > { %5327 = vrcp.f32 %v3461_v3  ;;  %v4118_v3 = vld [vmem:[#allocation7 + $0x440] sm:$0xff] }
0x11d8   : > { %v3474_v33 = vpop.permute.xlu0 %3473 }
0x11d9   : > { %5076 = vmatprep.subr.mxu0 %v3474_v33 }
0x11da   : > { %5077 = vmatpush3.msra.mxu0 %v3474_v33  ;;  %v4117_v33 = vld [vmem:[#allocation7 + $0x438] sm:$0xff] }
0x11db   : > { %5078 = vmatprep.subr.mxu0 %v3472_v39 }
0x11dc   : > { %5079 = vmatpush3.msra.mxu0 %v3472_v39  ;;  %v4115_v39 = vld [vmem:[#allocation7 + $0x428] sm:$0xff] }
0x11dd   : > { %5083 = vmatprep.subr.msk.mxu0 %vm1558_vm0, %v5882_v5 }
0x11de   : > { %v5326_v42 = vpop.eup %5325 }
0x11df   : > { %v3468_v45 = vmul.f32 %v5326_v42, %v5322_v10  ;;  %v4114_v42 = vld [vmem:[#allocation7 + $0x420] sm:$0xff] }
0x11e2   : > { %v5328_v46 = vpop.eup %5327 }
0x11e3   : > { %v3467_v19 = vmul.f32 %v5328_v46, %v5324_v55  ;;  %v4123_v55 = vld [vmem:[#allocation7 + $0x468] sm:$0xff]  ;;  %v4112_v46 = vld [vmem:[#allocation7 + $0x410] sm:$0xff] }
0x11e5   : > { %5080 = vmatprep.mubr.msk.f32.mxu0 %vm1646_vm3, %v3467_v19  ;;  %v4111_v19 = vld [vmem:[#allocation7 + $0x408] sm:$0xff] }
0x11e6   : > { %5081 = vmatmul.mubr.msk.f32.vlgmr.msra.gmra.mxu0 %vm1646_vm3, %v3468_v45  ;;  %v4109_v45 = vld [vmem:[#allocation7 + $0x3f8] sm:$0xff] }
0x11e7   : > { %5084 = vmatpush3.xpose.msk.msra.mxu0 %vm1558_vm0, %v5882_v5  ;;  %5087 = vmatprep.mubr.msk.f32.mxu0 %vm1558_vm0, %v3558_v14 }
0x11e8   : > { %5085 = vmatprep.subr.msk.mxu0 %vm1558_vm0, %v5878_v53 }
0x11eb   : > { %5086 = vmatpush3.xpose.msk.msra.mxu0 %vm1558_vm0, %v5878_v53 }
0x11ee   : > { %5088 = vmatmul.mubr.msk.f32.vlgmr.msra.gmra.mxu0 %vm1558_vm0, %v3559_v35 }
0x12a6   : > { %v6170_v25 = vpop.f32.mrf.mxu0 }
0x12a8   : > { %v6172_v47 = vpop.f32.mrf.mxu0 }
0x12ae   : > { %v5089_v21 = vpop.f32.mrf.mxu0 }
0x12af   : > { %v3644_v24 = vadd.f32 %v5089_v21, %v5914_v18  ;;  %v4105_v21 = vld [vmem:[#allocation7 + $0x3d8] sm:$0xff] }
0x12b0   : > { %v3638_v26 = vpop.f32.mrf.mxu0 }
0x12b1   : > { %v3639_v29 = vadd.f32 %v3638_v26, %v5912_v17  ;;  %v3650_v30 = vsel %vm1646_vm3, %v3644_v24, -inf  ;;  %v4102_v26 = vld [vmem:[#allocation7 + $0x3c0] sm:$0xff] }
0x12b2   : > { %3651 = vmax.xlane.f32.xlu0 %v3650_v30  ;;  %v4099_v30 = vld [vmem:[#allocation7 + $0x3a8] sm:$0xff] }
0x12b3   : > { %v3647_v15 = vsel %vm1646_vm3, %v3639_v29, -inf }
0x12b4   : > { %3648 = vmax.xlane.f32.xlu1 %v3647_v15  ;;  %v4097_v15 = vld [vmem:[#allocation7 + $0x398] sm:$0xff] }
0x133b   : > { %v3652_v16 = vpop.xlane.xlu0 %3651 }
0x133c   : > { %v3654_v31 = vsub.f32 %v3644_v24, %v3652_v16  ;;  %v4103_v24 = vld [vmem:[#allocation7 + $0x3c8] sm:$0xff]  ;;  %v4096_v16 = vld [vmem:[#allocation7 + $0x390] sm:$0xff] }
0x133d   : > { %v3649_v2 = vpop.xlane.xlu1 %3648 }
0x133e   : > { %v3657_v49 = vmul.f32 1.442695, %v3654_v31  ;;  %v3653_v58 = vsub.f32 %v3639_v29, %v3649_v2  ;;  %v4100_v29 = vld [vmem:[#allocation7 + $0x3b0] sm:$0xff]  ;;  %v4094_v31 = vld [vmem:[#allocation7 + $0x380] sm:$0xff]  ;;  %v4093_v2 = vld [vmem:[#allocation7 + $0x378] sm:$0xff] }
0x1340   : > { %5329 = vpow2.f32 %v3657_v49  ;;  %v3655_v34 = vmul.f32 1.442695, %v3653_v58  ;;  %v4091_v49 = vld [vmem:[#allocation7 + $0x368] sm:$0xff] }
0x1342   : > { %5331 = vpow2.f32 %v3655_v34 }
0x134d   : > { %v5330_v56 = vpop.eup %5329 }
0x134e   : > { %v3662_v36 = vsel %vm1646_vm3, %v5330_v56, 0.0 }
0x134f   : > { %v5332_v6 = vpop.eup %5331  ;;  %3663 = vadd.xlane.f32.xlu1 %v3662_v36 }
0x1350   : > { %v3659_v37 = vsel %vm1646_vm3, %v5332_v6, 0.0 }
0x1351   : > { %3660 = vadd.xlane.f32.xlu0 %v3659_v37 }
0x1360   : > { %3754 = vrot.lane.b32.xlu1 %v5878_v53, %s5515_s18 }
0x1364   : > { %3750 = vrot.lane.b32.xlu1 %v3558_v14, %s5515_s18  ;;  %v4108_v14 = vld [vmem:[#allocation7 + $0x3f0] sm:$0xff] }
0x1367   : > { %3756 = vrot.lane.b32.xlu0 %v5882_v5, %s5515_s18 }
0x1368   : > { %3752 = vrot.lane.b32.xlu1 %v3559_v35, %s5515_s18  ;;  %v4106_v35 = vld [vmem:[#allocation7 + $0x3e0] sm:$0xff] }
0x13d8   : > { %v3664_v41 = vpop.xlane.xlu1 %3663 }
0x13d9   : > { %5333 = vrcp.f32 %v3664_v41 }
0x13da   : > { %v3661_v7 = vpop.xlane.xlu0 %3660 }
0x13db   : > { %5335 = vrcp.f32 %v3661_v7 }
0x13dc   : > { %v3755_v52 = vpop.permute.xlu1 %3754 }
0x13de   : > { %v3757_v48 = vpop.permute.xlu0 %3756 }
0x13df   : > { %5097 = vmatprep.subr.msk.mxu1 %vm1558_vm0, %v3757_v48 }
0x13e0   : > { %v3751_v53 = vpop.permute.xlu1 %3750 }
0x13e4   : > { %v3753_v5 = vpop.permute.xlu1 %3752 }
0x13e6   : > { %v5334_v61 = vpop.eup %5333 }
0x13e7   : > { %v3668_v10 = vmul.f32 %v5334_v61, %v5330_v56  ;;  %v4087_v61 = vld [vmem:[#allocation7 + $0x348] sm:$0xff] }
0x13e8   : > { %v5336_v4 = vpop.eup %5335 }
0x13e9   : > { %v3667_v8 = vmul.f32 %v5336_v4, %v5332_v6  ;;  %v4085_v4 = vld [vmem:[#allocation7 + $0x338] sm:$0xff] }
0x13eb   : > { %5094 = vmatprep.mubr.msk.f32.mxu1 %vm1646_vm3, %v3667_v8  ;;  %v4084_v8 = vld [vmem:[#allocation7 + $0x330] sm:$0xff] }
0x13ec   : > { %5095 = vmatmul.mubr.msk.f32.vlgmr.msra.gmra.mxu1 %vm1646_vm3, %v3668_v10  ;;  %v4081_v10 = vld [vmem:[#allocation7 + $0x318] sm:$0xff] }
0x13ed   : > { %5098 = vmatpush3.xpose.msk.msra.mxu1 %vm1558_vm0, %v3757_v48  ;;  %5101 = vmatprep.mubr.msk.f32.mxu1 %vm1558_vm0, %v3751_v53  ;;  %v4090_v48 = vld [vmem:[#allocation7 + $0x360] sm:$0xff] }
0x13ee   : > { %5099 = vmatprep.subr.msk.mxu1 %vm1558_vm0, %v3755_v52  ;;  %v4078_v53 = vld [vmem:[#allocation7 + $0x300] sm:$0xff] }
0x13f1   : > { %5100 = vmatpush3.xpose.msk.msra.mxu1 %vm1558_vm0, %v3755_v52  ;;  %v4088_v52 = vld [vmem:[#allocation7 + $0x350] sm:$0xff] }
0x13f2   : > { %4215 = vmatprep.subr.mxu1 %v4124_v22 }
0x13f4   : > { %5102 = vmatmul.mubr.msk.f32.vlgmr.msra.gmra.mxu1 %vm1558_vm0, %v3753_v5  ;;  %v5229_v5 = vpack.i.bf16 %v5978_v44, %v6028_v63 }
0x13f5   : > { %4279 = vmatprep.mubr.f32.mxu1 %v5514_v0  ;;  %4216 = vmatpush1.msra.mxu1 %v4123_v55 }
0x13f6   : > { %4217 = vmatprep.subr.mxu1 %v4121_v28 }
0x13f7   : > { %4218 = vmatpush1.msra.mxu1 %v4120_v27 }
0x13f8   : > { %4219 = vmatprep.subr.mxu1 %v4118_v3 }
0x13f9   : > { %4220 = vmatpush1.msra.mxu1 %v4117_v33 }
0x13fa   : > { %4221 = vmatprep.subr.mxu1 %v4115_v39 }
0x13fb   : > { %4222 = vmatpush1.msra.mxu1 %v4114_v42 }
0x13fc   : > { %4223 = vmatprep.subr.mxu1 %v4112_v46 }
0x13fd   : > { %4224 = vmatpush1.msra.mxu1 %v4111_v19 }
0x13fe   : > { %4225 = vmatprep.subr.mxu1 %v4109_v45 }
0x13ff   : > { %4226 = vmatpush1.msra.mxu1 %v4108_v14  ;;  %v4028_v14 = vld [vmem:[#allocation7 + $0x170] sm:$0xff] }
0x1400   : > { %4227 = vmatprep.subr.mxu1 %v4106_v35 }
0x1401   : > { %4228 = vmatpush1.msra.mxu1 %v4105_v21 }
0x1402   : > { %4229 = vmatprep.subr.mxu1 %v4103_v24 }
0x1403   : > { %4230 = vmatpush1.msra.mxu1 %v4102_v26 }
0x1404   : > { %4231 = vmatprep.subr.mxu1 %v4100_v29 }
0x1405   : > { %4232 = vmatpush1.msra.mxu1 %v4099_v30 }
0x1406   : > { %4233 = vmatprep.subr.mxu1 %v4097_v15  ;;  %v4027_v15 = vld [vmem:[#allocation7 + $0x168] sm:$0xff] }
0x1407   : > { %4234 = vmatpush1.msra.mxu1 %v4096_v16  ;;  %v4025_v16 = vld [vmem:[#allocation7 + $0x158] sm:$0xff] }
0x1408   : > { %4235 = vmatprep.subr.mxu1 %v4094_v31  ;;  %v4024_v31 = vld [vmem:[#allocation7 + $0x150] sm:$0xff] }
0x1409   : > { %4236 = vmatpush1.msra.mxu1 %v4093_v2  ;;  %v4022_v2 = vld [vmem:[#allocation7 + $0x140] sm:$0xff] }
0x140a   : > { %4237 = vmatprep.subr.mxu1 %v4091_v49  ;;  %v4021_v49 = vld [vmem:[#allocation7 + $0x138] sm:$0xff] }
0x140b   : > { %4238 = vmatpush1.msra.mxu1 %v4090_v48  ;;  %v4009_v48 = vld [vmem:[#allocation7 + $0xd8] sm:$0xff] }
0x140c   : > { %4239 = vmatprep.subr.mxu1 %v4088_v52  ;;  %v4007_v52 = vld [vmem:[#allocation7 + $0xc8] sm:$0xff] }
0x140d   : > { %4240 = vmatpush1.msra.mxu1 %v4087_v61  ;;  %v4006_v61 = vld [vmem:[#allocation7 + $0xc0] sm:$0xff] }
0x140e   : > { %4241 = vmatprep.subr.mxu1 %v4085_v4  ;;  %v4004_v4 = vld [vmem:[#allocation7 + $0xb0] sm:$0xff] }
0x140f   : > { %4242 = vmatpush1.msra.mxu1 %v4084_v8  ;;  %v4003_v8 = vld [vmem:[#allocation7 + $0xa8] sm:$0xff] }
0x14ac   : > { %v6195_v58 = vpop.f32.mrf.mxu1 }
0x14ae   : > { %v6197_v34 = vpop.f32.mrf.mxu1 }
0x14b4   : > { %v5103_v56 = vpop.f32.mrf.mxu1 }
0x14b5   : > { %v3838_v36 = vadd.f32 %v5103_v56, %v5914_v18  ;;  %v4082_v18 = vld [vmem:[#allocation7 + $0x320] sm:$0xff]  ;;  %v4019_v56 = vld [vmem:[#allocation7 + $0x128] sm:$0xff] }
0x14b6   : > { %v3832_v6 = vpop.f32.mrf.mxu1  ;;  %4243 = vmatprep.subr.mxu1 %v4082_v18  ;;  %v4001_v18 = vld [vmem:[#allocation7 + $0x98] sm:$0xff] }
0x14b7   : > { %v3833_v37 = vadd.f32 %v3832_v6, %v5912_v17  ;;  %v3844_v41 = vsel %vm1646_vm3, %v3838_v36, -inf  ;;  %4244 = vmatpush1.msra.mxu1 %v4081_v10  ;;  %v4079_v17 = vld [vmem:[#allocation7 + $0x308] sm:$0xff]  ;;  %v4016_v6 = vld [vmem:[#allocation7 + $0x110] sm:$0xff] }
0x14b8   : > { %3845 = vmax.xlane.f32.xlu1 %v3844_v41  ;;  %4245 = vmatprep.subr.mxu1 %v4079_v17  ;;  %v4013_v41 = vld [vmem:[#allocation7 + $0xf8] sm:$0xff]  ;;  %v4000_v10 = vld [vmem:[#allocation7 + $0x90] sm:$0xff]  ;;  %v3998_v17 = vld [vmem:[#allocation7 + $0x80] sm:$0xff] }
0x14b9   : > { %v3841_v7 = vsel %vm1646_vm3, %v3833_v37, -inf  ;;  %4246 = vmatpush1.msra.mxu1 %v4078_v53  ;;  %v3997_v53 = vld [vmem:[#allocation7 + $0x78] sm:$0xff] }
0x14ba   : > { %3842 = vmax.xlane.f32.xlu0 %v3841_v7  ;;  %v4010_v7 = vld [vmem:[#allocation7 + $0xe0] sm:$0xff] }
0x14c9   : > { %3865 = vrot.lane.b32.xlu1 %v5908_v59, %s5515_s18 }
0x14cd   : > { %2758 = vrot.lane.b32.xlu1 %v6060_v20, %s5515_s18 }
0x14d1   : > { %5230 = vrot.lane.b32.xlu1 %v5229_v5, %s5515_s18  ;;  %v3995_v5 = vld [vmem:[#allocation7 + $0x68] sm:$0xff] }
0x1541   : > { %v3846_v22 = vpop.xlane.xlu1 %3845 }
0x1542   : > { %v3848_v55 = vsub.f32 %v3838_v36, %v3846_v22  ;;  %v4018_v36 = vld [vmem:[#allocation7 + $0x120] sm:$0xff] }
0x1543   : > { %v3843_v28 = vpop.xlane.xlu0 %3842  ;;  %v3994_v22 = vld [vmem:[#allocation7 + $0x60] sm:$0xff] }
0x1544   : > { %v3851_v27 = vmul.f32 1.442695, %v3848_v55  ;;  %v3847_v3 = vsub.f32 %v3833_v37, %v3843_v28  ;;  %v4015_v37 = vld [vmem:[#allocation7 + $0x108] sm:$0xff]  ;;  %v3992_v55 = vld [vmem:[#allocation7 + $0x50] sm:$0xff] }
0x1545   : > { %v3866_v33 = vpop.permute.xlu1 %3865  ;;  %v3991_v28 = vld [vmem:[#allocation7 + $0x48] sm:$0xff] }
0x1546   : > { %5337 = vpow2.f32 %v3851_v27  ;;  %v3849_v39 = vmul.f32 1.442695, %v3847_v3  ;;  %v3989_v27 = vld [vmem:[#allocation7 + $0x38] sm:$0xff]  ;;  %v3988_v3 = vld [vmem:[#allocation7 + $0x30] sm:$0xff] }
0x1548   : > { %5339 = vpow2.f32 %v3849_v39  ;;  %v3985_v39 = vld [vmem:[#allocation7 + $0x18] sm:$0xff] }
0x1549   : > { %v2759_v59 = vpop.permute.xlu1 %2758 }
0x154a   : > { %v6212_v42 = vsel %vm1558_vm0, %v6032_v38, %v2759_v59  ;;  %v3983_v59 = vld [vmem:[#allocation7 + $0x8] sm:$0xff] }
0x154b   : > { %4280 = vmatmul.mubr.f32.vlgmr.msra.gmra.mxu1 %v6212_v42 }
0x154c   : > { %4285 = vmatprep.mubr.f32.mxu1 %v5514_v0 }
0x1553   : > { %v5338_v44 = vpop.eup %5337 }
0x1554   : > { %v3856_v63 = vsel %vm1646_vm3, %v5338_v44, 0.0 }
0x1555   : > { %v5340_v20 = vpop.eup %5339  ;;  %3857 = vadd.xlane.f32.xlu0 %v3856_v63  ;;  %v4076_v63 = vld [vmem:[#allocation7 + $0x2f0] sm:$0xff] }
0x1556   : > { %v3853_v46 = vsel %vm1646_vm3, %v5340_v20, 0.0 }
0x1559   : > { %3854 = vadd.xlane.f32.xlu0 %v3853_v46  ;;  %v4073_v46 = vld [vmem:[#allocation7 + $0x2d8] sm:$0xff] }
0x156f   : > { %3867 = vrot.lane.b32.xlu0 %v5910_v1, %s5515_s18  ;;  %v6227_v1 = vpop.permute.xlu1 %5230 }
0x1570   : > { %v5232_v26 = vunpack.i.l.bf16 %v6227_v1 }
0x1573   : > { %2760 = vrot.lane.b32.xlu0 %v6058_v60, %s5515_s18 }
0x15de   : > { %v3858_v38 = vpop.xlane.xlu0 %3857 }
0x15df   : > { %5341 = vrcp.f32 %v3858_v38  ;;  %v4072_v38 = vld [vmem:[#allocation7 + $0x2d0] sm:$0xff] }
0x15e2   : > { %v3855_v19 = vpop.xlane.xlu0 %3854 }
0x15e3   : > { %5343 = vrcp.f32 %v3855_v19  ;;  %v4070_v19 = vld [vmem:[#allocation7 + $0x2c0] sm:$0xff] }
0x15e6   : > { %v3868_v45 = vpop.permute.xlu0 %3867 }
0x15e7   : > { %5104 = vmatprep.subr.mxu0 %v3868_v45 }
0x15e8   : > { %5105 = vmatpush3.msra.mxu0 %v3868_v45  ;;  %v4069_v45 = vld [vmem:[#allocation7 + $0x2b8] sm:$0xff] }
0x15e9   : > { %5106 = vmatprep.subr.mxu0 %v3866_v33 }
0x15ea   : > { %5107 = vmatpush3.msra.mxu0 %v3866_v33  ;;  %v2761_v35 = vpop.permute.xlu0 %2760  ;;  %v3986_v33 = vld [vmem:[#allocation7 + $0x20] sm:$0xff] }
0x15eb   : > { %v6224_v21 = vsel %vm1558_vm0, %v6030_v50, %v2761_v35  ;;  %4126 = vmatprep.subr.mxu0 %v4028_v14  ;;  %v6235_v50 = vsel %vm1558_vm0, %v5982_v57, %v5232_v26  ;;  %v4012_v57 = vld [vmem:[#allocation7 + $0xf0] sm:$0xff]  ;;  %v4067_v14 = vld [vmem:[#allocation7 + $0x2a8] sm:$0xff]  ;;  %v4066_v35 = vld [vmem:[#allocation7 + $0x2a0] sm:$0xff] }
0x15ec   : > { %4286 = vmatmul.mubr.f32.gmra.mxu1 %v6224_v21  ;;  %v5342_v60 = vpop.eup %5341  ;;  %v4061_v26 = vld [vmem:[#allocation7 + $0x278] sm:$0xff] }
0x15ed   : > { %4291 = vmatprep.mubr.f32.mxu1 %v5514_v0  ;;  %v3862_v30 = vmul.f32 %v5342_v60, %v5338_v44  ;;  %v3982_v44 = vld [vmem:[#allocation7] sm:$0xff]  ;;  %v4064_v60 = vld [vmem:[#allocation7 + $0x290] sm:$0xff] }
0x15f0   : > { %v5344_v24 = vpop.eup %5343 }
0x15f1   : > { %v3861_v29 = vmul.f32 %v5344_v24, %v5340_v20  ;;  %v4075_v20 = vld [vmem:[#allocation7 + $0x2e8] sm:$0xff] }
0x15f2   : > { %v4063_v24 = vld [vmem:[#allocation7 + $0x288] sm:$0xff] }
0x15f3   : > { %5108 = vmatprep.mubr.msk.f32.mxu0 %vm1646_vm3, %v3861_v29  ;;  %v4060_v29 = vld [vmem:[#allocation7 + $0x270] sm:$0xff] }
0x15f4   : > { %5109 = vmatmul.mubr.msk.f32.vlgmr.msra.gmra.mxu0 %vm1646_vm3, %v3862_v30  ;;  %v4058_v30 = vld [vmem:[#allocation7 + $0x260] sm:$0xff] }
0x15f5   : > { %4127 = vmatpush1.msra.mxu0 %v4027_v15  ;;  %4190 = vmatprep.mubr.f32.mxu0 %v6235_v50  ;;  %v4057_v15 = vld [vmem:[#allocation7 + $0x258] sm:$0xff] }
0x15f6   : > { %4128 = vmatprep.subr.mxu0 %v4025_v16  ;;  %v4055_v16 = vld [vmem:[#allocation7 + $0x248] sm:$0xff] }
0x15f7   : > { %4129 = vmatpush1.msra.mxu0 %v4024_v31  ;;  %v4054_v31 = vld [vmem:[#allocation7 + $0x240] sm:$0xff] }
0x15f8   : > { %4130 = vmatprep.subr.mxu0 %v4022_v2  ;;  %v4052_v2 = vld [vmem:[#allocation7 + $0x230] sm:$0xff] }
0x15f9   : > { %4131 = vmatpush1.msra.mxu0 %v4021_v49  ;;  %v4051_v49 = vld [vmem:[#allocation7 + $0x228] sm:$0xff] }
0x15fa   : > { %4132 = vmatprep.subr.mxu0 %v4019_v56  ;;  %v4049_v56 = vld [vmem:[#allocation7 + $0x218] sm:$0xff] }
0x15fb   : > { %4133 = vmatpush1.msra.mxu0 %v4018_v36  ;;  %v4048_v36 = vld [vmem:[#allocation7 + $0x210] sm:$0xff] }
0x15fc   : > { %4134 = vmatprep.subr.mxu0 %v4016_v6  ;;  %v4046_v6 = vld [vmem:[#allocation7 + $0x200] sm:$0xff] }
0x15fd   : > { %4135 = vmatpush1.msra.mxu0 %v4015_v37  ;;  %v4045_v37 = vld [vmem:[#allocation7 + $0x1f8] sm:$0xff] }
0x15fe   : > { %4136 = vmatprep.subr.mxu0 %v4013_v41  ;;  %v4043_v41 = vld [vmem:[#allocation7 + $0x1e8] sm:$0xff] }
0x15ff   : > { %4137 = vmatpush1.msra.mxu0 %v4012_v57  ;;  %v4042_v57 = vld [vmem:[#allocation7 + $0x1e0] sm:$0xff] }
0x1600   : > { %4138 = vmatprep.subr.mxu0 %v4010_v7  ;;  %v4040_v7 = vld [vmem:[#allocation7 + $0x1d0] sm:$0xff] }
0x1601   : > { %4139 = vmatpush1.msra.mxu0 %v4009_v48  ;;  %v4039_v48 = vld [vmem:[#allocation7 + $0x1c8] sm:$0xff] }
0x1602   : > { %4140 = vmatprep.subr.mxu0 %v4007_v52  ;;  %v4037_v52 = vld [vmem:[#allocation7 + $0x1b8] sm:$0xff] }
0x1603   : > { %4141 = vmatpush1.msra.mxu0 %v4006_v61  ;;  %v4036_v61 = vld [vmem:[#allocation7 + $0x1b0] sm:$0xff] }
0x1604   : > { %4142 = vmatprep.subr.mxu0 %v4004_v4  ;;  %v4034_v4 = vld [vmem:[#allocation7 + $0x1a0] sm:$0xff] }
0x1605   : > { %4143 = vmatpush1.msra.mxu0 %v4003_v8  ;;  %v4033_v8 = vld [vmem:[#allocation7 + $0x198] sm:$0xff] }
0x1606   : > { %4144 = vmatprep.subr.mxu0 %v4001_v18  ;;  %v5233_v18 = vunpack.i.h.bf16 %v6227_v1  ;;  %v4071_v1 = vld [vmem:[#allocation7 + $0x2c8] sm:$0xff] }
0x1607   : > { %4145 = vmatpush1.msra.mxu0 %v4000_v10  ;;  %v4031_v10 = vld [vmem:[#allocation7 + $0x188] sm:$0xff] }
0x1608   : > { %4146 = vmatprep.subr.mxu0 %v3998_v17  ;;  %v4030_v17 = vld [vmem:[#allocation7 + $0x180] sm:$0xff] }
0x1609   : > { %4147 = vmatpush1.msra.mxu0 %v3997_v53  ;;  %v6241_v53 = vsel %vm1558_vm0, %v5936_v13, %v5233_v18  ;;  %v4119_v13 = vld [vmem:[#allocation7 + $0x448] sm:$0xff]  ;;  %v4092_v18 = vld [vmem:[#allocation7 + $0x370] sm:$0xff] }
0x160a   : > { %4148 = vmatprep.subr.mxu0 %v3995_v5  ;;  %v4077_v5 = vld [vmem:[#allocation7 + $0x2f8] sm:$0xff] }
0x160b   : > { %4149 = vmatpush1.msra.mxu0 %v3994_v22  ;;  %v4029_v22 = vld [vmem:[#allocation7 + $0x178] sm:$0xff]  ;;  %4841 = vmatprep.subr.mxu1 %v4077_v5 }
0x160c   : > { %4150 = vmatprep.subr.mxu0 %v3992_v55  ;;  %v4074_v55 = vld [vmem:[#allocation7 + $0x2e0] sm:$0xff]  ;;  %4842 = vmatpush3.msra.mxu1 %v4029_v22 }
0x160d   : > { %4151 = vmatpush1.msra.mxu0 %v3991_v28  ;;  %v4026_v28 = vld [vmem:[#allocation7 + $0x160] sm:$0xff]  ;;  %4843 = vmatprep.subr.mxu1 %v4074_v55 }
0x160e   : > { %4152 = vmatprep.subr.mxu0 %v3989_v27  ;;  %v4023_v27 = vld [vmem:[#allocation7 + $0x148] sm:$0xff]  ;;  %4844 = vmatpush3.msra.mxu1 %v4026_v28  ;;  %v4086_v55 = vld [vmem:[#allocation7 + $0x340] sm:$0xff] }
0x160f   : > { %4153 = vmatpush1.msra.mxu0 %v3988_v3  ;;  %v4125_v3 = vld [vmem:[#allocation7 + $0x478] sm:$0xff]  ;;  %4845 = vmatprep.subr.mxu1 %v4071_v1  ;;  %v4083_v1 = vld [vmem:[#allocation7 + $0x328] sm:$0xff] }
0x1610   : > { %4154 = vmatprep.subr.mxu0 %v3986_v33  ;;  %v4068_v33 = vld [vmem:[#allocation7 + $0x2b0] sm:$0xff]  ;;  %4846 = vmatpush3.msra.mxu1 %v4023_v27  ;;  %v5239_v27 = vpack.i.bf16 %v6116_v54, %v6172_v47 }
0x1611   : > { %4155 = vmatpush1.msra.mxu0 %v3985_v39  ;;  %v4122_v39 = vld [vmem:[#allocation7 + $0x460] sm:$0xff]  ;;  %4847 = vmatprep.subr.mxu1 %v4068_v33  ;;  %v4281_v33 = vpop.f32.mrf.mxu1 }
0x1612   : > { %4156 = vmatprep.subr.mxu0 %v3983_v59  ;;  %v4020_v59 = vld [vmem:[#allocation7 + $0x130] sm:$0xff] }
0x1613   : > { %4157 = vmatpush1.msra.mxu0 %v3982_v44  ;;  %v4065_v44 = vld [vmem:[#allocation7 + $0x298] sm:$0xff]  ;;  %4848 = vmatpush3.msra.mxu1 %v4020_v59 }
0x1614   : > { %4158 = vmatprep.subr.mxu0 %v4076_v63  ;;  %v4017_v63 = vld [vmem:[#allocation7 + $0x118] sm:$0xff]  ;;  %4849 = vmatprep.subr.mxu1 %v4065_v44 }
0x1615   : > { %4159 = vmatpush2.msra.mxu0 %v4075_v20  ;;  %v4116_v20 = vld [vmem:[#allocation7 + $0x430] sm:$0xff]  ;;  %4850 = vmatpush3.msra.mxu1 %v4017_v63 }
0x1616   : > { %4160 = vmatprep.subr.mxu0 %v4073_v46  ;;  %v4062_v46 = vld [vmem:[#allocation7 + $0x280] sm:$0xff] }
0x1617   : > { %4161 = vmatpush2.msra.mxu0 %v4072_v38  ;;  %v4014_v38 = vld [vmem:[#allocation7 + $0x100] sm:$0xff]  ;;  %4851 = vmatprep.subr.mxu1 %v4062_v46 }
0x1618   : > { %4162 = vmatprep.subr.mxu0 %v4070_v19  ;;  %v4113_v19 = vld [vmem:[#allocation7 + $0x418] sm:$0xff]  ;;  %4852 = vmatpush3.msra.mxu1 %v4014_v38 }
0x1619   : > { %4163 = vmatpush2.msra.mxu0 %v4069_v45  ;;  %v4059_v45 = vld [vmem:[#allocation7 + $0x268] sm:$0xff] }
0x161a   : > { %4164 = vmatprep.subr.mxu0 %v4067_v14  ;;  %v4011_v14 = vld [vmem:[#allocation7 + $0xe8] sm:$0xff]  ;;  %4853 = vmatprep.subr.mxu1 %v4059_v45 }
0x161b   : > { %4165 = vmatpush2.msra.mxu0 %v4066_v35  ;;  %v4110_v35 = vld [vmem:[#allocation7 + $0x400] sm:$0xff]  ;;  %4854 = vmatpush3.msra.mxu1 %v4011_v14 }
0x161c   : > { %4166 = vmatprep.subr.mxu0 %v4064_v60  ;;  %v4056_v60 = vld [vmem:[#allocation7 + $0x250] sm:$0xff] }
0x161d   : > { %4167 = vmatpush2.msra.mxu0 %v4063_v24  ;;  %v4008_v24 = vld [vmem:[#allocation7 + $0xd0] sm:$0xff]  ;;  %4855 = vmatprep.subr.mxu1 %v4056_v60 }
0x161e   : > { %4168 = vmatprep.subr.mxu0 %v4061_v26  ;;  %v4107_v26 = vld [vmem:[#allocation7 + $0x3e8] sm:$0xff]  ;;  %4856 = vmatpush3.msra.mxu1 %v4008_v24 }
0x161f   : > { %4169 = vmatpush2.msra.mxu0 %v4060_v29  ;;  %v4053_v29 = vld [vmem:[#allocation7 + $0x238] sm:$0xff] }
0x1620   : > { %4170 = vmatprep.subr.mxu0 %v4058_v30  ;;  %v4005_v30 = vld [vmem:[#allocation7 + $0xb8] sm:$0xff]  ;;  %4857 = vmatprep.subr.mxu1 %v4053_v29 }
0x1621   : > { %4171 = vmatpush2.msra.mxu0 %v4057_v15  ;;  %v4104_v15 = vld [vmem:[#allocation7 + $0x3d0] sm:$0xff]  ;;  %4858 = vmatpush3.msra.mxu1 %v4005_v30 }
0x1622   : > { %4172 = vmatprep.subr.mxu0 %v4055_v16  ;;  %v4050_v16 = vld [vmem:[#allocation7 + $0x220] sm:$0xff] }
0x1623   : > { %4173 = vmatpush2.msra.mxu0 %v4054_v31  ;;  %v4002_v31 = vld [vmem:[#allocation7 + $0xa0] sm:$0xff]  ;;  %4859 = vmatprep.subr.mxu1 %v4050_v16 }
0x1624   : > { %4174 = vmatprep.subr.mxu0 %v4052_v2  ;;  %v4047_v2 = vld [vmem:[#allocation7 + $0x208] sm:$0xff]  ;;  %4860 = vmatpush3.msra.mxu1 %v4002_v31 }
0x1625   : > { %4175 = vmatpush2.msra.mxu0 %v4051_v49  ;;  %v3999_v49 = vld [vmem:[#allocation7 + $0x88] sm:$0xff]  ;;  %4861 = vmatprep.subr.mxu1 %v4047_v2 }
0x1626   : > { %4176 = vmatprep.subr.mxu0 %v4049_v56  ;;  %v4044_v56 = vld [vmem:[#allocation7 + $0x1f0] sm:$0xff]  ;;  %4862 = vmatpush3.msra.mxu1 %v3999_v49 }
0x1627   : > { %4177 = vmatpush2.msra.mxu0 %v4048_v36  ;;  %4863 = vmatprep.subr.mxu1 %v4044_v56  ;;  %v3996_v36 = vld [vmem:[#allocation7 + $0x70] sm:$0xff] }
0x1628   : > { %4178 = vmatprep.subr.mxu0 %v4046_v6  ;;  %4864 = vmatpush3.msra.mxu1 %v3996_v36  ;;  %v4041_v6 = vld [vmem:[#allocation7 + $0x1d8] sm:$0xff] }
0x1629   : > { %4179 = vmatpush2.msra.mxu0 %v4045_v37  ;;  %v4101_v37 = vld [vmem:[#allocation7 + $0x3b8] sm:$0xff]  ;;  %4865 = vmatprep.subr.mxu1 %v4041_v6 }
0x162a   : > { %4180 = vmatprep.subr.mxu0 %v4043_v41  ;;  %v3993_v41 = vld [vmem:[#allocation7 + $0x58] sm:$0xff] }
0x162b   : > { %4181 = vmatpush2.msra.mxu0 %v4042_v57  ;;  %v4038_v57 = vld [vmem:[#allocation7 + $0x1c0] sm:$0xff]  ;;  %4866 = vmatpush3.msra.mxu1 %v3993_v41 }
0x162c   : > { %4182 = vmatprep.subr.mxu0 %v4040_v7  ;;  %v4098_v7 = vld [vmem:[#allocation7 + $0x3a0] sm:$0xff]  ;;  %4867 = vmatprep.subr.mxu1 %v4038_v57 }
0x162d   : > { %4183 = vmatpush2.msra.mxu0 %v4039_v48  ;;  %v3990_v48 = vld [vmem:[#allocation7 + $0x40] sm:$0xff] }
0x162e   : > { %4184 = vmatprep.subr.mxu0 %v4037_v52  ;;  %4868 = vmatpush3.msra.mxu1 %v3990_v48  ;;  %v4035_v52 = vld [vmem:[#allocation7 + $0x1a8] sm:$0xff] }
0x162f   : > { %4185 = vmatpush2.msra.mxu0 %v4036_v61  ;;  %v4095_v61 = vld [vmem:[#allocation7 + $0x388] sm:$0xff]  ;;  %4869 = vmatprep.subr.mxu1 %v4035_v52 }
0x1630   : > { %4186 = vmatprep.subr.mxu0 %v4034_v4  ;;  %v3987_v4 = vld [vmem:[#allocation7 + $0x28] sm:$0xff] }
0x1631   : > { %4187 = vmatpush2.msra.mxu0 %v4033_v8  ;;  %v4032_v8 = vld [vmem:[#allocation7 + $0x190] sm:$0xff]  ;;  %4870 = vmatpush3.msra.mxu1 %v3987_v4 }
0x1632   : > { %4188 = vmatprep.subr.mxu0 %v4031_v10  ;;  %4871 = vmatprep.subr.mxu1 %v4032_v8  ;;  %v3984_v10 = vld [vmem:[#allocation7 + $0x10] sm:$0xff] }
0x1633   : > { %4189 = vmatpush2.msra.mxu0 %v4030_v17  ;;  %4872 = vmatpush3.msra.mxu1 %v3984_v10  ;;  %v4089_v17 = vld [vmem:[#allocation7 + $0x358] sm:$0xff] }
0x1634   : > { %4191 = vmatmul.mubr.f32.vlgmr.msra.gmra.mxu0 %v6241_v53  ;;  %5111 = vmatprep.subr.mxu0 %v4125_v3 }
0x1635   : > { %5112 = vmatpush3.msra.mxu0 %v4125_v3  ;;  %v4080_v3 = vld [vmem:[#allocation7 + $0x310] sm:$0xff] }
0x1636   : > { %5113 = vmatprep.subr.mxu0 %v4122_v39 }
0x1637   : > { %5114 = vmatpush3.msra.mxu0 %v4122_v39 }
0x1638   : > { %5115 = vmatprep.subr.mxu0 %v4119_v13 }
0x1639   : > { %5116 = vmatpush3.msra.mxu0 %v4119_v13  ;;  %v4283_v13 = vpop.f32.mrf.mxu1 }
0x163a   : > { %5117 = vmatprep.subr.mxu0 %v4116_v20 }
0x163b   : > { %5118 = vmatpush3.msra.mxu0 %v4116_v20 }
0x163c   : > { %5119 = vmatprep.subr.mxu0 %v4113_v19 }
0x163d   : > { %5120 = vmatpush3.msra.mxu0 %v4113_v19 }
0x163e   : > { %5121 = vmatprep.subr.mxu0 %v4110_v35 }
0x163f   : > { %5122 = vmatpush3.msra.mxu0 %v4110_v35 }
0x1640   : > { %5123 = vmatprep.subr.mxu0 %v4107_v26 }
0x1641   : > { %5124 = vmatpush3.msra.mxu0 %v4107_v26 }
0x1642   : > { %5125 = vmatprep.subr.mxu0 %v4104_v15 }
0x1643   : > { %5126 = vmatpush3.msra.mxu0 %v4104_v15 }
0x1644   : > { %5127 = vmatprep.subr.mxu0 %v4101_v37 }
0x1645   : > { %5128 = vmatpush3.msra.mxu0 %v4101_v37 }
0x1646   : > { %5129 = vmatprep.subr.mxu0 %v4098_v7 }
0x1647   : > { %5130 = vmatpush3.msra.mxu0 %v4098_v7 }
0x1648   : > { %5131 = vmatprep.subr.mxu0 %v4095_v61 }
0x1649   : > { %5132 = vmatpush3.msra.mxu0 %v4095_v61 }
0x164a   : > { %5133 = vmatprep.subr.mxu0 %v4092_v18 }
0x164b   : > { %5134 = vmatpush3.msra.mxu0 %v4092_v18 }
0x164c   : > { %5135 = vmatprep.subr.mxu0 %v4089_v17 }
0x164d   : > { %5136 = vmatpush3.msra.mxu0 %v4089_v17 }
0x164e   : > { %5137 = vmatprep.subr.mxu0 %v4086_v55 }
0x164f   : > { %5138 = vmatpush3.msra.mxu0 %v4086_v55 }
0x1650   : > { %5139 = vmatprep.subr.mxu0 %v4083_v1 }
0x1651   : > { %5140 = vmatpush3.msra.mxu0 %v4083_v1 }
0x1652   : > { %5141 = vmatprep.subr.mxu0 %v4080_v3 }
0x1653   : > { %5142 = vmatpush3.msra.mxu0 %v4080_v3 }
0x16b4   : > { %v5110_v5 = vpop.f32.mrf.mxu0 }
0x16b5   : > { %v5234_v22 = vpack.i.bf16 %v6026_v32, %v5110_v5  ;;  %v5244_v32 = vpack.i.bf16 %v6114_v62, %v6170_v25 }
0x16b6   : > { %v3943_v28 = vpop.f32.mrf.mxu0 }
0x16b7   : > { %5235 = vrot.lane.b32.xlu0 %v5234_v22, %s5515_s18  ;;  %3970 = vrot.lane.b32.xlu1 %v3943_v28, %s5515_s18 }
0x16bb   : > { %5240 = vrot.lane.b32.xlu0 %v5239_v27, %s5515_s18  ;;  %2744 = vrot.lane.b32.xlu1 %v5976_v43, %s5515_s18 }
0x16bf   : > { %5245 = vrot.lane.b32.xlu1 %v5244_v32, %s5515_s18 }
0x16f4   : > { %v4192_v39 = vpop.f32.mrf.mxu0 }
0x16f5   : > { %v4282_v59 = vadd.f32 %v4281_v33, %v4192_v39 }
0x16f6   : > { %v4194_v54 = vpop.f32.mrf.mxu0 }
0x16f7   : > { %4474 = vst [vmem:[%s6257_s20] sm:$0xff] %v4282_v59  ;;  %v4284_v47 = vadd.f32 %v4283_v13, %v4194_v54 }
0x16f9   : > { %4475 = vst [vmem:[%s6257_s20 + $0x8] sm:$0xff] %v4284_v47 }
0x1729   : > { %v3971_v43 = vpop.permute.xlu1 %3970  ;;  %v5236_v44 = vpop.permute.xlu0 %5235 }
0x172a   : > { %v5238_v63 = vunpack.i.h.bf16 %v5236_v44  ;;  %v5237_v62 = vunpack.i.l.bf16 %v5236_v44  ;;  %v3980_v25 = vsel %vm1558_vm0, %v6197_v34, %v3971_v43 }
0x172b   : > { %4292 = vmatmul.mubr.f32.gmra.mxu1 %v3980_v25 }
0x172c   : > { %v2767_v20 = vsel %vm1558_vm0, %v5980_v51, %v5238_v63  ;;  %4297 = vmatprep.mubr.f32.mxu1 %v5514_v0  ;;  %v3981_v35 = vsel %vm1558_vm0, %v6195_v58, %v5237_v62 }
0x172d   : > { %v2745_v46 = vpop.permute.xlu1 %2744  ;;  %v5241_v38 = vpop.permute.xlu0 %5240  ;;  %4196 = vmatprep.mubr.f32.mxu0 %v2767_v20 }
0x172e   : > { %v5243_v19 = vunpack.i.h.bf16 %v5241_v38  ;;  %v5242_v45 = vunpack.i.l.bf16 %v5241_v38  ;;  %v2765_v14 = vsel %vm1558_vm0, %v5934_v11, %v2745_v46 }
0x172f   : > { %4197 = vmatmul.mubr.f32.gmra.mxu0 %v2765_v14  ;;  %4298 = vmatmul.mubr.f32.gmra.mxu1 %v3981_v35 }
0x1730   : > { %4368 = vmatprep.mubr.f32.mxu1 %v6235_v50  ;;  %v3978_v51 = vsel %vm1558_vm0, %v6144_v23, %v5242_v45  ;;  %v3976_v24 = vsel %vm1558_vm0, %v6088_v12, %v5243_v19  ;;  %v4287_v12 = vpop.f32.mrf.mxu1 }
0x1731   : > { %v5246_v34 = vpop.permute.xlu1 %5245  ;;  %4202 = vmatprep.mubr.f32.mxu0 %v3978_v51 }
0x1732   : > { %v5248_v0 = vunpack.i.h.bf16 %v5246_v34  ;;  %v5247_v60 = vunpack.i.l.bf16 %v5246_v34 }
0x1733   : > { %4203 = vmatmul.mubr.f32.gmra.mxu0 %v3976_v24  ;;  %4369 = vmatmul.mubr.f32.vlgmr.msra.gmra.mxu1 %v6241_v53 }
0x1734   : > { %4373 = vmatprep.mubr.f32.mxu1 %v2767_v20  ;;  %v3979_v11 = vsel %vm1558_vm0, %v6142_v40, %v5247_v60  ;;  %v3977_v58 = vsel %vm1558_vm0, %v6086_v9, %v5248_v0  ;;  %v4289_v40 = vpop.f32.mrf.mxu1 }
0x1735   : > { %4208 = vmatprep.mubr.f32.mxu0 %v3979_v11 }
0x1737   : > { %4209 = vmatmul.mubr.f32.gmra.mxu0 %v3977_v58  ;;  %4374 = vmatmul.mubr.f32.gmra.mxu1 %v2765_v14 }
0x1738   : > { %4378 = vmatprep.mubr.f32.mxu1 %v3978_v51  ;;  %5143 = vmatprep.mubr.f32.mxu0 %v6212_v42 }
0x173b   : > { %4379 = vmatmul.mubr.f32.gmra.mxu1 %v3976_v24  ;;  %5144 = vmatmul.mubr.f32.vlgmr.msra.gmra.mxu0 %v6224_v21 }
0x173c   : > { %4383 = vmatprep.mubr.f32.mxu1 %v3979_v11  ;;  %5146 = vmatprep.mubr.f32.mxu0 %v3980_v25 }
0x173f   : > { %4384 = vmatmul.mubr.f32.gmra.mxu1 %v3977_v58  ;;  %5147 = vmatmul.mubr.f32.gmra.mxu0 %v3981_v35 }
0x17eb   : > { %v4293_v23 = vpop.f32.mrf.mxu1 }
0x17ed   : > { %v4295_v50 = vpop.f32.mrf.mxu1 }
0x17ef   : > { %v4198_v9 = vpop.f32.mrf.mxu0  ;;  %v4299_v53 = vpop.f32.mrf.mxu1 }
0x17f0   : > { %v4288_v26 = vadd.f32 %v4287_v12, %v4198_v9 }
0x17f1   : > { %v4200_v29 = vpop.f32.mrf.mxu0  ;;  %v4301_v42 = vpop.f32.mrf.mxu1 }
0x17f2   : > { %4477 = vst [vmem:[%s6257_s20 + $0x18] sm:$0xff] %v4288_v26  ;;  %v4290_v30 = vadd.f32 %v4289_v40, %v4200_v29 }
0x17f3   : > { %v4204_v21 = vpop.f32.mrf.mxu0  ;;  %v4873_v15 = vpop.f32.mrf.mxu1 }
0x17f4   : > { %4478 = vst [vmem:[%s6257_s20 + $0x20] sm:$0xff] %v4290_v30  ;;  %v4294_v16 = vadd.f32 %v4293_v23, %v4204_v21 }
0x17f5   : > { %v4206_v31 = vpop.f32.mrf.mxu0  ;;  %v4874_v2 = vpop.f32.mrf.mxu1 }
0x17f6   : > { %4480 = vst [vmem:[%s6257_s20 + $0x30] sm:$0xff] %v4294_v16  ;;  %v4296_v49 = vadd.f32 %v4295_v50, %v4206_v31  ;;  %v4875_v61 = vadd.f32 %v4874_v2, %v4873_v15 }
0x17f7   : > { %v4210_v56 = vpop.f32.mrf.mxu0  ;;  %v4876_v36 = vpop.f32.mrf.mxu1 }
0x17f8   : > { %4481 = vst [vmem:[%s6257_s20 + $0x38] sm:$0xff] %v4296_v49  ;;  %v4300_v6 = vadd.f32 %v4299_v53, %v4210_v56 }
0x17f9   : > { %v4212_v37 = vpop.f32.mrf.mxu0  ;;  %v4877_v41 = vpop.f32.mrf.mxu1 }
0x17fa   : > { %4483 = vst [vmem:[%s6257_s20 + $0x48] sm:$0xff] %v4300_v6  ;;  %v4302_v57 = vadd.f32 %v4301_v42, %v4212_v37  ;;  %v4878_v7 = vadd.f32 %v4877_v41, %v4876_v36 }
0x17fb   : > { %v4879_v48 = vpop.f32.mrf.mxu1  ;;  %v5145_v52 = vpop.f32.mrf.mxu0 }
0x17fc   : > { %4484 = vst [vmem:[%s6257_s20 + $0x50] sm:$0xff] %v4302_v57  ;;  %v4461_v4 = vadd.f32 %v5145_v52, %v4878_v7 }
0x17fd   : > { %v4880_v8 = vpop.f32.mrf.mxu1  ;;  %v4455_v18 = vpop.f32.mrf.mxu0 }
0x17fe   : > { %4479 = vst [vmem:[%s6257_s20 + $0x28] sm:$0xff] %v4461_v4  ;;  %v4456_v10 = vadd.f32 %v4875_v61, %v4455_v18  ;;  %v4881_v22 = vadd.f32 %v4880_v8, %v4879_v48 }
0x17ff   : > { %v4882_v17 = vpop.f32.mrf.mxu1  ;;  %v5148_v5 = vpop.f32.mrf.mxu0 }
0x1800   : > { %4476 = vst [vmem:[%s6257_s20 + $0x10] sm:$0xff] %v4456_v10 }
0x1801   : > { %v4883_v55 = vpop.f32.mrf.mxu1  ;;  %v4465_v28 = vpop.f32.mrf.mxu0 }
0x1802   : > { %v4884_v1 = vadd.f32 %v4883_v55, %v4882_v17  ;;  %v4466_v27 = vadd.f32 %v4881_v22, %v4465_v28 }
0x1804   : > { %v4471_v3 = vadd.f32 %v5148_v5, %v4884_v1  ;;  %4482 = vst [vmem:[%s6257_s20 + $0x40] sm:$0xff] %v4466_v27 }
0x1806   : > { %4485 = vst [vmem:[%s6257_s20 + $0x58] sm:$0xff] %v4471_v3 }
0x1807   : > { %5450 = shalt.err (!%p5447_p9)
}
0x1808   : > { %s5451_s23 = scalar_lea.hbm %s6295_s4, 1536  ;;  %s5455_s8 = scalar_lea.hbm %s6345_s3, 3072 }
0x1809   : > { %p5452_p13 = scmp.ne.s32.totalorder %s6295_s4, %s5451_s23  ;;  %p5456_p4 = scmp.lt.s32.totalorder %s6295_s4, %s6345_s3 }
0x180a   : > { %p5457_p8 = scmp.lt.s32.totalorder %s5455_s8, %s5451_s23 }
0x180b   : > { %p5453_p5 = pnand %p5452_p13, %p6361_p10 }
0x180c   : > { %p5458_p7 = por %p5457_p8, %p5456_p4 }
0x180d   : > { %p5454_p0 = pneg %p5453_p5 }
0x180f   : > { %p5459_p11 = pnand %p5458_p7, %p5454_p0 }
0x1811   : > { %5462 = shalt.err (!%p5459_p11)
}
0x1812   : > { %s5518_s18 = smov 384   ;;  %s5519_s20 = smov 24  }
0x1813   : > { %5163 = dma.vmem_to_hbm [thread:$0]  (%p6361_p10), %s6297_s6, 1536, %s6295_s4, %s4487_s16, %s5518_s18, %s5518_s18, %s5519_s20  }
0x1814 PF: > { %s4516_s5 = sand.u32 1, %s5493_s12   ;;  %p6362_p1 = scmp.ne.s32.totalorder %s6351_s19, 0 }
0x1815   : > { %p6363_p2 = scmp.ge.s32.totalorder %s5505_s15, 2  ;;  %s4517_s28 = scalar_lea.sflag [#allocation4], %s4516_s5 }
0x1817   : > { %p5177_p6 = pnand %p6363_p2, %p6362_p1 }
0x1819   : > { %p5178_p12 = pneg %p5177_p6 }
0x181b   : > { %5488 = dma.done.wait (%p5178_p12), %s4517_s28, 1536  }
0x181c   : > { %5490 = vsyncadd (%p5178_p12), %s4517_s28, 4294965760  ;;  %p17_p3 = scmp.ge.s32.totalorder %s5615_s9, 4   ;;  %s6364_s12 = smov %s5497_s13 }
0x181d   : > { %s6365_s13 = smov %s5501_s14  ;;  %s6366_s14 = smov %s5624_s17 }
0x181e   : > { %s6367_s15 = smov %s5615_s9  ;;  %19 = sbr.rel (!%p17_p3) target bundleno = 6 (0x6), region = 85 }
0x1823   :  { %4522 = vsyncpa [#allocation3], 1 }
0x1824   :  { %4524 = vsyncpa [#allocation3 + $0x1], 1 }
0x1825   :  { %4525 = vsyncpa [#allocation6], 1 }
0x1826   :  { %4526 = vsyncpa [#allocation4], 1 }
0x1827   :  { %4528 = vsyncpa [#allocation4 + $0x1], 1 }

// kernel: tpu_custom_call.1
= control target key start
LH: loop header
LB: loop body
LE: loop exit
PB: predicated region body
PF: predicated region fallthrough
CT: control target
= control target key end

     0   :  { %8 = vsyncpa [#allocation3], 0  ;;  %s6342_s0 = inlined_call_operand.hbm [shape: f32[4,16,384], index: 0, kind: input, shape index: {}]   ;;  %s6343_s1 = inlined_call_operand.hbm [shape: f32[384,1152], index: 1, kind: input, shape index: {}]   ;;  %s6344_s2 = inlined_call_operand.hbm [shape: f32[384,384], index: 2, kind: input, shape index: {}]   ;;  %s6345_s3 = inlined_call_operand.hbm [shape: f32[4,16,384], index: 3, kind: output, shape index: {}]  }
   0x1   :  { %10 = vsyncpa [#allocation3 + $0x1], 0 }
   0x2   :  { %11 = vsyncpa [#allocation6], 0 }
   0x3   :  { %12 = vsyncpa [#allocation4], 0 }
   0x4   :  { %14 = vsyncpa [#allocation4 + $0x1], 0  ;;  %s5540_s12 = smov 0   ;;  %s5542_s13 = smov 0  }
   0x5   :  { %s5544_s14 = smov 0   ;;  %s5546_s15 = smov 0  }
   0x6 LB: > { %s5561_s16 = sadd.s32 4294967295, %s5505_s15   ;;  %s4593_s17 = sadd.s32 4294967294, %s5505_s15   ;;  %s5505_s15 = sphi %s5546_s15, %s6367_s15   ;;  %s5501_s14 = sphi %s5544_s14, %s6366_s14   ;;  %s5497_s13 = sphi %s5542_s13, %s6365_s13   ;;  %s5493_s12 = sphi %s5540_s12, %s6364_s12  }
   0x7   : > { %p40_p0 = scmp.ne.s32.totalorder %s5497_s13, %s5493_s12  ;;  %p6346_p1 = scmp.eq.s32.totalorder %s5561_s16, 0 }
   0x8   : > { %p112_p3 = scmp.eq.s32.totalorder %s4593_s17, 1  ;;  %p4594_p5 = scmp.ge.s32.totalorder %s5505_s15, 1 }
   0x9   : > { %p5570_p4 = por %p6346_p1, %p40_p0  ;;  %p119_p7 = scmp.lt.s32.totalorder %s5505_s15, 3 }
   0xa   : > { %p5575_p6 = por %p112_p3, %p40_p0  ;;  %s5507_s21 = smov [#allocation5]  }
   0xb   : > { %s6350_s18 = scalar_select %p5570_p4, 1, 0 }
   0xc   : > { %s6351_s19 = scalar_select %p5575_p6, 1, 0 }
   0xd   : > { %p5580_p8 = pnand %p4594_p5, %p119_p7  ;;  %s131_s22 = sshll.u32 %s5507_s21, 4  ;;  %s132_s22 = int_to_ptr.vmem [resolvable:$true] %s131_s22 }
   0xe   : > { %s5508_s24 = smov [#allocation7]   ;;  %s5368_s26 = scalar_lea.vmem %s132_s22, 55296 }
   0xf   : > { %s6352_s20 = scalar_select %p5580_p8, 1, 0 }
  0x10   : > { %p5165_p9 = pneg %p5580_p8  ;;  %s144_s25 = sshll.u32 %s5508_s24, 4  ;;  %s145_s25 = int_to_ptr.vmem [resolvable:$true] %s144_s25 }
  0x11   : > { %p5369_p13 = scmp.ne.s32.totalorder %s132_s22, %s5368_s26  ;;  %p5376_p5 = scmp.lt.s32.totalorder %s132_s22, %s132_s22 }
  0x12   : > { %p5589_p11 = pnand %p5165_p9, %p6346_p1  ;;  %p5377_p7 = scmp.lt.s32.totalorder %s5368_s26, %s5368_s26 }
  0x14   : > { %p5359_p12 = pneg %p5589_p11  ;;  %p5378_p10 = por %p5377_p7, %p5376_p5 }
  0x16   : > { %p5371_p0 = pnand %p5369_p13, %p5359_p12 }
  0x18   : > { %p5372_p3 = pneg %p5371_p0 }
  0x1a   : > { %p5379_p9 = pnand %p5378_p10, %p5372_p3 }
  0x1c   : > { %5382 = shalt.err (!%p5379_p9)
}
  0x1d   : > { %s5509_s27 = smov 1152   ;;  %s5510_s28 = smov 72  }
  0x1e   : > { %5168 = dma.hbm_to_vmem [thread:$0]  (!%p5589_p11), %s6343_s1, 55296, %s132_s22, [#allocation6], %s5509_s27, %s5509_s27, %s5510_s28  }
  0x1f   : > { %s5394_s4 = scalar_lea.vmem %s145_s25, 18432  ;;  %p5402_p2 = scmp.lt.s32.totalorder %s145_s25, %s145_s25 }
  0x20   : > { %p5395_p1 = scmp.ne.s32.totalorder %s145_s25, %s5394_s4  ;;  %p5403_p6 = scmp.lt.s32.totalorder %s5394_s4, %s5394_s4 }
  0x22   : > { %p5397_p13 = pnand %p5395_p1, %p5359_p12  ;;  %p5404_p5 = por %p5403_p6, %p5402_p2 }
  0x24   : > { %p5398_p0 = pneg %p5397_p13 }
  0x26   : > { %p5405_p10 = pnand %p5404_p5, %p5398_p0 }
  0x28   : > { %5408 = shalt.err (!%p5405_p10)
}
  0x29   : > { %s5511_s5 = smov 384   ;;  %s5512_s6 = smov 24  }
  0x2a   : > { %5171 = dma.hbm_to_vmem [thread:$0]  (!%p5589_p11), %s6344_s2, 18432, %s145_s25, [#allocation6], %s5511_s5, %s5511_s5, %s5512_s6  }
  0x2b   : > { %s5615_s9 = sadd.s32 1, %s5505_s15   ;;  %s27_s11 = sadd.s32 1, %s5501_s14 }
  0x2c   : > { %s24_s10 = ssub.s32 %s5505_s15, %s5615_s9  ;;  %p34_p2 = scmp.ne.s32.totalorder %s5501_s14, %s5497_s13 }
  0x2d   : > { %p25_p1 = scmp.eq.s32.totalorder %s24_s10, 0  ;;  %p35_p6 = scmp.eq.s32.totalorder %s5505_s15, 0 }
  0x2e   : > { %p6354_p3 = scmp.eq.s32.totalorder %s5561_s16, 1  ;;  %p5182_p9 = scmp.lt.s32.totalorder %s5505_s15, 2 }
  0x2f   : > { %s5624_s17 = scalar_select %p25_p1, %s5501_s14, %s27_s11  }
  0x30   : > { %p36_p12 = por %p35_p6, %p34_p2  ;;  %p5628_p7 = por %p6354_p3, %p34_p2 }
  0x31   : > { %s158_s22 = sand.u32 1, %s5501_s14   ;;  %s5150_s24 = smul.u32 1536, %s5505_s15 }
  0x32   : > { %s6355_s21 = scalar_select %p5628_p7, 1, 0 }
  0x33   : > { %s5149_s23 = smul.u32 96, %s158_s22  ;;  %p5635_p11 = pnand %p5182_p9, %p36_p12 }
  0x34   : > { %s5642_s28 = scalar_lea.hbm %s6342_s0, %s5150_s24  ;;  %s5646_s4 = scalar_lea.sflag [#allocation3], %s158_s22 }
  0x35   : > { %s162_s29 = scalar_lea.vmem [#allocation2], %s5149_s23  ;;  %s5409_s7 = scalar_lea.hbm %s5642_s28, 1536 }
  0x36   : > { %s170_s30 = sshll.u32 %s162_s29, 4  ;;  %p5410_p13 = scmp.ne.s32.totalorder %s5642_s28, %s5409_s7  ;;  %s5644_s30 = int_to_ptr.vmem [resolvable:$true] %s170_s30 }
  0x37   : > { %p5411_p0 = pneg %p5635_p11  ;;  %s5414_s11 = scalar_lea.hbm %s6342_s0, 3072 }
  0x38   : > { %p5415_p1 = scmp.lt.s32.totalorder %s5642_s28, %s6342_s0  ;;  %p5416_p2 = scmp.lt.s32.totalorder %s5414_s11, %s5409_s7 }
  0x39   : > { %p5412_p5 = pnand %p5411_p0, %p5410_p13 }
  0x3a   : > { %p5417_p6 = por %p5416_p2, %p5415_p1 }
  0x3b   : > { %p5413_p10 = pneg %p5412_p5 }
  0x3d   : > { %p5418_p12 = pnand %p5417_p6, %p5413_p10 }
  0x3f   : > { %5421 = shalt.err (!%p5418_p12)
}
  0x40   : > { %s5422_s22 = scalar_lea.vmem %s5644_s30, 1536  ;;  %s5513_s23 = smov [#allocation2]  }
  0x41   : > { %p5423_p3 = scmp.ne.s32.totalorder %s5644_s30, %s5422_s22  ;;  %s5427_s27 = sshll.u32 %s5513_s23, 4  ;;  %s5428_s27 = int_to_ptr.vmem [resolvable:$false] %s5427_s27 }
  0x42   : > { %s5429_s29 = scalar_lea.vmem %s5428_s27, 3072  ;;  %p5430_p5 = scmp.lt.s32.totalorder %s5644_s30, %s5428_s27 }
  0x43   : > { %p5425_p9 = pnand %p5423_p3, %p5411_p0  ;;  %p5431_p7 = scmp.lt.s32.totalorder %s5429_s29, %s5422_s22 }
  0x45   : > { %p5426_p13 = pneg %p5425_p9  ;;  %p5432_p4 = por %p5431_p7, %p5430_p5 }
  0x47   : > { %p5433_p8 = pnand %p5432_p4, %p5426_p13 }
  0x49   : > { %5436 = shalt.err (!%p5433_p8)
}
  0x4a   : > { %5175 = dma.hbm_to_vmem [thread:$0]  (!%p5635_p11), %s5642_s28, 1536, %s5644_s30, %s5646_s4, %s5511_s5, %s5511_s5, %s5512_s6  }
  0x4b   : > { %p6357_p0 = scmp.ne.s32.totalorder %s6352_s20, 0 }
  0x4c   : > { %s5673_s7 = sand.u32 (!%p6357_p0), 1, %s5497_s13   ;;  %p6358_p4 = scmp.ne.s32.totalorder (!%p6357_p0), %s6350_s18, 0 }
  0x4d   : > { %182 = sbr.rel (%p6357_p0) target bundleno = 6164 (0x1814), region = 32  ;;  %s185_s10 = scalar_lea.sflag (!%p6357_p0), [#allocation3], %s5673_s7 }
  0x4e   : > { %s5151_s8 = smul.u32 (!%p6357_p0), 96, %s5673_s7 }
  0x50   : > { %s5679_s25 = scalar_lea.vmem (!%p6357_p0), [#allocation2], %s5151_s8 }
  0x52   : > { %5480 = dma.done.wait (%p6358_p4), %s185_s10, 1536  }
  0x53   : > { %5482 = vsyncadd (%p6358_p4), %s185_s10, 4294965760  ;;  %p6359_p8 = scmp.eq.s32.totalorder %s5561_s16, 0 }
  0x55   : > { %5484 = dma.done.wait (%p6359_p8), [#allocation6], 73728   ;;  %p6360_p7 = pmov %p6359_p8 }
  0x56   : > { %v5514_v0 = vmov 0.0   ;;  %v369_v1 = vld [vmem:[#allocation5 + $0x440] sm:$0xff]  ;;  %v368_v3 = vld [vmem:[#allocation5 + $0x438] sm:$0xff]  ;;  %v359_v7 = vld [vmem:[#allocation5 + $0x3f0] sm:$0xff]  ;;  %vm1558_vm0 = vcmask 523264   ;;  %s5515_s18 = smov 64  }
  0x57   : > { %5486 = vsyncadd (%p6360_p7), [#allocation6], 4294893568  ;;  %818 = vmatprep.mubr.f32.mxu1 %v5514_v0  ;;  %v657_v2 = vld [vmem:[#allocation5 + $0xd40] sm:$0xff]  ;;  %665 = vmatprep.subr.mxu0 %v369_v1  ;;  %v656_v4 = vld [vmem:[#allocation5 + $0xd38] sm:$0xff]  ;;  %vm1646_vm3 = vcmask 130048   ;;  %s6257_s20 = scalar_lea.vmem [#allocation8], %s5151_s8 }
  0x58   : > { %754 = vmatprep.subr.mxu1 %v657_v2  ;;  %v360_v5 = vld [vmem:[#allocation5 + $0x3f8] sm:$0xff]  ;;  %666 = vmatpush1.msra.mxu0 %v368_v3  ;;  %v647_v8 = vld [vmem:[#allocation5 + $0xcf0] sm:$0xff]  ;;  %v350_v11 = vld [vmem:[#allocation5 + $0x3a8] sm:$0xff]  ;;  %s5152_s5 = smul.u32 1536, %s5561_s16  ;;  %s4501_s6 = sshll.u32 %s6257_s20, 4  ;;  %s6297_s6 = int_to_ptr.vmem [resolvable:$true] %s4501_s6 }
  0x59   : > { %v648_v6 = vld [vmem:[#allocation5 + $0xcf8] sm:$0xff]  ;;  %755 = vmatpush1.msra.mxu1 %v656_v4  ;;  %v351_v9 = vld [vmem:[#allocation5 + $0x3b0] sm:$0xff]  ;;  %667 = vmatprep.subr.mxu0 %v360_v5  ;;  %v638_v12 = vld [vmem:[#allocation5 + $0xca8] sm:$0xff]  ;;  %s4487_s16 = scalar_lea.sflag [#allocation4], %s5673_s7  ;;  %s5437_s11 = scalar_lea.vmem %s6297_s6, 1536 }
  0x5a   : > { %756 = vmatprep.subr.mxu1 %v648_v6  ;;  %v639_v10 = vld [vmem:[#allocation5 + $0xcb0] sm:$0xff]  ;;  %668 = vmatpush1.msra.mxu0 %v359_v7  ;;  %v342_v13 = vld [vmem:[#allocation5 + $0x368] sm:$0xff]  ;;  %v341_v15 = vld [vmem:[#allocation5 + $0x360] sm:$0xff]  ;;  %s6295_s4 = scalar_lea.hbm %s6345_s3, %s5152_s5  ;;  %p5438_p11 = scmp.ne.s32.totalorder %s6297_s6, %s5437_s11 }
  0x5b   : > { %757 = vmatpush1.msra.mxu1 %v647_v8  ;;  %v630_v14 = vld [vmem:[#allocation5 + $0xc68] sm:$0xff]  ;;  %669 = vmatprep.subr.mxu0 %v351_v9  ;;  %v629_v16 = vld [vmem:[#allocation5 + $0xc60] sm:$0xff]  ;;  %v332_v19 = vld [vmem:[#allocation5 + $0x318] sm:$0xff]  ;;  %p6361_p10 = scmp.ne.s32.totalorder %s6355_s21, 0  ;;  %s5517_s24 = smov [#allocation8]  }
  0x5c   : > { %758 = vmatprep.subr.mxu1 %v639_v10  ;;  %670 = vmatpush1.msra.mxu0 %v350_v11  ;;  %v333_v17 = vld [vmem:[#allocation5 + $0x320] sm:$0xff]  ;;  %v620_v20 = vld [vmem:[#allocation5 + $0xc18] sm:$0xff]  ;;  %v323_v23 = vld [vmem:[#allocation5 + $0x2d0] sm:$0xff]  ;;  %s5441_s26 = sshll.u32 %s5517_s24, 4  ;;  %s5442_s26 = int_to_ptr.vmem [resolvable:$false] %s5441_s26 }
  0x5d   : > { %759 = vmatpush1.msra.mxu1 %v638_v12  ;;  %v621_v18 = vld [vmem:[#allocation5 + $0xc20] sm:$0xff]  ;;  %671 = vmatprep.subr.mxu0 %v342_v13  ;;  %v324_v21 = vld [vmem:[#allocation5 + $0x2d8] sm:$0xff]  ;;  %v611_v24 = vld [vmem:[#allocation5 + $0xbd0] sm:$0xff]  ;;  %p5439_p1 = pnand %p5438_p11, %p6361_p10  ;;  %s5443_s22 = scalar_lea.vmem %s5442_s26, 3072 }
  0x5e   : > { %760 = vmatprep.subr.mxu1 %v630_v14  ;;  %672 = vmatpush1.msra.mxu0 %v341_v15  ;;  %v612_v22 = vld [vmem:[#allocation5 + $0xbd8] sm:$0xff]  ;;  %v315_v25 = vld [vmem:[#allocation5 + $0x290] sm:$0xff]  ;;  %v314_v27 = vld [vmem:[#allocation5 + $0x288] sm:$0xff]  ;;  %p5444_p6 = scmp.lt.s32.totalorder %s6297_s6, %s5442_s26  ;;  %p5445_p12 = scmp.lt.s32.totalorder %s5443_s22, %s5437_s11 }
  0x5f   : > { %761 = vmatpush1.msra.mxu1 %v629_v16  ;;  %673 = vmatprep.subr.mxu0 %v333_v17  ;;  %v603_v26 = vld [vmem:[#allocation5 + $0xb90] sm:$0xff]  ;;  %v602_v28 = vld [vmem:[#allocation5 + $0xb88] sm:$0xff]  ;;  %v305_v31 = vld [vmem:[#allocation5 + $0x240] sm:$0xff]  ;;  %p5440_p2 = pneg %p5439_p1 }
  0x60   : > { %762 = vmatprep.subr.mxu1 %v621_v18  ;;  %674 = vmatpush1.msra.mxu0 %v332_v19  ;;  %v306_v29 = vld [vmem:[#allocation5 + $0x248] sm:$0xff]  ;;  %v593_v32 = vld [vmem:[#allocation5 + $0xb40] sm:$0xff]  ;;  %v296_v35 = vld [vmem:[#allocation5 + $0x1f8] sm:$0xff]  ;;  %p5446_p3 = por %p5445_p12, %p5444_p6 }
  0x61   : > { %763 = vmatpush1.msra.mxu1 %v620_v20  ;;  %675 = vmatprep.subr.mxu0 %v324_v21  ;;  %v594_v30 = vld [vmem:[#allocation5 + $0xb48] sm:$0xff]  ;;  %v297_v33 = vld [vmem:[#allocation5 + $0x200] sm:$0xff]  ;;  %v584_v36 = vld [vmem:[#allocation5 + $0xaf8] sm:$0xff] }
  0x62   : > { %764 = vmatprep.subr.mxu1 %v612_v22  ;;  %676 = vmatpush1.msra.mxu0 %v323_v23  ;;  %v585_v34 = vld [vmem:[#allocation5 + $0xb00] sm:$0xff]  ;;  %v288_v37 = vld [vmem:[#allocation5 + $0x1b8] sm:$0xff]  ;;  %v287_v39 = vld [vmem:[#allocation5 + $0x1b0] sm:$0xff]  ;;  %p5447_p9 = pnand %p5446_p3, %p5440_p2 }
  0x63   : > { %765 = vmatpush1.msra.mxu1 %v611_v24  ;;  %677 = vmatprep.subr.mxu0 %v315_v25  ;;  %v576_v38 = vld [vmem:[#allocation5 + $0xab8] sm:$0xff]  ;;  %v575_v40 = vld [vmem:[#allocation5 + $0xab0] sm:$0xff]  ;;  %v278_v43 = vld [vmem:[#allocation5 + $0x168] sm:$0xff] }
  0x64   : > { %766 = vmatprep.subr.mxu1 %v603_v26  ;;  %678 = vmatpush1.msra.mxu0 %v314_v27  ;;  %v279_v41 = vld [vmem:[#allocation5 + $0x170] sm:$0xff]  ;;  %v566_v44 = vld [vmem:[#allocation5 + $0xa68] sm:$0xff]  ;;  %v269_v47 = vld [vmem:[#allocation5 + $0x120] sm:$0xff] }
  0x65   : > { %767 = vmatpush1.msra.mxu1 %v602_v28  ;;  %679 = vmatprep.subr.mxu0 %v306_v29  ;;  %v567_v42 = vld [vmem:[#allocation5 + $0xa70] sm:$0xff]  ;;  %v270_v45 = vld [vmem:[#allocation5 + $0x128] sm:$0xff]  ;;  %v557_v48 = vld [vmem:[#allocation5 + $0xa20] sm:$0xff] }
  0x66   : > { %768 = vmatprep.subr.mxu1 %v594_v30  ;;  %680 = vmatpush1.msra.mxu0 %v305_v31  ;;  %v558_v46 = vld [vmem:[#allocation5 + $0xa28] sm:$0xff]  ;;  %v261_v49 = vld [vmem:[#allocation5 + $0xe0] sm:$0xff]  ;;  %v260_v51 = vld [vmem:[#allocation5 + $0xd8] sm:$0xff] }
  0x67   : > { %769 = vmatpush1.msra.mxu1 %v593_v32  ;;  %681 = vmatprep.subr.mxu0 %v297_v33  ;;  %v549_v50 = vld [vmem:[#allocation5 + $0x9e0] sm:$0xff]  ;;  %v548_v52 = vld [vmem:[#allocation5 + $0x9d8] sm:$0xff]  ;;  %v251_v55 = vld [vmem:[#allocation5 + $0x90] sm:$0xff] }
  0x68   : > { %770 = vmatprep.subr.mxu1 %v585_v34  ;;  %682 = vmatpush1.msra.mxu0 %v296_v35  ;;  %v252_v53 = vld [vmem:[#allocation5 + $0x98] sm:$0xff]  ;;  %v539_v56 = vld [vmem:[#allocation5 + $0x990] sm:$0xff]  ;;  %v242_v59 = vld [vmem:[#allocation5 + $0x48] sm:$0xff] }
  0x69   : > { %771 = vmatpush1.msra.mxu1 %v584_v36  ;;  %683 = vmatprep.subr.mxu0 %v288_v37  ;;  %v540_v54 = vld [vmem:[#allocation5 + $0x998] sm:$0xff]  ;;  %v243_v57 = vld [vmem:[#allocation5 + $0x50] sm:$0xff]  ;;  %v530_v60 = vld [vmem:[#allocation5 + $0x948] sm:$0xff] }
  0x6a   : > { %772 = vmatprep.subr.mxu1 %v576_v38  ;;  %684 = vmatpush1.msra.mxu0 %v287_v39  ;;  %v531_v58 = vld [vmem:[#allocation5 + $0x950] sm:$0xff]  ;;  %v234_v61 = vld [vmem:[#allocation5 + $0x8] sm:$0xff]  ;;  %v233_v63 = vld [vmem:[#allocation5] sm:$0xff] }
  0x6b   : > { %773 = vmatpush1.msra.mxu1 %v575_v40  ;;  %685 = vmatprep.subr.mxu0 %v279_v41  ;;  %v522_v62 = vld [vmem:[#allocation5 + $0x908] sm:$0xff]  ;;  %v521_v1 = vld [vmem:[#allocation5 + $0x900] sm:$0xff]  ;;  %v5691_v3 = vld [vmem:[%s5679_s25 + $0x10] sm:$0xff] }
  0x6c   : > { %774 = vmatprep.subr.mxu1 %v567_v42  ;;  %686 = vmatpush1.msra.mxu0 %v278_v43  ;;  %v513_v2 = vld [vmem:[#allocation5 + $0x8c0] sm:$0xff]  ;;  %v371_v4 = vld [vmem:[#allocation5 + $0x450] sm:$0xff]  ;;  %v512_v5 = vld [vmem:[#allocation5 + $0x8b8] sm:$0xff] }
  0x6d   : > { %775 = vmatpush1.msra.mxu1 %v566_v44  ;;  %687 = vmatprep.subr.mxu0 %v270_v45  ;;  %v370_v6 = vld [vmem:[#allocation5 + $0x448] sm:$0xff]  ;;  %v504_v7 = vld [vmem:[#allocation5 + $0x878] sm:$0xff]  ;;  %v503_v9 = vld [vmem:[#allocation5 + $0x870] sm:$0xff] }
  0x6e   : > { %776 = vmatprep.subr.mxu1 %v558_v46  ;;  %688 = vmatpush1.msra.mxu0 %v269_v47  ;;  %v362_v8 = vld [vmem:[#allocation5 + $0x408] sm:$0xff]  ;;  %v361_v10 = vld [vmem:[#allocation5 + $0x400] sm:$0xff]  ;;  %v495_v11 = vld [vmem:[#allocation5 + $0x830] sm:$0xff] }
  0x6f   : > { %777 = vmatpush1.msra.mxu1 %v557_v48  ;;  %689 = vmatprep.subr.mxu0 %v261_v49  ;;  %v353_v12 = vld [vmem:[#allocation5 + $0x3c0] sm:$0xff]  ;;  %v494_v13 = vld [vmem:[#allocation5 + $0x828] sm:$0xff]  ;;  %v352_v14 = vld [vmem:[#allocation5 + $0x3b8] sm:$0xff] }
  0x70   : > { %778 = vmatprep.subr.mxu1 %v549_v50  ;;  %690 = vmatpush1.msra.mxu0 %v260_v51  ;;  %v486_v15 = vld [vmem:[#allocation5 + $0x7e8] sm:$0xff]  ;;  %v344_v16 = vld [vmem:[#allocation5 + $0x378] sm:$0xff]  ;;  %v485_v17 = vld [vmem:[#allocation5 + $0x7e0] sm:$0xff] }
  0x71   : > { %779 = vmatpush1.msra.mxu1 %v548_v52  ;;  %691 = vmatprep.subr.mxu0 %v252_v53  ;;  %v343_v18 = vld [vmem:[#allocation5 + $0x370] sm:$0xff]  ;;  %v477_v19 = vld [vmem:[#allocation5 + $0x7a0] sm:$0xff]  ;;  %v476_v21 = vld [vmem:[#allocation5 + $0x798] sm:$0xff] }
  0x72   : > { %780 = vmatprep.subr.mxu1 %v540_v54  ;;  %692 = vmatpush1.msra.mxu0 %v251_v55  ;;  %v335_v20 = vld [vmem:[#allocation5 + $0x330] sm:$0xff]  ;;  %v334_v22 = vld [vmem:[#allocation5 + $0x328] sm:$0xff]  ;;  %v468_v23 = vld [vmem:[#allocation5 + $0x758] sm:$0xff] }
  0x73   : > { %781 = vmatpush1.msra.mxu1 %v539_v56  ;;  %693 = vmatprep.subr.mxu0 %v243_v57  ;;  %v326_v24 = vld [vmem:[#allocation5 + $0x2e8] sm:$0xff]  ;;  %v467_v25 = vld [vmem:[#allocation5 + $0x750] sm:$0xff]  ;;  %v325_v26 = vld [vmem:[#allocation5 + $0x2e0] sm:$0xff] }
  0x74   : > { %782 = vmatprep.subr.mxu1 %v531_v58  ;;  %694 = vmatpush1.msra.mxu0 %v242_v59  ;;  %v459_v27 = vld [vmem:[#allocation5 + $0x710] sm:$0xff]  ;;  %v317_v28 = vld [vmem:[#allocation5 + $0x2a0] sm:$0xff]  ;;  %v458_v29 = vld [vmem:[#allocation5 + $0x708] sm:$0xff] }
  0x75   : > { %783 = vmatpush1.msra.mxu1 %v530_v60  ;;  %695 = vmatprep.subr.mxu0 %v234_v61  ;;  %v316_v30 = vld [vmem:[#allocation5 + $0x298] sm:$0xff]  ;;  %v450_v31 = vld [vmem:[#allocation5 + $0x6c8] sm:$0xff]  ;;  %v449_v33 = vld [vmem:[#allocation5 + $0x6c0] sm:$0xff] }
  0x76   : > { %784 = vmatprep.subr.mxu1 %v522_v62  ;;  %696 = vmatpush1.msra.mxu0 %v233_v63  ;;  %v308_v32 = vld [vmem:[#allocation5 + $0x258] sm:$0xff]  ;;  %v307_v34 = vld [vmem:[#allocation5 + $0x250] sm:$0xff]  ;;  %v441_v35 = vld [vmem:[#allocation5 + $0x680] sm:$0xff] }
  0x77   : > { %785 = vmatpush1.msra.mxu1 %v521_v1  ;;  %697 = vmatprep.subr.mxu0 %v513_v2  ;;  %v299_v36 = vld [vmem:[#allocation5 + $0x210] sm:$0xff]  ;;  %v440_v37 = vld [vmem:[#allocation5 + $0x678] sm:$0xff]  ;;  %v298_v38 = vld [vmem:[#allocation5 + $0x208] sm:$0xff] }
  0x78   : > { %819 = vmatmul.mubr.f32.vlgmr.msra.gmra.mxu1 %v5691_v3  ;;  %843 = vmatprep.subr.mxu1 %v371_v4  ;;  %v432_v39 = vld [vmem:[#allocation5 + $0x638] sm:$0xff]  ;;  %v290_v40 = vld [vmem:[#allocation5 + $0x1c8] sm:$0xff]  ;;  %v431_v41 = vld [vmem:[#allocation5 + $0x630] sm:$0xff] }
  0x79   : > { %698 = vmatpush2.msra.mxu0 %v512_v5  ;;  %844 = vmatpush1.msra.mxu1 %v370_v6  ;;  %v289_v42 = vld [vmem:[#allocation5 + $0x1c0] sm:$0xff]  ;;  %v423_v43 = vld [vmem:[#allocation5 + $0x5f0] sm:$0xff]  ;;  %v422_v45 = vld [vmem:[#allocation5 + $0x5e8] sm:$0xff] }
  0x7a   : > { %699 = vmatprep.subr.mxu0 %v504_v7  ;;  %845 = vmatprep.subr.mxu1 %v362_v8  ;;  %v281_v44 = vld [vmem:[#allocation5 + $0x180] sm:$0xff]  ;;  %v280_v46 = vld [vmem:[#allocation5 + $0x178] sm:$0xff]  ;;  %v414_v47 = vld [vmem:[#allocation5 + $0x5a8] sm:$0xff] }
  0x7b   : > { %700 = vmatpush2.msra.mxu0 %v503_v9  ;;  %846 = vmatpush1.msra.mxu1 %v361_v10  ;;  %v272_v48 = vld [vmem:[#allocation5 + $0x138] sm:$0xff]  ;;  %v413_v49 = vld [vmem:[#allocation5 + $0x5a0] sm:$0xff]  ;;  %v271_v50 = vld [vmem:[#allocation5 + $0x130] sm:$0xff] }
  0x7c   : > { %701 = vmatprep.subr.mxu0 %v495_v11  ;;  %847 = vmatprep.subr.mxu1 %v353_v12  ;;  %v405_v51 = vld [vmem:[#allocation5 + $0x560] sm:$0xff]  ;;  %v263_v52 = vld [vmem:[#allocation5 + $0xf0] sm:$0xff]  ;;  %v404_v53 = vld [vmem:[#allocation5 + $0x558] sm:$0xff] }
  0x7d   : > { %702 = vmatpush2.msra.mxu0 %v494_v13  ;;  %848 = vmatpush1.msra.mxu1 %v352_v14  ;;  %v262_v54 = vld [vmem:[#allocation5 + $0xe8] sm:$0xff]  ;;  %v396_v55 = vld [vmem:[#allocation5 + $0x518] sm:$0xff]  ;;  %v395_v57 = vld [vmem:[#allocation5 + $0x510] sm:$0xff] }
  0x7e   : > { %703 = vmatprep.subr.mxu0 %v486_v15  ;;  %849 = vmatprep.subr.mxu1 %v344_v16  ;;  %v254_v56 = vld [vmem:[#allocation5 + $0xa8] sm:$0xff]  ;;  %v253_v58 = vld [vmem:[#allocation5 + $0xa0] sm:$0xff]  ;;  %v387_v59 = vld [vmem:[#allocation5 + $0x4d0] sm:$0xff] }
  0x7f   : > { %704 = vmatpush2.msra.mxu0 %v485_v17  ;;  %850 = vmatpush1.msra.mxu1 %v343_v18  ;;  %v245_v60 = vld [vmem:[#allocation5 + $0x60] sm:$0xff]  ;;  %v386_v61 = vld [vmem:[#allocation5 + $0x4c8] sm:$0xff]  ;;  %v244_v62 = vld [vmem:[#allocation5 + $0x58] sm:$0xff] }
  0x80   : > { %705 = vmatprep.subr.mxu0 %v477_v19  ;;  %851 = vmatprep.subr.mxu1 %v335_v20  ;;  %v378_v63 = vld [vmem:[#allocation5 + $0x488] sm:$0xff]  ;;  %v236_v1 = vld [vmem:[#allocation5 + $0x18] sm:$0xff]  ;;  %v377_v2 = vld [vmem:[#allocation5 + $0x480] sm:$0xff] }
  0x81   : > { %706 = vmatpush2.msra.mxu0 %v476_v21  ;;  %852 = vmatpush1.msra.mxu1 %v334_v22  ;;  %v5695_v4 = vld [vmem:[%s5679_s25 + $0x8] sm:$0xff]  ;;  %v235_v5 = vld [vmem:[#allocation5 + $0x10] sm:$0xff]  ;;  %v5698_v6 = vld [vmem:[%s5679_s25] sm:$0xff] }
  0x82   : > { %707 = vmatprep.subr.mxu0 %v468_v23  ;;  %853 = vmatprep.subr.mxu1 %v326_v24  ;;  %v515_v7 = vld [vmem:[#allocation5 + $0x8d0] sm:$0xff]  ;;  %v514_v9 = vld [vmem:[#allocation5 + $0x8c8] sm:$0xff]  ;;  %v505_v13 = vld [vmem:[#allocation5 + $0x880] sm:$0xff] }
  0x83   : > { %708 = vmatpush2.msra.mxu0 %v467_v25  ;;  %854 = vmatpush1.msra.mxu1 %v325_v26  ;;  %v659_v8 = vld [vmem:[#allocation5 + $0xd50] sm:$0xff]  ;;  %v658_v10 = vld [vmem:[#allocation5 + $0xd48] sm:$0xff]  ;;  %v649_v14 = vld [vmem:[#allocation5 + $0xd00] sm:$0xff] }
  0x84   : > { %709 = vmatprep.subr.mxu0 %v459_v27  ;;  %855 = vmatprep.subr.mxu1 %v317_v28  ;;  %v506_v11 = vld [vmem:[#allocation5 + $0x888] sm:$0xff]  ;;  %v497_v15 = vld [vmem:[#allocation5 + $0x840] sm:$0xff]  ;;  %v496_v17 = vld [vmem:[#allocation5 + $0x838] sm:$0xff] }
  0x85   : > { %710 = vmatpush2.msra.mxu0 %v458_v29  ;;  %856 = vmatpush1.msra.mxu1 %v316_v30  ;;  %v650_v12 = vld [vmem:[#allocation5 + $0xd08] sm:$0xff]  ;;  %v641_v16 = vld [vmem:[#allocation5 + $0xcc0] sm:$0xff]  ;;  %v640_v18 = vld [vmem:[#allocation5 + $0xcb8] sm:$0xff] }
  0x86   : > { %711 = vmatprep.subr.mxu0 %v450_v31  ;;  %857 = vmatprep.subr.mxu1 %v308_v32  ;;  %v488_v19 = vld [vmem:[#allocation5 + $0x7f8] sm:$0xff]  ;;  %v487_v21 = vld [vmem:[#allocation5 + $0x7f0] sm:$0xff]  ;;  %v478_v25 = vld [vmem:[#allocation5 + $0x7a8] sm:$0xff] }
  0x87   : > { %712 = vmatpush2.msra.mxu0 %v449_v33  ;;  %858 = vmatpush1.msra.mxu1 %v307_v34  ;;  %v632_v20 = vld [vmem:[#allocation5 + $0xc78] sm:$0xff]  ;;  %v631_v22 = vld [vmem:[#allocation5 + $0xc70] sm:$0xff]  ;;  %v622_v26 = vld [vmem:[#allocation5 + $0xc28] sm:$0xff] }
  0x88   : > { %713 = vmatprep.subr.mxu0 %v441_v35  ;;  %859 = vmatprep.subr.mxu1 %v299_v36  ;;  %v479_v23 = vld [vmem:[#allocation5 + $0x7b0] sm:$0xff]  ;;  %v470_v27 = vld [vmem:[#allocation5 + $0x768] sm:$0xff]  ;;  %v469_v29 = vld [vmem:[#allocation5 + $0x760] sm:$0xff] }
  0x89   : > { %714 = vmatpush2.msra.mxu0 %v440_v37  ;;  %860 = vmatpush1.msra.mxu1 %v298_v38  ;;  %v623_v24 = vld [vmem:[#allocation5 + $0xc30] sm:$0xff]  ;;  %v614_v28 = vld [vmem:[#allocation5 + $0xbe8] sm:$0xff]  ;;  %v613_v30 = vld [vmem:[#allocation5 + $0xbe0] sm:$0xff] }
  0x8a   : > { %715 = vmatprep.subr.mxu0 %v432_v39  ;;  %861 = vmatprep.subr.mxu1 %v290_v40  ;;  %v461_v31 = vld [vmem:[#allocation5 + $0x720] sm:$0xff]  ;;  %v460_v33 = vld [vmem:[#allocation5 + $0x718] sm:$0xff]  ;;  %v451_v37 = vld [vmem:[#allocation5 + $0x6d0] sm:$0xff] }
  0x8b   : > { %716 = vmatpush2.msra.mxu0 %v431_v41  ;;  %862 = vmatpush1.msra.mxu1 %v289_v42  ;;  %v605_v32 = vld [vmem:[#allocation5 + $0xba0] sm:$0xff]  ;;  %v604_v34 = vld [vmem:[#allocation5 + $0xb98] sm:$0xff]  ;;  %v595_v38 = vld [vmem:[#allocation5 + $0xb50] sm:$0xff] }
  0x8c   : > { %717 = vmatprep.subr.mxu0 %v423_v43  ;;  %863 = vmatprep.subr.mxu1 %v281_v44  ;;  %v452_v35 = vld [vmem:[#allocation5 + $0x6d8] sm:$0xff]  ;;  %v443_v39 = vld [vmem:[#allocation5 + $0x690] sm:$0xff]  ;;  %v5703_v41 = vld [vmem:[%s5679_s25 + $0x20] sm:$0xff] }
  0x8d   : > { %718 = vmatpush2.msra.mxu0 %v422_v45  ;;  %864 = vmatpush1.msra.mxu1 %v280_v46  ;;  %v596_v36 = vld [vmem:[#allocation5 + $0xb58] sm:$0xff]  ;;  %v587_v40 = vld [vmem:[#allocation5 + $0xb10] sm:$0xff]  ;;  %v442_v42 = vld [vmem:[#allocation5 + $0x688] sm:$0xff] }
  0x8e   : > { %719 = vmatprep.subr.mxu0 %v414_v47  ;;  %865 = vmatprep.subr.mxu1 %v272_v48  ;;  %v586_v43 = vld [vmem:[#allocation5 + $0xb08] sm:$0xff]  ;;  %v5710_v45 = vld [vmem:[%s5679_s25 + $0x18] sm:$0xff]  ;;  %v433_v48 = vld [vmem:[#allocation5 + $0x640] sm:$0xff] }
  0x8f   : > { %720 = vmatpush2.msra.mxu0 %v413_v49  ;;  %866 = vmatpush1.msra.mxu1 %v271_v50  ;;  %v5706_v44 = vld [vmem:[%s5679_s25 + $0x28] sm:$0xff]  ;;  %v577_v49 = vld [vmem:[#allocation5 + $0xac0] sm:$0xff] }
  0x90   : > { %721 = vmatprep.subr.mxu0 %v405_v51  ;;  %867 = vmatprep.subr.mxu1 %v263_v52  ;;  %v434_v46 = vld [vmem:[#allocation5 + $0x648] sm:$0xff]  ;;  %v425_v50 = vld [vmem:[#allocation5 + $0x600] sm:$0xff]  ;;  %v5716_v52 = vld [vmem:[%s5679_s25 + $0x38] sm:$0xff] }
  0x91   : > { %722 = vmatpush2.msra.mxu0 %v404_v53  ;;  %868 = vmatpush1.msra.mxu1 %v262_v54  ;;  %v578_v47 = vld [vmem:[#allocation5 + $0xac8] sm:$0xff]  ;;  %v569_v51 = vld [vmem:[#allocation5 + $0xa80] sm:$0xff]  ;;  %v424_v53 = vld [vmem:[#allocation5 + $0x5f8] sm:$0xff] }
  0x92   : > { %723 = vmatprep.subr.mxu0 %v396_v55  ;;  %869 = vmatprep.subr.mxu1 %v254_v56  ;;  %v568_v54 = vld [vmem:[#allocation5 + $0xa78] sm:$0xff]  ;;  %v5719_v55 = vld [vmem:[%s5679_s25 + $0x40] sm:$0xff]  ;;  %v5723_v56 = vld [vmem:[%s5679_s25 + $0x30] sm:$0xff] }
  0x93   : > { %724 = vmatpush2.msra.mxu0 %v395_v57  ;;  %870 = vmatpush1.msra.mxu1 %v253_v58  ;;  %v416_v57 = vld [vmem:[#allocation5 + $0x5b8] sm:$0xff] }
  0x94   : > { %725 = vmatprep.subr.mxu0 %v387_v59  ;;  %871 = vmatprep.subr.mxu1 %v245_v60  ;;  %v560_v58 = vld [vmem:[#allocation5 + $0xa38] sm:$0xff]  ;;  %v415_v59 = vld [vmem:[#allocation5 + $0x5b0] sm:$0xff] }
  0x95   : > { %726 = vmatpush2.msra.mxu0 %v386_v61  ;;  %872 = vmatpush1.msra.mxu1 %v244_v62  ;;  %v559_v60 = vld [vmem:[#allocation5 + $0xa30] sm:$0xff] }
  0x96   : > { %727 = vmatprep.subr.mxu0 %v378_v63  ;;  %873 = vmatprep.subr.mxu1 %v236_v1  ;;  %v407_v61 = vld [vmem:[#allocation5 + $0x570] sm:$0xff]  ;;  %v406_v1 = vld [vmem:[#allocation5 + $0x568] sm:$0xff] }
  0x97   : > { %728 = vmatpush2.msra.mxu0 %v377_v2  ;;  %729 = vmatprep.mubr.f32.mxu0 %v5695_v4  ;;  %v551_v62 = vld [vmem:[#allocation5 + $0x9f0] sm:$0xff]  ;;  %v550_v2 = vld [vmem:[#allocation5 + $0x9e8] sm:$0xff] }
  0x98   : > { %874 = vmatpush1.msra.mxu1 %v235_v5  ;;  %730 = vmatmul.mubr.f32.vlgmr.msra.gmra.mxu0 %v5698_v6  ;;  %v5729_v63 = vld [vmem:[%s5679_s25 + $0x50] sm:$0xff]  ;;  %v5732_v5 = vld [vmem:[%s5679_s25 + $0x58] sm:$0xff] }
  0x99   : > { %875 = vmatprep.subr.mxu1 %v515_v7  ;;  %932 = vmatprep.subr.mxu0 %v659_v8  ;;  %v5736_v7 = vld [vmem:[%s5679_s25 + $0x48] sm:$0xff] }
  0x9a   : > { %876 = vmatpush2.msra.mxu1 %v514_v9  ;;  %933 = vmatpush1.msra.mxu0 %v658_v10  ;;  %v398_v8 = vld [vmem:[#allocation5 + $0x528] sm:$0xff]  ;;  %v397_v10 = vld [vmem:[#allocation5 + $0x520] sm:$0xff] }
  0x9b   : > { %877 = vmatprep.subr.mxu1 %v506_v11  ;;  %934 = vmatprep.subr.mxu0 %v650_v12  ;;  %v542_v9 = vld [vmem:[#allocation5 + $0x9a8] sm:$0xff]  ;;  %v541_v11 = vld [vmem:[#allocation5 + $0x9a0] sm:$0xff] }
  0x9c   : > { %878 = vmatpush2.msra.mxu1 %v505_v13  ;;  %935 = vmatpush1.msra.mxu0 %v649_v14  ;;  %v389_v12 = vld [vmem:[#allocation5 + $0x4e0] sm:$0xff]  ;;  %v388_v14 = vld [vmem:[#allocation5 + $0x4d8] sm:$0xff] }
  0x9d   : > { %879 = vmatprep.subr.mxu1 %v497_v15  ;;  %936 = vmatprep.subr.mxu0 %v641_v16  ;;  %v533_v13 = vld [vmem:[#allocation5 + $0x960] sm:$0xff]  ;;  %v532_v15 = vld [vmem:[#allocation5 + $0x958] sm:$0xff] }
  0x9e   : > { %880 = vmatpush2.msra.mxu1 %v496_v17  ;;  %937 = vmatpush1.msra.mxu0 %v640_v18  ;;  %v380_v16 = vld [vmem:[#allocation5 + $0x498] sm:$0xff]  ;;  %v379_v18 = vld [vmem:[#allocation5 + $0x490] sm:$0xff] }
  0x9f   : > { %881 = vmatprep.subr.mxu1 %v488_v19  ;;  %938 = vmatprep.subr.mxu0 %v632_v20  ;;  %v524_v17 = vld [vmem:[#allocation5 + $0x918] sm:$0xff]  ;;  %v523_v19 = vld [vmem:[#allocation5 + $0x910] sm:$0xff]  ;;  %v373_v20 = vld [vmem:[#allocation5 + $0x460] sm:$0xff] }
  0xa0   : > { %882 = vmatpush2.msra.mxu1 %v487_v21  ;;  %939 = vmatpush1.msra.mxu0 %v631_v22  ;;  %v372_v21 = vld [vmem:[#allocation5 + $0x458] sm:$0xff] }
  0xa1   : > { %883 = vmatprep.subr.mxu1 %v479_v23  ;;  %940 = vmatprep.subr.mxu0 %v623_v24  ;;  %v364_v22 = vld [vmem:[#allocation5 + $0x418] sm:$0xff]  ;;  %v363_v23 = vld [vmem:[#allocation5 + $0x410] sm:$0xff] }
  0xa2   : > { %884 = vmatpush2.msra.mxu1 %v478_v25  ;;  %941 = vmatpush1.msra.mxu0 %v622_v26  ;;  %v355_v24 = vld [vmem:[#allocation5 + $0x3d0] sm:$0xff]  ;;  %v354_v25 = vld [vmem:[#allocation5 + $0x3c8] sm:$0xff]  ;;  %v661_v26 = vld [vmem:[#allocation5 + $0xd60] sm:$0xff] }
  0xa3   : > { %885 = vmatprep.subr.mxu1 %v470_v27  ;;  %942 = vmatprep.subr.mxu0 %v614_v28  ;;  %v346_v27 = vld [vmem:[#allocation5 + $0x388] sm:$0xff]  ;;  %v660_v28 = vld [vmem:[#allocation5 + $0xd58] sm:$0xff] }
  0xa4   : > { %886 = vmatpush2.msra.mxu1 %v469_v29  ;;  %943 = vmatpush1.msra.mxu0 %v613_v30  ;;  %v345_v29 = vld [vmem:[#allocation5 + $0x380] sm:$0xff]  ;;  %v652_v30 = vld [vmem:[#allocation5 + $0xd18] sm:$0xff] }
  0xa5   : > { %887 = vmatprep.subr.mxu1 %v461_v31  ;;  %944 = vmatprep.subr.mxu0 %v605_v32  ;;  %v337_v31 = vld [vmem:[#allocation5 + $0x340] sm:$0xff]  ;;  %v651_v32 = vld [vmem:[#allocation5 + $0xd10] sm:$0xff] }
  0xa6   : > { %888 = vmatpush2.msra.mxu1 %v460_v33  ;;  %945 = vmatpush1.msra.mxu0 %v604_v34  ;;  %v336_v33 = vld [vmem:[#allocation5 + $0x338] sm:$0xff]  ;;  %v643_v34 = vld [vmem:[#allocation5 + $0xcd0] sm:$0xff] }
  0xa7   : > { %889 = vmatprep.subr.mxu1 %v452_v35  ;;  %946 = vmatprep.subr.mxu0 %v596_v36  ;;  %v328_v35 = vld [vmem:[#allocation5 + $0x2f8] sm:$0xff]  ;;  %v642_v36 = vld [vmem:[#allocation5 + $0xcc8] sm:$0xff] }
  0xa8   : > { %890 = vmatpush2.msra.mxu1 %v451_v37  ;;  %947 = vmatpush1.msra.mxu0 %v595_v38  ;;  %v327_v37 = vld [vmem:[#allocation5 + $0x2f0] sm:$0xff]  ;;  %v634_v38 = vld [vmem:[#allocation5 + $0xc88] sm:$0xff] }
  0xa9   : > { %891 = vmatprep.subr.mxu1 %v443_v39  ;;  %948 = vmatprep.subr.mxu0 %v587_v40  ;;  %v319_v39 = vld [vmem:[#allocation5 + $0x2b0] sm:$0xff]  ;;  %v633_v40 = vld [vmem:[#allocation5 + $0xc80] sm:$0xff] }
  0xaa   : > { %735 = vmatprep.mubr.f32.mxu0 %v5703_v41  ;;  %824 = vmatprep.mubr.f32.mxu1 %v5514_v0 }
  0xab   : > { %892 = vmatpush2.msra.mxu1 %v442_v42  ;;  %949 = vmatpush1.msra.mxu0 %v586_v43  ;;  %v318_v42 = vld [vmem:[#allocation5 + $0x2a8] sm:$0xff]  ;;  %v625_v43 = vld [vmem:[#allocation5 + $0xc40] sm:$0xff] }
  0xac   : > { %825 = vmatmul.mubr.f32.gmra.mxu1 %v5706_v44  ;;  %736 = vmatmul.mubr.f32.gmra.mxu0 %v5710_v45 }
  0xad   : > { %893 = vmatprep.subr.mxu1 %v434_v46  ;;  %950 = vmatprep.subr.mxu0 %v578_v47  ;;  %v310_v46 = vld [vmem:[#allocation5 + $0x268] sm:$0xff]  ;;  %v624_v47 = vld [vmem:[#allocation5 + $0xc38] sm:$0xff] }
  0xae   : > { %894 = vmatpush2.msra.mxu1 %v433_v48  ;;  %951 = vmatpush1.msra.mxu0 %v577_v49  ;;  %v309_v48 = vld [vmem:[#allocation5 + $0x260] sm:$0xff]  ;;  %v616_v49 = vld [vmem:[#allocation5 + $0xbf8] sm:$0xff] }
  0xaf   : > { %895 = vmatprep.subr.mxu1 %v425_v50  ;;  %952 = vmatprep.subr.mxu0 %v569_v51  ;;  %v301_v50 = vld [vmem:[#allocation5 + $0x220] sm:$0xff]  ;;  %v615_v51 = vld [vmem:[#allocation5 + $0xbf0] sm:$0xff] }
  0xb0   : > { %741 = vmatprep.mubr.f32.mxu0 %v5716_v52  ;;  %830 = vmatprep.mubr.f32.mxu1 %v5514_v0 }
  0xb1   : > { %896 = vmatpush2.msra.mxu1 %v424_v53  ;;  %953 = vmatpush1.msra.mxu0 %v568_v54  ;;  %v300_v53 = vld [vmem:[#allocation5 + $0x218] sm:$0xff]  ;;  %v607_v54 = vld [vmem:[#allocation5 + $0xbb0] sm:$0xff] }
  0xb2   : > { %831 = vmatmul.mubr.f32.gmra.mxu1 %v5719_v55  ;;  %742 = vmatmul.mubr.f32.gmra.mxu0 %v5723_v56 }
  0xb3   : > { %897 = vmatprep.subr.mxu1 %v416_v57  ;;  %954 = vmatprep.subr.mxu0 %v560_v58  ;;  %v292_v57 = vld [vmem:[#allocation5 + $0x1d8] sm:$0xff]  ;;  %v606_v58 = vld [vmem:[#allocation5 + $0xba8] sm:$0xff] }
  0xb4   : > { %898 = vmatpush2.msra.mxu1 %v415_v59  ;;  %955 = vmatpush1.msra.mxu0 %v559_v60  ;;  %v291_v59 = vld [vmem:[#allocation5 + $0x1d0] sm:$0xff]  ;;  %v598_v60 = vld [vmem:[#allocation5 + $0xb68] sm:$0xff] }
  0xb5   : > { %899 = vmatprep.subr.mxu1 %v407_v61  ;;  %956 = vmatprep.subr.mxu0 %v551_v62  ;;  %v283_v61 = vld [vmem:[#allocation5 + $0x190] sm:$0xff]  ;;  %v597_v62 = vld [vmem:[#allocation5 + $0xb60] sm:$0xff] }
  0xb6   : > { %747 = vmatprep.mubr.f32.mxu0 %v5729_v63  ;;  %836 = vmatprep.mubr.f32.mxu1 %v5514_v0 }
  0xb7   : > { %900 = vmatpush2.msra.mxu1 %v406_v1  ;;  %957 = vmatpush1.msra.mxu0 %v550_v2  ;;  %v282_v1 = vld [vmem:[#allocation5 + $0x188] sm:$0xff]  ;;  %v589_v2 = vld [vmem:[#allocation5 + $0xb20] sm:$0xff] }
  0xb8   : > { %837 = vmatmul.mubr.f32.gmra.mxu1 %v5732_v5  ;;  %748 = vmatmul.mubr.f32.gmra.mxu0 %v5736_v7 }
  0xb9   : > { %901 = vmatprep.subr.mxu1 %v398_v8  ;;  %958 = vmatprep.subr.mxu0 %v542_v9  ;;  %v274_v8 = vld [vmem:[#allocation5 + $0x148] sm:$0xff]  ;;  %v588_v9 = vld [vmem:[#allocation5 + $0xb18] sm:$0xff] }
  0xba   : > { %902 = vmatpush2.msra.mxu1 %v397_v10  ;;  %959 = vmatpush1.msra.mxu0 %v541_v11  ;;  %v273_v10 = vld [vmem:[#allocation5 + $0x140] sm:$0xff]  ;;  %v580_v11 = vld [vmem:[#allocation5 + $0xad8] sm:$0xff] }
  0xbb   : > { %903 = vmatprep.subr.mxu1 %v389_v12  ;;  %960 = vmatprep.subr.mxu0 %v533_v13  ;;  %v265_v12 = vld [vmem:[#allocation5 + $0x100] sm:$0xff]  ;;  %v579_v13 = vld [vmem:[#allocation5 + $0xad0] sm:$0xff] }
  0xbc   : > { %904 = vmatpush2.msra.mxu1 %v388_v14  ;;  %961 = vmatpush1.msra.mxu0 %v532_v15  ;;  %v264_v14 = vld [vmem:[#allocation5 + $0xf8] sm:$0xff]  ;;  %v571_v15 = vld [vmem:[#allocation5 + $0xa90] sm:$0xff] }
  0xbd   : > { %905 = vmatprep.subr.mxu1 %v380_v16  ;;  %962 = vmatprep.subr.mxu0 %v524_v17  ;;  %v256_v16 = vld [vmem:[#allocation5 + $0xb8] sm:$0xff]  ;;  %v570_v17 = vld [vmem:[#allocation5 + $0xa88] sm:$0xff] }
  0xbe   : > { %906 = vmatpush2.msra.mxu1 %v379_v18  ;;  %907 = vmatprep.mubr.f32.mxu1 %v5695_v4  ;;  %v255_v18 = vld [vmem:[#allocation5 + $0xb0] sm:$0xff] }
  0xbf   : > { %963 = vmatpush1.msra.mxu0 %v523_v19  ;;  %996 = vmatprep.mubr.f32.mxu0 %v5514_v0  ;;  %v562_v19 = vld [vmem:[#allocation5 + $0xa48] sm:$0xff] }
  0xc0   : > { %908 = vmatmul.mubr.f32.vlgmr.msra.gmra.mxu1 %v5698_v6  ;;  %997 = vmatmul.mubr.f32.vlgmr.msra.gmra.mxu0 %v5691_v3 }
  0xc1   : > { %1021 = vmatprep.subr.mxu0 %v373_v20  ;;  %913 = vmatprep.mubr.f32.mxu1 %v5703_v41  ;;  %v247_v20 = vld [vmem:[#allocation5 + $0x70] sm:$0xff] }
  0xc2   : > { %1022 = vmatpush1.msra.mxu0 %v372_v21  ;;  %1002 = vmatprep.mubr.f32.mxu0 %v5514_v0  ;;  %v246_v21 = vld [vmem:[#allocation5 + $0x68] sm:$0xff] }
  0xc3   : > { %1023 = vmatprep.subr.mxu0 %v364_v22  ;;  %1110 = vmatprep.subr.mxu1 %v661_v26  ;;  %v238_v22 = vld [vmem:[#allocation5 + $0x28] sm:$0xff]  ;;  %v516_v26 = vld [vmem:[#allocation5 + $0x8d8] sm:$0xff] }
  0xc4   : > { %1024 = vmatpush1.msra.mxu0 %v363_v23  ;;  %914 = vmatmul.mubr.f32.gmra.mxu1 %v5710_v45  ;;  %v561_v23 = vld [vmem:[#allocation5 + $0xa40] sm:$0xff] }
  0xc5   : > { %1003 = vmatmul.mubr.f32.gmra.mxu0 %v5706_v44  ;;  %1025 = vmatprep.subr.mxu0 %v355_v24  ;;  %v237_v24 = vld [vmem:[#allocation5 + $0x20] sm:$0xff] }
  0xc6   : > { %1026 = vmatpush1.msra.mxu0 %v354_v25  ;;  %1111 = vmatpush1.msra.mxu1 %v660_v28  ;;  %v517_v25 = vld [vmem:[#allocation5 + $0x8e0] sm:$0xff]  ;;  %v508_v28 = vld [vmem:[#allocation5 + $0x898] sm:$0xff] }
  0xc7   : > { %1027 = vmatprep.subr.mxu0 %v346_v27  ;;  %1112 = vmatprep.subr.mxu1 %v652_v30  ;;  %v553_v27 = vld [vmem:[#allocation5 + $0xa00] sm:$0xff]  ;;  %v507_v30 = vld [vmem:[#allocation5 + $0x890] sm:$0xff] }
  0xc8   : > { %1028 = vmatpush1.msra.mxu0 %v345_v29  ;;  %1113 = vmatpush1.msra.mxu1 %v651_v32  ;;  %v552_v29 = vld [vmem:[#allocation5 + $0x9f8] sm:$0xff]  ;;  %v499_v32 = vld [vmem:[#allocation5 + $0x850] sm:$0xff] }
  0xc9   : > { %1029 = vmatprep.subr.mxu0 %v337_v31  ;;  %1114 = vmatprep.subr.mxu1 %v643_v34  ;;  %v544_v31 = vld [vmem:[#allocation5 + $0x9b8] sm:$0xff]  ;;  %v490_v34 = vld [vmem:[#allocation5 + $0x808] sm:$0xff] }
  0xca   : > { %1030 = vmatpush1.msra.mxu0 %v336_v33  ;;  %1115 = vmatpush1.msra.mxu1 %v642_v36  ;;  %v498_v33 = vld [vmem:[#allocation5 + $0x848] sm:$0xff]  ;;  %v489_v36 = vld [vmem:[#allocation5 + $0x800] sm:$0xff] }
  0xcb   : > { %1031 = vmatprep.subr.mxu0 %v328_v35  ;;  %1116 = vmatprep.subr.mxu1 %v634_v38  ;;  %v543_v35 = vld [vmem:[#allocation5 + $0x9b0] sm:$0xff]  ;;  %v480_v38 = vld [vmem:[#allocation5 + $0x7b8] sm:$0xff] }
  0xcc   : > { %1032 = vmatpush1.msra.mxu0 %v327_v37  ;;  %1117 = vmatpush1.msra.mxu1 %v633_v40  ;;  %v481_v37 = vld [vmem:[#allocation5 + $0x7c0] sm:$0xff]  ;;  %v472_v40 = vld [vmem:[#allocation5 + $0x778] sm:$0xff] }
  0xcd   : > { %1033 = vmatprep.subr.mxu0 %v319_v39  ;;  %1118 = vmatprep.subr.mxu1 %v625_v43  ;;  %v535_v39 = vld [vmem:[#allocation5 + $0x970] sm:$0xff] }
  0xce   : > { %1034 = vmatpush1.msra.mxu0 %v318_v42  ;;  %1119 = vmatpush1.msra.mxu1 %v624_v47  ;;  %v534_v42 = vld [vmem:[#allocation5 + $0x968] sm:$0xff]  ;;  %v471_v43 = vld [vmem:[#allocation5 + $0x770] sm:$0xff] }
  0xcf   : > { %1035 = vmatprep.subr.mxu0 %v310_v46  ;;  %1120 = vmatprep.subr.mxu1 %v616_v49  ;;  %v526_v46 = vld [vmem:[#allocation5 + $0x928] sm:$0xff]  ;;  %v463_v47 = vld [vmem:[#allocation5 + $0x730] sm:$0xff]  ;;  %v525_v49 = vld [vmem:[#allocation5 + $0x920] sm:$0xff] }
  0xd0   : > { %1036 = vmatpush1.msra.mxu0 %v309_v48  ;;  %1121 = vmatpush1.msra.mxu1 %v615_v51  ;;  %v462_v48 = vld [vmem:[#allocation5 + $0x728] sm:$0xff]  ;;  %v453_v51 = vld [vmem:[#allocation5 + $0x6e0] sm:$0xff] }
  0xd1   : > { %1037 = vmatprep.subr.mxu0 %v301_v50  ;;  %1122 = vmatprep.subr.mxu1 %v607_v54  ;;  %v454_v50 = vld [vmem:[#allocation5 + $0x6e8] sm:$0xff]  ;;  %v375_v54 = vld [vmem:[#allocation5 + $0x470] sm:$0xff] }
  0xd2   : > { %1038 = vmatpush1.msra.mxu0 %v300_v53  ;;  %1123 = vmatpush1.msra.mxu1 %v606_v58  ;;  %v445_v53 = vld [vmem:[#allocation5 + $0x6a0] sm:$0xff]  ;;  %v374_v58 = vld [vmem:[#allocation5 + $0x468] sm:$0xff] }
  0xd3   : > { %1039 = vmatprep.subr.mxu0 %v292_v57  ;;  %1124 = vmatprep.subr.mxu1 %v598_v60  ;;  %v444_v57 = vld [vmem:[#allocation5 + $0x698] sm:$0xff]  ;;  %v366_v60 = vld [vmem:[#allocation5 + $0x428] sm:$0xff] }
  0xd4   : > { %1040 = vmatpush1.msra.mxu0 %v291_v59  ;;  %1125 = vmatpush1.msra.mxu1 %v597_v62  ;;  %v436_v59 = vld [vmem:[#allocation5 + $0x658] sm:$0xff]  ;;  %v427_v62 = vld [vmem:[#allocation5 + $0x610] sm:$0xff] }
  0xd5   : > { %1041 = vmatprep.subr.mxu0 %v283_v61  ;;  %1126 = vmatprep.subr.mxu1 %v589_v2  ;;  %v435_v61 = vld [vmem:[#allocation5 + $0x650] sm:$0xff]  ;;  %v418_v2 = vld [vmem:[#allocation5 + $0x5c8] sm:$0xff] }
  0xd6   : > { %1042 = vmatpush1.msra.mxu0 %v282_v1  ;;  %1127 = vmatpush1.msra.mxu1 %v588_v9  ;;  %v426_v1 = vld [vmem:[#allocation5 + $0x608] sm:$0xff]  ;;  %v417_v9 = vld [vmem:[#allocation5 + $0x5c0] sm:$0xff] }
  0xd7   : > { %1043 = vmatprep.subr.mxu0 %v274_v8  ;;  %1128 = vmatprep.subr.mxu1 %v580_v11  ;;  %v357_v8 = vld [vmem:[#allocation5 + $0x3e0] sm:$0xff]  ;;  %v348_v11 = vld [vmem:[#allocation5 + $0x398] sm:$0xff] }
  0xd8   : > { %1044 = vmatpush1.msra.mxu0 %v273_v10  ;;  %1129 = vmatpush1.msra.mxu1 %v579_v13  ;;  %v409_v10 = vld [vmem:[#allocation5 + $0x580] sm:$0xff]  ;;  %v347_v13 = vld [vmem:[#allocation5 + $0x390] sm:$0xff] }
  0xd9   : > { %1045 = vmatprep.subr.mxu0 %v265_v12  ;;  %1130 = vmatprep.subr.mxu1 %v571_v15  ;;  %v408_v12 = vld [vmem:[#allocation5 + $0x578] sm:$0xff]  ;;  %v339_v15 = vld [vmem:[#allocation5 + $0x350] sm:$0xff] }
  0xda   : > { %1046 = vmatpush1.msra.mxu0 %v264_v14  ;;  %1131 = vmatpush1.msra.mxu1 %v570_v17  ;;  %v400_v14 = vld [vmem:[#allocation5 + $0x538] sm:$0xff]  ;;  %v338_v17 = vld [vmem:[#allocation5 + $0x348] sm:$0xff] }
  0xdb   : > { %1047 = vmatprep.subr.mxu0 %v256_v16  ;;  %1132 = vmatprep.subr.mxu1 %v562_v19  ;;  %v399_v16 = vld [vmem:[#allocation5 + $0x530] sm:$0xff]  ;;  %v330_v19 = vld [vmem:[#allocation5 + $0x308] sm:$0xff] }
  0xdc   : > { %1048 = vmatpush1.msra.mxu0 %v255_v18  ;;  %919 = vmatprep.mubr.f32.mxu1 %v5716_v52  ;;  %v391_v18 = vld [vmem:[#allocation5 + $0x4f0] sm:$0xff] }
  0xdd   : > { %1049 = vmatprep.subr.mxu0 %v247_v20  ;;  %1008 = vmatprep.mubr.f32.mxu0 %v5514_v0  ;;  %v390_v20 = vld [vmem:[#allocation5 + $0x4e8] sm:$0xff] }
  0xde   : > { %1050 = vmatpush1.msra.mxu0 %v246_v21  ;;  %1133 = vmatpush1.msra.mxu1 %v561_v23  ;;  %v382_v21 = vld [vmem:[#allocation5 + $0x4a8] sm:$0xff]  ;;  %v381_v23 = vld [vmem:[#allocation5 + $0x4a0] sm:$0xff] }
  0xdf   : > { %1051 = vmatprep.subr.mxu0 %v238_v22  ;;  %920 = vmatmul.mubr.f32.gmra.mxu1 %v5723_v56  ;;  %v321_v22 = vld [vmem:[#allocation5 + $0x2c0] sm:$0xff] }
  0xe0   : > { %1052 = vmatpush1.msra.mxu0 %v237_v24  ;;  %1134 = vmatprep.subr.mxu1 %v553_v27  ;;  %v320_v24 = vld [vmem:[#allocation5 + $0x2b8] sm:$0xff]  ;;  %v303_v27 = vld [vmem:[#allocation5 + $0x230] sm:$0xff] }
  0xe1   : > { %1053 = vmatprep.subr.mxu0 %v517_v25  ;;  %1009 = vmatmul.mubr.f32.gmra.mxu0 %v5719_v55  ;;  %v312_v25 = vld [vmem:[#allocation5 + $0x278] sm:$0xff] }
  0xe2   : > { %1054 = vmatpush2.msra.mxu0 %v516_v26  ;;  %1135 = vmatpush1.msra.mxu1 %v552_v29  ;;  %v311_v26 = vld [vmem:[#allocation5 + $0x270] sm:$0xff]  ;;  %v302_v29 = vld [vmem:[#allocation5 + $0x228] sm:$0xff] }
  0xe3   : > { %1055 = vmatprep.subr.mxu0 %v508_v28  ;;  %1136 = vmatprep.subr.mxu1 %v544_v31  ;;  %v663_v28 = vld [vmem:[#allocation5 + $0xd70] sm:$0xff]  ;;  %v294_v31 = vld [vmem:[#allocation5 + $0x1e8] sm:$0xff] }
  0xe4   : > { %1056 = vmatpush2.msra.mxu0 %v507_v30  ;;  %925 = vmatprep.mubr.f32.mxu1 %v5729_v63  ;;  %v662_v30 = vld [vmem:[#allocation5 + $0xd68] sm:$0xff] }
  0xe5   : > { %1057 = vmatprep.subr.mxu0 %v499_v32  ;;  %1014 = vmatprep.mubr.f32.mxu0 %v5514_v0  ;;  %v293_v32 = vld [vmem:[#allocation5 + $0x1e0] sm:$0xff] }
  0xe6   : > { %1058 = vmatpush2.msra.mxu0 %v498_v33  ;;  %1137 = vmatpush1.msra.mxu1 %v543_v35  ;;  %v654_v33 = vld [vmem:[#allocation5 + $0xd28] sm:$0xff]  ;;  %v653_v35 = vld [vmem:[#allocation5 + $0xd20] sm:$0xff] }
  0xe7   : > { %1059 = vmatprep.subr.mxu0 %v490_v34  ;;  %926 = vmatmul.mubr.f32.gmra.mxu1 %v5736_v7  ;;  %v285_v34 = vld [vmem:[#allocation5 + $0x1a0] sm:$0xff] }
  0xe8   : > { %1060 = vmatpush2.msra.mxu0 %v489_v36  ;;  %1138 = vmatprep.subr.mxu1 %v535_v39  ;;  %v284_v36 = vld [vmem:[#allocation5 + $0x198] sm:$0xff] }
  0xe9   : > { %1061 = vmatprep.subr.mxu0 %v481_v37  ;;  %1015 = vmatmul.mubr.f32.gmra.mxu0 %v5732_v5  ;;  %v276_v37 = vld [vmem:[#allocation5 + $0x158] sm:$0xff] }
  0xea   : > { %1062 = vmatpush2.msra.mxu0 %v480_v38  ;;  %1139 = vmatpush1.msra.mxu1 %v534_v42  ;;  %v644_v38 = vld [vmem:[#allocation5 + $0xcd8] sm:$0xff]  ;;  %v635_v42 = vld [vmem:[#allocation5 + $0xc90] sm:$0xff] }
  0xeb   : > { %1063 = vmatprep.subr.mxu0 %v472_v40  ;;  %1140 = vmatprep.subr.mxu1 %v526_v46  ;;  %v636_v39 = vld [vmem:[#allocation5 + $0xc98] sm:$0xff]  ;;  %v267_v40 = vld [vmem:[#allocation5 + $0x110] sm:$0xff] }
  0xec   : > { %1064 = vmatpush2.msra.mxu0 %v471_v43  ;;  %1085 = vmatprep.mubr.f32.mxu0 %v5695_v4  ;;  %v365_v4 = vld [vmem:[#allocation5 + $0x420] sm:$0xff]  ;;  %v266_v43 = vld [vmem:[#allocation5 + $0x108] sm:$0xff]  ;;  %v627_v46 = vld [vmem:[#allocation5 + $0xc50] sm:$0xff] }
  0xed   : > { %1065 = vmatprep.subr.mxu0 %v463_v47  ;;  %1141 = vmatpush1.msra.mxu1 %v525_v49  ;;  %v626_v47 = vld [vmem:[#allocation5 + $0xc48] sm:$0xff] }
  0xee   : > { %1066 = vmatpush2.msra.mxu0 %v462_v48  ;;  %1174 = vmatprep.mubr.f32.mxu1 %v5514_v0  ;;  %v257_v48 = vld [vmem:[#allocation5 + $0xc0] sm:$0xff]  ;;  %v618_v49 = vld [vmem:[#allocation5 + $0xc08] sm:$0xff] }
  0xef   : > { %1067 = vmatprep.subr.mxu0 %v454_v50  ;;  %1175 = vmatmul.mubr.f32.vlgmr.msra.gmra.mxu1 %v5691_v3  ;;  %v356_v3 = vld [vmem:[#allocation5 + $0x3d8] sm:$0xff]  ;;  %v249_v50 = vld [vmem:[#allocation5 + $0x80] sm:$0xff] }
  0xf0   : > { %1068 = vmatpush2.msra.mxu0 %v453_v51  ;;  %1199 = vmatprep.subr.mxu1 %v375_v54  ;;  %v617_v51 = vld [vmem:[#allocation5 + $0xc00] sm:$0xff] }
  0xf1   : > { %1069 = vmatprep.subr.mxu0 %v445_v53  ;;  %1200 = vmatpush1.msra.mxu1 %v374_v58  ;;  %v248_v53 = vld [vmem:[#allocation5 + $0x78] sm:$0xff]  ;;  %v609_v54 = vld [vmem:[#allocation5 + $0xbc0] sm:$0xff] }
  0xf2   : > { %1070 = vmatpush2.msra.mxu0 %v444_v57  ;;  %1201 = vmatprep.subr.mxu1 %v366_v60  ;;  %v240_v57 = vld [vmem:[#allocation5 + $0x38] sm:$0xff] }
  0xf3   : > { %1071 = vmatprep.subr.mxu0 %v436_v59  ;;  %1180 = vmatprep.mubr.f32.mxu1 %v5514_v0  ;;  %v608_v58 = vld [vmem:[#allocation5 + $0xbb8] sm:$0xff]  ;;  %v239_v59 = vld [vmem:[#allocation5 + $0x30] sm:$0xff] }
  0xf4   : > { %1072 = vmatpush2.msra.mxu0 %v435_v61  ;;  %1202 = vmatpush1.msra.mxu1 %v365_v4  ;;  %v600_v60 = vld [vmem:[#allocation5 + $0xb78] sm:$0xff]  ;;  %v519_v61 = vld [vmem:[#allocation5 + $0x8f0] sm:$0xff]  ;;  %v518_v4 = vld [vmem:[#allocation5 + $0x8e8] sm:$0xff] }
  0xf5   : > { %1073 = vmatprep.subr.mxu0 %v427_v62  ;;  %1181 = vmatmul.mubr.f32.gmra.mxu1 %v5706_v44  ;;  %v329_v44 = vld [vmem:[#allocation5 + $0x300] sm:$0xff]  ;;  %v599_v62 = vld [vmem:[#allocation5 + $0xb70] sm:$0xff] }
  0xf6   : > { %1074 = vmatpush2.msra.mxu0 %v426_v1  ;;  %1203 = vmatprep.subr.mxu1 %v357_v8  ;;  %v591_v1 = vld [vmem:[#allocation5 + $0xb30] sm:$0xff]  ;;  %v590_v8 = vld [vmem:[#allocation5 + $0xb28] sm:$0xff] }
  0xf7   : > { %1075 = vmatprep.subr.mxu0 %v418_v2  ;;  %1204 = vmatpush1.msra.mxu1 %v356_v3  ;;  %v510_v2 = vld [vmem:[#allocation5 + $0x8a8] sm:$0xff] }
  0xf8   : > { %1076 = vmatpush2.msra.mxu0 %v417_v9  ;;  %1205 = vmatprep.subr.mxu1 %v348_v11  ;;  %v509_v9 = vld [vmem:[#allocation5 + $0x8a0] sm:$0xff]  ;;  %v582_v3 = vld [vmem:[#allocation5 + $0xae8] sm:$0xff] }
  0xf9   : > { %1077 = vmatprep.subr.mxu0 %v409_v10  ;;  %1206 = vmatpush1.msra.mxu1 %v347_v13  ;;  %v501_v10 = vld [vmem:[#allocation5 + $0x860] sm:$0xff] }
  0xfa   : > { %1078 = vmatpush2.msra.mxu0 %v408_v12  ;;  %1207 = vmatprep.subr.mxu1 %v339_v15  ;;  %v581_v11 = vld [vmem:[#allocation5 + $0xae0] sm:$0xff]  ;;  %v500_v12 = vld [vmem:[#allocation5 + $0x858] sm:$0xff] }
  0xfb   : > { %1079 = vmatprep.subr.mxu0 %v400_v14  ;;  %1208 = vmatpush1.msra.mxu1 %v338_v17  ;;  %v573_v13 = vld [vmem:[#allocation5 + $0xaa0] sm:$0xff]  ;;  %v492_v14 = vld [vmem:[#allocation5 + $0x818] sm:$0xff] }
  0xfc   : > { %1080 = vmatpush2.msra.mxu0 %v399_v16  ;;  %1209 = vmatprep.subr.mxu1 %v330_v19  ;;  %v572_v15 = vld [vmem:[#allocation5 + $0xa98] sm:$0xff]  ;;  %v491_v16 = vld [vmem:[#allocation5 + $0x810] sm:$0xff] }
  0xfd   : > { %1081 = vmatprep.subr.mxu0 %v391_v18  ;;  %1210 = vmatpush1.msra.mxu1 %v329_v44  ;;  %v564_v17 = vld [vmem:[#allocation5 + $0xa58] sm:$0xff]  ;;  %v483_v18 = vld [vmem:[#allocation5 + $0x7d0] sm:$0xff]  ;;  %v474_v44 = vld [vmem:[#allocation5 + $0x788] sm:$0xff] }
  0xfe   : > { %1082 = vmatpush2.msra.mxu0 %v390_v20  ;;  %1211 = vmatprep.subr.mxu1 %v321_v22  ;;  %v563_v19 = vld [vmem:[#allocation5 + $0xa50] sm:$0xff]  ;;  %v482_v20 = vld [vmem:[#allocation5 + $0x7c8] sm:$0xff]  ;;  %v473_v22 = vld [vmem:[#allocation5 + $0x780] sm:$0xff] }
  0xff   : > { %1083 = vmatprep.subr.mxu0 %v382_v21  ;;  %1212 = vmatpush1.msra.mxu1 %v320_v24  ;;  %v555_v21 = vld [vmem:[#allocation5 + $0xa10] sm:$0xff]  ;;  %v554_v24 = vld [vmem:[#allocation5 + $0xa08] sm:$0xff] }
 0x100   : > { %1084 = vmatpush2.msra.mxu0 %v381_v23  ;;  %1213 = vmatprep.subr.mxu1 %v312_v25  ;;  %v465_v23 = vld [vmem:[#allocation5 + $0x740] sm:$0xff]  ;;  %v464_v25 = vld [vmem:[#allocation5 + $0x738] sm:$0xff] }
 0x101   : > { %1086 = vmatmul.mubr.f32.vlgmr.msra.gmra.mxu0 %v5698_v6  ;;  %1214 = vmatpush1.msra.mxu1 %v311_v26  ;;  %v645_v6 = vld [vmem:[#allocation5 + $0xce0] sm:$0xff]  ;;  %v546_v26 = vld [vmem:[#allocation5 + $0x9c8] sm:$0xff] }
 0x102   : > { %1091 = vmatprep.mubr.f32.mxu0 %v5703_v41  ;;  %1215 = vmatprep.subr.mxu1 %v303_v27  ;;  %v275_v41 = vld [vmem:[#allocation5 + $0x150] sm:$0xff]  ;;  %v456_v27 = vld [vmem:[#allocation5 + $0x6f8] sm:$0xff] }
 0x103   : > { %1288 = vmatprep.subr.mxu0 %v663_v28  ;;  %1216 = vmatpush1.msra.mxu1 %v302_v29  ;;  %v545_v28 = vld [vmem:[#allocation5 + $0x9c0] sm:$0xff]  ;;  %v455_v29 = vld [vmem:[#allocation5 + $0x6f0] sm:$0xff] }
 0x104   : > { %1289 = vmatpush1.msra.mxu0 %v662_v30  ;;  %1217 = vmatprep.subr.mxu1 %v294_v31  ;;  %v447_v30 = vld [vmem:[#allocation5 + $0x6b0] sm:$0xff]  ;;  %v537_v31 = vld [vmem:[#allocation5 + $0x980] sm:$0xff] }
 0x105   : > { %1092 = vmatmul.mubr.f32.gmra.mxu0 %v5710_v45  ;;  %1218 = vmatpush1.msra.mxu1 %v293_v32  ;;  %v258_v45 = vld [vmem:[#allocation5 + $0xc8] sm:$0xff] }
 0x106   : > { %1290 = vmatprep.subr.mxu0 %v654_v33  ;;  %1219 = vmatprep.subr.mxu1 %v285_v34  ;;  %v446_v32 = vld [vmem:[#allocation5 + $0x6a8] sm:$0xff]  ;;  %v536_v33 = vld [vmem:[#allocation5 + $0x978] sm:$0xff]  ;;  %v437_v34 = vld [vmem:[#allocation5 + $0x660] sm:$0xff] }
 0x107   : > { %1291 = vmatpush1.msra.mxu0 %v653_v35  ;;  %1220 = vmatpush1.msra.mxu1 %v284_v36  ;;  %v528_v35 = vld [vmem:[#allocation5 + $0x938] sm:$0xff] }
 0x108   : > { %1292 = vmatprep.subr.mxu0 %v645_v6  ;;  %1221 = vmatprep.subr.mxu1 %v276_v37  ;;  %v428_v36 = vld [vmem:[#allocation5 + $0x618] sm:$0xff]  ;;  %v527_v6 = vld [vmem:[#allocation5 + $0x930] sm:$0xff] }
 0x109   : > { %1293 = vmatpush1.msra.mxu0 %v644_v38  ;;  %1222 = vmatpush1.msra.mxu1 %v275_v41  ;;  %v420_v37 = vld [vmem:[#allocation5 + $0x5d8] sm:$0xff]  ;;  %v419_v38 = vld [vmem:[#allocation5 + $0x5d0] sm:$0xff] }
 0x10a   : > { %1294 = vmatprep.subr.mxu0 %v636_v39  ;;  %1223 = vmatprep.subr.mxu1 %v267_v40  ;;  %v520_v41 = vld [vmem:[#allocation5 + $0x8f8] sm:$0xff]  ;;  %v402_v39 = vld [vmem:[#allocation5 + $0x548] sm:$0xff] }
 0x10b   : > { %1295 = vmatpush1.msra.mxu0 %v635_v42  ;;  %1224 = vmatpush1.msra.mxu1 %v266_v43  ;;  %v376_v40 = vld [vmem:[#allocation5 + $0x478] sm:$0xff]  ;;  %v401_v42 = vld [vmem:[#allocation5 + $0x540] sm:$0xff]  ;;  %v5773_v43 = vld [vmem:[%s5679_s25 + $0x10] sm:$0xff] }
 0x10c   : > { %1296 = vmatprep.subr.mxu0 %v627_v46  ;;  %1225 = vmatprep.subr.mxu1 %v258_v45  ;;  %v393_v46 = vld [vmem:[#allocation5 + $0x500] sm:$0xff]  ;;  %v511_v45 = vld [vmem:[#allocation5 + $0x8b0] sm:$0xff] }
 0x10d   : > { %1297 = vmatpush1.msra.mxu0 %v626_v47  ;;  %1226 = vmatpush1.msra.mxu1 %v257_v48  ;;  %v367_v47 = vld [vmem:[#allocation5 + $0x430] sm:$0xff]  ;;  %v502_v48 = vld [vmem:[#allocation5 + $0x868] sm:$0xff] }
 0x10e   : > { %1298 = vmatprep.subr.mxu0 %v618_v49  ;;  %1227 = vmatprep.subr.mxu1 %v249_v50  ;;  %v384_v49 = vld [vmem:[#allocation5 + $0x4b8] sm:$0xff]  ;;  %v358_v50 = vld [vmem:[#allocation5 + $0x3e8] sm:$0xff] }
 0x10f   : > { %1299 = vmatpush1.msra.mxu0 %v617_v51  ;;  %1228 = vmatpush1.msra.mxu1 %v248_v53  ;;  %v383_v51 = vld [vmem:[#allocation5 + $0x4b0] sm:$0xff]  ;;  %v493_v53 = vld [vmem:[#allocation5 + $0x820] sm:$0xff] }
 0x110   : > { %1300 = vmatprep.subr.mxu0 %v609_v54  ;;  %1229 = vmatprep.subr.mxu1 %v240_v57  ;;  %v664_v54 = vld [vmem:[#allocation5 + $0xd78] sm:$0xff]  ;;  %v349_v57 = vld [vmem:[#allocation5 + $0x3a0] sm:$0xff] }
 0x111   : > { %1301 = vmatpush1.msra.mxu0 %v608_v58  ;;  %1230 = vmatpush1.msra.mxu1 %v239_v59  ;;  %v5779_v58 = vld [vmem:[%s5679_s25 + $0x8] sm:$0xff]  ;;  %v484_v59 = vld [vmem:[#allocation5 + $0x7d8] sm:$0xff] }
 0x112   : > { %1302 = vmatprep.subr.mxu0 %v600_v60  ;;  %1231 = vmatprep.subr.mxu1 %v519_v61  ;;  %v655_v60 = vld [vmem:[#allocation5 + $0xd30] sm:$0xff]  ;;  %v5783_v61 = vld [vmem:[%s5679_s25] sm:$0xff] }
 0x113   : > { %1303 = vmatpush1.msra.mxu0 %v599_v62  ;;  %1232 = vmatpush2.msra.mxu1 %v518_v4  ;;  %v475_v62 = vld [vmem:[#allocation5 + $0x790] sm:$0xff]  ;;  %v646_v4 = vld [vmem:[#allocation5 + $0xce8] sm:$0xff] }
 0x114   : > { %1304 = vmatprep.subr.mxu0 %v591_v1  ;;  %1233 = vmatprep.subr.mxu1 %v510_v2  ;;  %v331_v1 = vld [vmem:[#allocation5 + $0x310] sm:$0xff]  ;;  %v466_v2 = vld [vmem:[#allocation5 + $0x748] sm:$0xff] }
 0x115   : > { %1305 = vmatpush1.msra.mxu0 %v590_v8  ;;  %1234 = vmatpush2.msra.mxu1 %v509_v9  ;;  %v637_v8 = vld [vmem:[#allocation5 + $0xca0] sm:$0xff]  ;;  %v322_v9 = vld [vmem:[#allocation5 + $0x2c8] sm:$0xff] }
 0x116   : > { %1306 = vmatprep.subr.mxu0 %v582_v3  ;;  %1235 = vmatprep.subr.mxu1 %v501_v10  ;;  %v457_v3 = vld [vmem:[#allocation5 + $0x700] sm:$0xff]  ;;  %v628_v10 = vld [vmem:[#allocation5 + $0xc58] sm:$0xff] }
 0x117   : > { %1307 = vmatpush1.msra.mxu0 %v581_v11  ;;  %1236 = vmatpush2.msra.mxu1 %v500_v12  ;;  %v313_v11 = vld [vmem:[#allocation5 + $0x280] sm:$0xff]  ;;  %v448_v12 = vld [vmem:[#allocation5 + $0x6b8] sm:$0xff] }
 0x118   : > { %1308 = vmatprep.subr.mxu0 %v573_v13  ;;  %1237 = vmatprep.subr.mxu1 %v492_v14  ;;  %v619_v13 = vld [vmem:[#allocation5 + $0xc10] sm:$0xff]  ;;  %v304_v14 = vld [vmem:[#allocation5 + $0x238] sm:$0xff] }
 0x119   : > { %1309 = vmatpush1.msra.mxu0 %v572_v15  ;;  %1238 = vmatpush2.msra.mxu1 %v491_v16  ;;  %v439_v15 = vld [vmem:[#allocation5 + $0x670] sm:$0xff]  ;;  %v610_v16 = vld [vmem:[#allocation5 + $0xbc8] sm:$0xff] }
 0x11a   : > { %1310 = vmatprep.subr.mxu0 %v564_v17  ;;  %1239 = vmatprep.subr.mxu1 %v483_v18  ;;  %v295_v17 = vld [vmem:[#allocation5 + $0x1f0] sm:$0xff]  ;;  %v430_v18 = vld [vmem:[#allocation5 + $0x628] sm:$0xff] }
 0x11b   : > { %1311 = vmatpush1.msra.mxu0 %v563_v19  ;;  %1240 = vmatpush2.msra.mxu1 %v482_v20  ;;  %v601_v19 = vld [vmem:[#allocation5 + $0xb80] sm:$0xff]  ;;  %v286_v20 = vld [vmem:[#allocation5 + $0x1a8] sm:$0xff] }
 0x11c   : > { %1097 = vmatprep.mubr.f32.mxu0 %v5716_v52  ;;  %1241 = vmatprep.subr.mxu1 %v474_v44  ;;  %v438_v52 = vld [vmem:[#allocation5 + $0x668] sm:$0xff]  ;;  %v421_v44 = vld [vmem:[#allocation5 + $0x5e0] sm:$0xff] }
 0x11d   : > { %1312 = vmatprep.subr.mxu0 %v555_v21  ;;  %1242 = vmatpush2.msra.mxu1 %v473_v22  ;;  %v5788_v21 = vld [vmem:[%s5679_s25 + $0x28] sm:$0xff]  ;;  %v592_v22 = vld [vmem:[#allocation5 + $0xb38] sm:$0xff] }
 0x11e   : > { %1098 = vmatmul.mubr.f32.gmra.mxu0 %v5723_v56  ;;  %1243 = vmatprep.subr.mxu1 %v465_v23  ;;  %v429_v56 = vld [vmem:[#allocation5 + $0x620] sm:$0xff] }
 0x11f   : > { %1313 = vmatpush1.msra.mxu0 %v554_v24  ;;  %1244 = vmatpush2.msra.mxu1 %v464_v25  ;;  %v277_v23 = vld [vmem:[#allocation5 + $0x160] sm:$0xff]  ;;  %v412_v24 = vld [vmem:[#allocation5 + $0x598] sm:$0xff]  ;;  %v583_v25 = vld [vmem:[#allocation5 + $0xaf0] sm:$0xff] }
 0x120   : > { %1314 = vmatprep.subr.mxu0 %v546_v26  ;;  %1245 = vmatprep.subr.mxu1 %v456_v27  ;;  %v268_v26 = vld [vmem:[#allocation5 + $0x118] sm:$0xff]  ;;  %v5349_v27 = vld [vmem:[%s5679_s25 + $0x40] sm:$0xff] }
 0x121   : > { %1315 = vmatpush1.msra.mxu0 %v545_v28  ;;  %1246 = vmatpush2.msra.mxu1 %v455_v29  ;;  %v403_v28 = vld [vmem:[#allocation5 + $0x550] sm:$0xff]  ;;  %v5350_v29 = vld [vmem:[%s5679_s25 + $0x20] sm:$0xff] }
 0x122   : > { %1103 = vmatprep.mubr.f32.mxu0 %v5729_v63  ;;  %1247 = vmatprep.subr.mxu1 %v447_v30  ;;  %v411_v63 = vld [vmem:[#allocation5 + $0x590] sm:$0xff]  ;;  %v574_v30 = vld [vmem:[#allocation5 + $0xaa8] sm:$0xff] }
 0x123   : > { %1316 = vmatprep.subr.mxu0 %v537_v31  ;;  %1248 = vmatpush2.msra.mxu1 %v446_v32  ;;  %v259_v31 = vld [vmem:[#allocation5 + $0xd0] sm:$0xff]  ;;  %v5351_v32 = vld [vmem:[%s5679_s25 + $0x18] sm:$0xff] }
 0x124   : > { %1104 = vmatmul.mubr.f32.gmra.mxu0 %v5736_v7  ;;  %1249 = vmatprep.subr.mxu1 %v438_v52  ;;  %v410_v7 = vld [vmem:[#allocation5 + $0x588] sm:$0xff] }
 0x125   : > { %1317 = vmatpush1.msra.mxu0 %v536_v33  ;;  %1250 = vmatpush2.msra.mxu1 %v437_v34  ;;  %v394_v52 = vld [vmem:[#allocation5 + $0x508] sm:$0xff]  ;;  %v565_v33 = vld [vmem:[#allocation5 + $0xa60] sm:$0xff] }
 0x126   : > { %1186 = vmatprep.mubr.f32.mxu1 %v5514_v0  ;;  %1251 = vmatprep.subr.mxu1 %v429_v56  ;;  %v250_v34 = vld [vmem:[#allocation5 + $0x88] sm:$0xff]  ;;  %v5352_v56 = vld [vmem:[%s5679_s25 + $0x58] sm:$0xff] }
 0x127   : > { %1318 = vmatprep.subr.mxu0 %v528_v35  ;;  %1252 = vmatpush2.msra.mxu1 %v428_v36  ;;  %v385_v35 = vld [vmem:[#allocation5 + $0x4c0] sm:$0xff]  ;;  %v5353_v36 = vld [vmem:[%s5679_s25 + $0x38] sm:$0xff] }
 0x128   : > { %1319 = vmatpush1.msra.mxu0 %v527_v6  ;;  %1253 = vmatprep.subr.mxu1 %v420_v37  ;;  %v556_v6 = vld [vmem:[#allocation5 + $0xa18] sm:$0xff]  ;;  %v241_v37 = vld [vmem:[#allocation5 + $0x40] sm:$0xff] }
 0x129   : > { %1187 = vmatmul.mubr.f32.gmra.mxu1 %v5719_v55  ;;  %1352 = vmatprep.mubr.f32.mxu0 %v5514_v0  ;;  %v392_v55 = vld [vmem:[#allocation5 + $0x4f8] sm:$0xff] }
 0x12a   : > { %1254 = vmatpush2.msra.mxu1 %v419_v38  ;;  %4681 = vmatprep.subr.mxu0 %v520_v41  ;;  %v5354_v38 = vld [vmem:[%s5679_s25 + $0x30] sm:$0xff]  ;;  %v538_v41 = vld [vmem:[#allocation5 + $0x988] sm:$0xff] }
 0x12b   : > { %1255 = vmatprep.subr.mxu1 %v411_v63  ;;  %1353 = vmatmul.mubr.f32.vlgmr.msra.gmra.mxu0 %v5773_v43  ;;  %v547_v63 = vld [vmem:[#allocation5 + $0x9d0] sm:$0xff] }
 0x12c   : > { %1256 = vmatpush2.msra.mxu1 %v410_v7  ;;  %4682 = vmatpush3.msra.mxu0 %v376_v40  ;;  %v5355_v7 = vld [vmem:[%s5679_s25 + $0x50] sm:$0xff]  ;;  %v5356_v40 = vld [vmem:[%s5679_s25 + $0x48] sm:$0xff] }
 0x12d   : > { %1257 = vmatprep.subr.mxu1 %v402_v39  ;;  %1192 = vmatprep.mubr.f32.mxu1 %v5514_v0  ;;  %v529_v39 = vld [vmem:[#allocation5 + $0x940] sm:$0xff] }
 0x12e   : > { %1258 = vmatpush2.msra.mxu1 %v401_v42  ;;  %4683 = vmatprep.subr.mxu0 %v511_v45 }
 0x12f   : > { %1259 = vmatprep.subr.mxu1 %v393_v46  ;;  %1193 = vmatmul.mubr.f32.gmra.mxu1 %v5732_v5  ;;  %v340_v5 = vld [vmem:[#allocation5 + $0x358] sm:$0xff] }
 0x130   : > { %4684 = vmatpush3.msra.mxu0 %v367_v47  ;;  %1260 = vmatpush2.msra.mxu1 %v392_v55 }
 0x131   : > { %4685 = vmatprep.subr.mxu0 %v502_v48  ;;  %1261 = vmatprep.subr.mxu1 %v384_v49 }
 0x132   : > { %4686 = vmatpush3.msra.mxu0 %v358_v50  ;;  %1262 = vmatpush2.msra.mxu1 %v383_v51 }
 0x133   : > { %1263 = vmatprep.mubr.f32.mxu1 %v5779_v58  ;;  %4687 = vmatprep.subr.mxu0 %v493_v53 }
 0x134   : > { %4905 = vmatprep.subr.mxu1 %v664_v54  ;;  %1264 = vmatmul.mubr.f32.vlgmr.msra.gmra.mxu1 %v5783_v61 }
 0x135   : > { %4688 = vmatpush3.msra.mxu0 %v349_v57  ;;  %4906 = vmatpush3.msra.mxu1 %v664_v54 }
 0x136   : > { %4689 = vmatprep.subr.mxu0 %v484_v59  ;;  %4907 = vmatprep.subr.mxu1 %v655_v60 }
 0x137   : > { %4690 = vmatpush3.msra.mxu0 %v340_v5  ;;  %4908 = vmatpush3.msra.mxu1 %v655_v60 }
 0x138   : > { %4691 = vmatprep.subr.mxu0 %v475_v62  ;;  %4909 = vmatprep.subr.mxu1 %v646_v4  ;;  %v820_v42 = vpop.f32.mrf.mxu1 }
 0x139   : > { %4692 = vmatpush3.msra.mxu0 %v331_v1  ;;  %4910 = vmatpush3.msra.mxu1 %v646_v4 }
 0x13a   : > { %4693 = vmatprep.subr.mxu0 %v466_v2  ;;  %4911 = vmatprep.subr.mxu1 %v637_v8  ;;  %v822_v47 = vpop.f32.mrf.mxu1 }
 0x13b   : > { %4694 = vmatpush3.msra.mxu0 %v322_v9  ;;  %4912 = vmatpush3.msra.mxu1 %v637_v8 }
 0x13c   : > { %4695 = vmatprep.subr.mxu0 %v457_v3  ;;  %4913 = vmatprep.subr.mxu1 %v628_v10 }
 0x13d   : > { %4696 = vmatpush3.msra.mxu0 %v313_v11  ;;  %4914 = vmatpush3.msra.mxu1 %v628_v10 }
 0x13e   : > { %4697 = vmatprep.subr.mxu0 %v448_v12  ;;  %4915 = vmatprep.subr.mxu1 %v619_v13 }
 0x13f   : > { %4698 = vmatpush3.msra.mxu0 %v304_v14  ;;  %4916 = vmatpush3.msra.mxu1 %v619_v13 }
 0x140   : > { %4699 = vmatprep.subr.mxu0 %v439_v15  ;;  %4917 = vmatprep.subr.mxu1 %v610_v16 }
 0x141   : > { %1358 = vmatprep.mubr.f32.mxu0 %v5514_v0  ;;  %4700 = vmatpush3.msra.mxu0 %v295_v17 }
 0x142   : > { %4918 = vmatpush3.msra.mxu1 %v610_v16  ;;  %1359 = vmatmul.mubr.f32.gmra.mxu0 %v5788_v21 }
 0x143   : > { %4701 = vmatprep.subr.mxu0 %v430_v18  ;;  %4919 = vmatprep.subr.mxu1 %v601_v19 }
 0x144   : > { %4702 = vmatpush3.msra.mxu0 %v286_v20  ;;  %4920 = vmatpush3.msra.mxu1 %v601_v19 }
 0x145   : > { %4703 = vmatprep.subr.mxu0 %v421_v44  ;;  %4921 = vmatprep.subr.mxu1 %v592_v22 }
 0x146   : > { %1364 = vmatprep.mubr.f32.mxu0 %v5514_v0  ;;  %4704 = vmatpush3.msra.mxu0 %v277_v23 }
 0x147   : > { %4922 = vmatpush3.msra.mxu1 %v592_v22  ;;  %1365 = vmatmul.mubr.f32.gmra.mxu0 %v5349_v27 }
 0x148   : > { %4705 = vmatprep.subr.mxu0 %v412_v24  ;;  %4923 = vmatprep.subr.mxu1 %v583_v25 }
 0x149   : > { %1269 = vmatprep.mubr.f32.mxu1 %v5350_v29  ;;  %4706 = vmatpush3.msra.mxu0 %v268_v26 }
 0x14a   : > { %4924 = vmatpush3.msra.mxu1 %v583_v25  ;;  %4707 = vmatprep.subr.mxu0 %v403_v28 }
 0x14b   : > { %1270 = vmatmul.mubr.f32.gmra.mxu1 %v5351_v32  ;;  %4925 = vmatprep.subr.mxu1 %v574_v30 }
 0x14c   : > { %1370 = vmatprep.mubr.f32.mxu0 %v5514_v0  ;;  %4708 = vmatpush3.msra.mxu0 %v259_v31 }
 0x14d   : > { %4926 = vmatpush3.msra.mxu1 %v574_v30  ;;  %1371 = vmatmul.mubr.f32.gmra.mxu0 %v5352_v56 }
 0x14e   : > { %4709 = vmatprep.subr.mxu0 %v394_v52  ;;  %4927 = vmatprep.subr.mxu1 %v565_v33 }
 0x14f   : > { %1275 = vmatprep.mubr.f32.mxu1 %v5353_v36  ;;  %4710 = vmatpush3.msra.mxu0 %v250_v34 }
 0x150   : > { %4928 = vmatpush3.msra.mxu1 %v565_v33  ;;  %4711 = vmatprep.subr.mxu0 %v385_v35 }
 0x151   : > { %1276 = vmatmul.mubr.f32.gmra.mxu1 %v5354_v38  ;;  %4929 = vmatprep.subr.mxu1 %v556_v6 }
 0x152   : > { %4712 = vmatpush3.msra.mxu0 %v241_v37  ;;  %1441 = vmatprep.mubr.f32.mxu0 %v5779_v58 }
 0x153   : > { %4930 = vmatpush3.msra.mxu1 %v556_v6  ;;  %1442 = vmatmul.mubr.f32.vlgmr.msra.gmra.mxu0 %v5783_v61 }
 0x154   : > { %4931 = vmatprep.subr.mxu1 %v547_v63  ;;  %1281 = vmatprep.mubr.f32.mxu1 %v5355_v7 }
 0x155   : > { %4932 = vmatpush3.msra.mxu1 %v547_v63  ;;  %1446 = vmatprep.mubr.f32.mxu0 %v5350_v29 }
 0x156   : > { %1282 = vmatmul.mubr.f32.gmra.mxu1 %v5356_v40  ;;  %4933 = vmatprep.subr.mxu1 %v538_v41 }
 0x157   : > { %4934 = vmatpush3.msra.mxu1 %v538_v41  ;;  %1447 = vmatmul.mubr.f32.gmra.mxu0 %v5351_v32 }
 0x158   : > { %4935 = vmatprep.subr.mxu1 %v529_v39  ;;  %4937 = vmatprep.mubr.f32.mxu1 %v5773_v43  ;;  %v731_v46 = vpop.f32.mrf.mxu0 }
 0x159   : > { %4936 = vmatpush3.msra.mxu1 %v529_v39  ;;  %v821_v45 = vadd.f32 %v820_v42, %v731_v46  ;;  %1451 = vmatprep.mubr.f32.mxu0 %v5353_v36 }
 0x15a   : > { %4938 = vmatmul.mubr.f32.vlgmr.msra.gmra.mxu1 %v5788_v21  ;;  %v733_v55 = vpop.f32.mrf.mxu0 }
 0x15b   : > { %4940 = vmatprep.mubr.f32.mxu1 %v5349_v27  ;;  %v1556_v48 = vmul.f32 0.125, %v821_v45  ;;  %v823_v49 = vadd.f32 %v822_v47, %v733_v55  ;;  %1452 = vmatmul.mubr.f32.gmra.mxu0 %v5354_v38 }
 0x15c   : > { %1456 = vmatprep.mubr.f32.mxu0 %v5355_v7 }
 0x15d   : > { %v5805_v50 = vmul.f32 0.125, %v823_v49 }
 0x15e   : > { %4941 = vmatmul.mubr.f32.gmra.mxu1 %v5352_v56 }
 0x15f   : > { %4947 = vmatprep.mubr.msk.f32.mxu1 %vm1558_vm0, %v1556_v48  ;;  %1457 = vmatmul.mubr.f32.gmra.mxu0 %v5356_v40 }
 0x160   : > { %4975 = vmatprep.mubr.msk.f32.mxu0 %vm1558_vm0, %v5805_v50 }
 0x16c   : > { %v826_v43 = vpop.f32.mrf.mxu1  ;;  %v737_v51 = vpop.f32.mrf.mxu0 }
 0x16d   : > { %v827_v21 = vadd.f32 %v826_v43, %v737_v51 }
 0x16e   : > { %v828_v53 = vpop.f32.mrf.mxu1  ;;  %v739_v54 = vpop.f32.mrf.mxu0 }
 0x16f   : > { %v829_v57 = vadd.f32 %v828_v53, %v739_v54  ;;  %v5828_v22 = vmul.f32 0.125, %v827_v21 }
 0x171   : > { %v5854_v40 = vmul.f32 0.125, %v829_v57 }
 0x172   : > { %v832_v58 = vpop.f32.mrf.mxu1  ;;  %v743_v59 = vpop.f32.mrf.mxu0 }
 0x173   : > { %v5810_v60 = vadd.f32 %v832_v58, %v743_v59 }
 0x174   : > { %v834_v5 = vpop.f32.mrf.mxu1  ;;  %v745_v61 = vpop.f32.mrf.mxu0 }
 0x175   : > { %v5812_v62 = vadd.f32 %v834_v5, %v745_v61 }
 0x178   : > { %v838_v4 = vpop.f32.mrf.mxu1  ;;  %v749_v1 = vpop.f32.mrf.mxu0 }
 0x179   : > { %v5814_v2 = vadd.f32 %v838_v4, %v749_v1 }
 0x17a   : > { %v840_v8 = vpop.f32.mrf.mxu1  ;;  %v751_v9 = vpop.f32.mrf.mxu0 }
 0x17b   : > { %v5816_v3 = vadd.f32 %v840_v8, %v751_v9 }
 0x180   : > { %v909_v10 = vpop.f32.mrf.mxu1  ;;  %v998_v11 = vpop.f32.mrf.mxu0 }
 0x181   : > { %v999_v12 = vadd.f32 %v998_v11, %v909_v10 }
 0x182   : > { %v911_v13 = vpop.f32.mrf.mxu1  ;;  %v1000_v14 = vpop.f32.mrf.mxu0 }
 0x183   : > { %v1001_v15 = vadd.f32 %v1000_v14, %v911_v13  ;;  %v5860_v46 = vmul.f32 0.125, %v999_v12 }
 0x184   : > { %v915_v16 = vpop.f32.mrf.mxu1 }
 0x185   : > { %v1004_v17 = vpop.f32.mrf.mxu0  ;;  %1754 = vrot.lane.b32.xlu1 %v1001_v15, %s5515_s18 }
 0x186   : > { %v1005_v18 = vadd.f32 %v1004_v17, %v915_v16  ;;  %v917_v19 = vpop.f32.mrf.mxu1 }
 0x187   : > { %v1006_v20 = vpop.f32.mrf.mxu0 }
 0x188   : > { %v5819_v44 = vadd.f32 %v1006_v20, %v917_v19  ;;  %v5872_v45 = vmul.f32 0.125, %v1005_v18 }
 0x189   : > { %1750 = vrot.lane.b32.xlu1 %v1556_v48, %s5515_s18 }
 0x18a   : > { %4943 = vmatprep.subr.msk.mxu1 %vm1558_vm0, %v5819_v44 }
 0x18b   : > { %4944 = vmatpush3.xpose.msk.msra.mxu1 %vm1558_vm0, %v5819_v44 }
 0x18c   : > { %4945 = vmatprep.subr.msk.mxu1 %vm1558_vm0, %v1001_v15 }
 0x18f   : > { %4946 = vmatpush3.xpose.msk.msra.mxu1 %vm1558_vm0, %v1001_v15 }
 0x192   : > { %4948 = vmatmul.mubr.msk.f32.vlgmr.msra.gmra.mxu1 %vm1558_vm0, %v5828_v22 }
 0x19f   : > { %v921_v23 = vpop.f32.mrf.mxu1 }
 0x1a1   : > { %v1010_v24 = vpop.f32.mrf.mxu0  ;;  %v923_v26 = vpop.f32.mrf.mxu1 }
 0x1a2   : > { %v5832_v25 = vadd.f32 %v1010_v24, %v921_v23 }
 0x1a3   : > { %v1012_v27 = vpop.f32.mrf.mxu0 }
 0x1a4   : > { %v5834_v28 = vadd.f32 %v1012_v27, %v923_v26 }
 0x1a7   : > { %v927_v29 = vpop.f32.mrf.mxu1 }
 0x1a9   : > { %v1016_v30 = vpop.f32.mrf.mxu0  ;;  %v929_v32 = vpop.f32.mrf.mxu1 }
 0x1aa   : > { %v5836_v31 = vadd.f32 %v1016_v30, %v927_v29 }
 0x1ab   : > { %v1018_v52 = vpop.f32.mrf.mxu0 }
 0x1ac   : > { %v5838_v33 = vadd.f32 %v1018_v52, %v929_v32 }
 0x1af   : > { %v1176_v34 = vpop.f32.mrf.mxu1 }
 0x1b1   : > { %v1178_v56 = vpop.f32.mrf.mxu1 }
 0x1b5   : > { %v1182_v6 = vpop.f32.mrf.mxu1 }
 0x1b7   : > { %v1184_v7 = vpop.f32.mrf.mxu1 }
 0x1c1   : > { %v1087_v35 = vpop.f32.mrf.mxu0 }
 0x1c2   : > { %v5840_v38 = vadd.f32 %v1176_v34, %v1087_v35 }
 0x1c3   : > { %v1089_v36 = vpop.f32.mrf.mxu0 }
 0x1c4   : > { %v5856_v42 = vadd.f32 %v1178_v56, %v1089_v36 }
 0x1c5   : > { %v1093_v37 = vpop.f32.mrf.mxu0 }
 0x1c6   : > { %v5842_v63 = vadd.f32 %v1182_v6, %v1093_v37 }
 0x1c7   : > { %v1095_v41 = vpop.f32.mrf.mxu0 }
 0x1c8   : > { %4971 = vmatprep.subr.msk.mxu0 %vm1558_vm0, %v5842_v63  ;;  %v5850_v39 = vadd.f32 %v1184_v7, %v1095_v41 }
 0x1c9   : > { %4972 = vmatpush3.xpose.msk.msra.mxu0 %vm1558_vm0, %v5842_v63 }
 0x1ca   : > { %4973 = vmatprep.subr.msk.mxu0 %vm1558_vm0, %v5840_v38 }
 0x1cd   : > { %4974 = vmatpush3.xpose.msk.msra.mxu0 %vm1558_vm0, %v5840_v38 }
 0x1ce   : > { %4999 = vmatprep.subr.msk.mxu0 %vm1558_vm0, %v5850_v39 }
 0x1d0   : > { %4976 = vmatmul.mubr.msk.f32.vlgmr.msra.gmra.mxu0 %vm1558_vm0, %v5854_v40 }
 0x1d1   : > { %5000 = vmatpush3.xpose.msk.msra.mxu0 %vm1558_vm0, %v5850_v39  ;;  %5003 = vmatprep.mubr.msk.f32.mxu0 %vm1558_vm0, %v5860_v46 }
 0x1d2   : > { %5001 = vmatprep.subr.msk.mxu0 %vm1558_vm0, %v5856_v42 }
 0x1d5   : > { %5002 = vmatpush3.xpose.msk.msra.mxu0 %vm1558_vm0, %v5856_v42 }
 0x1d8   : > { %5004 = vmatmul.mubr.msk.f32.vlgmr.msra.gmra.mxu0 %vm1558_vm0, %v5872_v45 }
 0x1de   : > { %v1099_v47 = vpop.f32.mrf.mxu0 }
 0x1e0   : > { %v1101_v55 = vpop.f32.mrf.mxu0 }
 0x1e4   : > { %v1105_v51 = vpop.f32.mrf.mxu0 }
 0x1e6   : > { %v1107_v54 = vpop.f32.mrf.mxu0 }
 0x1e9   : > { %v1188_v48 = vpop.f32.mrf.mxu1 }
 0x1ea   : > { %v5876_v49 = vadd.f32 %v1188_v48, %v1099_v47 }
 0x1eb   : > { %v1190_v43 = vpop.f32.mrf.mxu1  ;;  %v1354_v61 = vpop.f32.mrf.mxu0 }
 0x1ec   : > { %v5878_v53 = vadd.f32 %v1190_v43, %v1101_v55 }
 0x1ed   : > { %v1356_v8 = vpop.f32.mrf.mxu0 }
 0x1ef   : > { %v1194_v57 = vpop.f32.mrf.mxu1 }
 0x1f0   : > { %v5880_v58 = vadd.f32 %v1194_v57, %v1105_v51 }
 0x1f1   : > { %v1196_v59 = vpop.f32.mrf.mxu1 }
 0x1f2   : > { %v5882_v5 = vadd.f32 %v1196_v59, %v1107_v54 }
 0x1f4   : > { %v1265_v4 = vpop.f32.mrf.mxu1 }
 0x1f5   : > { %v5886_v15 = vadd.f32 %v1354_v61, %v1265_v4 }
 0x1f6   : > { %v1267_v1 = vpop.f32.mrf.mxu1 }
 0x1f7   : > { %v5884_v9 = vadd.f32 %v1356_v8, %v1267_v1  ;;  %v1547_v8 = vlaneseq }
 0x202   : > { %v1360_v10 = vpop.f32.mrf.mxu0 }
 0x204   : > { %v1362_v11 = vpop.f32.mrf.mxu0 }
 0x207   : > { %v1366_v12 = vpop.f32.mrf.mxu0 }
 0x209   : > { %v1368_v13 = vpop.f32.mrf.mxu0 }
 0x20b   : > { %v1271_v14 = vpop.f32.mrf.mxu1 }
 0x20c   : > { %v5888_v16 = vadd.f32 %v1360_v10, %v1271_v14  ;;  %v1548_v10 = vshrl.u32 %v1547_v8, 7  ;;  %v5516_v14 = vmov -inf  }
 0x20d   : > { %v1273_v17 = vpop.f32.mrf.mxu1  ;;  %v1372_v18 = vpop.f32.mrf.mxu0 }
 0x20e   : > { %4950 = vmatprep.subr.mxu1 %v5888_v16  ;;  %v5891_v19 = vadd.f32 %v1362_v11, %v1273_v17  ;;  %v1549_v11 = vadd.s32 8, %v1548_v10 }
 0x20f   : > { %4951 = vmatpush3.msra.mxu1 %v5888_v16  ;;  %v1374_v20 = vpop.f32.mrf.mxu0 }
 0x210   : > { %4952 = vmatprep.subr.mxu1 %v5886_v15 }
 0x211   : > { %4953 = vmatpush3.msra.mxu1 %v5886_v15  ;;  %v1277_v21 = vpop.f32.mrf.mxu1 }
 0x212   : > { %v5896_v23 = vadd.f32 %v1366_v12, %v1277_v21  ;;  %v1551_v12 = vand.u32 127, %v1547_v8 }
 0x213   : > { %v1279_v24 = vpop.f32.mrf.mxu1  ;;  %v4713_v26 = vpop.f32.mrf.mxu0 }
 0x214   : > { %v5898_v27 = vadd.f32 %v1368_v13, %v1279_v24  ;;  %vm1552_vm1 = vcmp.ge.s32.totalorder %v1548_v10, %v1551_v12  ;;  %vm1553_vm2 = vcmp.ge.s32.totalorder %v1549_v11, %v1551_v12 }
 0x215   : > { %v4714_v29 = vpop.f32.mrf.mxu0  ;;  %v5912_v17 = vsel %vm1552_vm1, 0.0, %v5516_v14 }
 0x216   : > { %v1283_v30 = vpop.f32.mrf.mxu1  ;;  %v4715_v32 = vadd.f32 %v4714_v29, %v4713_v26 }
 0x217   : > { %v5900_v52 = vadd.f32 %v1372_v18, %v1283_v30  ;;  %v4716_v34 = vpop.f32.mrf.mxu0  ;;  %v5914_v18 = vsel %vm1553_vm2, 0.0, %v5516_v14 }
 0x218   : > { %v1285_v56 = vpop.f32.mrf.mxu1 }
 0x219   : > { %v5902_v35 = vadd.f32 %v1374_v20, %v1285_v56  ;;  %v4717_v36 = vpop.f32.mrf.mxu0 }
 0x21a   : > { %v4939_v6 = vpop.f32.mrf.mxu1  ;;  %v4718_v37 = vadd.f32 %v4717_v36, %v4716_v34 }
 0x21b   : > { %v4719_v41 = vpop.f32.mrf.mxu0 }
 0x21c   : > { %v1528_v7 = vpop.f32.mrf.mxu1  ;;  %v5904_v47 = vadd.f32 %v4939_v6, %v4718_v37 }
 0x21d   : > { %v5906_v55 = vadd.f32 %v4715_v32, %v1528_v7  ;;  %v4720_v48 = vpop.f32.mrf.mxu0 }
 0x21e   : > { %v4942_v43 = vpop.f32.mrf.mxu1  ;;  %v4721_v51 = vadd.f32 %v4720_v48, %v4719_v41 }
 0x21f   : > { %v4722_v54 = vpop.f32.mrf.mxu0 }
 0x220   : > { %v1538_v57 = vpop.f32.mrf.mxu1 }
 0x221   : > { %v5908_v59 = vadd.f32 %v4721_v51, %v1538_v57  ;;  %v4723_v61 = vpop.f32.mrf.mxu0 }
 0x222   : > { %v4724_v4 = vadd.f32 %v4723_v61, %v4722_v54 }
 0x224   : > { %v5910_v1 = vadd.f32 %v4942_v43, %v4724_v4 }
 0x252   : > { %v4949_v13 = vpop.f32.mrf.mxu1 }
 0x253   : > { %v1643_v24 = vadd.f32 %v4949_v13, %v5914_v18 }
 0x254   : > { %v1637_v20 = vpop.f32.mrf.mxu1 }
 0x255   : > { %v1638_v21 = vadd.f32 %v1637_v20, %v5912_v17  ;;  %v1650_v29 = vsel %vm1646_vm3, %v1643_v24, -inf }
 0x257   : > { %v1647_v26 = vsel %vm1646_vm3, %v1638_v21, -inf }
 0x258   : > { %1648 = vmax.xlane.f32.xlu0 %v1647_v26 }
 0x25c   : > { %1651 = vmax.xlane.f32.xlu0 %v1650_v29 }
 0x272   : > { %1756 = vrot.lane.b32.xlu0 %v5819_v44, %s5515_s18  ;;  %v1755_v44 = vpop.permute.xlu1 %1754 }
 0x276   : > { %v1751_v51 = vpop.permute.xlu1 %1750 }
 0x290   : > { %v4977_v12 = vpop.f32.mrf.mxu0 }
 0x2e1   : > { %v1649_v30 = vpop.xlane.xlu0 %1648 }
 0x2e2   : > { %v1653_v32 = vsub.f32 %v1638_v21, %v1649_v30  ;;  %v2032_v21 = vpop.f32.mrf.mxu0 }
 0x2e3   : > { %v2033_v30 = vadd.f32 %v2032_v21, %v5912_v17 }
 0x2e4   : > { %v1655_v36 = vmul.f32 1.442695, %v1653_v32 }
 0x2e5   : > { %v1652_v34 = vpop.xlane.xlu0 %1651 }
 0x2e6   : > { %v1654_v56 = vsub.f32 %v1643_v24, %v1652_v34  ;;  %v2038_v34 = vadd.f32 %v4977_v12, %v5914_v18 }
 0x2e8   : > { %v1657_v6 = vmul.f32 1.442695, %v1654_v56  ;;  %v2041_v56 = vsel %vm1646_vm3, %v2033_v30, -inf }
 0x2e9   : > { %v1757_v37 = vpop.permute.xlu0 %1756 }
 0x2ea   : > { %5249 = vpow2.f32 %v1657_v6  ;;  %4957 = vmatprep.subr.msk.mxu1 %vm1558_vm0, %v1757_v37 }
 0x2eb   : > { %5251 = vpow2.f32 %v1655_v36  ;;  %v2044_v36 = vsel %vm1646_vm3, %v2038_v34, -inf }
 0x2f7   : > { %v5250_v41 = vpop.eup %5249 }
 0x2f8   : > { %v1662_v7 = vsel %vm1646_vm3, %v5250_v41, 0.0  ;;  %v5252_v48 = vpop.eup %5251 }
 0x2f9   : > { %1663 = vadd.xlane.f32.xlu1 %v1662_v7  ;;  %v1659_v43 = vsel %vm1646_vm3, %v5252_v48, 0.0 }
 0x2fd   : > { %1660 = vadd.xlane.f32.xlu1 %v1659_v43 }
 0x30e   : > { %1752 = vrot.lane.b32.xlu1 %v5828_v22, %s5515_s18 }
 0x382   : > { %v1664_v54 = vpop.xlane.xlu1 %1663 }
 0x383   : > { %5253 = vrcp.f32 %v1664_v54 }
 0x386   : > { %v1661_v57 = vpop.xlane.xlu1 %1660 }
 0x387   : > { %5255 = vrcp.f32 %v1661_v57 }
 0x38a   : > { %v1753_v22 = vpop.permute.xlu1 %1752 }
 0x390   : > { %v5254_v61 = vpop.eup %5253 }
 0x391   : > { %v1668_v10 = vmul.f32 %v5254_v61, %v5250_v41 }
 0x394   : > { %v5256_v4 = vpop.eup %5255 }
 0x395   : > { %v1667_v8 = vmul.f32 %v5256_v4, %v5252_v48 }
 0x397   : > { %4954 = vmatprep.mubr.msk.f32.mxu1 %vm1646_vm3, %v1667_v8 }
 0x398   : > { %4955 = vmatmul.mubr.msk.f32.vlgmr.msra.gmra.mxu1 %vm1646_vm3, %v1668_v10 }
 0x399   : > { %4958 = vmatpush3.xpose.msk.msra.mxu1 %vm1558_vm0, %v1757_v37  ;;  %4961 = vmatprep.mubr.msk.f32.mxu1 %vm1558_vm0, %v1751_v51 }
 0x39a   : > { %4959 = vmatprep.subr.msk.mxu1 %vm1558_vm0, %v1755_v44 }
 0x39d   : > { %4960 = vmatpush3.xpose.msk.msra.mxu1 %vm1558_vm0, %v1755_v44 }
 0x3a0   : > { %4962 = vmatmul.mubr.msk.f32.vlgmr.msra.gmra.mxu1 %vm1558_vm0, %v1753_v22 }
 0x458   : > { %v5934_v11 = vpop.f32.mrf.mxu1 }
 0x45a   : > { %v5936_v13 = vpop.f32.mrf.mxu1 }
 0x460   : > { %v4963_v14 = vpop.f32.mrf.mxu1 }
 0x461   : > { %v1838_v20 = vadd.f32 %v4963_v14, %v5914_v18 }
 0x462   : > { %v1832_v24 = vpop.f32.mrf.mxu1 }
 0x463   : > { %v1833_v26 = vadd.f32 %v1832_v24, %v5912_v17  ;;  %v1844_v29 = vsel %vm1646_vm3, %v1838_v20, -inf }
 0x464   : > { %1845 = vmax.xlane.f32.xlu1 %v1844_v29 }
 0x465   : > { %v1841_v32 = vsel %vm1646_vm3, %v1833_v26, -inf }
 0x466   : > { %1842 = vmax.xlane.f32.xlu0 %v1841_v32 }
 0x46a   : > { %2042 = vmax.xlane.f32.xlu0 %v2041_v56 }
 0x46e   : > { %2045 = vmax.xlane.f32.xlu0 %v2044_v36 }
 0x4ed   : > { %v1846_v41 = vpop.xlane.xlu1 %1845 }
 0x4ee   : > { %v1848_v43 = vsub.f32 %v1838_v20, %v1846_v41 }
 0x4ef   : > { %v1843_v6 = vpop.xlane.xlu0 %1842 }
 0x4f0   : > { %v1847_v37 = vsub.f32 %v1833_v26, %v1843_v6  ;;  %v1851_v61 = vmul.f32 1.442695, %v1848_v43 }
 0x4f2   : > { %v1849_v44 = vmul.f32 1.442695, %v1847_v37 }
 0x4f3   : > { %v2043_v7 = vpop.xlane.xlu0 %2042 }
 0x4f4   : > { %v2047_v48 = vsub.f32 %v2033_v30, %v2043_v7 }
 0x4f6   : > { %v2049_v51 = vmul.f32 1.442695, %v2047_v48 }
 0x4f7   : > { %v2046_v54 = vpop.xlane.xlu0 %2045 }
 0x4f8   : > { %5257 = vpow2.f32 %v2049_v51  ;;  %v2048_v57 = vsub.f32 %v2038_v34, %v2046_v54  ;;  %v5005_v54 = vpop.f32.mrf.mxu0 }
 0x4f9   : > { %5259 = vpow2.f32 %v1849_v44 }
 0x4fa   : > { %v2051_v4 = vmul.f32 1.442695, %v2048_v57 }
 0x4fc   : > { %5261 = vpow2.f32 %v2051_v4 }
 0x4fd   : > { %5263 = vpow2.f32 %v1851_v61 }
 0x505   : > { %v5258_v8 = vpop.eup %5257 }
 0x506   : > { %v2053_v10 = vsel %vm1646_vm3, %v5258_v8, 0.0  ;;  %v5260_v22 = vpop.eup %5259 }
 0x507   : > { %2054 = vadd.xlane.f32.xlu0 %v2053_v10  ;;  %v1853_v14 = vsel %vm1646_vm3, %v5260_v22, 0.0 }
 0x509   : > { %v5262_v12 = vpop.eup %5261 }
 0x50a   : > { %v2056_v20 = vsel %vm1646_vm3, %v5262_v12, 0.0  ;;  %v5264_v21 = vpop.eup %5263 }
 0x50b   : > { %1854 = vadd.xlane.f32.xlu0 %v1853_v14  ;;  %2057 = vadd.xlane.f32.xlu1 %v2056_v20  ;;  %v1856_v24 = vsel %vm1646_vm3, %v5264_v21, 0.0 }
 0x50f   : > { %1857 = vadd.xlane.f32.xlu1 %v1856_v24 }
 0x520   : > { %1865 = vrot.lane.b32.xlu1 %v5886_v15, %s5515_s18 }
 0x521   : > { %1867 = vrot.lane.b32.xlu0 %v5888_v16, %s5515_s18 }
 0x524   : > { %2150 = vrot.lane.b32.xlu1 %v5842_v63, %s5515_s18 }
 0x525   : > { %2144 = vrot.lane.b32.xlu0 %v5805_v50, %s5515_s18 }
 0x528   : > { %2148 = vrot.lane.b32.xlu1 %v5840_v38, %s5515_s18 }
 0x52c   : > { %2146 = vrot.lane.b32.xlu1 %v5854_v40, %s5515_s18 }
 0x590   : > { %v2055_v26 = vpop.xlane.xlu0 %2054 }
 0x594   : > { %v2058_v29 = vpop.xlane.xlu1 %2057  ;;  %v1855_v30 = vpop.xlane.xlu0 %1854 }
 0x595   : > { %5265 = vrcp.f32 %v1855_v30 }
 0x596   : > { %5267 = vrcp.f32 %v2055_v26 }
 0x598   : > { %v1858_v15 = vpop.xlane.xlu1 %1857  ;;  %v1868_v32 = vpop.permute.xlu0 %1867 }
 0x599   : > { %5269 = vrcp.f32 %v1858_v15  ;;  %4964 = vmatprep.subr.mxu1 %v1868_v32 }
 0x59a   : > { %4965 = vmatpush3.msra.mxu1 %v1868_v32  ;;  %5271 = vrcp.f32 %v2058_v29 }
 0x59c   : > { %v1866_v63 = vpop.permute.xlu1 %1865  ;;  %v2145_v41 = vpop.permute.xlu0 %2144 }
 0x59d   : > { %4966 = vmatprep.subr.mxu1 %v1866_v63 }
 0x59e   : > { %4967 = vmatpush3.msra.mxu1 %v1866_v63 }
 0x59f   : > { %4978 = vmatprep.subr.mxu1 %v5891_v19 }
 0x5a0   : > { %v2151_v36 = vpop.permute.xlu1 %2150 }
 0x5a2   : > { %v5266_v50 = vpop.eup %5265 }
 0x5a3   : > { %v1861_v38 = vmul.f32 %v5266_v50, %v5260_v22  ;;  %v5268_v16 = vpop.eup %5267 }
 0x5a4   : > { %v2061_v6 = vmul.f32 %v5268_v16, %v5258_v8  ;;  %v2149_v7 = vpop.permute.xlu1 %2148  ;;  %v2426_v8 = vpop.f32.mrf.mxu0 }
 0x5a5   : > { %4968 = vmatprep.mubr.msk.f32.mxu1 %vm1646_vm3, %v1861_v38  ;;  %v2427_v14 = vadd.f32 %v2426_v8, %v5912_v17 }
 0x5a6   : > { %v5270_v40 = vpop.eup %5269 }
 0x5a7   : > { %v1862_v34 = vmul.f32 %v5270_v40, %v5264_v21  ;;  %v5272_v56 = vpop.eup %5271  ;;  %v2432_v21 = vadd.f32 %v5005_v54, %v5914_v18  ;;  %v2435_v24 = vsel %vm1646_vm3, %v2427_v14, -inf }
 0x5a8   : > { %v2062_v37 = vmul.f32 %v5272_v56, %v5262_v12  ;;  %v2147_v48 = vpop.permute.xlu1 %2146 }
 0x5a9   : > { %4969 = vmatmul.mubr.msk.f32.vlgmr.msra.gmra.mxu1 %vm1646_vm3, %v1862_v34  ;;  %v2438_v26 = vsel %vm1646_vm3, %v2432_v21, -inf }
 0x5aa   : > { %4979 = vmatpush3.msra.mxu1 %v5891_v19  ;;  %4982 = vmatprep.mubr.msk.f32.mxu1 %vm1646_vm3, %v2061_v6 }
 0x5ab   : > { %4980 = vmatprep.subr.mxu1 %v5884_v9 }
 0x5ac   : > { %4981 = vmatpush3.msra.mxu1 %v5884_v9 }
 0x5ad   : > { %4985 = vmatprep.subr.msk.mxu1 %vm1558_vm0, %v2151_v36  ;;  %4983 = vmatmul.mubr.msk.f32.vlgmr.msra.gmra.mxu1 %vm1646_vm3, %v2062_v37 }
 0x5ae   : > { %4986 = vmatpush3.xpose.msk.msra.mxu1 %vm1558_vm0, %v2151_v36  ;;  %4989 = vmatprep.mubr.msk.f32.mxu1 %vm1558_vm0, %v2145_v41 }
 0x5af   : > { %4987 = vmatprep.subr.msk.mxu1 %vm1558_vm0, %v2149_v7 }
 0x5b2   : > { %4988 = vmatpush3.xpose.msk.msra.mxu1 %vm1558_vm0, %v2149_v7 }
 0x5b5   : > { %4990 = vmatmul.mubr.msk.f32.vlgmr.msra.gmra.mxu1 %vm1558_vm0, %v2147_v48 }
 0x669   : > { %v5976_v43 = vpop.f32.mrf.mxu1 }
 0x66b   : > { %v5978_v44 = vpop.f32.mrf.mxu1 }
 0x66d   : > { %v5980_v51 = vpop.f32.mrf.mxu1 }
 0x66f   : > { %v5982_v57 = vpop.f32.mrf.mxu1 }
 0x675   : > { %v4991_v61 = vpop.f32.mrf.mxu1 }
 0x676   : > { %v2232_v4 = vadd.f32 %v4991_v61, %v5914_v18 }
 0x677   : > { %v2226_v10 = vpop.f32.mrf.mxu1 }
 0x678   : > { %v2227_v22 = vadd.f32 %v2226_v10, %v5912_v17  ;;  %v2238_v12 = vsel %vm1646_vm3, %v2232_v4, -inf }
 0x679   : > { %2239 = vmax.xlane.f32.xlu1 %v2238_v12 }
 0x67a   : > { %v2235_v20 = vsel %vm1646_vm3, %v2227_v22, -inf }
 0x67b   : > { %2236 = vmax.xlane.f32.xlu0 %v2235_v20 }
 0x67f   : > { %2436 = vmax.xlane.f32.xlu0 %v2435_v24 }
 0x683   : > { %2439 = vmax.xlane.f32.xlu0 %v2438_v26 }
 0x702   : > { %v2240_v15 = vpop.xlane.xlu1 %2239 }
 0x703   : > { %v2242_v50 = vsub.f32 %v2232_v4, %v2240_v15 }
 0x704   : > { %v2237_v29 = vpop.xlane.xlu0 %2236 }
 0x705   : > { %v2241_v30 = vsub.f32 %v2227_v22, %v2237_v29  ;;  %v2245_v56 = vmul.f32 1.442695, %v2242_v50 }
 0x707   : > { %v2243_v38 = vmul.f32 1.442695, %v2241_v30 }
 0x708   : > { %v2437_v32 = vpop.xlane.xlu0 %2436 }
 0x709   : > { %v2441_v63 = vsub.f32 %v2427_v14, %v2437_v32 }
 0x70b   : > { %v2443_v16 = vmul.f32 1.442695, %v2441_v63 }
 0x70c   : > { %v2440_v40 = vpop.xlane.xlu0 %2439 }
 0x70d   : > { %5273 = vpow2.f32 %v2443_v16  ;;  %v2442_v34 = vsub.f32 %v2432_v21, %v2440_v40 }
 0x70e   : > { %5275 = vpow2.f32 %v2243_v38 }
 0x70f   : > { %v2445_v36 = vmul.f32 1.442695, %v2442_v34 }
 0x711   : > { %5277 = vpow2.f32 %v2445_v36 }
 0x712   : > { %5279 = vpow2.f32 %v2245_v56 }
 0x71a   : > { %v5274_v6 = vpop.eup %5273 }
 0x71b   : > { %v2447_v37 = vsel %vm1646_vm3, %v5274_v6, 0.0  ;;  %v5276_v41 = vpop.eup %5275 }
 0x71c   : > { %2448 = vadd.xlane.f32.xlu0 %v2447_v37  ;;  %v2247_v48 = vsel %vm1646_vm3, %v5276_v41, 0.0 }
 0x71e   : > { %v5278_v7 = vpop.eup %5277 }
 0x71f   : > { %v2450_v54 = vsel %vm1646_vm3, %v5278_v7, 0.0  ;;  %v5280_v61 = vpop.eup %5279 }
 0x720   : > { %2248 = vadd.xlane.f32.xlu0 %v2247_v48  ;;  %2451 = vadd.xlane.f32.xlu1 %v2450_v54  ;;  %v2250_v4 = vsel %vm1646_vm3, %v5280_v61, 0.0 }
 0x724   : > { %2251 = vadd.xlane.f32.xlu1 %v2250_v4 }
 0x735   : > { %2259 = vrot.lane.b32.xlu1 %v5884_v9, %s5515_s18 }
 0x736   : > { %2261 = vrot.lane.b32.xlu0 %v5891_v19, %s5515_s18 }
 0x739   : > { %2544 = vrot.lane.b32.xlu1 %v5850_v39, %s5515_s18 }
 0x73a   : > { %2538 = vrot.lane.b32.xlu0 %v5860_v46, %s5515_s18 }
 0x73d   : > { %2542 = vrot.lane.b32.xlu1 %v5856_v42, %s5515_s18 }
 0x741   : > { %2540 = vrot.lane.b32.xlu1 %v5872_v45, %s5515_s18 }
 0x7a5   : > { %v2449_v8 = vpop.xlane.xlu0 %2448 }
 0x7a9   : > { %v2452_v10 = vpop.xlane.xlu1 %2451  ;;  %v2249_v22 = vpop.xlane.xlu0 %2248 }
 0x7aa   : > { %5281 = vrcp.f32 %v2249_v22 }
 0x7ab   : > { %5283 = vrcp.f32 %v2449_v8 }
 0x7ad   : > { %v2252_v9 = vpop.xlane.xlu1 %2251  ;;  %v2262_v12 = vpop.permute.xlu0 %2261 }
 0x7ae   : > { %5285 = vrcp.f32 %v2252_v9  ;;  %4992 = vmatprep.subr.mxu1 %v2262_v12 }
 0x7af   : > { %4993 = vmatpush3.msra.mxu1 %v2262_v12  ;;  %5287 = vrcp.f32 %v2452_v10 }
 0x7b1   : > { %v2260_v39 = vpop.permute.xlu1 %2259  ;;  %v2539_v29 = vpop.permute.xlu0 %2538 }
 0x7b2   : > { %4994 = vmatprep.subr.mxu1 %v2260_v39 }
 0x7b3   : > { %4995 = vmatpush3.msra.mxu1 %v2260_v39 }
 0x7b4   : > { %5006 = vmatprep.subr.mxu1 %v5904_v47 }
 0x7b5   : > { %v2545_v21 = vpop.permute.xlu1 %2544 }
 0x7b7   : > { %v5282_v42 = vpop.eup %5281 }
 0x7b8   : > { %v2255_v46 = vmul.f32 %v5282_v42, %v5276_v41  ;;  %v5284_v19 = vpop.eup %5283 }
 0x7b9   : > { %v2455_v24 = vmul.f32 %v5284_v19, %v5274_v6  ;;  %v2543_v30 = vpop.permute.xlu1 %2542 }
 0x7ba   : > { %4996 = vmatprep.mubr.msk.f32.mxu1 %vm1646_vm3, %v2255_v46 }
 0x7bb   : > { %v5286_v45 = vpop.eup %5285 }
 0x7bc   : > { %v2256_v14 = vmul.f32 %v5286_v45, %v5280_v61  ;;  %v5288_v20 = vpop.eup %5287 }
 0x7bd   : > { %v2456_v26 = vmul.f32 %v5288_v20, %v5278_v7  ;;  %v2541_v15 = vpop.permute.xlu1 %2540 }
 0x7be   : > { %4997 = vmatmul.mubr.msk.f32.vlgmr.msra.gmra.mxu1 %vm1646_vm3, %v2256_v14  ;;  %v2770_v14 = vmul.f32 0.125, %v5810_v60 }
 0x7bf   : > { %5007 = vmatpush3.msra.mxu1 %v5904_v47  ;;  %5010 = vmatprep.mubr.msk.f32.mxu1 %vm1646_vm3, %v2455_v24 }
 0x7c0   : > { %5008 = vmatprep.subr.mxu1 %v5906_v55 }
 0x7c1   : > { %5009 = vmatpush3.msra.mxu1 %v5906_v55 }
 0x7c2   : > { %5013 = vmatprep.subr.msk.mxu1 %vm1558_vm0, %v2545_v21  ;;  %5011 = vmatmul.mubr.msk.f32.vlgmr.msra.gmra.mxu1 %vm1646_vm3, %v2456_v26 }
 0x7c3   : > { %5014 = vmatpush3.xpose.msk.msra.mxu1 %vm1558_vm0, %v2545_v21  ;;  %5017 = vmatprep.mubr.msk.f32.mxu1 %vm1558_vm0, %v2539_v29 }
 0x7c4   : > { %5015 = vmatprep.subr.msk.mxu1 %vm1558_vm0, %v2543_v30 }
 0x7c7   : > { %5016 = vmatpush3.xpose.msk.msra.mxu1 %vm1558_vm0, %v2543_v30 }
 0x7c8   : > { %5034 = vmatprep.subr.mxu1 %v5900_v52 }
 0x7ca   : > { %5018 = vmatmul.mubr.msk.f32.vlgmr.msra.gmra.mxu1 %vm1558_vm0, %v2541_v15 }
 0x7cb   : > { %5035 = vmatpush3.msra.mxu1 %v5900_v52 }
 0x7cc   : > { %5036 = vmatprep.subr.mxu1 %v5896_v23 }
 0x7cd   : > { %5037 = vmatpush3.msra.mxu1 %v5896_v23 }
 0x87e   : > { %v6026_v32 = vpop.f32.mrf.mxu1 }
 0x880   : > { %v6028_v63 = vpop.f32.mrf.mxu1 }
 0x882   : > { %v6030_v50 = vpop.f32.mrf.mxu1 }
 0x884   : > { %v6032_v38 = vpop.f32.mrf.mxu1 }
 0x88a   : > { %v5019_v16 = vpop.f32.mrf.mxu1 }
 0x88b   : > { %v2626_v40 = vadd.f32 %v5019_v16, %v5914_v18 }
 0x88c   : > { %v2620_v34 = vpop.f32.mrf.mxu1 }
 0x88d   : > { %v2621_v56 = vadd.f32 %v2620_v34, %v5912_v17  ;;  %v2632_v36 = vsel %vm1646_vm3, %v2626_v40, -inf }
 0x88e   : > { %2633 = vmax.xlane.f32.xlu1 %v2632_v36 }
 0x88f   : > { %v2629_v6 = vsel %vm1646_vm3, %v2621_v56, -inf }
 0x890   : > { %2630 = vmax.xlane.f32.xlu0 %v2629_v6 }
 0x89f   : > { %2653 = vrot.lane.b32.xlu1 %v5906_v55, %s5515_s18 }
 0x917   : > { %v2634_v37 = vpop.xlane.xlu1 %2633 }
 0x918   : > { %v2636_v41 = vsub.f32 %v2626_v40, %v2634_v37 }
 0x919   : > { %v2631_v7 = vpop.xlane.xlu0 %2630 }
 0x91a   : > { %v2639_v48 = vmul.f32 1.442695, %v2636_v41  ;;  %v2635_v54 = vsub.f32 %v2621_v56, %v2631_v7 }
 0x91b   : > { %v2654_v39 = vpop.permute.xlu1 %2653 }
 0x91c   : > { %5289 = vpow2.f32 %v2639_v48  ;;  %v2637_v61 = vmul.f32 1.442695, %v2635_v54 }
 0x91e   : > { %5291 = vpow2.f32 %v2637_v61 }
 0x929   : > { %v5290_v4 = vpop.eup %5289 }
 0x92a   : > { %v2644_v8 = vsel %vm1646_vm3, %v5290_v4, 0.0 }
 0x92b   : > { %v5292_v10 = vpop.eup %5291  ;;  %2645 = vadd.xlane.f32.xlu0 %v2644_v8 }
 0x92c   : > { %v2641_v22 = vsel %vm1646_vm3, %v5292_v10, 0.0 }
 0x92f   : > { %2642 = vadd.xlane.f32.xlu0 %v2641_v22 }
 0x945   : > { %2655 = vrot.lane.b32.xlu0 %v5904_v47, %s5515_s18  ;;  %v2771_v47 = vmul.f32 0.125, %v5814_v2 }
 0x9b4   : > { %v2646_v55 = vpop.xlane.xlu0 %2645 }
 0x9b5   : > { %5293 = vrcp.f32 %v2646_v55 }
 0x9b8   : > { %v2643_v9 = vpop.xlane.xlu0 %2642 }
 0x9b9   : > { %5295 = vrcp.f32 %v2643_v9 }
 0x9bc   : > { %v2656_v12 = vpop.permute.xlu0 %2655 }
 0x9bd   : > { %5020 = vmatprep.subr.mxu0 %v2656_v12 }
 0x9be   : > { %5021 = vmatpush3.msra.mxu0 %v2656_v12 }
 0x9bf   : > { %5022 = vmatprep.subr.mxu0 %v2654_v39 }
 0x9c0   : > { %5023 = vmatpush3.msra.mxu0 %v2654_v39 }
 0x9c1   : > { %5027 = vmatprep.subr.msk.mxu0 %vm1558_vm0, %v5838_v33 }
 0x9c2   : > { %v5294_v42 = vpop.eup %5293 }
 0x9c3   : > { %v2650_v45 = vmul.f32 %v5294_v42, %v5290_v4 }
 0x9c6   : > { %v5296_v46 = vpop.eup %5295 }
 0x9c7   : > { %v2649_v19 = vmul.f32 %v5296_v46, %v5292_v10 }
 0x9c9   : > { %5024 = vmatprep.mubr.msk.f32.mxu0 %vm1646_vm3, %v2649_v19 }
 0x9ca   : > { %5025 = vmatmul.mubr.msk.f32.vlgmr.msra.gmra.mxu0 %vm1646_vm3, %v2650_v45 }
 0x9cb   : > { %5028 = vmatpush3.xpose.msk.msra.mxu0 %vm1558_vm0, %v5838_v33  ;;  %5031 = vmatprep.mubr.msk.f32.mxu0 %vm1558_vm0, %v2770_v14 }
 0x9cc   : > { %5029 = vmatprep.subr.msk.mxu0 %vm1558_vm0, %v5834_v28 }
 0x9cf   : > { %5030 = vmatpush3.xpose.msk.msra.mxu0 %vm1558_vm0, %v5834_v28 }
 0x9d2   : > { %5032 = vmatmul.mubr.msk.f32.vlgmr.msra.gmra.mxu0 %vm1558_vm0, %v2771_v47 }
 0xa8a   : > { %v6058_v60 = vpop.f32.mrf.mxu0 }
 0xa8c   : > { %v6060_v20 = vpop.f32.mrf.mxu0 }
 0xa92   : > { %v5033_v21 = vpop.f32.mrf.mxu0 }
 0xa93   : > { %v2856_v24 = vadd.f32 %v5033_v21, %v5914_v18 }
 0xa94   : > { %v2850_v26 = vpop.f32.mrf.mxu0 }
 0xa95   : > { %v2851_v29 = vadd.f32 %v2850_v26, %v5912_v17  ;;  %v2862_v30 = vsel %vm1646_vm3, %v2856_v24, -inf }
 0xa96   : > { %2863 = vmax.xlane.f32.xlu0 %v2862_v30 }
 0xa97   : > { %v2859_v15 = vsel %vm1646_vm3, %v2851_v29, -inf }
 0xa98   : > { %2860 = vmax.xlane.f32.xlu1 %v2859_v15 }
 0xb1f   : > { %v2864_v16 = vpop.xlane.xlu0 %2863 }
 0xb20   : > { %v2866_v2 = vsub.f32 %v2856_v24, %v2864_v16 }
 0xb21   : > { %v2861_v40 = vpop.xlane.xlu1 %2860 }
 0xb22   : > { %v2869_v34 = vmul.f32 1.442695, %v2866_v2  ;;  %v2865_v56 = vsub.f32 %v2851_v29, %v2861_v40 }
 0xb24   : > { %5297 = vpow2.f32 %v2869_v34  ;;  %v2867_v36 = vmul.f32 1.442695, %v2865_v56 }
 0xb26   : > { %5299 = vpow2.f32 %v2867_v36 }
 0xb31   : > { %v5298_v6 = vpop.eup %5297 }
 0xb32   : > { %v2874_v37 = vsel %vm1646_vm3, %v5298_v6, 0.0 }
 0xb33   : > { %v5300_v41 = vpop.eup %5299  ;;  %2875 = vadd.xlane.f32.xlu1 %v2874_v37 }
 0xb34   : > { %v2871_v7 = vsel %vm1646_vm3, %v5300_v41, 0.0 }
 0xb35   : > { %2872 = vadd.xlane.f32.xlu0 %v2871_v7 }
 0xb44   : > { %2966 = vrot.lane.b32.xlu1 %v5834_v28, %s5515_s18 }
 0xb48   : > { %2962 = vrot.lane.b32.xlu1 %v2770_v14, %s5515_s18 }
 0xb4b   : > { %2968 = vrot.lane.b32.xlu0 %v5838_v33, %s5515_s18 }
 0xb4c   : > { %2964 = vrot.lane.b32.xlu1 %v2771_v47, %s5515_s18 }
 0xbbc   : > { %v2876_v48 = vpop.xlane.xlu1 %2875 }
 0xbbd   : > { %5301 = vrcp.f32 %v2876_v48  ;;  %v3164_v48 = vmul.f32 0.125, %v5812_v62 }
 0xbbe   : > { %v2873_v54 = vpop.xlane.xlu0 %2872 }
 0xbbf   : > { %5303 = vrcp.f32 %v2873_v54 }
 0xbc0   : > { %v2967_v4 = vpop.permute.xlu1 %2966 }
 0xbc2   : > { %v2969_v61 = vpop.permute.xlu0 %2968 }
 0xbc3   : > { %5041 = vmatprep.subr.msk.mxu1 %vm1558_vm0, %v2969_v61 }
 0xbc4   : > { %v2963_v28 = vpop.permute.xlu1 %2962 }
 0xbc8   : > { %v2965_v33 = vpop.permute.xlu1 %2964 }
 0xbca   : > { %v5302_v8 = vpop.eup %5301 }
 0xbcb   : > { %v2880_v55 = vmul.f32 %v5302_v8, %v5298_v6 }
 0xbcc   : > { %v5304_v10 = vpop.eup %5303 }
 0xbcd   : > { %v2879_v22 = vmul.f32 %v5304_v10, %v5300_v41 }
 0xbcf   : > { %5038 = vmatprep.mubr.msk.f32.mxu1 %vm1646_vm3, %v2879_v22 }
 0xbd0   : > { %5039 = vmatmul.mubr.msk.f32.vlgmr.msra.gmra.mxu1 %vm1646_vm3, %v2880_v55 }
 0xbd1   : > { %5042 = vmatpush3.xpose.msk.msra.mxu1 %vm1558_vm0, %v2969_v61  ;;  %5045 = vmatprep.mubr.msk.f32.mxu1 %vm1558_vm0, %v2963_v28 }
 0xbd2   : > { %5043 = vmatprep.subr.msk.mxu1 %vm1558_vm0, %v2967_v4 }
 0xbd5   : > { %5044 = vmatpush3.xpose.msk.msra.mxu1 %vm1558_vm0, %v2967_v4 }
 0xbd6   : > { %5062 = vmatprep.subr.mxu1 %v5902_v35 }
 0xbd8   : > { %5046 = vmatmul.mubr.msk.f32.vlgmr.msra.gmra.mxu1 %vm1558_vm0, %v2965_v33 }
 0xbd9   : > { %5063 = vmatpush3.msra.mxu1 %v5902_v35 }
 0xbda   : > { %5064 = vmatprep.subr.mxu1 %v5898_v27 }
 0xbdb   : > { %5065 = vmatpush3.msra.mxu1 %v5898_v27 }
 0xc90   : > { %v6086_v9 = vpop.f32.mrf.mxu1 }
 0xc92   : > { %v6088_v12 = vpop.f32.mrf.mxu1 }
 0xc98   : > { %v5047_v39 = vpop.f32.mrf.mxu1 }
 0xc99   : > { %v3050_v42 = vadd.f32 %v5047_v39, %v5914_v18 }
 0xc9a   : > { %v3044_v46 = vpop.f32.mrf.mxu1 }
 0xc9b   : > { %v3045_v19 = vadd.f32 %v3044_v46, %v5912_v17  ;;  %v3056_v45 = vsel %vm1646_vm3, %v3050_v42, -inf }
 0xc9c   : > { %3057 = vmax.xlane.f32.xlu1 %v3056_v45 }
 0xc9d   : > { %v3053_v14 = vsel %vm1646_vm3, %v3045_v19, -inf }
 0xc9e   : > { %3054 = vmax.xlane.f32.xlu0 %v3053_v14 }
 0xcad   : > { %3077 = vrot.lane.b32.xlu1 %v5896_v23, %s5515_s18 }
 0xd25   : > { %v3058_v47 = vpop.xlane.xlu1 %3057 }
 0xd26   : > { %v3060_v21 = vsub.f32 %v3050_v42, %v3058_v47 }
 0xd27   : > { %v3055_v24 = vpop.xlane.xlu0 %3054 }
 0xd28   : > { %v3063_v26 = vmul.f32 1.442695, %v3060_v21  ;;  %v3059_v29 = vsub.f32 %v3045_v19, %v3055_v24 }
 0xd29   : > { %v3078_v36 = vpop.permute.xlu1 %3077 }
 0xd2a   : > { %5305 = vpow2.f32 %v3063_v26  ;;  %v3061_v30 = vmul.f32 1.442695, %v3059_v29 }
 0xd2c   : > { %5307 = vpow2.f32 %v3061_v30 }
 0xd37   : > { %v5306_v15 = vpop.eup %5305 }
 0xd38   : > { %v3068_v16 = vsel %vm1646_vm3, %v5306_v15, 0.0 }
 0xd39   : > { %v5308_v2 = vpop.eup %5307  ;;  %3069 = vadd.xlane.f32.xlu0 %v3068_v16 }
 0xd3a   : > { %v3065_v40 = vsel %vm1646_vm3, %v5308_v2, 0.0 }
 0xd3d   : > { %3066 = vadd.xlane.f32.xlu0 %v3065_v40 }
 0xd53   : > { %3079 = vrot.lane.b32.xlu0 %v5900_v52, %s5515_s18  ;;  %v3165_v52 = vmul.f32 0.125, %v5816_v3 }
 0xdc2   : > { %v3070_v23 = vpop.xlane.xlu0 %3069 }
 0xdc3   : > { %5309 = vrcp.f32 %v3070_v23 }
 0xdc6   : > { %v3067_v34 = vpop.xlane.xlu0 %3066 }
 0xdc7   : > { %5311 = vrcp.f32 %v3067_v34 }
 0xdca   : > { %v3080_v56 = vpop.permute.xlu0 %3079 }
 0xdcb   : > { %5048 = vmatprep.subr.mxu0 %v3080_v56 }
 0xdcc   : > { %5049 = vmatpush3.msra.mxu0 %v3080_v56 }
 0xdcd   : > { %5050 = vmatprep.subr.mxu0 %v3078_v36 }
 0xdce   : > { %5051 = vmatpush3.msra.mxu0 %v3078_v36 }
 0xdcf   : > { %5055 = vmatprep.subr.msk.mxu0 %vm1558_vm0, %v5880_v58 }
 0xdd0   : > { %v5310_v6 = vpop.eup %5309 }
 0xdd1   : > { %v3074_v7 = vmul.f32 %v5310_v6, %v5306_v15 }
 0xdd4   : > { %v5312_v37 = vpop.eup %5311 }
 0xdd5   : > { %v3073_v41 = vmul.f32 %v5312_v37, %v5308_v2 }
 0xdd7   : > { %5052 = vmatprep.mubr.msk.f32.mxu0 %vm1646_vm3, %v3073_v41 }
 0xdd8   : > { %5053 = vmatmul.mubr.msk.f32.vlgmr.msra.gmra.mxu0 %vm1646_vm3, %v3074_v7 }
 0xdd9   : > { %5056 = vmatpush3.xpose.msk.msra.mxu0 %vm1558_vm0, %v5880_v58  ;;  %5059 = vmatprep.mubr.msk.f32.mxu0 %vm1558_vm0, %v3164_v48 }
 0xdda   : > { %5057 = vmatprep.subr.msk.mxu0 %vm1558_vm0, %v5876_v49 }
 0xddd   : > { %5058 = vmatpush3.xpose.msk.msra.mxu0 %vm1558_vm0, %v5876_v49 }
 0xde0   : > { %5060 = vmatmul.mubr.msk.f32.vlgmr.msra.gmra.mxu0 %vm1558_vm0, %v3165_v52 }
 0xe98   : > { %v6114_v62 = vpop.f32.mrf.mxu0 }
 0xe9a   : > { %v6116_v54 = vpop.f32.mrf.mxu0 }
 0xea0   : > { %v5061_v61 = vpop.f32.mrf.mxu0 }
 0xea1   : > { %v3250_v4 = vadd.f32 %v5061_v61, %v5914_v18 }
 0xea2   : > { %v3244_v8 = vpop.f32.mrf.mxu0 }
 0xea3   : > { %v3245_v10 = vadd.f32 %v3244_v8, %v5912_v17  ;;  %v3256_v22 = vsel %vm1646_vm3, %v3250_v4, -inf }
 0xea4   : > { %3257 = vmax.xlane.f32.xlu0 %v3256_v22 }
 0xea5   : > { %v3253_v55 = vsel %vm1646_vm3, %v3245_v10, -inf }
 0xea6   : > { %3254 = vmax.xlane.f32.xlu1 %v3253_v55 }
 0xf2d   : > { %v3258_v28 = vpop.xlane.xlu0 %3257 }
 0xf2e   : > { %v3260_v3 = vsub.f32 %v3250_v4, %v3258_v28 }
 0xf2f   : > { %v3255_v33 = vpop.xlane.xlu1 %3254 }
 0xf30   : > { %v3263_v39 = vmul.f32 1.442695, %v3260_v3  ;;  %v3259_v42 = vsub.f32 %v3245_v10, %v3255_v33 }
 0xf32   : > { %5313 = vpow2.f32 %v3263_v39  ;;  %v3261_v46 = vmul.f32 1.442695, %v3259_v42 }
 0xf34   : > { %5315 = vpow2.f32 %v3261_v46 }
 0xf3f   : > { %v5314_v19 = vpop.eup %5313 }
 0xf40   : > { %v3268_v45 = vsel %vm1646_vm3, %v5314_v19, 0.0 }
 0xf41   : > { %v5316_v14 = vpop.eup %5315  ;;  %3269 = vadd.xlane.f32.xlu1 %v3268_v45 }
 0xf42   : > { %v3265_v47 = vsel %vm1646_vm3, %v5316_v14, 0.0 }
 0xf43   : > { %3266 = vadd.xlane.f32.xlu0 %v3265_v47 }
 0xf52   : > { %3360 = vrot.lane.b32.xlu1 %v5876_v49, %s5515_s18 }
 0xf56   : > { %3356 = vrot.lane.b32.xlu1 %v3164_v48, %s5515_s18 }
 0xf59   : > { %3362 = vrot.lane.b32.xlu0 %v5880_v58, %s5515_s18 }
 0xf5a   : > { %3358 = vrot.lane.b32.xlu1 %v3165_v52, %s5515_s18 }
 0xfca   : > { %v3270_v21 = vpop.xlane.xlu1 %3269 }
 0xfcb   : > { %5317 = vrcp.f32 %v3270_v21 }
 0xfcc   : > { %v3267_v24 = vpop.xlane.xlu0 %3266 }
 0xfcd   : > { %5319 = vrcp.f32 %v3267_v24 }
 0xfce   : > { %v3361_v29 = vpop.permute.xlu1 %3360 }
 0xfd0   : > { %v3363_v26 = vpop.permute.xlu0 %3362 }
 0xfd1   : > { %5069 = vmatprep.subr.msk.mxu1 %vm1558_vm0, %v3363_v26 }
 0xfd2   : > { %v3357_v49 = vpop.permute.xlu1 %3356 }
 0xfd6   : > { %v3359_v58 = vpop.permute.xlu1 %3358 }
 0xfd8   : > { %v5318_v30 = vpop.eup %5317 }
 0xfd9   : > { %v3274_v2 = vmul.f32 %v5318_v30, %v5314_v19 }
 0xfda   : > { %v5320_v15 = vpop.eup %5319 }
 0xfdb   : > { %v3273_v16 = vmul.f32 %v5320_v15, %v5316_v14  ;;  %v3558_v14 = vmul.f32 0.125, %v5832_v25 }
 0xfdd   : > { %5066 = vmatprep.mubr.msk.f32.mxu1 %vm1646_vm3, %v3273_v16 }
 0xfde   : > { %5067 = vmatmul.mubr.msk.f32.vlgmr.msra.gmra.mxu1 %vm1646_vm3, %v3274_v2 }
 0xfdf   : > { %5070 = vmatpush3.xpose.msk.msra.mxu1 %vm1558_vm0, %v3363_v26  ;;  %5073 = vmatprep.mubr.msk.f32.mxu1 %vm1558_vm0, %v3357_v49 }
 0xfe0   : > { %5071 = vmatprep.subr.msk.mxu1 %vm1558_vm0, %v3361_v29 }
 0xfe3   : > { %5072 = vmatpush3.xpose.msk.msra.mxu1 %vm1558_vm0, %v3361_v29 }
 0xfe4   : > { %5090 = vmatprep.subr.mxu1 %v5910_v1 }
 0xfe6   : > { %5074 = vmatmul.mubr.msk.f32.vlgmr.msra.gmra.mxu1 %vm1558_vm0, %v3359_v58 }
 0xfe7   : > { %5091 = vmatpush3.msra.mxu1 %v5910_v1 }
 0xfe8   : > { %5092 = vmatprep.subr.mxu1 %v5908_v59 }
 0xfe9   : > { %5093 = vmatpush3.msra.mxu1 %v5908_v59 }
0x109e   : > { %v6142_v40 = vpop.f32.mrf.mxu1 }
0x10a0   : > { %v6144_v23 = vpop.f32.mrf.mxu1 }
0x10a6   : > { %v5075_v34 = vpop.f32.mrf.mxu1 }
0x10a7   : > { %v3444_v56 = vadd.f32 %v5075_v34, %v5914_v18 }
0x10a8   : > { %v3438_v36 = vpop.f32.mrf.mxu1 }
0x10a9   : > { %v3439_v6 = vadd.f32 %v3438_v36, %v5912_v17  ;;  %v3450_v37 = vsel %vm1646_vm3, %v3444_v56, -inf }
0x10aa   : > { %3451 = vmax.xlane.f32.xlu1 %v3450_v37 }
0x10ab   : > { %v3447_v41 = vsel %vm1646_vm3, %v3439_v6, -inf }
0x10ac   : > { %3448 = vmax.xlane.f32.xlu0 %v3447_v41 }
0x10bb   : > { %3471 = vrot.lane.b32.xlu1 %v5898_v27, %s5515_s18 }
0x1133   : > { %v3452_v7 = vpop.xlane.xlu1 %3451 }
0x1134   : > { %v3454_v48 = vsub.f32 %v3444_v56, %v3452_v7 }
0x1135   : > { %v3449_v52 = vpop.xlane.xlu0 %3448 }
0x1136   : > { %v3457_v61 = vmul.f32 1.442695, %v3454_v48  ;;  %v3453_v4 = vsub.f32 %v3439_v6, %v3449_v52 }
0x1137   : > { %v3472_v39 = vpop.permute.xlu1 %3471 }
0x1138   : > { %5321 = vpow2.f32 %v3457_v61  ;;  %v3455_v8 = vmul.f32 1.442695, %v3453_v4 }
0x113a   : > { %5323 = vpow2.f32 %v3455_v8 }
0x1145   : > { %v5322_v10 = vpop.eup %5321 }
0x1146   : > { %v3462_v22 = vsel %vm1646_vm3, %v5322_v10, 0.0 }
0x1147   : > { %v5324_v55 = vpop.eup %5323  ;;  %3463 = vadd.xlane.f32.xlu0 %v3462_v22  ;;  %v4124_v22 = vld [vmem:[#allocation7 + $0x470] sm:$0xff] }
0x1148   : > { %v3459_v28 = vsel %vm1646_vm3, %v5324_v55, 0.0 }
0x114b   : > { %3460 = vadd.xlane.f32.xlu0 %v3459_v28  ;;  %v4121_v28 = vld [vmem:[#allocation7 + $0x458] sm:$0xff] }
0x1161   : > { %3473 = vrot.lane.b32.xlu0 %v5902_v35, %s5515_s18  ;;  %v3559_v35 = vmul.f32 0.125, %v5836_v31 }
0x11d0   : > { %v3464_v27 = vpop.xlane.xlu0 %3463 }
0x11d1   : > { %5325 = vrcp.f32 %v3464_v27  ;;  %v4120_v27 = vld [vmem:[#allocation7 + $0x450] sm:$0xff] }
0x11d4   : > { %v3461_v3 = vpop.xlane.xlu0 %3460 }
0x11d5   : > { %5327 = vrcp.f32 %v3461_v3  ;;  %v4118_v3 = vld [vmem:[#allocation7 + $0x440] sm:$0xff] }
0x11d8   : > { %v3474_v33 = vpop.permute.xlu0 %3473 }
0x11d9   : > { %5076 = vmatprep.subr.mxu0 %v3474_v33 }
0x11da   : > { %5077 = vmatpush3.msra.mxu0 %v3474_v33  ;;  %v4117_v33 = vld [vmem:[#allocation7 + $0x438] sm:$0xff] }
0x11db   : > { %5078 = vmatprep.subr.mxu0 %v3472_v39 }
0x11dc   : > { %5079 = vmatpush3.msra.mxu0 %v3472_v39  ;;  %v4115_v39 = vld [vmem:[#allocation7 + $0x428] sm:$0xff] }
0x11dd   : > { %5083 = vmatprep.subr.msk.mxu0 %vm1558_vm0, %v5882_v5 }
0x11de   : > { %v5326_v42 = vpop.eup %5325 }
0x11df   : > { %v3468_v45 = vmul.f32 %v5326_v42, %v5322_v10  ;;  %v4114_v42 = vld [vmem:[#allocation7 + $0x420] sm:$0xff] }
0x11e2   : > { %v5328_v46 = vpop.eup %5327 }
0x11e3   : > { %v3467_v19 = vmul.f32 %v5328_v46, %v5324_v55  ;;  %v4123_v55 = vld [vmem:[#allocation7 + $0x468] sm:$0xff]  ;;  %v4112_v46 = vld [vmem:[#allocation7 + $0x410] sm:$0xff] }
0x11e5   : > { %5080 = vmatprep.mubr.msk.f32.mxu0 %vm1646_vm3, %v3467_v19  ;;  %v4111_v19 = vld [vmem:[#allocation7 + $0x408] sm:$0xff] }
0x11e6   : > { %5081 = vmatmul.mubr.msk.f32.vlgmr.msra.gmra.mxu0 %vm1646_vm3, %v3468_v45  ;;  %v4109_v45 = vld [vmem:[#allocation7 + $0x3f8] sm:$0xff] }
0x11e7   : > { %5084 = vmatpush3.xpose.msk.msra.mxu0 %vm1558_vm0, %v5882_v5  ;;  %5087 = vmatprep.mubr.msk.f32.mxu0 %vm1558_vm0, %v3558_v14 }
0x11e8   : > { %5085 = vmatprep.subr.msk.mxu0 %vm1558_vm0, %v5878_v53 }
0x11eb   : > { %5086 = vmatpush3.xpose.msk.msra.mxu0 %vm1558_vm0, %v5878_v53 }
0x11ee   : > { %5088 = vmatmul.mubr.msk.f32.vlgmr.msra.gmra.mxu0 %vm1558_vm0, %v3559_v35 }
0x12a6   : > { %v6170_v25 = vpop.f32.mrf.mxu0 }
0x12a8   : > { %v6172_v47 = vpop.f32.mrf.mxu0 }
0x12ae   : > { %v5089_v21 = vpop.f32.mrf.mxu0 }
0x12af   : > { %v3644_v24 = vadd.f32 %v5089_v21, %v5914_v18  ;;  %v4105_v21 = vld [vmem:[#allocation7 + $0x3d8] sm:$0xff] }
0x12b0   : > { %v3638_v26 = vpop.f32.mrf.mxu0 }
0x12b1   : > { %v3639_v29 = vadd.f32 %v3638_v26, %v5912_v17  ;;  %v3650_v30 = vsel %vm1646_vm3, %v3644_v24, -inf  ;;  %v4102_v26 = vld [vmem:[#allocation7 + $0x3c0] sm:$0xff] }
0x12b2   : > { %3651 = vmax.xlane.f32.xlu0 %v3650_v30  ;;  %v4099_v30 = vld [vmem:[#allocation7 + $0x3a8] sm:$0xff] }
0x12b3   : > { %v3647_v15 = vsel %vm1646_vm3, %v3639_v29, -inf }
0x12b4   : > { %3648 = vmax.xlane.f32.xlu1 %v3647_v15  ;;  %v4097_v15 = vld [vmem:[#allocation7 + $0x398] sm:$0xff] }
0x133b   : > { %v3652_v16 = vpop.xlane.xlu0 %3651 }
0x133c   : > { %v3654_v31 = vsub.f32 %v3644_v24, %v3652_v16  ;;  %v4103_v24 = vld [vmem:[#allocation7 + $0x3c8] sm:$0xff]  ;;  %v4096_v16 = vld [vmem:[#allocation7 + $0x390] sm:$0xff] }
0x133d   : > { %v3649_v2 = vpop.xlane.xlu1 %3648 }
0x133e   : > { %v3657_v49 = vmul.f32 1.442695, %v3654_v31  ;;  %v3653_v58 = vsub.f32 %v3639_v29, %v3649_v2  ;;  %v4100_v29 = vld [vmem:[#allocation7 + $0x3b0] sm:$0xff]  ;;  %v4094_v31 = vld [vmem:[#allocation7 + $0x380] sm:$0xff]  ;;  %v4093_v2 = vld [vmem:[#allocation7 + $0x378] sm:$0xff] }
0x1340   : > { %5329 = vpow2.f32 %v3657_v49  ;;  %v3655_v34 = vmul.f32 1.442695, %v3653_v58  ;;  %v4091_v49 = vld [vmem:[#allocation7 + $0x368] sm:$0xff] }
0x1342   : > { %5331 = vpow2.f32 %v3655_v34 }
0x134d   : > { %v5330_v56 = vpop.eup %5329 }
0x134e   : > { %v3662_v36 = vsel %vm1646_vm3, %v5330_v56, 0.0 }
0x134f   : > { %v5332_v6 = vpop.eup %5331  ;;  %3663 = vadd.xlane.f32.xlu1 %v3662_v36 }
0x1350   : > { %v3659_v37 = vsel %vm1646_vm3, %v5332_v6, 0.0 }
0x1351   : > { %3660 = vadd.xlane.f32.xlu0 %v3659_v37 }
0x1360   : > { %3754 = vrot.lane.b32.xlu1 %v5878_v53, %s5515_s18 }
0x1364   : > { %3750 = vrot.lane.b32.xlu1 %v3558_v14, %s5515_s18  ;;  %v4108_v14 = vld [vmem:[#allocation7 + $0x3f0] sm:$0xff] }
0x1367   : > { %3756 = vrot.lane.b32.xlu0 %v5882_v5, %s5515_s18 }
0x1368   : > { %3752 = vrot.lane.b32.xlu1 %v3559_v35, %s5515_s18  ;;  %v4106_v35 = vld [vmem:[#allocation7 + $0x3e0] sm:$0xff] }
0x13d8   : > { %v3664_v41 = vpop.xlane.xlu1 %3663 }
0x13d9   : > { %5333 = vrcp.f32 %v3664_v41 }
0x13da   : > { %v3661_v7 = vpop.xlane.xlu0 %3660 }
0x13db   : > { %5335 = vrcp.f32 %v3661_v7 }
0x13dc   : > { %v3755_v52 = vpop.permute.xlu1 %3754 }
0x13de   : > { %v3757_v48 = vpop.permute.xlu0 %3756 }
0x13df   : > { %5097 = vmatprep.subr.msk.mxu1 %vm1558_vm0, %v3757_v48 }
0x13e0   : > { %v3751_v53 = vpop.permute.xlu1 %3750 }
0x13e4   : > { %v3753_v5 = vpop.permute.xlu1 %3752 }
0x13e6   : > { %v5334_v61 = vpop.eup %5333 }
0x13e7   : > { %v3668_v10 = vmul.f32 %v5334_v61, %v5330_v56  ;;  %v4087_v61 = vld [vmem:[#allocation7 + $0x348] sm:$0xff] }
0x13e8   : > { %v5336_v4 = vpop.eup %5335 }
0x13e9   : > { %v3667_v8 = vmul.f32 %v5336_v4, %v5332_v6  ;;  %v4085_v4 = vld [vmem:[#allocation7 + $0x338] sm:$0xff] }
0x13eb   : > { %5094 = vmatprep.mubr.msk.f32.mxu1 %vm1646_vm3, %v3667_v8  ;;  %v4084_v8 = vld [vmem:[#allocation7 + $0x330] sm:$0xff] }
0x13ec   : > { %5095 = vmatmul.mubr.msk.f32.vlgmr.msra.gmra.mxu1 %vm1646_vm3, %v3668_v10  ;;  %v4081_v10 = vld [vmem:[#allocation7 + $0x318] sm:$0xff] }
0x13ed   : > { %5098 = vmatpush3.xpose.msk.msra.mxu1 %vm1558_vm0, %v3757_v48  ;;  %5101 = vmatprep.mubr.msk.f32.mxu1 %vm1558_vm0, %v3751_v53  ;;  %v4090_v48 = vld [vmem:[#allocation7 + $0x360] sm:$0xff] }
0x13ee   : > { %5099 = vmatprep.subr.msk.mxu1 %vm1558_vm0, %v3755_v52  ;;  %v4078_v53 = vld [vmem:[#allocation7 + $0x300] sm:$0xff] }
0x13f1   : > { %5100 = vmatpush3.xpose.msk.msra.mxu1 %vm1558_vm0, %v3755_v52  ;;  %v4088_v52 = vld [vmem:[#allocation7 + $0x350] sm:$0xff] }
0x13f2   : > { %4215 = vmatprep.subr.mxu1 %v4124_v22 }
0x13f4   : > { %5102 = vmatmul.mubr.msk.f32.vlgmr.msra.gmra.mxu1 %vm1558_vm0, %v3753_v5  ;;  %v5229_v5 = vpack.i.bf16 %v5978_v44, %v6028_v63 }
0x13f5   : > { %4279 = vmatprep.mubr.f32.mxu1 %v5514_v0  ;;  %4216 = vmatpush1.msra.mxu1 %v4123_v55 }
0x13f6   : > { %4217 = vmatprep.subr.mxu1 %v4121_v28 }
0x13f7   : > { %4218 = vmatpush1.msra.mxu1 %v4120_v27 }
0x13f8   : > { %4219 = vmatprep.subr.mxu1 %v4118_v3 }
0x13f9   : > { %4220 = vmatpush1.msra.mxu1 %v4117_v33 }
0x13fa   : > { %4221 = vmatprep.subr.mxu1 %v4115_v39 }
0x13fb   : > { %4222 = vmatpush1.msra.mxu1 %v4114_v42 }
0x13fc   : > { %4223 = vmatprep.subr.mxu1 %v4112_v46 }
0x13fd   : > { %4224 = vmatpush1.msra.mxu1 %v4111_v19 }
0x13fe   : > { %4225 = vmatprep.subr.mxu1 %v4109_v45 }
0x13ff   : > { %4226 = vmatpush1.msra.mxu1 %v4108_v14  ;;  %v4028_v14 = vld [vmem:[#allocation7 + $0x170] sm:$0xff] }
0x1400   : > { %4227 = vmatprep.subr.mxu1 %v4106_v35 }
0x1401   : > { %4228 = vmatpush1.msra.mxu1 %v4105_v21 }
0x1402   : > { %4229 = vmatprep.subr.mxu1 %v4103_v24 }
0x1403   : > { %4230 = vmatpush1.msra.mxu1 %v4102_v26 }
0x1404   : > { %4231 = vmatprep.subr.mxu1 %v4100_v29 }
0x1405   : > { %4232 = vmatpush1.msra.mxu1 %v4099_v30 }
0x1406   : > { %4233 = vmatprep.subr.mxu1 %v4097_v15  ;;  %v4027_v15 = vld [vmem:[#allocation7 + $0x168] sm:$0xff] }
0x1407   : > { %4234 = vmatpush1.msra.mxu1 %v4096_v16  ;;  %v4025_v16 = vld [vmem:[#allocation7 + $0x158] sm:$0xff] }
0x1408   : > { %4235 = vmatprep.subr.mxu1 %v4094_v31  ;;  %v4024_v31 = vld [vmem:[#allocation7 + $0x150] sm:$0xff] }
0x1409   : > { %4236 = vmatpush1.msra.mxu1 %v4093_v2  ;;  %v4022_v2 = vld [vmem:[#allocation7 + $0x140] sm:$0xff] }
0x140a   : > { %4237 = vmatprep.subr.mxu1 %v4091_v49  ;;  %v4021_v49 = vld [vmem:[#allocation7 + $0x138] sm:$0xff] }
0x140b   : > { %4238 = vmatpush1.msra.mxu1 %v4090_v48  ;;  %v4009_v48 = vld [vmem:[#allocation7 + $0xd8] sm:$0xff] }
0x140c   : > { %4239 = vmatprep.subr.mxu1 %v4088_v52  ;;  %v4007_v52 = vld [vmem:[#allocation7 + $0xc8] sm:$0xff] }
0x140d   : > { %4240 = vmatpush1.msra.mxu1 %v4087_v61  ;;  %v4006_v61 = vld [vmem:[#allocation7 + $0xc0] sm:$0xff] }
0x140e   : > { %4241 = vmatprep.subr.mxu1 %v4085_v4  ;;  %v4004_v4 = vld [vmem:[#allocation7 + $0xb0] sm:$0xff] }
0x140f   : > { %4242 = vmatpush1.msra.mxu1 %v4084_v8  ;;  %v4003_v8 = vld [vmem:[#allocation7 + $0xa8] sm:$0xff] }
0x14ac   : > { %v6195_v58 = vpop.f32.mrf.mxu1 }
0x14ae   : > { %v6197_v34 = vpop.f32.mrf.mxu1 }
0x14b4   : > { %v5103_v56 = vpop.f32.mrf.mxu1 }
0x14b5   : > { %v3838_v36 = vadd.f32 %v5103_v56, %v5914_v18  ;;  %v4082_v18 = vld [vmem:[#allocation7 + $0x320] sm:$0xff]  ;;  %v4019_v56 = vld [vmem:[#allocation7 + $0x128] sm:$0xff] }
0x14b6   : > { %v3832_v6 = vpop.f32.mrf.mxu1  ;;  %4243 = vmatprep.subr.mxu1 %v4082_v18  ;;  %v4001_v18 = vld [vmem:[#allocation7 + $0x98] sm:$0xff] }
0x14b7   : > { %v3833_v37 = vadd.f32 %v3832_v6, %v5912_v17  ;;  %v3844_v41 = vsel %vm1646_vm3, %v3838_v36, -inf  ;;  %4244 = vmatpush1.msra.mxu1 %v4081_v10  ;;  %v4079_v17 = vld [vmem:[#allocation7 + $0x308] sm:$0xff]  ;;  %v4016_v6 = vld [vmem:[#allocation7 + $0x110] sm:$0xff] }
0x14b8   : > { %3845 = vmax.xlane.f32.xlu1 %v3844_v41  ;;  %4245 = vmatprep.subr.mxu1 %v4079_v17  ;;  %v4013_v41 = vld [vmem:[#allocation7 + $0xf8] sm:$0xff]  ;;  %v4000_v10 = vld [vmem:[#allocation7 + $0x90] sm:$0xff]  ;;  %v3998_v17 = vld [vmem:[#allocation7 + $0x80] sm:$0xff] }
0x14b9   : > { %v3841_v7 = vsel %vm1646_vm3, %v3833_v37, -inf  ;;  %4246 = vmatpush1.msra.mxu1 %v4078_v53  ;;  %v3997_v53 = vld [vmem:[#allocation7 + $0x78] sm:$0xff] }
0x14ba   : > { %3842 = vmax.xlane.f32.xlu0 %v3841_v7  ;;  %v4010_v7 = vld [vmem:[#allocation7 + $0xe0] sm:$0xff] }
0x14c9   : > { %3865 = vrot.lane.b32.xlu1 %v5908_v59, %s5515_s18 }
0x14cd   : > { %2758 = vrot.lane.b32.xlu1 %v6060_v20, %s5515_s18 }
0x14d1   : > { %5230 = vrot.lane.b32.xlu1 %v5229_v5, %s5515_s18  ;;  %v3995_v5 = vld [vmem:[#allocation7 + $0x68] sm:$0xff] }
0x1541   : > { %v3846_v22 = vpop.xlane.xlu1 %3845 }
0x1542   : > { %v3848_v55 = vsub.f32 %v3838_v36, %v3846_v22  ;;  %v4018_v36 = vld [vmem:[#allocation7 + $0x120] sm:$0xff] }
0x1543   : > { %v3843_v28 = vpop.xlane.xlu0 %3842  ;;  %v3994_v22 = vld [vmem:[#allocation7 + $0x60] sm:$0xff] }
0x1544   : > { %v3851_v27 = vmul.f32 1.442695, %v3848_v55  ;;  %v3847_v3 = vsub.f32 %v3833_v37, %v3843_v28  ;;  %v4015_v37 = vld [vmem:[#allocation7 + $0x108] sm:$0xff]  ;;  %v3992_v55 = vld [vmem:[#allocation7 + $0x50] sm:$0xff] }
0x1545   : > { %v3866_v33 = vpop.permute.xlu1 %3865  ;;  %v3991_v28 = vld [vmem:[#allocation7 + $0x48] sm:$0xff] }
0x1546   : > { %5337 = vpow2.f32 %v3851_v27  ;;  %v3849_v39 = vmul.f32 1.442695, %v3847_v3  ;;  %v3989_v27 = vld [vmem:[#allocation7 + $0x38] sm:$0xff]  ;;  %v3988_v3 = vld [vmem:[#allocation7 + $0x30] sm:$0xff] }
0x1548   : > { %5339 = vpow2.f32 %v3849_v39  ;;  %v3985_v39 = vld [vmem:[#allocation7 + $0x18] sm:$0xff] }
0x1549   : > { %v2759_v59 = vpop.permute.xlu1 %2758 }
0x154a   : > { %v6212_v42 = vsel %vm1558_vm0, %v6032_v38, %v2759_v59  ;;  %v3983_v59 = vld [vmem:[#allocation7 + $0x8] sm:$0xff] }
0x154b   : > { %4280 = vmatmul.mubr.f32.vlgmr.msra.gmra.mxu1 %v6212_v42 }
0x154c   : > { %4285 = vmatprep.mubr.f32.mxu1 %v5514_v0 }
0x1553   : > { %v5338_v44 = vpop.eup %5337 }
0x1554   : > { %v3856_v63 = vsel %vm1646_vm3, %v5338_v44, 0.0 }
0x1555   : > { %v5340_v20 = vpop.eup %5339  ;;  %3857 = vadd.xlane.f32.xlu0 %v3856_v63  ;;  %v4076_v63 = vld [vmem:[#allocation7 + $0x2f0] sm:$0xff] }
0x1556   : > { %v3853_v46 = vsel %vm1646_vm3, %v5340_v20, 0.0 }
0x1559   : > { %3854 = vadd.xlane.f32.xlu0 %v3853_v46  ;;  %v4073_v46 = vld [vmem:[#allocation7 + $0x2d8] sm:$0xff] }
0x156f   : > { %3867 = vrot.lane.b32.xlu0 %v5910_v1, %s5515_s18  ;;  %v6227_v1 = vpop.permute.xlu1 %5230 }
0x1570   : > { %v5232_v26 = vunpack.i.l.bf16 %v6227_v1 }
0x1573   : > { %2760 = vrot.lane.b32.xlu0 %v6058_v60, %s5515_s18 }
0x15de   : > { %v3858_v38 = vpop.xlane.xlu0 %3857 }
0x15df   : > { %5341 = vrcp.f32 %v3858_v38  ;;  %v4072_v38 = vld [vmem:[#allocation7 + $0x2d0] sm:$0xff] }
0x15e2   : > { %v3855_v19 = vpop.xlane.xlu0 %3854 }
0x15e3   : > { %5343 = vrcp.f32 %v3855_v19  ;;  %v4070_v19 = vld [vmem:[#allocation7 + $0x2c0] sm:$0xff] }
0x15e6   : > { %v3868_v45 = vpop.permute.xlu0 %3867 }
0x15e7   : > { %5104 = vmatprep.subr.mxu0 %v3868_v45 }
0x15e8   : > { %5105 = vmatpush3.msra.mxu0 %v3868_v45  ;;  %v4069_v45 = vld [vmem:[#allocation7 + $0x2b8] sm:$0xff] }
0x15e9   : > { %5106 = vmatprep.subr.mxu0 %v3866_v33 }
0x15ea   : > { %5107 = vmatpush3.msra.mxu0 %v3866_v33  ;;  %v2761_v35 = vpop.permute.xlu0 %2760  ;;  %v3986_v33 = vld [vmem:[#allocation7 + $0x20] sm:$0xff] }
0x15eb   : > { %v6224_v21 = vsel %vm1558_vm0, %v6030_v50, %v2761_v35  ;;  %4126 = vmatprep.subr.mxu0 %v4028_v14  ;;  %v6235_v50 = vsel %vm1558_vm0, %v5982_v57, %v5232_v26  ;;  %v4012_v57 = vld [vmem:[#allocation7 + $0xf0] sm:$0xff]  ;;  %v4067_v14 = vld [vmem:[#allocation7 + $0x2a8] sm:$0xff]  ;;  %v4066_v35 = vld [vmem:[#allocation7 + $0x2a0] sm:$0xff] }
0x15ec   : > { %4286 = vmatmul.mubr.f32.gmra.mxu1 %v6224_v21  ;;  %v5342_v60 = vpop.eup %5341  ;;  %v4061_v26 = vld [vmem:[#allocation7 + $0x278] sm:$0xff] }
0x15ed   : > { %4291 = vmatprep.mubr.f32.mxu1 %v5514_v0  ;;  %v3862_v30 = vmul.f32 %v5342_v60, %v5338_v44  ;;  %v3982_v44 = vld [vmem:[#allocation7] sm:$0xff]  ;;  %v4064_v60 = vld [vmem:[#allocation7 + $0x290] sm:$0xff] }
0x15f0   : > { %v5344_v24 = vpop.eup %5343 }
0x15f1   : > { %v3861_v29 = vmul.f32 %v5344_v24, %v5340_v20  ;;  %v4075_v20 = vld [vmem:[#allocation7 + $0x2e8] sm:$0xff] }
0x15f2   : > { %v4063_v24 = vld [vmem:[#allocation7 + $0x288] sm:$0xff] }
0x15f3   : > { %5108 = vmatprep.mubr.msk.f32.mxu0 %vm1646_vm3, %v3861_v29  ;;  %v4060_v29 = vld [vmem:[#allocation7 + $0x270] sm:$0xff] }
0x15f4   : > { %5109 = vmatmul.mubr.msk.f32.vlgmr.msra.gmra.mxu0 %vm1646_vm3, %v3862_v30  ;;  %v4058_v30 = vld [vmem:[#allocation7 + $0x260] sm:$0xff] }
0x15f5   : > { %4127 = vmatpush1.msra.mxu0 %v4027_v15  ;;  %4190 = vmatprep.mubr.f32.mxu0 %v6235_v50  ;;  %v4057_v15 = vld [vmem:[#allocation7 + $0x258] sm:$0xff] }
0x15f6   : > { %4128 = vmatprep.subr.mxu0 %v4025_v16  ;;  %v4055_v16 = vld [vmem:[#allocation7 + $0x248] sm:$0xff] }
0x15f7   : > { %4129 = vmatpush1.msra.mxu0 %v4024_v31  ;;  %v4054_v31 = vld [vmem:[#allocation7 + $0x240] sm:$0xff] }
0x15f8   : > { %4130 = vmatprep.subr.mxu0 %v4022_v2  ;;  %v4052_v2 = vld [vmem:[#allocation7 + $0x230] sm:$0xff] }
0x15f9   : > { %4131 = vmatpush1.msra.mxu0 %v4021_v49  ;;  %v4051_v49 = vld [vmem:[#allocation7 + $0x228] sm:$0xff] }
0x15fa   : > { %4132 = vmatprep.subr.mxu0 %v4019_v56  ;;  %v4049_v56 = vld [vmem:[#allocation7 + $0x218] sm:$0xff] }
0x15fb   : > { %4133 = vmatpush1.msra.mxu0 %v4018_v36  ;;  %v4048_v36 = vld [vmem:[#allocation7 + $0x210] sm:$0xff] }
0x15fc   : > { %4134 = vmatprep.subr.mxu0 %v4016_v6  ;;  %v4046_v6 = vld [vmem:[#allocation7 + $0x200] sm:$0xff] }
0x15fd   : > { %4135 = vmatpush1.msra.mxu0 %v4015_v37  ;;  %v4045_v37 = vld [vmem:[#allocation7 + $0x1f8] sm:$0xff] }
0x15fe   : > { %4136 = vmatprep.subr.mxu0 %v4013_v41  ;;  %v4043_v41 = vld [vmem:[#allocation7 + $0x1e8] sm:$0xff] }
0x15ff   : > { %4137 = vmatpush1.msra.mxu0 %v4012_v57  ;;  %v4042_v57 = vld [vmem:[#allocation7 + $0x1e0] sm:$0xff] }
0x1600   : > { %4138 = vmatprep.subr.mxu0 %v4010_v7  ;;  %v4040_v7 = vld [vmem:[#allocation7 + $0x1d0] sm:$0xff] }
0x1601   : > { %4139 = vmatpush1.msra.mxu0 %v4009_v48  ;;  %v4039_v48 = vld [vmem:[#allocation7 + $0x1c8] sm:$0xff] }
0x1602   : > { %4140 = vmatprep.subr.mxu0 %v4007_v52  ;;  %v4037_v52 = vld [vmem:[#allocation7 + $0x1b8] sm:$0xff] }
0x1603   : > { %4141 = vmatpush1.msra.mxu0 %v4006_v61  ;;  %v4036_v61 = vld [vmem:[#allocation7 + $0x1b0] sm:$0xff] }
0x1604   : > { %4142 = vmatprep.subr.mxu0 %v4004_v4  ;;  %v4034_v4 = vld [vmem:[#allocation7 + $0x1a0] sm:$0xff] }
0x1605   : > { %4143 = vmatpush1.msra.mxu0 %v4003_v8  ;;  %v4033_v8 = vld [vmem:[#allocation7 + $0x198] sm:$0xff] }
0x1606   : > { %4144 = vmatprep.subr.mxu0 %v4001_v18  ;;  %v5233_v18 = vunpack.i.h.bf16 %v6227_v1  ;;  %v4071_v1 = vld [vmem:[#allocation7 + $0x2c8] sm:$0xff] }
0x1607   : > { %4145 = vmatpush1.msra.mxu0 %v4000_v10  ;;  %v4031_v10 = vld [vmem:[#allocation7 + $0x188] sm:$0xff] }
0x1608   : > { %4146 = vmatprep.subr.mxu0 %v3998_v17  ;;  %v4030_v17 = vld [vmem:[#allocation7 + $0x180] sm:$0xff] }
0x1609   : > { %4147 = vmatpush1.msra.mxu0 %v3997_v53  ;;  %v6241_v53 = vsel %vm1558_vm0, %v5936_v13, %v5233_v18  ;;  %v4119_v13 = vld [vmem:[#allocation7 + $0x448] sm:$0xff]  ;;  %v4092_v18 = vld [vmem:[#allocation7 + $0x370] sm:$0xff] }
0x160a   : > { %4148 = vmatprep.subr.mxu0 %v3995_v5  ;;  %v4077_v5 = vld [vmem:[#allocation7 + $0x2f8] sm:$0xff] }
0x160b   : > { %4149 = vmatpush1.msra.mxu0 %v3994_v22  ;;  %v4029_v22 = vld [vmem:[#allocation7 + $0x178] sm:$0xff]  ;;  %4841 = vmatprep.subr.mxu1 %v4077_v5 }
0x160c   : > { %4150 = vmatprep.subr.mxu0 %v3992_v55  ;;  %v4074_v55 = vld [vmem:[#allocation7 + $0x2e0] sm:$0xff]  ;;  %4842 = vmatpush3.msra.mxu1 %v4029_v22 }
0x160d   : > { %4151 = vmatpush1.msra.mxu0 %v3991_v28  ;;  %v4026_v28 = vld [vmem:[#allocation7 + $0x160] sm:$0xff]  ;;  %4843 = vmatprep.subr.mxu1 %v4074_v55 }
0x160e   : > { %4152 = vmatprep.subr.mxu0 %v3989_v27  ;;  %v4023_v27 = vld [vmem:[#allocation7 + $0x148] sm:$0xff]  ;;  %4844 = vmatpush3.msra.mxu1 %v4026_v28  ;;  %v4086_v55 = vld [vmem:[#allocation7 + $0x340] sm:$0xff] }
0x160f   : > { %4153 = vmatpush1.msra.mxu0 %v3988_v3  ;;  %v4125_v3 = vld [vmem:[#allocation7 + $0x478] sm:$0xff]  ;;  %4845 = vmatprep.subr.mxu1 %v4071_v1  ;;  %v4083_v1 = vld [vmem:[#allocation7 + $0x328] sm:$0xff] }
0x1610   : > { %4154 = vmatprep.subr.mxu0 %v3986_v33  ;;  %v4068_v33 = vld [vmem:[#allocation7 + $0x2b0] sm:$0xff]  ;;  %4846 = vmatpush3.msra.mxu1 %v4023_v27  ;;  %v5239_v27 = vpack.i.bf16 %v6116_v54, %v6172_v47 }
0x1611   : > { %4155 = vmatpush1.msra.mxu0 %v3985_v39  ;;  %v4122_v39 = vld [vmem:[#allocation7 + $0x460] sm:$0xff]  ;;  %4847 = vmatprep.subr.mxu1 %v4068_v33  ;;  %v4281_v33 = vpop.f32.mrf.mxu1 }
0x1612   : > { %4156 = vmatprep.subr.mxu0 %v3983_v59  ;;  %v4020_v59 = vld [vmem:[#allocation7 + $0x130] sm:$0xff] }
0x1613   : > { %4157 = vmatpush1.msra.mxu0 %v3982_v44  ;;  %v4065_v44 = vld [vmem:[#allocation7 + $0x298] sm:$0xff]  ;;  %4848 = vmatpush3.msra.mxu1 %v4020_v59 }
0x1614   : > { %4158 = vmatprep.subr.mxu0 %v4076_v63  ;;  %v4017_v63 = vld [vmem:[#allocation7 + $0x118] sm:$0xff]  ;;  %4849 = vmatprep.subr.mxu1 %v4065_v44 }
0x1615   : > { %4159 = vmatpush2.msra.mxu0 %v4075_v20  ;;  %v4116_v20 = vld [vmem:[#allocation7 + $0x430] sm:$0xff]  ;;  %4850 = vmatpush3.msra.mxu1 %v4017_v63 }
0x1616   : > { %4160 = vmatprep.subr.mxu0 %v4073_v46  ;;  %v4062_v46 = vld [vmem:[#allocation7 + $0x280] sm:$0xff] }
0x1617   : > { %4161 = vmatpush2.msra.mxu0 %v4072_v38  ;;  %v4014_v38 = vld [vmem:[#allocation7 + $0x100] sm:$0xff]  ;;  %4851 = vmatprep.subr.mxu1 %v4062_v46 }
0x1618   : > { %4162 = vmatprep.subr.mxu0 %v4070_v19  ;;  %v4113_v19 = vld [vmem:[#allocation7 + $0x418] sm:$0xff]  ;;  %4852 = vmatpush3.msra.mxu1 %v4014_v38 }
0x1619   : > { %4163 = vmatpush2.msra.mxu0 %v4069_v45  ;;  %v4059_v45 = vld [vmem:[#allocation7 + $0x268] sm:$0xff] }
0x161a   : > { %4164 = vmatprep.subr.mxu0 %v4067_v14  ;;  %v4011_v14 = vld [vmem:[#allocation7 + $0xe8] sm:$0xff]  ;;  %4853 = vmatprep.subr.mxu1 %v4059_v45 }
0x161b   : > { %4165 = vmatpush2.msra.mxu0 %v4066_v35  ;;  %v4110_v35 = vld [vmem:[#allocation7 + $0x400] sm:$0xff]  ;;  %4854 = vmatpush3.msra.mxu1 %v4011_v14 }
0x161c   : > { %4166 = vmatprep.subr.mxu0 %v4064_v60  ;;  %v4056_v60 = vld [vmem:[#allocation7 + $0x250] sm:$0xff] }
0x161d   : > { %4167 = vmatpush2.msra.mxu0 %v4063_v24  ;;  %v4008_v24 = vld [vmem:[#allocation7 + $0xd0] sm:$0xff]  ;;  %4855 = vmatprep.subr.mxu1 %v4056_v60 }
0x161e   : > { %4168 = vmatprep.subr.mxu0 %v4061_v26  ;;  %v4107_v26 = vld [vmem:[#allocation7 + $0x3e8] sm:$0xff]  ;;  %4856 = vmatpush3.msra.mxu1 %v4008_v24 }
0x161f   : > { %4169 = vmatpush2.msra.mxu0 %v4060_v29  ;;  %v4053_v29 = vld [vmem:[#allocation7 + $0x238] sm:$0xff] }
0x1620   : > { %4170 = vmatprep.subr.mxu0 %v4058_v30  ;;  %v4005_v30 = vld [vmem:[#allocation7 + $0xb8] sm:$0xff]  ;;  %4857 = vmatprep.subr.mxu1 %v4053_v29 }
0x1621   : > { %4171 = vmatpush2.msra.mxu0 %v4057_v15  ;;  %v4104_v15 = vld [vmem:[#allocation7 + $0x3d0] sm:$0xff]  ;;  %4858 = vmatpush3.msra.mxu1 %v4005_v30 }
0x1622   : > { %4172 = vmatprep.subr.mxu0 %v4055_v16  ;;  %v4050_v16 = vld [vmem:[#allocation7 + $0x220] sm:$0xff] }
0x1623   : > { %4173 = vmatpush2.msra.mxu0 %v4054_v31  ;;  %v4002_v31 = vld [vmem:[#allocation7 + $0xa0] sm:$0xff]  ;;  %4859 = vmatprep.subr.mxu1 %v4050_v16 }
0x1624   : > { %4174 = vmatprep.subr.mxu0 %v4052_v2  ;;  %v4047_v2 = vld [vmem:[#allocation7 + $0x208] sm:$0xff]  ;;  %4860 = vmatpush3.msra.mxu1 %v4002_v31 }
0x1625   : > { %4175 = vmatpush2.msra.mxu0 %v4051_v49  ;;  %v3999_v49 = vld [vmem:[#allocation7 + $0x88] sm:$0xff]  ;;  %4861 = vmatprep.subr.mxu1 %v4047_v2 }
0x1626   : > { %4176 = vmatprep.subr.mxu0 %v4049_v56  ;;  %v4044_v56 = vld [vmem:[#allocation7 + $0x1f0] sm:$0xff]  ;;  %4862 = vmatpush3.msra.mxu1 %v3999_v49 }
0x1627   : > { %4177 = vmatpush2.msra.mxu0 %v4048_v36  ;;  %4863 = vmatprep.subr.mxu1 %v4044_v56  ;;  %v3996_v36 = vld [vmem:[#allocation7 + $0x70] sm:$0xff] }
0x1628   : > { %4178 = vmatprep.subr.mxu0 %v4046_v6  ;;  %4864 = vmatpush3.msra.mxu1 %v3996_v36  ;;  %v4041_v6 = vld [vmem:[#allocation7 + $0x1d8] sm:$0xff] }
0x1629   : > { %4179 = vmatpush2.msra.mxu0 %v4045_v37  ;;  %v4101_v37 = vld [vmem:[#allocation7 + $0x3b8] sm:$0xff]  ;;  %4865 = vmatprep.subr.mxu1 %v4041_v6 }
0x162a   : > { %4180 = vmatprep.subr.mxu0 %v4043_v41  ;;  %v3993_v41 = vld [vmem:[#allocation7 + $0x58] sm:$0xff] }
0x162b   : > { %4181 = vmatpush2.msra.mxu0 %v4042_v57  ;;  %v4038_v57 = vld [vmem:[#allocation7 + $0x1c0] sm:$0xff]  ;;  %4866 = vmatpush3.msra.mxu1 %v3993_v41 }
0x162c   : > { %4182 = vmatprep.subr.mxu0 %v4040_v7  ;;  %v4098_v7 = vld [vmem:[#allocation7 + $0x3a0] sm:$0xff]  ;;  %4867 = vmatprep.subr.mxu1 %v4038_v57 }
0x162d   : > { %4183 = vmatpush2.msra.mxu0 %v4039_v48  ;;  %v3990_v48 = vld [vmem:[#allocation7 + $0x40] sm:$0xff] }
0x162e   : > { %4184 = vmatprep.subr.mxu0 %v4037_v52  ;;  %4868 = vmatpush3.msra.mxu1 %v3990_v48  ;;  %v4035_v52 = vld [vmem:[#allocation7 + $0x1a8] sm:$0xff] }
0x162f   : > { %4185 = vmatpush2.msra.mxu0 %v4036_v61  ;;  %v4095_v61 = vld [vmem:[#allocation7 + $0x388] sm:$0xff]  ;;  %4869 = vmatprep.subr.mxu1 %v4035_v52 }
0x1630   : > { %4186 = vmatprep.subr.mxu0 %v4034_v4  ;;  %v3987_v4 = vld [vmem:[#allocation7 + $0x28] sm:$0xff] }
0x1631   : > { %4187 = vmatpush2.msra.mxu0 %v4033_v8  ;;  %v4032_v8 = vld [vmem:[#allocation7 + $0x190] sm:$0xff]  ;;  %4870 = vmatpush3.msra.mxu1 %v3987_v4 }
0x1632   : > { %4188 = vmatprep.subr.mxu0 %v4031_v10  ;;  %4871 = vmatprep.subr.mxu1 %v4032_v8  ;;  %v3984_v10 = vld [vmem:[#allocation7 + $0x10] sm:$0xff] }
0x1633   : > { %4189 = vmatpush2.msra.mxu0 %v4030_v17  ;;  %4872 = vmatpush3.msra.mxu1 %v3984_v10  ;;  %v4089_v17 = vld [vmem:[#allocation7 + $0x358] sm:$0xff] }
0x1634   : > { %4191 = vmatmul.mubr.f32.vlgmr.msra.gmra.mxu0 %v6241_v53  ;;  %5111 = vmatprep.subr.mxu0 %v4125_v3 }
0x1635   : > { %5112 = vmatpush3.msra.mxu0 %v4125_v3  ;;  %v4080_v3 = vld [vmem:[#allocation7 + $0x310] sm:$0xff] }
0x1636   : > { %5113 = vmatprep.subr.mxu0 %v4122_v39 }
0x1637   : > { %5114 = vmatpush3.msra.mxu0 %v4122_v39 }
0x1638   : > { %5115 = vmatprep.subr.mxu0 %v4119_v13 }
0x1639   : > { %5116 = vmatpush3.msra.mxu0 %v4119_v13  ;;  %v4283_v13 = vpop.f32.mrf.mxu1 }
0x163a   : > { %5117 = vmatprep.subr.mxu0 %v4116_v20 }
0x163b   : > { %5118 = vmatpush3.msra.mxu0 %v4116_v20 }
0x163c   : > { %5119 = vmatprep.subr.mxu0 %v4113_v19 }
0x163d   : > { %5120 = vmatpush3.msra.mxu0 %v4113_v19 }
0x163e   : > { %5121 = vmatprep.subr.mxu0 %v4110_v35 }
0x163f   : > { %5122 = vmatpush3.msra.mxu0 %v4110_v35 }
0x1640   : > { %5123 = vmatprep.subr.mxu0 %v4107_v26 }
0x1641   : > { %5124 = vmatpush3.msra.mxu0 %v4107_v26 }
0x1642   : > { %5125 = vmatprep.subr.mxu0 %v4104_v15 }
0x1643   : > { %5126 = vmatpush3.msra.mxu0 %v4104_v15 }
0x1644   : > { %5127 = vmatprep.subr.mxu0 %v4101_v37 }
0x1645   : > { %5128 = vmatpush3.msra.mxu0 %v4101_v37 }
0x1646   : > { %5129 = vmatprep.subr.mxu0 %v4098_v7 }
0x1647   : > { %5130 = vmatpush3.msra.mxu0 %v4098_v7 }
0x1648   : > { %5131 = vmatprep.subr.mxu0 %v4095_v61 }
0x1649   : > { %5132 = vmatpush3.msra.mxu0 %v4095_v61 }
0x164a   : > { %5133 = vmatprep.subr.mxu0 %v4092_v18 }
0x164b   : > { %5134 = vmatpush3.msra.mxu0 %v4092_v18 }
0x164c   : > { %5135 = vmatprep.subr.mxu0 %v4089_v17 }
0x164d   : > { %5136 = vmatpush3.msra.mxu0 %v4089_v17 }
0x164e   : > { %5137 = vmatprep.subr.mxu0 %v4086_v55 }
0x164f   : > { %5138 = vmatpush3.msra.mxu0 %v4086_v55 }
0x1650   : > { %5139 = vmatprep.subr.mxu0 %v4083_v1 }
0x1651   : > { %5140 = vmatpush3.msra.mxu0 %v4083_v1 }
0x1652   : > { %5141 = vmatprep.subr.mxu0 %v4080_v3 }
0x1653   : > { %5142 = vmatpush3.msra.mxu0 %v4080_v3 }
0x16b4   : > { %v5110_v5 = vpop.f32.mrf.mxu0 }
0x16b5   : > { %v5234_v22 = vpack.i.bf16 %v6026_v32, %v5110_v5  ;;  %v5244_v32 = vpack.i.bf16 %v6114_v62, %v6170_v25 }
0x16b6   : > { %v3943_v28 = vpop.f32.mrf.mxu0 }
0x16b7   : > { %5235 = vrot.lane.b32.xlu0 %v5234_v22, %s5515_s18  ;;  %3970 = vrot.lane.b32.xlu1 %v3943_v28, %s5515_s18 }
0x16bb   : > { %5240 = vrot.lane.b32.xlu0 %v5239_v27, %s5515_s18  ;;  %2744 = vrot.lane.b32.xlu1 %v5976_v43, %s5515_s18 }
0x16bf   : > { %5245 = vrot.lane.b32.xlu1 %v5244_v32, %s5515_s18 }
0x16f4   : > { %v4192_v39 = vpop.f32.mrf.mxu0 }
0x16f5   : > { %v4282_v59 = vadd.f32 %v4281_v33, %v4192_v39 }
0x16f6   : > { %v4194_v54 = vpop.f32.mrf.mxu0 }
0x16f7   : > { %4474 = vst [vmem:[%s6257_s20] sm:$0xff] %v4282_v59  ;;  %v4284_v47 = vadd.f32 %v4283_v13, %v4194_v54 }
0x16f9   : > { %4475 = vst [vmem:[%s6257_s20 + $0x8] sm:$0xff] %v4284_v47 }
0x1729   : > { %v3971_v43 = vpop.permute.xlu1 %3970  ;;  %v5236_v44 = vpop.permute.xlu0 %5235 }
0x172a   : > { %v5238_v63 = vunpack.i.h.bf16 %v5236_v44  ;;  %v5237_v62 = vunpack.i.l.bf16 %v5236_v44  ;;  %v3980_v25 = vsel %vm1558_vm0, %v6197_v34, %v3971_v43 }
0x172b   : > { %4292 = vmatmul.mubr.f32.gmra.mxu1 %v3980_v25 }
0x172c   : > { %v2767_v20 = vsel %vm1558_vm0, %v5980_v51, %v5238_v63  ;;  %4297 = vmatprep.mubr.f32.mxu1 %v5514_v0  ;;  %v3981_v35 = vsel %vm1558_vm0, %v6195_v58, %v5237_v62 }
0x172d   : > { %v2745_v46 = vpop.permute.xlu1 %2744  ;;  %v5241_v38 = vpop.permute.xlu0 %5240  ;;  %4196 = vmatprep.mubr.f32.mxu0 %v2767_v20 }
0x172e   : > { %v5243_v19 = vunpack.i.h.bf16 %v5241_v38  ;;  %v5242_v45 = vunpack.i.l.bf16 %v5241_v38  ;;  %v2765_v14 = vsel %vm1558_vm0, %v5934_v11, %v2745_v46 }
0x172f   : > { %4197 = vmatmul.mubr.f32.gmra.mxu0 %v2765_v14  ;;  %4298 = vmatmul.mubr.f32.gmra.mxu1 %v3981_v35 }
0x1730   : > { %4368 = vmatprep.mubr.f32.mxu1 %v6235_v50  ;;  %v3978_v51 = vsel %vm1558_vm0, %v6144_v23, %v5242_v45  ;;  %v3976_v24 = vsel %vm1558_vm0, %v6088_v12, %v5243_v19  ;;  %v4287_v12 = vpop.f32.mrf.mxu1 }
0x1731   : > { %v5246_v34 = vpop.permute.xlu1 %5245  ;;  %4202 = vmatprep.mubr.f32.mxu0 %v3978_v51 }
0x1732   : > { %v5248_v0 = vunpack.i.h.bf16 %v5246_v34  ;;  %v5247_v60 = vunpack.i.l.bf16 %v5246_v34 }
0x1733   : > { %4203 = vmatmul.mubr.f32.gmra.mxu0 %v3976_v24  ;;  %4369 = vmatmul.mubr.f32.vlgmr.msra.gmra.mxu1 %v6241_v53 }
0x1734   : > { %4373 = vmatprep.mubr.f32.mxu1 %v2767_v20  ;;  %v3979_v11 = vsel %vm1558_vm0, %v6142_v40, %v5247_v60  ;;  %v3977_v58 = vsel %vm1558_vm0, %v6086_v9, %v5248_v0  ;;  %v4289_v40 = vpop.f32.mrf.mxu1 }
0x1735   : > { %4208 = vmatprep.mubr.f32.mxu0 %v3979_v11 }
0x1737   : > { %4209 = vmatmul.mubr.f32.gmra.mxu0 %v3977_v58  ;;  %4374 = vmatmul.mubr.f32.gmra.mxu1 %v2765_v14 }
0x1738   : > { %4378 = vmatprep.mubr.f32.mxu1 %v3978_v51  ;;  %5143 = vmatprep.mubr.f32.mxu0 %v6212_v42 }
0x173b   : > { %4379 = vmatmul.mubr.f32.gmra.mxu1 %v3976_v24  ;;  %5144 = vmatmul.mubr.f32.vlgmr.msra.gmra.mxu0 %v6224_v21 }
0x173c   : > { %4383 = vmatprep.mubr.f32.mxu1 %v3979_v11  ;;  %5146 = vmatprep.mubr.f32.mxu0 %v3980_v25 }
0x173f   : > { %4384 = vmatmul.mubr.f32.gmra.mxu1 %v3977_v58  ;;  %5147 = vmatmul.mubr.f32.gmra.mxu0 %v3981_v35 }
0x17eb   : > { %v4293_v23 = vpop.f32.mrf.mxu1 }
0x17ed   : > { %v4295_v50 = vpop.f32.mrf.mxu1 }
0x17ef   : > { %v4198_v9 = vpop.f32.mrf.mxu0  ;;  %v4299_v53 = vpop.f32.mrf.mxu1 }
0x17f0   : > { %v4288_v26 = vadd.f32 %v4287_v12, %v4198_v9 }
0x17f1   : > { %v4200_v29 = vpop.f32.mrf.mxu0  ;;  %v4301_v42 = vpop.f32.mrf.mxu1 }
0x17f2   : > { %4477 = vst [vmem:[%s6257_s20 + $0x18] sm:$0xff] %v4288_v26  ;;  %v4290_v30 = vadd.f32 %v4289_v40, %v4200_v29 }
0x17f3   : > { %v4204_v21 = vpop.f32.mrf.mxu0  ;;  %v4873_v15 = vpop.f32.mrf.mxu1 }
0x17f4   : > { %4478 = vst [vmem:[%s6257_s20 + $0x20] sm:$0xff] %v4290_v30  ;;  %v4294_v16 = vadd.f32 %v4293_v23, %v4204_v21 }
0x17f5   : > { %v4206_v31 = vpop.f32.mrf.mxu0  ;;  %v4874_v2 = vpop.f32.mrf.mxu1 }
0x17f6   : > { %4480 = vst [vmem:[%s6257_s20 + $0x30] sm:$0xff] %v4294_v16  ;;  %v4296_v49 = vadd.f32 %v4295_v50, %v4206_v31  ;;  %v4875_v61 = vadd.f32 %v4874_v2, %v4873_v15 }
0x17f7   : > { %v4210_v56 = vpop.f32.mrf.mxu0  ;;  %v4876_v36 = vpop.f32.mrf.mxu1 }
0x17f8   : > { %4481 = vst [vmem:[%s6257_s20 + $0x38] sm:$0xff] %v4296_v49  ;;  %v4300_v6 = vadd.f32 %v4299_v53, %v4210_v56 }
0x17f9   : > { %v4212_v37 = vpop.f32.mrf.mxu0  ;;  %v4877_v41 = vpop.f32.mrf.mxu1 }
0x17fa   : > { %4483 = vst [vmem:[%s6257_s20 + $0x48] sm:$0xff] %v4300_v6  ;;  %v4302_v57 = vadd.f32 %v4301_v42, %v4212_v37  ;;  %v4878_v7 = vadd.f32 %v4877_v41, %v4876_v36 }
0x17fb   : > { %v4879_v48 = vpop.f32.mrf.mxu1  ;;  %v5145_v52 = vpop.f32.mrf.mxu0 }
0x17fc   : > { %4484 = vst [vmem:[%s6257_s20 + $0x50] sm:$0xff] %v4302_v57  ;;  %v4461_v4 = vadd.f32 %v5145_v52, %v4878_v7 }
0x17fd   : > { %v4880_v8 = vpop.f32.mrf.mxu1  ;;  %v4455_v18 = vpop.f32.mrf.mxu0 }
0x17fe   : > { %4479 = vst [vmem:[%s6257_s20 + $0x28] sm:$0xff] %v4461_v4  ;;  %v4456_v10 = vadd.f32 %v4875_v61, %v4455_v18  ;;  %v4881_v22 = vadd.f32 %v4880_v8, %v4879_v48 }
0x17ff   : > { %v4882_v17 = vpop.f32.mrf.mxu1  ;;  %v5148_v5 = vpop.f32.mrf.mxu0 }
0x1800   : > { %4476 = vst [vmem:[%s6257_s20 + $0x10] sm:$0xff] %v4456_v10 }
0x1801   : > { %v4883_v55 = vpop.f32.mrf.mxu1  ;;  %v4465_v28 = vpop.f32.mrf.mxu0 }
0x1802   : > { %v4884_v1 = vadd.f32 %v4883_v55, %v4882_v17  ;;  %v4466_v27 = vadd.f32 %v4881_v22, %v4465_v28 }
0x1804   : > { %v4471_v3 = vadd.f32 %v5148_v5, %v4884_v1  ;;  %4482 = vst [vmem:[%s6257_s20 + $0x40] sm:$0xff] %v4466_v27 }
0x1806   : > { %4485 = vst [vmem:[%s6257_s20 + $0x58] sm:$0xff] %v4471_v3 }
0x1807   : > { %5450 = shalt.err (!%p5447_p9)
}
0x1808   : > { %s5451_s23 = scalar_lea.hbm %s6295_s4, 1536  ;;  %s5455_s8 = scalar_lea.hbm %s6345_s3, 3072 }
0x1809   : > { %p5452_p13 = scmp.ne.s32.totalorder %s6295_s4, %s5451_s23  ;;  %p5456_p4 = scmp.lt.s32.totalorder %s6295_s4, %s6345_s3 }
0x180a   : > { %p5457_p8 = scmp.lt.s32.totalorder %s5455_s8, %s5451_s23 }
0x180b   : > { %p5453_p5 = pnand %p5452_p13, %p6361_p10 }
0x180c   : > { %p5458_p7 = por %p5457_p8, %p5456_p4 }
0x180d   : > { %p5454_p0 = pneg %p5453_p5 }
0x180f   : > { %p5459_p11 = pnand %p5458_p7, %p5454_p0 }
0x1811   : > { %5462 = shalt.err (!%p5459_p11)
}
0x1812   : > { %s5518_s18 = smov 384   ;;  %s5519_s20 = smov 24  }
0x1813   : > { %5163 = dma.vmem_to_hbm [thread:$0]  (%p6361_p10), %s6297_s6, 1536, %s6295_s4, %s4487_s16, %s5518_s18, %s5518_s18, %s5519_s20  }
0x1814 PF: > { %s4516_s5 = sand.u32 1, %s5493_s12   ;;  %p6362_p1 = scmp.ne.s32.totalorder %s6351_s19, 0 }
0x1815   : > { %p6363_p2 = scmp.ge.s32.totalorder %s5505_s15, 2  ;;  %s4517_s28 = scalar_lea.sflag [#allocation4], %s4516_s5 }
0x1817   : > { %p5177_p6 = pnand %p6363_p2, %p6362_p1 }
0x1819   : > { %p5178_p12 = pneg %p5177_p6 }
0x181b   : > { %5488 = dma.done.wait (%p5178_p12), %s4517_s28, 1536  }
0x181c   : > { %5490 = vsyncadd (%p5178_p12), %s4517_s28, 4294965760  ;;  %p17_p3 = scmp.ge.s32.totalorder %s5615_s9, 4   ;;  %s6364_s12 = smov %s5497_s13 }
0x181d   : > { %s6365_s13 = smov %s5501_s14  ;;  %s6366_s14 = smov %s5624_s17 }
0x181e   : > { %s6367_s15 = smov %s5615_s9  ;;  %19 = sbr.rel (!%p17_p3) target bundleno = 6 (0x6), region = 85 }
0x1823   :  { %4522 = vsyncpa [#allocation3], 1 }
0x1824   :  { %4524 = vsyncpa [#allocation3 + $0x1], 1 }
0x1825   :  { %4525 = vsyncpa [#allocation6], 1 }
0x1826   :  { %4526 = vsyncpa [#allocation4], 1 }
0x1827   :  { %4528 = vsyncpa [#allocation4 + $0x1], 1 }

</bundles_post_ra>
